<compile_context>
chip_gen: v5e
topology: v5e:2x2
jax: 0.10.0
libtpu: 0.0.40
codegen_flags: <defaults>
</compile_context>

<pallas_src>
import functools
import numpy as np
import jax
import jax.numpy as jnp
from jax import lax
from jax.experimental import pallas as pl
from jax.experimental.pallas import tpu as pltpu

LN_EPS = 1e-5
VEC_ROWS = 16
# packed vector-parameter row layout (per block d):
#   0 n1_g | 1 n1_b | 2 n2_g | 3 n2_b | 4 red_b | 5 proj_b | 6 fc2_b
#   7 qkv_b (3C wide, qk scale folded into the q third) | 8 fc1_b (hidden wide)


# ----------------------------------------------------------------------------
# In-kernel helpers
# ----------------------------------------------------------------------------
def _layernorm(x, gamma, beta):
    mean = jnp.mean(x, axis=-1, keepdims=True)
    var = jnp.mean((x - mean) ** 2, axis=-1, keepdims=True)
    return (x - mean) * lax.rsqrt(var + LN_EPS) * gamma + beta


def _erf(x):
    # Abramowitz & Stegun 7.1.26 (|abs err| < 1.5e-7): exact-GELU fidelity
    # using only exp/mul/div/select, all of which lower on Mosaic TPU.
    p = 0.3275911
    a1, a2, a3, a4, a5 = 0.254829592, -0.284496736, 1.421413741, -1.453152027, 1.061405429
    ax = jnp.abs(x)
    t = 1.0 / (1.0 + p * ax)
    poly = ((((a5 * t + a4) * t + a3) * t + a2) * t + a1) * t
    y = 1.0 - poly * jnp.exp(-ax * ax)
    return jnp.where(x < 0.0, -y, y)


def _gelu(x):
    return 0.5 * x * (1.0 + _erf(x * 0.7071067811865476))


# ----------------------------------------------------------------------------
# Fused kernel: all SwinTransformerBlocks for one batch element
# ----------------------------------------------------------------------------
def swin_stack_kernel(x_ref, hx_ref, bias_ref, vecs_ref, wqkv_ref, wred_ref,
                      wp_ref, w1_ref, w2_ref, o_ref, *,
                      depth, num_heads, dim, hidden):
    bf16 = jnp.bfloat16
    f32 = jnp.float32
    C = dim
    hd = C // num_heads

    xt = x_ref[0]                        # (L, C) f32, original block-stack input
    hx0 = hx_ref[0]                      # (L, C) f32, hidden state
    x = xt

    for d in range(depth):               # static unroll over the block stack
        # hidden-state source for this block (SwinTransformer.forward schedule)
        if d == 0:
            hsrc = hx0
        elif d % 2 == 0:
            hsrc = xt
        else:
            hsrc = None

        # ---- norm1 (+ red(cat(norm1(x), norm1(hx))) without a concat) ----
        n1_g = vecs_ref[d, 0:1, 0:C]
        n1_b = vecs_ref[d, 1:2, 0:C]
        xn = _layernorm(x, n1_g, n1_b)
        if hsrc is not None:
            hn = _layernorm(hsrc, n1_g, n1_b)
            xn = (jnp.dot(xn.astype(bf16), wred_ref[d, 0:C, :],
                          preferred_element_type=f32)
                  + jnp.dot(hn.astype(bf16), wred_ref[d, C:2 * C, :],
                            preferred_element_type=f32)
                  + vecs_ref[d, 4:5, 0:C])
        xb = xn.astype(bf16)

        # ---- window attention: one full-width QKV matmul, per-head lane slices ----
        qkv = (jnp.dot(xb, wqkv_ref[d], preferred_element_type=f32)
               + vecs_ref[d, 7:8, 0:3 * C])                      # (L, 3C), q pre-scaled
        qkv = qkv.astype(bf16)
        ctx_heads = []
        for h in range(num_heads):                               # static, hd = 8 lanes
            q = qkv[:, h * hd:(h + 1) * hd]
            k = qkv[:, C + h * hd:C + (h + 1) * hd]
            v = qkv[:, 2 * C + h * hd:2 * C + (h + 1) * hd]
            # scores[l, m] = sum_d q[l, d] * k[m, d]  (no materialized transpose)
            s = lax.dot_general(q, k, (((1,), (1,)), ((), ())),
                                preferred_element_type=f32)      # (L, L) f32
            s = s + bias_ref[d, h].astype(f32)   # rel-pos bias + shift mask + window mask
            m = jnp.max(s, axis=-1, keepdims=True)
            e = jnp.exp(s - m)
            e = e * pl.reciprocal(jnp.sum(e, axis=-1, keepdims=True), approx=True)
            ctx_heads.append(jnp.dot(e.astype(bf16), v, preferred_element_type=f32))
        # heads written into the lanes of one (L, C) buffer -> single proj matmul
        ctx = jnp.concatenate(ctx_heads, axis=-1).astype(bf16)
        attn = (jnp.dot(ctx, wp_ref[d], preferred_element_type=f32)
                + vecs_ref[d, 5:6, 0:C])
        x = x + attn                                             # residual 1 (DropPath = id)

        # ---- norm2 + MLP + residual ----
        xn2 = _layernorm(x, vecs_ref[d, 2:3, 0:C], vecs_ref[d, 3:4, 0:C])
        h1 = (jnp.dot(xn2.astype(bf16), w1_ref[d], preferred_element_type=f32)
              + vecs_ref[d, 8:9, 0:hidden])
        h1 = _gelu(h1)                                           # exact-erf GELU
        y = (jnp.dot(h1.astype(bf16), w2_ref[d], preferred_element_type=f32)
             + vecs_ref[d, 6:7, 0:C])
        x = x + y

    o_ref[0] = x.astype(o_ref.dtype)


# ----------------------------------------------------------------------------
# pallas_call wrapper: single call, grid over batch
# ----------------------------------------------------------------------------
def _rep_spec(a):
    zeros = (0,) * a.ndim
    return pl.BlockSpec(a.shape, lambda i, _z=zeros: _z)


@jax.jit
def swin_transformer_forward(xt, hx, fused_bias, weights):
    B, L, C = xt.shape
    depth, num_heads = fused_bias.shape[0], fused_bias.shape[1]
    hidden = weights["w1"].shape[-1]
    kern = functools.partial(swin_stack_kernel, depth=depth,
                             num_heads=num_heads, dim=C, hidden=hidden)
    act_spec = pl.BlockSpec((1, L, C), lambda i: (i, 0, 0))
    wargs = [fused_bias, weights["vecs"], weights["wqkv"], weights["wred"],
             weights["wp"], weights["w1"], weights["w2"]]
    return pl.pallas_call(
        kern,
        out_shape=jax.ShapeDtypeStruct((B, L, C), xt.dtype),
        grid=(B,),
        in_specs=[act_spec, act_spec] + [_rep_spec(a) for a in wargs],
        out_specs=act_spec,
        compiler_params=pltpu.CompilerParams(
            dimension_semantics=("parallel",)),       # v7x: 2 TCs split the batch
    )(xt, hx, *wargs)


# ----------------------------------------------------------------------------
# Host-side static setup: relative-position index + fused (roll/window/mask) bias
# ----------------------------------------------------------------------------
def relative_position_index(ws):
    coords = np.stack(np.meshgrid(np.arange(ws), np.arange(ws), indexing="ij"))
    coords_flat = coords.reshape(2, -1)
    rel = coords_flat[:, :, None] - coords_flat[:, None, :]
    rel = rel.transpose(1, 2, 0).astype(np.int64)
    rel[:, :, 0] += ws - 1
    rel[:, :, 1] += ws - 1
    rel[:, :, 0] *= 2 * ws - 1
    return rel.sum(-1)                                   # (ws*ws, ws*ws)


def build_fused_bias(rel_table, H, W, ws, shift, num_heads):
    """(num_heads, L, L) additive bias encoding cyclic shift + window partition:
       rel-pos bias at rolled intra-window positions for same-window pairs,
       -100 added for same-window/different-region pairs (shift mask),
       -1e9 for different-window pairs (never attend)."""
    L = H * W
    rel_index = relative_position_index(ws)
    hh, wwc = np.meshgrid(np.arange(H), np.arange(W), indexing="ij")
    hr = (hh - shift) % H                                # shifted coords of each token
    wr = (wwc - shift) % W
    win_id = (hr // ws) * (W // ws) + (wr // ws)
    pos = (hr % ws) * ws + (wr % ws)
    if shift > 0:
        img_mask = np.zeros((H, W), np.int32)            # official Swin region labels
        slices = (slice(0, -ws), slice(-ws, -shift), slice(-shift, None))
        cnt = 0
        for hs in slices:
            for vs in slices:
                img_mask[hs, vs] = cnt
                cnt += 1
        region = img_mask[hr, wr]
    else:
        region = np.zeros((H, W), np.int32)
    win_id, pos, region = win_id.reshape(L), pos.reshape(L), region.reshape(L)
    same_win = win_id[:, None] == win_id[None, :]
    same_reg = region[:, None] == region[None, :]
    add_mask = np.where(same_win, np.where(same_reg, 0.0, -100.0), -1e9)
    bias = rel_table[rel_index[pos[:, None], pos[None, :]]]          # (L, L, nH)
    fused = bias.transpose(2, 0, 1) + add_mask[None].astype(np.float32)
    return fused.astype(np.float32)


# ----------------------------------------------------------------------------
# Parameters (deterministic synthetic init, PyTorch-style semantics) + packing
# ----------------------------------------------------------------------------
def init_block_params(key, dim, num_heads, window_size, mlp_ratio):
    hidden = int(dim * mlp_ratio)
    ks = jax.random.split(key, 12)
    nrm = lambda k, s: (0.02 * jax.random.normal(k, s)).astype(jnp.float32)
    return {
        "norm1_g": jnp.ones((dim,), jnp.float32),
        "norm1_b": jnp.zeros((dim,), jnp.float32),
        "norm2_g": jnp.ones((dim,), jnp.float32),
        "norm2_b": jnp.zeros((dim,), jnp.float32),
        "qkv_w": nrm(ks[0], (dim, 3 * dim)),
        "qkv_b": nrm(ks[1], (3 * dim,)),
        "proj_w": nrm(ks[2], (dim, dim)),
        "proj_b": nrm(ks[3], (dim,)),
        "fc1_w": nrm(ks[4], (dim, hidden)),
        "fc1_b": nrm(ks[5], (hidden,)),
        "fc2_w": nrm(ks[6], (hidden, dim)),
        "fc2_b": nrm(ks[7], (dim,)),
        "red_w": nrm(ks[8], (2 * dim, dim)),
        "red_b": nrm(ks[9], (dim,)),
        "rel_table": nrm(ks[10], ((2 * window_size - 1) ** 2, num_heads)),
    }


def prepare_stacked_params(raw_params, dim, num_heads, hidden, scale):
    """Stack weights over depth, fold the qk scale into the Q projection, pack
       all small vector params into one (depth, 16, lanes) array, cast matmul
       weights to bf16 -- all host-side, once."""
    depth = len(raw_params)
    C = dim
    lanes = max(128, 3 * C, hidden)
    wqkv = np.zeros((depth, C, 3 * C), np.float32)
    wred = np.zeros((depth, 2 * C, C), np.float32)
    wp = np.zeros((depth, C, C), np.float32)
    w1 = np.zeros((depth, C, hidden), np.float32)
    w2 = np.zeros((depth, hidden, C), np.float32)
    vecs = np.zeros((depth, VEC_ROWS, lanes), np.float32)
    for d, p in enumerate(raw_params):
        qw = np.asarray(p["qkv_w"], np.float32).copy()
        qb = np.asarray(p["qkv_b"], np.float32).copy()
        qw[:, :C] *= scale                       # fold qk scale into Q weights
        qb[:C] *= scale                          # ... and Q bias (q = scale*(xW+b))
        wqkv[d] = qw
        wred[d] = np.asarray(p["red_w"], np.float32)
        wp[d] = np.asarray(p["proj_w"], np.float32)
        w1[d] = np.asarray(p["fc1_w"], np.float32)
        w2[d] = np.asarray(p["fc2_w"], np.float32)
        vecs[d, 0, :C] = np.asarray(p["norm1_g"]).reshape(-1)
        vecs[d, 1, :C] = np.asarray(p["norm1_b"]).reshape(-1)
        vecs[d, 2, :C] = np.asarray(p["norm2_g"]).reshape(-1)
        vecs[d, 3, :C] = np.asarray(p["norm2_b"]).reshape(-1)
        vecs[d, 4, :C] = np.asarray(p["red_b"]).reshape(-1)
        vecs[d, 5, :C] = np.asarray(p["proj_b"]).reshape(-1)
        vecs[d, 6, :C] = np.asarray(p["fc2_b"]).reshape(-1)
        vecs[d, 7, :3 * C] = qb
        vecs[d, 8, :hidden] = np.asarray(p["fc1_b"]).reshape(-1)
    bf16 = jnp.bfloat16
    return {
        "wqkv": jnp.asarray(wqkv, bf16),
        "wred": jnp.asarray(wred, bf16),
        "wp": jnp.asarray(wp, bf16),
        "w1": jnp.asarray(w1, bf16),
        "w2": jnp.asarray(w2, bf16),
        "vecs": jnp.asarray(vecs, jnp.float32),
    }


# ----------------------------------------------------------------------------
# main
# ----------------------------------------------------------------------------
if __name__ == "__main__":
    # Small, self-consistent config (SwinLSTMCell core inside UpSample)
    B = 2
    dim = 32
    H = W = 8                          # input_resolution
    L = H * W
    depth = 3
    num_heads = 4
    window_size = 4
    mlp_ratio = 4.0
    hidden = int(dim * mlp_ratio)
    # drop / attn_drop / drop_path are identity in inference mode.

    shifts = [0 if i % 2 == 0 else window_size // 2 for i in range(depth)]
    if min(H, W) <= window_size:       # SwinTransformerBlock fallback
        window_size = min(H, W)
        shifts = [0] * depth

    key = jax.random.PRNGKey(0)
    key, *bkeys = jax.random.split(key, depth + 1)
    raw_params = [init_block_params(bkeys[i], dim, num_heads, window_size, mlp_ratio)
                  for i in range(depth)]
    scale = (dim // num_heads) ** -0.5
    weights = prepare_stacked_params(raw_params, dim, num_heads, hidden, scale)
    fused_bias = jnp.asarray(
        np.stack([build_fused_bias(np.asarray(raw_params[i]["rel_table"], np.float32),
                                   H, W, window_size, shifts[i], num_heads)
                  for i in range(depth)]),
        jnp.bfloat16)                                     # (depth, nH, L, L) bf16

    kx, kh = jax.random.split(jax.random.PRNGKey(0))
    xt = jax.random.normal(kx, (B, L, dim), dtype=jnp.float32)
    hx = jax.random.normal(kh, (B, L, dim), dtype=jnp.float32)

    out = swin_transformer_forward(xt, hx, fused_bias, weights)
    out = jax.block_until_ready(out)
    assert out.shape == (B, L, dim), out.shape
    assert bool(jnp.all(jnp.isfinite(out)))
    print("KERNEL_OK")
</pallas_src>

<mosaic_0001>
module attributes {stable_mosaic.version = 11 : i64} {
  func.func @swin_stack_kernel(%arg0: i32, %arg1: memref<1x64x32xf32, #tpu.memory_space<vmem>>, %arg2: memref<1x64x32xf32, #tpu.memory_space<vmem>>, %arg3: memref<3x4x64x64xbf16, #tpu.memory_space<vmem>>, %arg4: memref<3x16x128xf32, #tpu.memory_space<vmem>>, %arg5: memref<3x32x96xbf16, #tpu.memory_space<vmem>>, %arg6: memref<3x64x32xbf16, #tpu.memory_space<vmem>>, %arg7: memref<3x32x32xbf16, #tpu.memory_space<vmem>>, %arg8: memref<3x32x128xbf16, #tpu.memory_space<vmem>>, %arg9: memref<3x128x32xbf16, #tpu.memory_space<vmem>>, %arg10: memref<1x64x32xf32, #tpu.memory_space<vmem>>) attributes {dimension_semantics = [#tpu.dimension_semantics<parallel>], iteration_bounds = array<i64: 2>, scalar_prefetch = 0 : i64, scratch_operands = 0 : i64, tpu.core_type = #tpu.core_type<tc>, window_params = [{transform_indices = @transform_0, window_bounds = array<i64: 1, 64, 32>}, {transform_indices = @transform_1, window_bounds = array<i64: 1, 64, 32>}, {pipeline_mode = #tpu.pipeline_mode<synchronous>, transform_indices = @transform_2, window_bounds = array<i64: 3, 4, 64, 64>}, {pipeline_mode = #tpu.pipeline_mode<synchronous>, transform_indices = @transform_3, window_bounds = array<i64: 3, 16, 128>}, {pipeline_mode = #tpu.pipeline_mode<synchronous>, transform_indices = @transform_4, window_bounds = array<i64: 3, 32, 96>}, {pipeline_mode = #tpu.pipeline_mode<synchronous>, transform_indices = @transform_5, window_bounds = array<i64: 3, 64, 32>}, {pipeline_mode = #tpu.pipeline_mode<synchronous>, transform_indices = @transform_6, window_bounds = array<i64: 3, 32, 32>}, {pipeline_mode = #tpu.pipeline_mode<synchronous>, transform_indices = @transform_7, window_bounds = array<i64: 3, 32, 128>}, {pipeline_mode = #tpu.pipeline_mode<synchronous>, transform_indices = @transform_8, window_bounds = array<i64: 3, 128, 32>}, {transform_indices = @transform_9, window_bounds = array<i64: 1, 64, 32>}]} {
    %c0 = arith.constant 0 : index
    %c0_0 = arith.constant 0 : index
    %c0_1 = arith.constant 0 : index
    %0 = vector.load %arg1[%c0, %c0_0, %c0_1] : memref<1x64x32xf32, #tpu.memory_space<vmem>>, vector<1x64x32xf32>
    %1 = vector.shape_cast %0 : vector<1x64x32xf32> to vector<64x32xf32>
    %c0_2 = arith.constant 0 : index
    %c0_3 = arith.constant 0 : index
    %c0_4 = arith.constant 0 : index
    %2 = vector.load %arg2[%c0_2, %c0_3, %c0_4] : memref<1x64x32xf32, #tpu.memory_space<vmem>>, vector<1x64x32xf32>
    %3 = vector.shape_cast %2 : vector<1x64x32xf32> to vector<64x32xf32>
    %c0_5 = arith.constant 0 : index
    %c0_6 = arith.constant 0 : index
    %c0_7 = arith.constant 0 : index
    %4 = vector.load %arg4[%c0_5, %c0_6, %c0_7] : memref<3x16x128xf32, #tpu.memory_space<vmem>>, vector<1x1x32xf32>
    %5 = vector.shape_cast %4 : vector<1x1x32xf32> to vector<1x32xf32>
    %c0_8 = arith.constant 0 : index
    %c1 = arith.constant 1 : index
    %c0_9 = arith.constant 0 : index
    %6 = vector.load %arg4[%c0_8, %c1, %c0_9] : memref<3x16x128xf32, #tpu.memory_space<vmem>>, vector<1x1x32xf32>
    %7 = vector.shape_cast %6 : vector<1x1x32xf32> to vector<1x32xf32>
    %cst = arith.constant dense<0.000000e+00> : vector<64xf32>
    %8 = vector.multi_reduction <add>, %1, %cst [1] : vector<64x32xf32> to vector<64xf32>
    %9 = vector.shape_cast %8 : vector<64xf32> to vector<64x1xf32>
    %cst_10 = arith.constant 3.200000e+01 : f32
    %10 = vector.broadcast %cst_10 : f32 to vector<64x1xf32>
    %11 = arith.divf %9, %10 : vector<64x1xf32>
    %12 = vector.broadcast %11 : vector<64x1xf32> to vector<64x32xf32>
    %13 = arith.subf %1, %12 : vector<64x32xf32>
    %14 = arith.mulf %13, %13 : vector<64x32xf32>
    %cst_11 = arith.constant dense<0.000000e+00> : vector<64xf32>
    %15 = vector.multi_reduction <add>, %14, %cst_11 [1] : vector<64x32xf32> to vector<64xf32>
    %16 = vector.shape_cast %15 : vector<64xf32> to vector<64x1xf32>
    %cst_12 = arith.constant 3.200000e+01 : f32
    %17 = vector.broadcast %cst_12 : f32 to vector<64x1xf32>
    %18 = arith.divf %16, %17 : vector<64x1xf32>
    %19 = vector.broadcast %11 : vector<64x1xf32> to vector<64x32xf32>
    %20 = arith.subf %1, %19 : vector<64x32xf32>
    %cst_13 = arith.constant 9.99999974E-6 : f32
    %21 = vector.broadcast %cst_13 : f32 to vector<64x1xf32>
    %22 = arith.addf %18, %21 : vector<64x1xf32>
    %23 = math.rsqrt %22 : vector<64x1xf32>
    %24 = vector.broadcast %23 : vector<64x1xf32> to vector<64x32xf32>
    %25 = arith.mulf %20, %24 : vector<64x32xf32>
    %26 = vector.broadcast %5 : vector<1x32xf32> to vector<64x32xf32>
    %27 = arith.mulf %25, %26 : vector<64x32xf32>
    %28 = vector.broadcast %7 : vector<1x32xf32> to vector<64x32xf32>
    %29 = arith.addf %27, %28 : vector<64x32xf32>
    %cst_14 = arith.constant dense<0.000000e+00> : vector<64xf32>
    %30 = vector.multi_reduction <add>, %3, %cst_14 [1] : vector<64x32xf32> to vector<64xf32>
    %31 = vector.shape_cast %30 : vector<64xf32> to vector<64x1xf32>
    %cst_15 = arith.constant 3.200000e+01 : f32
    %32 = vector.broadcast %cst_15 : f32 to vector<64x1xf32>
    %33 = arith.divf %31, %32 : vector<64x1xf32>
    %34 = vector.broadcast %33 : vector<64x1xf32> to vector<64x32xf32>
    %35 = arith.subf %3, %34 : vector<64x32xf32>
    %36 = arith.mulf %35, %35 : vector<64x32xf32>
    %cst_16 = arith.constant dense<0.000000e+00> : vector<64xf32>
    %37 = vector.multi_reduction <add>, %36, %cst_16 [1] : vector<64x32xf32> to vector<64xf32>
    %38 = vector.shape_cast %37 : vector<64xf32> to vector<64x1xf32>
    %cst_17 = arith.constant 3.200000e+01 : f32
    %39 = vector.broadcast %cst_17 : f32 to vector<64x1xf32>
    %40 = arith.divf %38, %39 : vector<64x1xf32>
    %41 = vector.broadcast %33 : vector<64x1xf32> to vector<64x32xf32>
    %42 = arith.subf %3, %41 : vector<64x32xf32>
    %cst_18 = arith.constant 9.99999974E-6 : f32
    %43 = vector.broadcast %cst_18 : f32 to vector<64x1xf32>
    %44 = arith.addf %40, %43 : vector<64x1xf32>
    %45 = math.rsqrt %44 : vector<64x1xf32>
    %46 = vector.broadcast %45 : vector<64x1xf32> to vector<64x32xf32>
    %47 = arith.mulf %42, %46 : vector<64x32xf32>
    %48 = vector.broadcast %5 : vector<1x32xf32> to vector<64x32xf32>
    %49 = arith.mulf %47, %48 : vector<64x32xf32>
    %50 = vector.broadcast %7 : vector<1x32xf32> to vector<64x32xf32>
    %51 = arith.addf %49, %50 : vector<64x32xf32>
    %52 = arith.truncf %29 : vector<64x32xf32> to vector<64x32xbf16>
    %c0_19 = arith.constant 0 : index
    %c0_20 = arith.constant 0 : index
    %c0_21 = arith.constant 0 : index
    %53 = vector.load %arg6[%c0_19, %c0_20, %c0_21] : memref<3x64x32xbf16, #tpu.memory_space<vmem>>, vector<1x32x32xbf16>
    %54 = vector.shape_cast %53 : vector<1x32x32xbf16> to vector<32x32xbf16>
    %cst_22 = arith.constant dense<0.000000e+00> : vector<64x32xf32>
    %55 = tpu.matmul %52, %54, %cst_22 {dimension_numbers = #tpu.dot_dimension_numbers<[1], [0], [0], [1], [0, 0, 1, 1], [], []>} : vector<64x32xbf16>, vector<32x32xbf16>, vector<64x32xf32> -> vector<64x32xf32>
    %56 = arith.truncf %51 : vector<64x32xf32> to vector<64x32xbf16>
    %c0_23 = arith.constant 0 : index
    %c32 = arith.constant 32 : index
    %c0_24 = arith.constant 0 : index
    %57 = vector.load %arg6[%c0_23, %c32, %c0_24] : memref<3x64x32xbf16, #tpu.memory_space<vmem>>, vector<1x32x32xbf16>
    %58 = vector.shape_cast %57 : vector<1x32x32xbf16> to vector<32x32xbf16>
    %cst_25 = arith.constant dense<0.000000e+00> : vector<64x32xf32>
    %59 = tpu.matmul %56, %58, %cst_25 {dimension_numbers = #tpu.dot_dimension_numbers<[1], [0], [0], [1], [0, 0, 1, 1], [], []>} : vector<64x32xbf16>, vector<32x32xbf16>, vector<64x32xf32> -> vector<64x32xf32>
    %60 = arith.addf %55, %59 : vector<64x32xf32>
    %c0_26 = arith.constant 0 : index
    %c4 = arith.constant 4 : index
    %c0_27 = arith.constant 0 : index
    %61 = vector.load %arg4[%c0_26, %c4, %c0_27] : memref<3x16x128xf32, #tpu.memory_space<vmem>>, vector<1x1x32xf32>
    %62 = vector.shape_cast %61 : vector<1x1x32xf32> to vector<1x32xf32>
    %63 = vector.broadcast %62 : vector<1x32xf32> to vector<64x32xf32>
    %64 = arith.addf %60, %63 : vector<64x32xf32>
    %65 = arith.truncf %64 : vector<64x32xf32> to vector<64x32xbf16>
    %c0_28 = arith.constant 0 : index
    %c0_29 = arith.constant 0 : index
    %c0_30 = arith.constant 0 : index
    %66 = vector.load %arg5[%c0_28, %c0_29, %c0_30] : memref<3x32x96xbf16, #tpu.memory_space<vmem>>, vector<1x32x96xbf16>
    %67 = vector.shape_cast %66 : vector<1x32x96xbf16> to vector<32x96xbf16>
    %cst_31 = arith.constant dense<0.000000e+00> : vector<64x96xf32>
    %68 = tpu.matmul %65, %67, %cst_31 {dimension_numbers = #tpu.dot_dimension_numbers<[1], [0], [0], [1], [0, 0, 1, 1], [], []>} : vector<64x32xbf16>, vector<32x96xbf16>, vector<64x96xf32> -> vector<64x96xf32>
    %c0_32 = arith.constant 0 : index
    %c7 = arith.constant 7 : index
    %c0_33 = arith.constant 0 : index
    %69 = vector.load %arg4[%c0_32, %c7, %c0_33] : memref<3x16x128xf32, #tpu.memory_space<vmem>>, vector<1x1x96xf32>
    %70 = vector.shape_cast %69 : vector<1x1x96xf32> to vector<1x96xf32>
    %71 = vector.broadcast %70 : vector<1x96xf32> to vector<64x96xf32>
    %72 = arith.addf %68, %71 : vector<64x96xf32>
    %73 = arith.truncf %72 : vector<64x96xf32> to vector<64x96xbf16>
    %74 = vector.extract_strided_slice %73 {offsets = [0, 0], sizes = [64, 8], strides = [1, 1]} : vector<64x96xbf16> to vector<64x8xbf16>
    %75 = vector.extract_strided_slice %73 {offsets = [0, 32], sizes = [64, 8], strides = [1, 1]} : vector<64x96xbf16> to vector<64x8xbf16>
    %76 = vector.extract_strided_slice %73 {offsets = [0, 64], sizes = [64, 8], strides = [1, 1]} : vector<64x96xbf16> to vector<64x8xbf16>
    %cst_34 = arith.constant dense<0.000000e+00> : vector<64x64xf32>
    %77 = tpu.matmul %74, %75, %cst_34 {dimension_numbers = #tpu.dot_dimension_numbers<[1], [1], [0], [0], [0, 0, 1, 0], [], []>} : vector<64x8xbf16>, vector<64x8xbf16>, vector<64x64xf32> -> vector<64x64xf32>
    %c0_35 = arith.constant 0 : index
    %c0_36 = arith.constant 0 : index
    %c0_37 = arith.constant 0 : index
    %c0_38 = arith.constant 0 : index
    %78 = vector.load %arg3[%c0_35, %c0_36, %c0_37, %c0_38] : memref<3x4x64x64xbf16, #tpu.memory_space<vmem>>, vector<1x1x64x64xbf16>
    %79 = vector.shape_cast %78 : vector<1x1x64x64xbf16> to vector<64x64xbf16>
    %80 = arith.extf %79 : vector<64x64xbf16> to vector<64x64xf32>
    %81 = arith.addf %77, %80 : vector<64x64xf32>
    %cst_39 = arith.constant dense<0xFF800000> : vector<64xf32>
    %82 = vector.multi_reduction <maximumf>, %81, %cst_39 [1] : vector<64x64xf32> to vector<64xf32>
    %83 = vector.shape_cast %82 : vector<64xf32> to vector<64x1xf32>
    %84 = vector.broadcast %83 : vector<64x1xf32> to vector<64x64xf32>
    %85 = arith.subf %81, %84 : vector<64x64xf32>
    %86 = math.exp %85 : vector<64x64xf32>
    %cst_40 = arith.constant dense<0.000000e+00> : vector<64xf32>
    %87 = vector.multi_reduction <add>, %86, %cst_40 [1] : vector<64x64xf32> to vector<64xf32>
    %88 = vector.shape_cast %87 : vector<64xf32> to vector<64x1xf32>
    %89 = tpu.reciprocal %88 {approx = true} : vector<64x1xf32> -> vector<64x1xf32>
    %90 = vector.broadcast %89 : vector<64x1xf32> to vector<64x64xf32>
    %91 = arith.mulf %86, %90 : vector<64x64xf32>
    %92 = arith.truncf %91 : vector<64x64xf32> to vector<64x64xbf16>
    %cst_41 = arith.constant dense<0.000000e+00> : vector<64x8xf32>
    %93 = tpu.matmul %92, %76, %cst_41 {dimension_numbers = #tpu.dot_dimension_numbers<[1], [0], [0], [1], [0, 0, 1, 1], [], []>} : vector<64x64xbf16>, vector<64x8xbf16>, vector<64x8xf32> -> vector<64x8xf32>
    %94 = vector.extract_strided_slice %73 {offsets = [0, 8], sizes = [64, 8], strides = [1, 1]} : vector<64x96xbf16> to vector<64x8xbf16>
    %95 = vector.extract_strided_slice %73 {offsets = [0, 40], sizes = [64, 8], strides = [1, 1]} : vector<64x96xbf16> to vector<64x8xbf16>
    %96 = vector.extract_strided_slice %73 {offsets = [0, 72], sizes = [64, 8], strides = [1, 1]} : vector<64x96xbf16> to vector<64x8xbf16>
    %cst_42 = arith.constant dense<0.000000e+00> : vector<64x64xf32>
    %97 = tpu.matmul %94, %95, %cst_42 {dimension_numbers = #tpu.dot_dimension_numbers<[1], [1], [0], [0], [0, 0, 1, 0], [], []>} : vector<64x8xbf16>, vector<64x8xbf16>, vector<64x64xf32> -> vector<64x64xf32>
    %c0_43 = arith.constant 0 : index
    %c1_44 = arith.constant 1 : index
    %c0_45 = arith.constant 0 : index
    %c0_46 = arith.constant 0 : index
    %98 = vector.load %arg3[%c0_43, %c1_44, %c0_45, %c0_46] : memref<3x4x64x64xbf16, #tpu.memory_space<vmem>>, vector<1x1x64x64xbf16>
    %99 = vector.shape_cast %98 : vector<1x1x64x64xbf16> to vector<64x64xbf16>
    %100 = arith.extf %99 : vector<64x64xbf16> to vector<64x64xf32>
    %101 = arith.addf %97, %100 : vector<64x64xf32>
    %cst_47 = arith.constant dense<0xFF800000> : vector<64xf32>
    %102 = vector.multi_reduction <maximumf>, %101, %cst_47 [1] : vector<64x64xf32> to vector<64xf32>
    %103 = vector.shape_cast %102 : vector<64xf32> to vector<64x1xf32>
    %104 = vector.broadcast %103 : vector<64x1xf32> to vector<64x64xf32>
    %105 = arith.subf %101, %104 : vector<64x64xf32>
    %106 = math.exp %105 : vector<64x64xf32>
    %cst_48 = arith.constant dense<0.000000e+00> : vector<64xf32>
    %107 = vector.multi_reduction <add>, %106, %cst_48 [1] : vector<64x64xf32> to vector<64xf32>
    %108 = vector.shape_cast %107 : vector<64xf32> to vector<64x1xf32>
    %109 = tpu.reciprocal %108 {approx = true} : vector<64x1xf32> -> vector<64x1xf32>
    %110 = vector.broadcast %109 : vector<64x1xf32> to vector<64x64xf32>
    %111 = arith.mulf %106, %110 : vector<64x64xf32>
    %112 = arith.truncf %111 : vector<64x64xf32> to vector<64x64xbf16>
    %cst_49 = arith.constant dense<0.000000e+00> : vector<64x8xf32>
    %113 = tpu.matmul %112, %96, %cst_49 {dimension_numbers = #tpu.dot_dimension_numbers<[1], [0], [0], [1], [0, 0, 1, 1], [], []>} : vector<64x64xbf16>, vector<64x8xbf16>, vector<64x8xf32> -> vector<64x8xf32>
    %114 = vector.extract_strided_slice %73 {offsets = [0, 16], sizes = [64, 8], strides = [1, 1]} : vector<64x96xbf16> to vector<64x8xbf16>
    %115 = vector.extract_strided_slice %73 {offsets = [0, 48], sizes = [64, 8], strides = [1, 1]} : vector<64x96xbf16> to vector<64x8xbf16>
    %116 = vector.extract_strided_slice %73 {offsets = [0, 80], sizes = [64, 8], strides = [1, 1]} : vector<64x96xbf16> to vector<64x8xbf16>
    %cst_50 = arith.constant dense<0.000000e+00> : vector<64x64xf32>
    %117 = tpu.matmul %114, %115, %cst_50 {dimension_numbers = #tpu.dot_dimension_numbers<[1], [1], [0], [0], [0, 0, 1, 0], [], []>} : vector<64x8xbf16>, vector<64x8xbf16>, vector<64x64xf32> -> vector<64x64xf32>
    %c0_51 = arith.constant 0 : index
    %c2 = arith.constant 2 : index
    %c0_52 = arith.constant 0 : index
    %c0_53 = arith.constant 0 : index
    %118 = vector.load %arg3[%c0_51, %c2, %c0_52, %c0_53] : memref<3x4x64x64xbf16, #tpu.memory_space<vmem>>, vector<1x1x64x64xbf16>
    %119 = vector.shape_cast %118 : vector<1x1x64x64xbf16> to vector<64x64xbf16>
    %120 = arith.extf %119 : vector<64x64xbf16> to vector<64x64xf32>
    %121 = arith.addf %117, %120 : vector<64x64xf32>
    %cst_54 = arith.constant dense<0xFF800000> : vector<64xf32>
    %122 = vector.multi_reduction <maximumf>, %121, %cst_54 [1] : vector<64x64xf32> to vector<64xf32>
    %123 = vector.shape_cast %122 : vector<64xf32> to vector<64x1xf32>
    %124 = vector.broadcast %123 : vector<64x1xf32> to vector<64x64xf32>
    %125 = arith.subf %121, %124 : vector<64x64xf32>
    %126 = math.exp %125 : vector<64x64xf32>
    %cst_55 = arith.constant dense<0.000000e+00> : vector<64xf32>
    %127 = vector.multi_reduction <add>, %126, %cst_55 [1] : vector<64x64xf32> to vector<64xf32>
    %128 = vector.shape_cast %127 : vector<64xf32> to vector<64x1xf32>
    %129 = tpu.reciprocal %128 {approx = true} : vector<64x1xf32> -> vector<64x1xf32>
    %130 = vector.broadcast %129 : vector<64x1xf32> to vector<64x64xf32>
    %131 = arith.mulf %126, %130 : vector<64x64xf32>
    %132 = arith.truncf %131 : vector<64x64xf32> to vector<64x64xbf16>
    %cst_56 = arith.constant dense<0.000000e+00> : vector<64x8xf32>
    %133 = tpu.matmul %132, %116, %cst_56 {dimension_numbers = #tpu.dot_dimension_numbers<[1], [0], [0], [1], [0, 0, 1, 1], [], []>} : vector<64x64xbf16>, vector<64x8xbf16>, vector<64x8xf32> -> vector<64x8xf32>
    %134 = vector.extract_strided_slice %73 {offsets = [0, 24], sizes = [64, 8], strides = [1, 1]} : vector<64x96xbf16> to vector<64x8xbf16>
    %135 = vector.extract_strided_slice %73 {offsets = [0, 56], sizes = [64, 8], strides = [1, 1]} : vector<64x96xbf16> to vector<64x8xbf16>
    %136 = vector.extract_strided_slice %73 {offsets = [0, 88], sizes = [64, 8], strides = [1, 1]} : vector<64x96xbf16> to vector<64x8xbf16>
    %cst_57 = arith.constant dense<0.000000e+00> : vector<64x64xf32>
    %137 = tpu.matmul %134, %135, %cst_57 {dimension_numbers = #tpu.dot_dimension_numbers<[1], [1], [0], [0], [0, 0, 1, 0], [], []>} : vector<64x8xbf16>, vector<64x8xbf16>, vector<64x64xf32> -> vector<64x64xf32>
    %c0_58 = arith.constant 0 : index
    %c3 = arith.constant 3 : index
    %c0_59 = arith.constant 0 : index
    %c0_60 = arith.constant 0 : index
    %138 = vector.load %arg3[%c0_58, %c3, %c0_59, %c0_60] : memref<3x4x64x64xbf16, #tpu.memory_space<vmem>>, vector<1x1x64x64xbf16>
    %139 = vector.shape_cast %138 : vector<1x1x64x64xbf16> to vector<64x64xbf16>
    %140 = arith.extf %139 : vector<64x64xbf16> to vector<64x64xf32>
    %141 = arith.addf %137, %140 : vector<64x64xf32>
    %cst_61 = arith.constant dense<0xFF800000> : vector<64xf32>
    %142 = vector.multi_reduction <maximumf>, %141, %cst_61 [1] : vector<64x64xf32> to vector<64xf32>
    %143 = vector.shape_cast %142 : vector<64xf32> to vector<64x1xf32>
    %144 = vector.broadcast %143 : vector<64x1xf32> to vector<64x64xf32>
    %145 = arith.subf %141, %144 : vector<64x64xf32>
    %146 = math.exp %145 : vector<64x64xf32>
    %cst_62 = arith.constant dense<0.000000e+00> : vector<64xf32>
    %147 = vector.multi_reduction <add>, %146, %cst_62 [1] : vector<64x64xf32> to vector<64xf32>
    %148 = vector.shape_cast %147 : vector<64xf32> to vector<64x1xf32>
    %149 = tpu.reciprocal %148 {approx = true} : vector<64x1xf32> -> vector<64x1xf32>
    %150 = vector.broadcast %149 : vector<64x1xf32> to vector<64x64xf32>
    %151 = arith.mulf %146, %150 : vector<64x64xf32>
    %152 = arith.truncf %151 : vector<64x64xf32> to vector<64x64xbf16>
    %cst_63 = arith.constant dense<0.000000e+00> : vector<64x8xf32>
    %153 = tpu.matmul %152, %136, %cst_63 {dimension_numbers = #tpu.dot_dimension_numbers<[1], [0], [0], [1], [0, 0, 1, 1], [], []>} : vector<64x64xbf16>, vector<64x8xbf16>, vector<64x8xf32> -> vector<64x8xf32>
    %154 = tpu.concatenate %93, %113, %133, %153 in 1 : vector<64x8xf32>, vector<64x8xf32>, vector<64x8xf32>, vector<64x8xf32> -> vector<64x32xf32>
    %155 = arith.truncf %154 : vector<64x32xf32> to vector<64x32xbf16>
    %c0_64 = arith.constant 0 : index
    %c0_65 = arith.constant 0 : index
    %c0_66 = arith.constant 0 : index
    %156 = vector.load %arg7[%c0_64, %c0_65, %c0_66] : memref<3x32x32xbf16, #tpu.memory_space<vmem>>, vector<1x32x32xbf16>
    %157 = vector.shape_cast %156 : vector<1x32x32xbf16> to vector<32x32xbf16>
    %cst_67 = arith.constant dense<0.000000e+00> : vector<64x32xf32>
    %158 = tpu.matmul %155, %157, %cst_67 {dimension_numbers = #tpu.dot_dimension_numbers<[1], [0], [0], [1], [0, 0, 1, 1], [], []>} : vector<64x32xbf16>, vector<32x32xbf16>, vector<64x32xf32> -> vector<64x32xf32>
    %c0_68 = arith.constant 0 : index
    %c5 = arith.constant 5 : index
    %c0_69 = arith.constant 0 : index
    %159 = vector.load %arg4[%c0_68, %c5, %c0_69] : memref<3x16x128xf32, #tpu.memory_space<vmem>>, vector<1x1x32xf32>
    %160 = vector.shape_cast %159 : vector<1x1x32xf32> to vector<1x32xf32>
    %161 = vector.broadcast %160 : vector<1x32xf32> to vector<64x32xf32>
    %162 = arith.addf %158, %161 : vector<64x32xf32>
    %163 = arith.addf %1, %162 : vector<64x32xf32>
    %c0_70 = arith.constant 0 : index
    %c2_71 = arith.constant 2 : index
    %c0_72 = arith.constant 0 : index
    %164 = vector.load %arg4[%c0_70, %c2_71, %c0_72] : memref<3x16x128xf32, #tpu.memory_space<vmem>>, vector<1x1x32xf32>
    %165 = vector.shape_cast %164 : vector<1x1x32xf32> to vector<1x32xf32>
    %c0_73 = arith.constant 0 : index
    %c3_74 = arith.constant 3 : index
    %c0_75 = arith.constant 0 : index
    %166 = vector.load %arg4[%c0_73, %c3_74, %c0_75] : memref<3x16x128xf32, #tpu.memory_space<vmem>>, vector<1x1x32xf32>
    %167 = vector.shape_cast %166 : vector<1x1x32xf32> to vector<1x32xf32>
    %cst_76 = arith.constant dense<0.000000e+00> : vector<64xf32>
    %168 = vector.multi_reduction <add>, %163, %cst_76 [1] : vector<64x32xf32> to vector<64xf32>
    %169 = vector.shape_cast %168 : vector<64xf32> to vector<64x1xf32>
    %cst_77 = arith.constant 3.200000e+01 : f32
    %170 = vector.broadcast %cst_77 : f32 to vector<64x1xf32>
    %171 = arith.divf %169, %170 : vector<64x1xf32>
    %172 = vector.broadcast %171 : vector<64x1xf32> to vector<64x32xf32>
    %173 = arith.subf %163, %172 : vector<64x32xf32>
    %174 = arith.mulf %173, %173 : vector<64x32xf32>
    %cst_78 = arith.constant dense<0.000000e+00> : vector<64xf32>
    %175 = vector.multi_reduction <add>, %174, %cst_78 [1] : vector<64x32xf32> to vector<64xf32>
    %176 = vector.shape_cast %175 : vector<64xf32> to vector<64x1xf32>
    %cst_79 = arith.constant 3.200000e+01 : f32
    %177 = vector.broadcast %cst_79 : f32 to vector<64x1xf32>
    %178 = arith.divf %176, %177 : vector<64x1xf32>
    %179 = vector.broadcast %171 : vector<64x1xf32> to vector<64x32xf32>
    %180 = arith.subf %163, %179 : vector<64x32xf32>
    %cst_80 = arith.constant 9.99999974E-6 : f32
    %181 = vector.broadcast %cst_80 : f32 to vector<64x1xf32>
    %182 = arith.addf %178, %181 : vector<64x1xf32>
    %183 = math.rsqrt %182 : vector<64x1xf32>
    %184 = vector.broadcast %183 : vector<64x1xf32> to vector<64x32xf32>
    %185 = arith.mulf %180, %184 : vector<64x32xf32>
    %186 = vector.broadcast %165 : vector<1x32xf32> to vector<64x32xf32>
    %187 = arith.mulf %185, %186 : vector<64x32xf32>
    %188 = vector.broadcast %167 : vector<1x32xf32> to vector<64x32xf32>
    %189 = arith.addf %187, %188 : vector<64x32xf32>
    %190 = arith.truncf %189 : vector<64x32xf32> to vector<64x32xbf16>
    %c0_81 = arith.constant 0 : index
    %c0_82 = arith.constant 0 : index
    %c0_83 = arith.constant 0 : index
    %191 = vector.load %arg8[%c0_81, %c0_82, %c0_83] : memref<3x32x128xbf16, #tpu.memory_space<vmem>>, vector<1x32x128xbf16>
    %192 = vector.shape_cast %191 : vector<1x32x128xbf16> to vector<32x128xbf16>
    %cst_84 = arith.constant dense<0.000000e+00> : vector<64x128xf32>
    %193 = tpu.matmul %190, %192, %cst_84 {dimension_numbers = #tpu.dot_dimension_numbers<[1], [0], [0], [1], [0, 0, 1, 1], [], []>} : vector<64x32xbf16>, vector<32x128xbf16>, vector<64x128xf32> -> vector<64x128xf32>
    %c0_85 = arith.constant 0 : index
    %c8 = arith.constant 8 : index
    %c0_86 = arith.constant 0 : index
    %194 = vector.load %arg4[%c0_85, %c8, %c0_86] : memref<3x16x128xf32, #tpu.memory_space<vmem>>, vector<1x1x128xf32>
    %195 = vector.shape_cast %194 : vector<1x1x128xf32> to vector<1x128xf32>
    %196 = vector.broadcast %195 : vector<1x128xf32> to vector<64x128xf32>
    %197 = arith.addf %193, %196 : vector<64x128xf32>
    %cst_87 = arith.constant 5.000000e-01 : f32
    %198 = vector.broadcast %cst_87 : f32 to vector<64x128xf32>
    %199 = arith.mulf %198, %197 : vector<64x128xf32>
    %cst_88 = arith.constant 0.707106769 : f32
    %200 = vector.broadcast %cst_88 : f32 to vector<64x128xf32>
    %201 = arith.mulf %197, %200 : vector<64x128xf32>
    %202 = math.absf %201 : vector<64x128xf32>
    %cst_89 = arith.constant 0.327591091 : f32
    %203 = vector.broadcast %cst_89 : f32 to vector<64x128xf32>
    %204 = arith.mulf %203, %202 : vector<64x128xf32>
    %cst_90 = arith.constant 1.000000e+00 : f32
    %205 = vector.broadcast %cst_90 : f32 to vector<64x128xf32>
    %206 = arith.addf %205, %204 : vector<64x128xf32>
    %cst_91 = arith.constant 1.000000e+00 : f32
    %207 = vector.broadcast %cst_91 : f32 to vector<64x128xf32>
    %208 = arith.divf %207, %206 : vector<64x128xf32>
    %cst_92 = arith.constant 1.06140542 : f32
    %209 = vector.broadcast %cst_92 : f32 to vector<64x128xf32>
    %210 = arith.mulf %209, %208 : vector<64x128xf32>
    %cst_93 = arith.constant -1.45315206 : f32
    %211 = vector.broadcast %cst_93 : f32 to vector<64x128xf32>
    %212 = arith.addf %210, %211 : vector<64x128xf32>
    %213 = arith.mulf %212, %208 : vector<64x128xf32>
    %cst_94 = arith.constant 1.42141378 : f32
    %214 = vector.broadcast %cst_94 : f32 to vector<64x128xf32>
    %215 = arith.addf %213, %214 : vector<64x128xf32>
    %216 = arith.mulf %215, %208 : vector<64x128xf32>
    %cst_95 = arith.constant -0.284496725 : f32
    %217 = vector.broadcast %cst_95 : f32 to vector<64x128xf32>
    %218 = arith.addf %216, %217 : vector<64x128xf32>
    %219 = arith.mulf %218, %208 : vector<64x128xf32>
    %cst_96 = arith.constant 0.254829586 : f32
    %220 = vector.broadcast %cst_96 : f32 to vector<64x128xf32>
    %221 = arith.addf %219, %220 : vector<64x128xf32>
    %222 = arith.mulf %221, %208 : vector<64x128xf32>
    %cst_97 = arith.constant 0.000000e+00 : f32
    %223 = vector.broadcast %cst_97 : f32 to vector<64x128xf32>
    %224 = arith.subf %223, %202 : vector<64x128xf32>
    %225 = arith.mulf %224, %202 : vector<64x128xf32>
    %226 = math.exp %225 : vector<64x128xf32>
    %227 = arith.mulf %222, %226 : vector<64x128xf32>
    %cst_98 = arith.constant 1.000000e+00 : f32
    %228 = vector.broadcast %cst_98 : f32 to vector<64x128xf32>
    %229 = arith.subf %228, %227 : vector<64x128xf32>
    %cst_99 = arith.constant 0.000000e+00 : f32
    %230 = vector.broadcast %cst_99 : f32 to vector<64x128xf32>
    %231 = arith.cmpf olt, %201, %230 : vector<64x128xf32>
    %cst_100 = arith.constant 0.000000e+00 : f32
    %232 = vector.broadcast %cst_100 : f32 to vector<64x128xf32>
    %233 = arith.subf %232, %229 : vector<64x128xf32>
    %234 = arith.select %231, %233, %229 : vector<64x128xi1>, vector<64x128xf32>
    %cst_101 = arith.constant 1.000000e+00 : f32
    %235 = vector.broadcast %cst_101 : f32 to vector<64x128xf32>
    %236 = arith.addf %235, %234 : vector<64x128xf32>
    %237 = arith.mulf %199, %236 : vector<64x128xf32>
    %238 = arith.truncf %237 : vector<64x128xf32> to vector<64x128xbf16>
    %c0_102 = arith.constant 0 : index
    %c0_103 = arith.constant 0 : index
    %c0_104 = arith.constant 0 : index
    %239 = vector.load %arg9[%c0_102, %c0_103, %c0_104] : memref<3x128x32xbf16, #tpu.memory_space<vmem>>, vector<1x128x32xbf16>
    %240 = vector.shape_cast %239 : vector<1x128x32xbf16> to vector<128x32xbf16>
    %cst_105 = arith.constant dense<0.000000e+00> : vector<64x32xf32>
    %241 = tpu.matmul %238, %240, %cst_105 {dimension_numbers = #tpu.dot_dimension_numbers<[1], [0], [0], [1], [0, 0, 1, 1], [], []>} : vector<64x128xbf16>, vector<128x32xbf16>, vector<64x32xf32> -> vector<64x32xf32>
    %c0_106 = arith.constant 0 : index
    %c6 = arith.constant 6 : index
    %c0_107 = arith.constant 0 : index
    %242 = vector.load %arg4[%c0_106, %c6, %c0_107] : memref<3x16x128xf32, #tpu.memory_space<vmem>>, vector<1x1x32xf32>
    %243 = vector.shape_cast %242 : vector<1x1x32xf32> to vector<1x32xf32>
    %244 = vector.broadcast %243 : vector<1x32xf32> to vector<64x32xf32>
    %245 = arith.addf %241, %244 : vector<64x32xf32>
    %246 = arith.addf %163, %245 : vector<64x32xf32>
    %c1_108 = arith.constant 1 : index
    %c0_109 = arith.constant 0 : index
    %c0_110 = arith.constant 0 : index
    %247 = vector.load %arg4[%c1_108, %c0_109, %c0_110] : memref<3x16x128xf32, #tpu.memory_space<vmem>>, vector<1x1x32xf32>
    %248 = vector.shape_cast %247 : vector<1x1x32xf32> to vector<1x32xf32>
    %c1_111 = arith.constant 1 : index
    %c1_112 = arith.constant 1 : index
    %c0_113 = arith.constant 0 : index
    %249 = vector.load %arg4[%c1_111, %c1_112, %c0_113] : memref<3x16x128xf32, #tpu.memory_space<vmem>>, vector<1x1x32xf32>
    %250 = vector.shape_cast %249 : vector<1x1x32xf32> to vector<1x32xf32>
    %cst_114 = arith.constant dense<0.000000e+00> : vector<64xf32>
    %251 = vector.multi_reduction <add>, %246, %cst_114 [1] : vector<64x32xf32> to vector<64xf32>
    %252 = vector.shape_cast %251 : vector<64xf32> to vector<64x1xf32>
    %cst_115 = arith.constant 3.200000e+01 : f32
    %253 = vector.broadcast %cst_115 : f32 to vector<64x1xf32>
    %254 = arith.divf %252, %253 : vector<64x1xf32>
    %255 = vector.broadcast %254 : vector<64x1xf32> to vector<64x32xf32>
    %256 = arith.subf %246, %255 : vector<64x32xf32>
    %257 = arith.mulf %256, %256 : vector<64x32xf32>
    %cst_116 = arith.constant dense<0.000000e+00> : vector<64xf32>
    %258 = vector.multi_reduction <add>, %257, %cst_116 [1] : vector<64x32xf32> to vector<64xf32>
    %259 = vector.shape_cast %258 : vector<64xf32> to vector<64x1xf32>
    %cst_117 = arith.constant 3.200000e+01 : f32
    %260 = vector.broadcast %cst_117 : f32 to vector<64x1xf32>
    %261 = arith.divf %259, %260 : vector<64x1xf32>
    %262 = vector.broadcast %254 : vector<64x1xf32> to vector<64x32xf32>
    %263 = arith.subf %246, %262 : vector<64x32xf32>
    %cst_118 = arith.constant 9.99999974E-6 : f32
    %264 = vector.broadcast %cst_118 : f32 to vector<64x1xf32>
    %265 = arith.addf %261, %264 : vector<64x1xf32>
    %266 = math.rsqrt %265 : vector<64x1xf32>
    %267 = vector.broadcast %266 : vector<64x1xf32> to vector<64x32xf32>
    %268 = arith.mulf %263, %267 : vector<64x32xf32>
    %269 = vector.broadcast %248 : vector<1x32xf32> to vector<64x32xf32>
    %270 = arith.mulf %268, %269 : vector<64x32xf32>
    %271 = vector.broadcast %250 : vector<1x32xf32> to vector<64x32xf32>
    %272 = arith.addf %270, %271 : vector<64x32xf32>
    %273 = arith.truncf %272 : vector<64x32xf32> to vector<64x32xbf16>
    %c1_119 = arith.constant 1 : index
    %c0_120 = arith.constant 0 : index
    %c0_121 = arith.constant 0 : index
    %274 = vector.load %arg5[%c1_119, %c0_120, %c0_121] : memref<3x32x96xbf16, #tpu.memory_space<vmem>>, vector<1x32x96xbf16>
    %275 = vector.shape_cast %274 : vector<1x32x96xbf16> to vector<32x96xbf16>
    %cst_122 = arith.constant dense<0.000000e+00> : vector<64x96xf32>
    %276 = tpu.matmul %273, %275, %cst_122 {dimension_numbers = #tpu.dot_dimension_numbers<[1], [0], [0], [1], [0, 0, 1, 1], [], []>} : vector<64x32xbf16>, vector<32x96xbf16>, vector<64x96xf32> -> vector<64x96xf32>
    %c1_123 = arith.constant 1 : index
    %c7_124 = arith.constant 7 : index
    %c0_125 = arith.constant 0 : index
    %277 = vector.load %arg4[%c1_123, %c7_124, %c0_125] : memref<3x16x128xf32, #tpu.memory_space<vmem>>, vector<1x1x96xf32>
    %278 = vector.shape_cast %277 : vector<1x1x96xf32> to vector<1x96xf32>
    %279 = vector.broadcast %278 : vector<1x96xf32> to vector<64x96xf32>
    %280 = arith.addf %276, %279 : vector<64x96xf32>
    %281 = arith.truncf %280 : vector<64x96xf32> to vector<64x96xbf16>
    %282 = vector.extract_strided_slice %281 {offsets = [0, 0], sizes = [64, 8], strides = [1, 1]} : vector<64x96xbf16> to vector<64x8xbf16>
    %283 = vector.extract_strided_slice %281 {offsets = [0, 32], sizes = [64, 8], strides = [1, 1]} : vector<64x96xbf16> to vector<64x8xbf16>
    %284 = vector.extract_strided_slice %281 {offsets = [0, 64], sizes = [64, 8], strides = [1, 1]} : vector<64x96xbf16> to vector<64x8xbf16>
    %cst_126 = arith.constant dense<0.000000e+00> : vector<64x64xf32>
    %285 = tpu.matmul %282, %283, %cst_126 {dimension_numbers = #tpu.dot_dimension_numbers<[1], [1], [0], [0], [0, 0, 1, 0], [], []>} : vector<64x8xbf16>, vector<64x8xbf16>, vector<64x64xf32> -> vector<64x64xf32>
    %c1_127 = arith.constant 1 : index
    %c0_128 = arith.constant 0 : index
    %c0_129 = arith.constant 0 : index
    %c0_130 = arith.constant 0 : index
    %286 = vector.load %arg3[%c1_127, %c0_128, %c0_129, %c0_130] : memref<3x4x64x64xbf16, #tpu.memory_space<vmem>>, vector<1x1x64x64xbf16>
    %287 = vector.shape_cast %286 : vector<1x1x64x64xbf16> to vector<64x64xbf16>
    %288 = arith.extf %287 : vector<64x64xbf16> to vector<64x64xf32>
    %289 = arith.addf %285, %288 : vector<64x64xf32>
    %cst_131 = arith.constant dense<0xFF800000> : vector<64xf32>
    %290 = vector.multi_reduction <maximumf>, %289, %cst_131 [1] : vector<64x64xf32> to vector<64xf32>
    %291 = vector.shape_cast %290 : vector<64xf32> to vector<64x1xf32>
    %292 = vector.broadcast %291 : vector<64x1xf32> to vector<64x64xf32>
    %293 = arith.subf %289, %292 : vector<64x64xf32>
    %294 = math.exp %293 : vector<64x64xf32>
    %cst_132 = arith.constant dense<0.000000e+00> : vector<64xf32>
    %295 = vector.multi_reduction <add>, %294, %cst_132 [1] : vector<64x64xf32> to vector<64xf32>
    %296 = vector.shape_cast %295 : vector<64xf32> to vector<64x1xf32>
    %297 = tpu.reciprocal %296 {approx = true} : vector<64x1xf32> -> vector<64x1xf32>
    %298 = vector.broadcast %297 : vector<64x1xf32> to vector<64x64xf32>
    %299 = arith.mulf %294, %298 : vector<64x64xf32>
    %300 = arith.truncf %299 : vector<64x64xf32> to vector<64x64xbf16>
    %cst_133 = arith.constant dense<0.000000e+00> : vector<64x8xf32>
    %301 = tpu.matmul %300, %284, %cst_133 {dimension_numbers = #tpu.dot_dimension_numbers<[1], [0], [0], [1], [0, 0, 1, 1], [], []>} : vector<64x64xbf16>, vector<64x8xbf16>, vector<64x8xf32> -> vector<64x8xf32>
    %302 = vector.extract_strided_slice %281 {offsets = [0, 8], sizes = [64, 8], strides = [1, 1]} : vector<64x96xbf16> to vector<64x8xbf16>
    %303 = vector.extract_strided_slice %281 {offsets = [0, 40], sizes = [64, 8], strides = [1, 1]} : vector<64x96xbf16> to vector<64x8xbf16>
    %304 = vector.extract_strided_slice %281 {offsets = [0, 72], sizes = [64, 8], strides = [1, 1]} : vector<64x96xbf16> to vector<64x8xbf16>
    %cst_134 = arith.constant dense<0.000000e+00> : vector<64x64xf32>
    %305 = tpu.matmul %302, %303, %cst_134 {dimension_numbers = #tpu.dot_dimension_numbers<[1], [1], [0], [0], [0, 0, 1, 0], [], []>} : vector<64x8xbf16>, vector<64x8xbf16>, vector<64x64xf32> -> vector<64x64xf32>
    %c1_135 = arith.constant 1 : index
    %c1_136 = arith.constant 1 : index
    %c0_137 = arith.constant 0 : index
    %c0_138 = arith.constant 0 : index
    %306 = vector.load %arg3[%c1_135, %c1_136, %c0_137, %c0_138] : memref<3x4x64x64xbf16, #tpu.memory_space<vmem>>, vector<1x1x64x64xbf16>
    %307 = vector.shape_cast %306 : vector<1x1x64x64xbf16> to vector<64x64xbf16>
    %308 = arith.extf %307 : vector<64x64xbf16> to vector<64x64xf32>
    %309 = arith.addf %305, %308 : vector<64x64xf32>
    %cst_139 = arith.constant dense<0xFF800000> : vector<64xf32>
    %310 = vector.multi_reduction <maximumf>, %309, %cst_139 [1] : vector<64x64xf32> to vector<64xf32>
    %311 = vector.shape_cast %310 : vector<64xf32> to vector<64x1xf32>
    %312 = vector.broadcast %311 : vector<64x1xf32> to vector<64x64xf32>
    %313 = arith.subf %309, %312 : vector<64x64xf32>
    %314 = math.exp %313 : vector<64x64xf32>
    %cst_140 = arith.constant dense<0.000000e+00> : vector<64xf32>
    %315 = vector.multi_reduction <add>, %314, %cst_140 [1] : vector<64x64xf32> to vector<64xf32>
    %316 = vector.shape_cast %315 : vector<64xf32> to vector<64x1xf32>
    %317 = tpu.reciprocal %316 {approx = true} : vector<64x1xf32> -> vector<64x1xf32>
    %318 = vector.broadcast %317 : vector<64x1xf32> to vector<64x64xf32>
    %319 = arith.mulf %314, %318 : vector<64x64xf32>
    %320 = arith.truncf %319 : vector<64x64xf32> to vector<64x64xbf16>
    %cst_141 = arith.constant dense<0.000000e+00> : vector<64x8xf32>
    %321 = tpu.matmul %320, %304, %cst_141 {dimension_numbers = #tpu.dot_dimension_numbers<[1], [0], [0], [1], [0, 0, 1, 1], [], []>} : vector<64x64xbf16>, vector<64x8xbf16>, vector<64x8xf32> -> vector<64x8xf32>
    %322 = vector.extract_strided_slice %281 {offsets = [0, 16], sizes = [64, 8], strides = [1, 1]} : vector<64x96xbf16> to vector<64x8xbf16>
    %323 = vector.extract_strided_slice %281 {offsets = [0, 48], sizes = [64, 8], strides = [1, 1]} : vector<64x96xbf16> to vector<64x8xbf16>
    %324 = vector.extract_strided_slice %281 {offsets = [0, 80], sizes = [64, 8], strides = [1, 1]} : vector<64x96xbf16> to vector<64x8xbf16>
    %cst_142 = arith.constant dense<0.000000e+00> : vector<64x64xf32>
    %325 = tpu.matmul %322, %323, %cst_142 {dimension_numbers = #tpu.dot_dimension_numbers<[1], [1], [0], [0], [0, 0, 1, 0], [], []>} : vector<64x8xbf16>, vector<64x8xbf16>, vector<64x64xf32> -> vector<64x64xf32>
    %c1_143 = arith.constant 1 : index
    %c2_144 = arith.constant 2 : index
    %c0_145 = arith.constant 0 : index
    %c0_146 = arith.constant 0 : index
    %326 = vector.load %arg3[%c1_143, %c2_144, %c0_145, %c0_146] : memref<3x4x64x64xbf16, #tpu.memory_space<vmem>>, vector<1x1x64x64xbf16>
    %327 = vector.shape_cast %326 : vector<1x1x64x64xbf16> to vector<64x64xbf16>
    %328 = arith.extf %327 : vector<64x64xbf16> to vector<64x64xf32>
    %329 = arith.addf %325, %328 : vector<64x64xf32>
    %cst_147 = arith.constant dense<0xFF800000> : vector<64xf32>
    %330 = vector.multi_reduction <maximumf>, %329, %cst_147 [1] : vector<64x64xf32> to vector<64xf32>
    %331 = vector.shape_cast %330 : vector<64xf32> to vector<64x1xf32>
    %332 = vector.broadcast %331 : vector<64x1xf32> to vector<64x64xf32>
    %333 = arith.subf %329, %332 : vector<64x64xf32>
    %334 = math.exp %333 : vector<64x64xf32>
    %cst_148 = arith.constant dense<0.000000e+00> : vector<64xf32>
    %335 = vector.multi_reduction <add>, %334, %cst_148 [1] : vector<64x64xf32> to vector<64xf32>
    %336 = vector.shape_cast %335 : vector<64xf32> to vector<64x1xf32>
    %337 = tpu.reciprocal %336 {approx = true} : vector<64x1xf32> -> vector<64x1xf32>
    %338 = vector.broadcast %337 : vector<64x1xf32> to vector<64x64xf32>
    %339 = arith.mulf %334, %338 : vector<64x64xf32>
    %340 = arith.truncf %339 : vector<64x64xf32> to vector<64x64xbf16>
    %cst_149 = arith.constant dense<0.000000e+00> : vector<64x8xf32>
    %341 = tpu.matmul %340, %324, %cst_149 {dimension_numbers = #tpu.dot_dimension_numbers<[1], [0], [0], [1], [0, 0, 1, 1], [], []>} : vector<64x64xbf16>, vector<64x8xbf16>, vector<64x8xf32> -> vector<64x8xf32>
    %342 = vector.extract_strided_slice %281 {offsets = [0, 24], sizes = [64, 8], strides = [1, 1]} : vector<64x96xbf16> to vector<64x8xbf16>
    %343 = vector.extract_strided_slice %281 {offsets = [0, 56], sizes = [64, 8], strides = [1, 1]} : vector<64x96xbf16> to vector<64x8xbf16>
    %344 = vector.extract_strided_slice %281 {offsets = [0, 88], sizes = [64, 8], strides = [1, 1]} : vector<64x96xbf16> to vector<64x8xbf16>
    %cst_150 = arith.constant dense<0.000000e+00> : vector<64x64xf32>
    %345 = tpu.matmul %342, %343, %cst_150 {dimension_numbers = #tpu.dot_dimension_numbers<[1], [1], [0], [0], [0, 0, 1, 0], [], []>} : vector<64x8xbf16>, vector<64x8xbf16>, vector<64x64xf32> -> vector<64x64xf32>
    %c1_151 = arith.constant 1 : index
    %c3_152 = arith.constant 3 : index
    %c0_153 = arith.constant 0 : index
    %c0_154 = arith.constant 0 : index
    %346 = vector.load %arg3[%c1_151, %c3_152, %c0_153, %c0_154] : memref<3x4x64x64xbf16, #tpu.memory_space<vmem>>, vector<1x1x64x64xbf16>
    %347 = vector.shape_cast %346 : vector<1x1x64x64xbf16> to vector<64x64xbf16>
    %348 = arith.extf %347 : vector<64x64xbf16> to vector<64x64xf32>
    %349 = arith.addf %345, %348 : vector<64x64xf32>
    %cst_155 = arith.constant dense<0xFF800000> : vector<64xf32>
    %350 = vector.multi_reduction <maximumf>, %349, %cst_155 [1] : vector<64x64xf32> to vector<64xf32>
    %351 = vector.shape_cast %350 : vector<64xf32> to vector<64x1xf32>
    %352 = vector.broadcast %351 : vector<64x1xf32> to vector<64x64xf32>
    %353 = arith.subf %349, %352 : vector<64x64xf32>
    %354 = math.exp %353 : vector<64x64xf32>
    %cst_156 = arith.constant dense<0.000000e+00> : vector<64xf32>
    %355 = vector.multi_reduction <add>, %354, %cst_156 [1] : vector<64x64xf32> to vector<64xf32>
    %356 = vector.shape_cast %355 : vector<64xf32> to vector<64x1xf32>
    %357 = tpu.reciprocal %356 {approx = true} : vector<64x1xf32> -> vector<64x1xf32>
    %358 = vector.broadcast %357 : vector<64x1xf32> to vector<64x64xf32>
    %359 = arith.mulf %354, %358 : vector<64x64xf32>
    %360 = arith.truncf %359 : vector<64x64xf32> to vector<64x64xbf16>
    %cst_157 = arith.constant dense<0.000000e+00> : vector<64x8xf32>
    %361 = tpu.matmul %360, %344, %cst_157 {dimension_numbers = #tpu.dot_dimension_numbers<[1], [0], [0], [1], [0, 0, 1, 1], [], []>} : vector<64x64xbf16>, vector<64x8xbf16>, vector<64x8xf32> -> vector<64x8xf32>
    %362 = tpu.concatenate %301, %321, %341, %361 in 1 : vector<64x8xf32>, vector<64x8xf32>, vector<64x8xf32>, vector<64x8xf32> -> vector<64x32xf32>
    %363 = arith.truncf %362 : vector<64x32xf32> to vector<64x32xbf16>
    %c1_158 = arith.constant 1 : index
    %c0_159 = arith.constant 0 : index
    %c0_160 = arith.constant 0 : index
    %364 = vector.load %arg7[%c1_158, %c0_159, %c0_160] : memref<3x32x32xbf16, #tpu.memory_space<vmem>>, vector<1x32x32xbf16>
    %365 = vector.shape_cast %364 : vector<1x32x32xbf16> to vector<32x32xbf16>
    %cst_161 = arith.constant dense<0.000000e+00> : vector<64x32xf32>
    %366 = tpu.matmul %363, %365, %cst_161 {dimension_numbers = #tpu.dot_dimension_numbers<[1], [0], [0], [1], [0, 0, 1, 1], [], []>} : vector<64x32xbf16>, vector<32x32xbf16>, vector<64x32xf32> -> vector<64x32xf32>
    %c1_162 = arith.constant 1 : index
    %c5_163 = arith.constant 5 : index
    %c0_164 = arith.constant 0 : index
    %367 = vector.load %arg4[%c1_162, %c5_163, %c0_164] : memref<3x16x128xf32, #tpu.memory_space<vmem>>, vector<1x1x32xf32>
    %368 = vector.shape_cast %367 : vector<1x1x32xf32> to vector<1x32xf32>
    %369 = vector.broadcast %368 : vector<1x32xf32> to vector<64x32xf32>
    %370 = arith.addf %366, %369 : vector<64x32xf32>
    %371 = arith.addf %246, %370 : vector<64x32xf32>
    %c1_165 = arith.constant 1 : index
    %c2_166 = arith.constant 2 : index
    %c0_167 = arith.constant 0 : index
    %372 = vector.load %arg4[%c1_165, %c2_166, %c0_167] : memref<3x16x128xf32, #tpu.memory_space<vmem>>, vector<1x1x32xf32>
    %373 = vector.shape_cast %372 : vector<1x1x32xf32> to vector<1x32xf32>
    %c1_168 = arith.constant 1 : index
    %c3_169 = arith.constant 3 : index
    %c0_170 = arith.constant 0 : index
    %374 = vector.load %arg4[%c1_168, %c3_169, %c0_170] : memref<3x16x128xf32, #tpu.memory_space<vmem>>, vector<1x1x32xf32>
    %375 = vector.shape_cast %374 : vector<1x1x32xf32> to vector<1x32xf32>
    %cst_171 = arith.constant dense<0.000000e+00> : vector<64xf32>
    %376 = vector.multi_reduction <add>, %371, %cst_171 [1] : vector<64x32xf32> to vector<64xf32>
    %377 = vector.shape_cast %376 : vector<64xf32> to vector<64x1xf32>
    %cst_172 = arith.constant 3.200000e+01 : f32
    %378 = vector.broadcast %cst_172 : f32 to vector<64x1xf32>
    %379 = arith.divf %377, %378 : vector<64x1xf32>
    %380 = vector.broadcast %379 : vector<64x1xf32> to vector<64x32xf32>
    %381 = arith.subf %371, %380 : vector<64x32xf32>
    %382 = arith.mulf %381, %381 : vector<64x32xf32>
    %cst_173 = arith.constant dense<0.000000e+00> : vector<64xf32>
    %383 = vector.multi_reduction <add>, %382, %cst_173 [1] : vector<64x32xf32> to vector<64xf32>
    %384 = vector.shape_cast %383 : vector<64xf32> to vector<64x1xf32>
    %cst_174 = arith.constant 3.200000e+01 : f32
    %385 = vector.broadcast %cst_174 : f32 to vector<64x1xf32>
    %386 = arith.divf %384, %385 : vector<64x1xf32>
    %387 = vector.broadcast %379 : vector<64x1xf32> to vector<64x32xf32>
    %388 = arith.subf %371, %387 : vector<64x32xf32>
    %cst_175 = arith.constant 9.99999974E-6 : f32
    %389 = vector.broadcast %cst_175 : f32 to vector<64x1xf32>
    %390 = arith.addf %386, %389 : vector<64x1xf32>
    %391 = math.rsqrt %390 : vector<64x1xf32>
    %392 = vector.broadcast %391 : vector<64x1xf32> to vector<64x32xf32>
    %393 = arith.mulf %388, %392 : vector<64x32xf32>
    %394 = vector.broadcast %373 : vector<1x32xf32> to vector<64x32xf32>
    %395 = arith.mulf %393, %394 : vector<64x32xf32>
    %396 = vector.broadcast %375 : vector<1x32xf32> to vector<64x32xf32>
    %397 = arith.addf %395, %396 : vector<64x32xf32>
    %398 = arith.truncf %397 : vector<64x32xf32> to vector<64x32xbf16>
    %c1_176 = arith.constant 1 : index
    %c0_177 = arith.constant 0 : index
    %c0_178 = arith.constant 0 : index
    %399 = vector.load %arg8[%c1_176, %c0_177, %c0_178] : memref<3x32x128xbf16, #tpu.memory_space<vmem>>, vector<1x32x128xbf16>
    %400 = vector.shape_cast %399 : vector<1x32x128xbf16> to vector<32x128xbf16>
    %cst_179 = arith.constant dense<0.000000e+00> : vector<64x128xf32>
    %401 = tpu.matmul %398, %400, %cst_179 {dimension_numbers = #tpu.dot_dimension_numbers<[1], [0], [0], [1], [0, 0, 1, 1], [], []>} : vector<64x32xbf16>, vector<32x128xbf16>, vector<64x128xf32> -> vector<64x128xf32>
    %c1_180 = arith.constant 1 : index
    %c8_181 = arith.constant 8 : index
    %c0_182 = arith.constant 0 : index
    %402 = vector.load %arg4[%c1_180, %c8_181, %c0_182] : memref<3x16x128xf32, #tpu.memory_space<vmem>>, vector<1x1x128xf32>
    %403 = vector.shape_cast %402 : vector<1x1x128xf32> to vector<1x128xf32>
    %404 = vector.broadcast %403 : vector<1x128xf32> to vector<64x128xf32>
    %405 = arith.addf %401, %404 : vector<64x128xf32>
    %cst_183 = arith.constant 5.000000e-01 : f32
    %406 = vector.broadcast %cst_183 : f32 to vector<64x128xf32>
    %407 = arith.mulf %406, %405 : vector<64x128xf32>
    %cst_184 = arith.constant 0.707106769 : f32
    %408 = vector.broadcast %cst_184 : f32 to vector<64x128xf32>
    %409 = arith.mulf %405, %408 : vector<64x128xf32>
    %410 = math.absf %409 : vector<64x128xf32>
    %cst_185 = arith.constant 0.327591091 : f32
    %411 = vector.broadcast %cst_185 : f32 to vector<64x128xf32>
    %412 = arith.mulf %411, %410 : vector<64x128xf32>
    %cst_186 = arith.constant 1.000000e+00 : f32
    %413 = vector.broadcast %cst_186 : f32 to vector<64x128xf32>
    %414 = arith.addf %413, %412 : vector<64x128xf32>
    %cst_187 = arith.constant 1.000000e+00 : f32
    %415 = vector.broadcast %cst_187 : f32 to vector<64x128xf32>
    %416 = arith.divf %415, %414 : vector<64x128xf32>
    %cst_188 = arith.constant 1.06140542 : f32
    %417 = vector.broadcast %cst_188 : f32 to vector<64x128xf32>
    %418 = arith.mulf %417, %416 : vector<64x128xf32>
    %cst_189 = arith.constant -1.45315206 : f32
    %419 = vector.broadcast %cst_189 : f32 to vector<64x128xf32>
    %420 = arith.addf %418, %419 : vector<64x128xf32>
    %421 = arith.mulf %420, %416 : vector<64x128xf32>
    %cst_190 = arith.constant 1.42141378 : f32
    %422 = vector.broadcast %cst_190 : f32 to vector<64x128xf32>
    %423 = arith.addf %421, %422 : vector<64x128xf32>
    %424 = arith.mulf %423, %416 : vector<64x128xf32>
    %cst_191 = arith.constant -0.284496725 : f32
    %425 = vector.broadcast %cst_191 : f32 to vector<64x128xf32>
    %426 = arith.addf %424, %425 : vector<64x128xf32>
    %427 = arith.mulf %426, %416 : vector<64x128xf32>
    %cst_192 = arith.constant 0.254829586 : f32
    %428 = vector.broadcast %cst_192 : f32 to vector<64x128xf32>
    %429 = arith.addf %427, %428 : vector<64x128xf32>
    %430 = arith.mulf %429, %416 : vector<64x128xf32>
    %cst_193 = arith.constant 0.000000e+00 : f32
    %431 = vector.broadcast %cst_193 : f32 to vector<64x128xf32>
    %432 = arith.subf %431, %410 : vector<64x128xf32>
    %433 = arith.mulf %432, %410 : vector<64x128xf32>
    %434 = math.exp %433 : vector<64x128xf32>
    %435 = arith.mulf %430, %434 : vector<64x128xf32>
    %cst_194 = arith.constant 1.000000e+00 : f32
    %436 = vector.broadcast %cst_194 : f32 to vector<64x128xf32>
    %437 = arith.subf %436, %435 : vector<64x128xf32>
    %cst_195 = arith.constant 0.000000e+00 : f32
    %438 = vector.broadcast %cst_195 : f32 to vector<64x128xf32>
    %439 = arith.cmpf olt, %409, %438 : vector<64x128xf32>
    %cst_196 = arith.constant 0.000000e+00 : f32
    %440 = vector.broadcast %cst_196 : f32 to vector<64x128xf32>
    %441 = arith.subf %440, %437 : vector<64x128xf32>
    %442 = arith.select %439, %441, %437 : vector<64x128xi1>, vector<64x128xf32>
    %cst_197 = arith.constant 1.000000e+00 : f32
    %443 = vector.broadcast %cst_197 : f32 to vector<64x128xf32>
    %444 = arith.addf %443, %442 : vector<64x128xf32>
    %445 = arith.mulf %407, %444 : vector<64x128xf32>
    %446 = arith.truncf %445 : vector<64x128xf32> to vector<64x128xbf16>
    %c1_198 = arith.constant 1 : index
    %c0_199 = arith.constant 0 : index
    %c0_200 = arith.constant 0 : index
    %447 = vector.load %arg9[%c1_198, %c0_199, %c0_200] : memref<3x128x32xbf16, #tpu.memory_space<vmem>>, vector<1x128x32xbf16>
    %448 = vector.shape_cast %447 : vector<1x128x32xbf16> to vector<128x32xbf16>
    %cst_201 = arith.constant dense<0.000000e+00> : vector<64x32xf32>
    %449 = tpu.matmul %446, %448, %cst_201 {dimension_numbers = #tpu.dot_dimension_numbers<[1], [0], [0], [1], [0, 0, 1, 1], [], []>} : vector<64x128xbf16>, vector<128x32xbf16>, vector<64x32xf32> -> vector<64x32xf32>
    %c1_202 = arith.constant 1 : index
    %c6_203 = arith.constant 6 : index
    %c0_204 = arith.constant 0 : index
    %450 = vector.load %arg4[%c1_202, %c6_203, %c0_204] : memref<3x16x128xf32, #tpu.memory_space<vmem>>, vector<1x1x32xf32>
    %451 = vector.shape_cast %450 : vector<1x1x32xf32> to vector<1x32xf32>
    %452 = vector.broadcast %451 : vector<1x32xf32> to vector<64x32xf32>
    %453 = arith.addf %449, %452 : vector<64x32xf32>
    %454 = arith.addf %371, %453 : vector<64x32xf32>
    %c2_205 = arith.constant 2 : index
    %c0_206 = arith.constant 0 : index
    %c0_207 = arith.constant 0 : index
    %455 = vector.load %arg4[%c2_205, %c0_206, %c0_207] : memref<3x16x128xf32, #tpu.memory_space<vmem>>, vector<1x1x32xf32>
    %456 = vector.shape_cast %455 : vector<1x1x32xf32> to vector<1x32xf32>
    %c2_208 = arith.constant 2 : index
    %c1_209 = arith.constant 1 : index
    %c0_210 = arith.constant 0 : index
    %457 = vector.load %arg4[%c2_208, %c1_209, %c0_210] : memref<3x16x128xf32, #tpu.memory_space<vmem>>, vector<1x1x32xf32>
    %458 = vector.shape_cast %457 : vector<1x1x32xf32> to vector<1x32xf32>
    %cst_211 = arith.constant dense<0.000000e+00> : vector<64xf32>
    %459 = vector.multi_reduction <add>, %454, %cst_211 [1] : vector<64x32xf32> to vector<64xf32>
    %460 = vector.shape_cast %459 : vector<64xf32> to vector<64x1xf32>
    %cst_212 = arith.constant 3.200000e+01 : f32
    %461 = vector.broadcast %cst_212 : f32 to vector<64x1xf32>
    %462 = arith.divf %460, %461 : vector<64x1xf32>
    %463 = vector.broadcast %462 : vector<64x1xf32> to vector<64x32xf32>
    %464 = arith.subf %454, %463 : vector<64x32xf32>
    %465 = arith.mulf %464, %464 : vector<64x32xf32>
    %cst_213 = arith.constant dense<0.000000e+00> : vector<64xf32>
    %466 = vector.multi_reduction <add>, %465, %cst_213 [1] : vector<64x32xf32> to vector<64xf32>
    %467 = vector.shape_cast %466 : vector<64xf32> to vector<64x1xf32>
    %cst_214 = arith.constant 3.200000e+01 : f32
    %468 = vector.broadcast %cst_214 : f32 to vector<64x1xf32>
    %469 = arith.divf %467, %468 : vector<64x1xf32>
    %470 = vector.broadcast %462 : vector<64x1xf32> to vector<64x32xf32>
    %471 = arith.subf %454, %470 : vector<64x32xf32>
    %cst_215 = arith.constant 9.99999974E-6 : f32
    %472 = vector.broadcast %cst_215 : f32 to vector<64x1xf32>
    %473 = arith.addf %469, %472 : vector<64x1xf32>
    %474 = math.rsqrt %473 : vector<64x1xf32>
    %475 = vector.broadcast %474 : vector<64x1xf32> to vector<64x32xf32>
    %476 = arith.mulf %471, %475 : vector<64x32xf32>
    %477 = vector.broadcast %456 : vector<1x32xf32> to vector<64x32xf32>
    %478 = arith.mulf %476, %477 : vector<64x32xf32>
    %479 = vector.broadcast %458 : vector<1x32xf32> to vector<64x32xf32>
    %480 = arith.addf %478, %479 : vector<64x32xf32>
    %cst_216 = arith.constant dense<0.000000e+00> : vector<64xf32>
    %481 = vector.multi_reduction <add>, %1, %cst_216 [1] : vector<64x32xf32> to vector<64xf32>
    %482 = vector.shape_cast %481 : vector<64xf32> to vector<64x1xf32>
    %cst_217 = arith.constant 3.200000e+01 : f32
    %483 = vector.broadcast %cst_217 : f32 to vector<64x1xf32>
    %484 = arith.divf %482, %483 : vector<64x1xf32>
    %485 = vector.broadcast %484 : vector<64x1xf32> to vector<64x32xf32>
    %486 = arith.subf %1, %485 : vector<64x32xf32>
    %487 = arith.mulf %486, %486 : vector<64x32xf32>
    %cst_218 = arith.constant dense<0.000000e+00> : vector<64xf32>
    %488 = vector.multi_reduction <add>, %487, %cst_218 [1] : vector<64x32xf32> to vector<64xf32>
    %489 = vector.shape_cast %488 : vector<64xf32> to vector<64x1xf32>
    %cst_219 = arith.constant 3.200000e+01 : f32
    %490 = vector.broadcast %cst_219 : f32 to vector<64x1xf32>
    %491 = arith.divf %489, %490 : vector<64x1xf32>
    %492 = vector.broadcast %484 : vector<64x1xf32> to vector<64x32xf32>
    %493 = arith.subf %1, %492 : vector<64x32xf32>
    %cst_220 = arith.constant 9.99999974E-6 : f32
    %494 = vector.broadcast %cst_220 : f32 to vector<64x1xf32>
    %495 = arith.addf %491, %494 : vector<64x1xf32>
    %496 = math.rsqrt %495 : vector<64x1xf32>
    %497 = vector.broadcast %496 : vector<64x1xf32> to vector<64x32xf32>
    %498 = arith.mulf %493, %497 : vector<64x32xf32>
    %499 = vector.broadcast %456 : vector<1x32xf32> to vector<64x32xf32>
    %500 = arith.mulf %498, %499 : vector<64x32xf32>
    %501 = vector.broadcast %458 : vector<1x32xf32> to vector<64x32xf32>
    %502 = arith.addf %500, %501 : vector<64x32xf32>
    %503 = arith.truncf %480 : vector<64x32xf32> to vector<64x32xbf16>
    %c2_221 = arith.constant 2 : index
    %c0_222 = arith.constant 0 : index
    %c0_223 = arith.constant 0 : index
    %504 = vector.load %arg6[%c2_221, %c0_222, %c0_223] : memref<3x64x32xbf16, #tpu.memory_space<vmem>>, vector<1x32x32xbf16>
    %505 = vector.shape_cast %504 : vector<1x32x32xbf16> to vector<32x32xbf16>
    %cst_224 = arith.constant dense<0.000000e+00> : vector<64x32xf32>
    %506 = tpu.matmul %503, %505, %cst_224 {dimension_numbers = #tpu.dot_dimension_numbers<[1], [0], [0], [1], [0, 0, 1, 1], [], []>} : vector<64x32xbf16>, vector<32x32xbf16>, vector<64x32xf32> -> vector<64x32xf32>
    %507 = arith.truncf %502 : vector<64x32xf32> to vector<64x32xbf16>
    %c2_225 = arith.constant 2 : index
    %c32_226 = arith.constant 32 : index
    %c0_227 = arith.constant 0 : index
    %508 = vector.load %arg6[%c2_225, %c32_226, %c0_227] : memref<3x64x32xbf16, #tpu.memory_space<vmem>>, vector<1x32x32xbf16>
    %509 = vector.shape_cast %508 : vector<1x32x32xbf16> to vector<32x32xbf16>
    %cst_228 = arith.constant dense<0.000000e+00> : vector<64x32xf32>
    %510 = tpu.matmul %507, %509, %cst_228 {dimension_numbers = #tpu.dot_dimension_numbers<[1], [0], [0], [1], [0, 0, 1, 1], [], []>} : vector<64x32xbf16>, vector<32x32xbf16>, vector<64x32xf32> -> vector<64x32xf32>
    %511 = arith.addf %506, %510 : vector<64x32xf32>
    %c2_229 = arith.constant 2 : index
    %c4_230 = arith.constant 4 : index
    %c0_231 = arith.constant 0 : index
    %512 = vector.load %arg4[%c2_229, %c4_230, %c0_231] : memref<3x16x128xf32, #tpu.memory_space<vmem>>, vector<1x1x32xf32>
    %513 = vector.shape_cast %512 : vector<1x1x32xf32> to vector<1x32xf32>
    %514 = vector.broadcast %513 : vector<1x32xf32> to vector<64x32xf32>
    %515 = arith.addf %511, %514 : vector<64x32xf32>
    %516 = arith.truncf %515 : vector<64x32xf32> to vector<64x32xbf16>
    %c2_232 = arith.constant 2 : index
    %c0_233 = arith.constant 0 : index
    %c0_234 = arith.constant 0 : index
    %517 = vector.load %arg5[%c2_232, %c0_233, %c0_234] : memref<3x32x96xbf16, #tpu.memory_space<vmem>>, vector<1x32x96xbf16>
    %518 = vector.shape_cast %517 : vector<1x32x96xbf16> to vector<32x96xbf16>
    %cst_235 = arith.constant dense<0.000000e+00> : vector<64x96xf32>
    %519 = tpu.matmul %516, %518, %cst_235 {dimension_numbers = #tpu.dot_dimension_numbers<[1], [0], [0], [1], [0, 0, 1, 1], [], []>} : vector<64x32xbf16>, vector<32x96xbf16>, vector<64x96xf32> -> vector<64x96xf32>
    %c2_236 = arith.constant 2 : index
    %c7_237 = arith.constant 7 : index
    %c0_238 = arith.constant 0 : index
    %520 = vector.load %arg4[%c2_236, %c7_237, %c0_238] : memref<3x16x128xf32, #tpu.memory_space<vmem>>, vector<1x1x96xf32>
    %521 = vector.shape_cast %520 : vector<1x1x96xf32> to vector<1x96xf32>
    %522 = vector.broadcast %521 : vector<1x96xf32> to vector<64x96xf32>
    %523 = arith.addf %519, %522 : vector<64x96xf32>
    %524 = arith.truncf %523 : vector<64x96xf32> to vector<64x96xbf16>
    %525 = vector.extract_strided_slice %524 {offsets = [0, 0], sizes = [64, 8], strides = [1, 1]} : vector<64x96xbf16> to vector<64x8xbf16>
    %526 = vector.extract_strided_slice %524 {offsets = [0, 32], sizes = [64, 8], strides = [1, 1]} : vector<64x96xbf16> to vector<64x8xbf16>
    %527 = vector.extract_strided_slice %524 {offsets = [0, 64], sizes = [64, 8], strides = [1, 1]} : vector<64x96xbf16> to vector<64x8xbf16>
    %cst_239 = arith.constant dense<0.000000e+00> : vector<64x64xf32>
    %528 = tpu.matmul %525, %526, %cst_239 {dimension_numbers = #tpu.dot_dimension_numbers<[1], [1], [0], [0], [0, 0, 1, 0], [], []>} : vector<64x8xbf16>, vector<64x8xbf16>, vector<64x64xf32> -> vector<64x64xf32>
    %c2_240 = arith.constant 2 : index
    %c0_241 = arith.constant 0 : index
    %c0_242 = arith.constant 0 : index
    %c0_243 = arith.constant 0 : index
    %529 = vector.load %arg3[%c2_240, %c0_241, %c0_242, %c0_243] : memref<3x4x64x64xbf16, #tpu.memory_space<vmem>>, vector<1x1x64x64xbf16>
    %530 = vector.shape_cast %529 : vector<1x1x64x64xbf16> to vector<64x64xbf16>
    %531 = arith.extf %530 : vector<64x64xbf16> to vector<64x64xf32>
    %532 = arith.addf %528, %531 : vector<64x64xf32>
    %cst_244 = arith.constant dense<0xFF800000> : vector<64xf32>
    %533 = vector.multi_reduction <maximumf>, %532, %cst_244 [1] : vector<64x64xf32> to vector<64xf32>
    %534 = vector.shape_cast %533 : vector<64xf32> to vector<64x1xf32>
    %535 = vector.broadcast %534 : vector<64x1xf32> to vector<64x64xf32>
    %536 = arith.subf %532, %535 : vector<64x64xf32>
    %537 = math.exp %536 : vector<64x64xf32>
    %cst_245 = arith.constant dense<0.000000e+00> : vector<64xf32>
    %538 = vector.multi_reduction <add>, %537, %cst_245 [1] : vector<64x64xf32> to vector<64xf32>
    %539 = vector.shape_cast %538 : vector<64xf32> to vector<64x1xf32>
    %540 = tpu.reciprocal %539 {approx = true} : vector<64x1xf32> -> vector<64x1xf32>
    %541 = vector.broadcast %540 : vector<64x1xf32> to vector<64x64xf32>
    %542 = arith.mulf %537, %541 : vector<64x64xf32>
    %543 = arith.truncf %542 : vector<64x64xf32> to vector<64x64xbf16>
    %cst_246 = arith.constant dense<0.000000e+00> : vector<64x8xf32>
    %544 = tpu.matmul %543, %527, %cst_246 {dimension_numbers = #tpu.dot_dimension_numbers<[1], [0], [0], [1], [0, 0, 1, 1], [], []>} : vector<64x64xbf16>, vector<64x8xbf16>, vector<64x8xf32> -> vector<64x8xf32>
    %545 = vector.extract_strided_slice %524 {offsets = [0, 8], sizes = [64, 8], strides = [1, 1]} : vector<64x96xbf16> to vector<64x8xbf16>
    %546 = vector.extract_strided_slice %524 {offsets = [0, 40], sizes = [64, 8], strides = [1, 1]} : vector<64x96xbf16> to vector<64x8xbf16>
    %547 = vector.extract_strided_slice %524 {offsets = [0, 72], sizes = [64, 8], strides = [1, 1]} : vector<64x96xbf16> to vector<64x8xbf16>
    %cst_247 = arith.constant dense<0.000000e+00> : vector<64x64xf32>
    %548 = tpu.matmul %545, %546, %cst_247 {dimension_numbers = #tpu.dot_dimension_numbers<[1], [1], [0], [0], [0, 0, 1, 0], [], []>} : vector<64x8xbf16>, vector<64x8xbf16>, vector<64x64xf32> -> vector<64x64xf32>
    %c2_248 = arith.constant 2 : index
    %c1_249 = arith.constant 1 : index
    %c0_250 = arith.constant 0 : index
    %c0_251 = arith.constant 0 : index
    %549 = vector.load %arg3[%c2_248, %c1_249, %c0_250, %c0_251] : memref<3x4x64x64xbf16, #tpu.memory_space<vmem>>, vector<1x1x64x64xbf16>
    %550 = vector.shape_cast %549 : vector<1x1x64x64xbf16> to vector<64x64xbf16>
    %551 = arith.extf %550 : vector<64x64xbf16> to vector<64x64xf32>
    %552 = arith.addf %548, %551 : vector<64x64xf32>
    %cst_252 = arith.constant dense<0xFF800000> : vector<64xf32>
    %553 = vector.multi_reduction <maximumf>, %552, %cst_252 [1] : vector<64x64xf32> to vector<64xf32>
    %554 = vector.shape_cast %553 : vector<64xf32> to vector<64x1xf32>
    %555 = vector.broadcast %554 : vector<64x1xf32> to vector<64x64xf32>
    %556 = arith.subf %552, %555 : vector<64x64xf32>
    %557 = math.exp %556 : vector<64x64xf32>
    %cst_253 = arith.constant dense<0.000000e+00> : vector<64xf32>
    %558 = vector.multi_reduction <add>, %557, %cst_253 [1] : vector<64x64xf32> to vector<64xf32>
    %559 = vector.shape_cast %558 : vector<64xf32> to vector<64x1xf32>
    %560 = tpu.reciprocal %559 {approx = true} : vector<64x1xf32> -> vector<64x1xf32>
    %561 = vector.broadcast %560 : vector<64x1xf32> to vector<64x64xf32>
    %562 = arith.mulf %557, %561 : vector<64x64xf32>
    %563 = arith.truncf %562 : vector<64x64xf32> to vector<64x64xbf16>
    %cst_254 = arith.constant dense<0.000000e+00> : vector<64x8xf32>
    %564 = tpu.matmul %563, %547, %cst_254 {dimension_numbers = #tpu.dot_dimension_numbers<[1], [0], [0], [1], [0, 0, 1, 1], [], []>} : vector<64x64xbf16>, vector<64x8xbf16>, vector<64x8xf32> -> vector<64x8xf32>
    %565 = vector.extract_strided_slice %524 {offsets = [0, 16], sizes = [64, 8], strides = [1, 1]} : vector<64x96xbf16> to vector<64x8xbf16>
    %566 = vector.extract_strided_slice %524 {offsets = [0, 48], sizes = [64, 8], strides = [1, 1]} : vector<64x96xbf16> to vector<64x8xbf16>
    %567 = vector.extract_strided_slice %524 {offsets = [0, 80], sizes = [64, 8], strides = [1, 1]} : vector<64x96xbf16> to vector<64x8xbf16>
    %cst_255 = arith.constant dense<0.000000e+00> : vector<64x64xf32>
    %568 = tpu.matmul %565, %566, %cst_255 {dimension_numbers = #tpu.dot_dimension_numbers<[1], [1], [0], [0], [0, 0, 1, 0], [], []>} : vector<64x8xbf16>, vector<64x8xbf16>, vector<64x64xf32> -> vector<64x64xf32>
    %c2_256 = arith.constant 2 : index
    %c2_257 = arith.constant 2 : index
    %c0_258 = arith.constant 0 : index
    %c0_259 = arith.constant 0 : index
    %569 = vector.load %arg3[%c2_256, %c2_257, %c0_258, %c0_259] : memref<3x4x64x64xbf16, #tpu.memory_space<vmem>>, vector<1x1x64x64xbf16>
    %570 = vector.shape_cast %569 : vector<1x1x64x64xbf16> to vector<64x64xbf16>
    %571 = arith.extf %570 : vector<64x64xbf16> to vector<64x64xf32>
    %572 = arith.addf %568, %571 : vector<64x64xf32>
    %cst_260 = arith.constant dense<0xFF800000> : vector<64xf32>
    %573 = vector.multi_reduction <maximumf>, %572, %cst_260 [1] : vector<64x64xf32> to vector<64xf32>
    %574 = vector.shape_cast %573 : vector<64xf32> to vector<64x1xf32>
    %575 = vector.broadcast %574 : vector<64x1xf32> to vector<64x64xf32>
    %576 = arith.subf %572, %575 : vector<64x64xf32>
    %577 = math.exp %576 : vector<64x64xf32>
    %cst_261 = arith.constant dense<0.000000e+00> : vector<64xf32>
    %578 = vector.multi_reduction <add>, %577, %cst_261 [1] : vector<64x64xf32> to vector<64xf32>
    %579 = vector.shape_cast %578 : vector<64xf32> to vector<64x1xf32>
    %580 = tpu.reciprocal %579 {approx = true} : vector<64x1xf32> -> vector<64x1xf32>
    %581 = vector.broadcast %580 : vector<64x1xf32> to vector<64x64xf32>
    %582 = arith.mulf %577, %581 : vector<64x64xf32>
    %583 = arith.truncf %582 : vector<64x64xf32> to vector<64x64xbf16>
    %cst_262 = arith.constant dense<0.000000e+00> : vector<64x8xf32>
    %584 = tpu.matmul %583, %567, %cst_262 {dimension_numbers = #tpu.dot_dimension_numbers<[1], [0], [0], [1], [0, 0, 1, 1], [], []>} : vector<64x64xbf16>, vector<64x8xbf16>, vector<64x8xf32> -> vector<64x8xf32>
    %585 = vector.extract_strided_slice %524 {offsets = [0, 24], sizes = [64, 8], strides = [1, 1]} : vector<64x96xbf16> to vector<64x8xbf16>
    %586 = vector.extract_strided_slice %524 {offsets = [0, 56], sizes = [64, 8], strides = [1, 1]} : vector<64x96xbf16> to vector<64x8xbf16>
    %587 = vector.extract_strided_slice %524 {offsets = [0, 88], sizes = [64, 8], strides = [1, 1]} : vector<64x96xbf16> to vector<64x8xbf16>
    %cst_263 = arith.constant dense<0.000000e+00> : vector<64x64xf32>
    %588 = tpu.matmul %585, %586, %cst_263 {dimension_numbers = #tpu.dot_dimension_numbers<[1], [1], [0], [0], [0, 0, 1, 0], [], []>} : vector<64x8xbf16>, vector<64x8xbf16>, vector<64x64xf32> -> vector<64x64xf32>
    %c2_264 = arith.constant 2 : index
    %c3_265 = arith.constant 3 : index
    %c0_266 = arith.constant 0 : index
    %c0_267 = arith.constant 0 : index
    %589 = vector.load %arg3[%c2_264, %c3_265, %c0_266, %c0_267] : memref<3x4x64x64xbf16, #tpu.memory_space<vmem>>, vector<1x1x64x64xbf16>
    %590 = vector.shape_cast %589 : vector<1x1x64x64xbf16> to vector<64x64xbf16>
    %591 = arith.extf %590 : vector<64x64xbf16> to vector<64x64xf32>
    %592 = arith.addf %588, %591 : vector<64x64xf32>
    %cst_268 = arith.constant dense<0xFF800000> : vector<64xf32>
    %593 = vector.multi_reduction <maximumf>, %592, %cst_268 [1] : vector<64x64xf32> to vector<64xf32>
    %594 = vector.shape_cast %593 : vector<64xf32> to vector<64x1xf32>
    %595 = vector.broadcast %594 : vector<64x1xf32> to vector<64x64xf32>
    %596 = arith.subf %592, %595 : vector<64x64xf32>
    %597 = math.exp %596 : vector<64x64xf32>
    %cst_269 = arith.constant dense<0.000000e+00> : vector<64xf32>
    %598 = vector.multi_reduction <add>, %597, %cst_269 [1] : vector<64x64xf32> to vector<64xf32>
    %599 = vector.shape_cast %598 : vector<64xf32> to vector<64x1xf32>
    %600 = tpu.reciprocal %599 {approx = true} : vector<64x1xf32> -> vector<64x1xf32>
    %601 = vector.broadcast %600 : vector<64x1xf32> to vector<64x64xf32>
    %602 = arith.mulf %597, %601 : vector<64x64xf32>
    %603 = arith.truncf %602 : vector<64x64xf32> to vector<64x64xbf16>
    %cst_270 = arith.constant dense<0.000000e+00> : vector<64x8xf32>
    %604 = tpu.matmul %603, %587, %cst_270 {dimension_numbers = #tpu.dot_dimension_numbers<[1], [0], [0], [1], [0, 0, 1, 1], [], []>} : vector<64x64xbf16>, vector<64x8xbf16>, vector<64x8xf32> -> vector<64x8xf32>
    %605 = tpu.concatenate %544, %564, %584, %604 in 1 : vector<64x8xf32>, vector<64x8xf32>, vector<64x8xf32>, vector<64x8xf32> -> vector<64x32xf32>
    %606 = arith.truncf %605 : vector<64x32xf32> to vector<64x32xbf16>
    %c2_271 = arith.constant 2 : index
    %c0_272 = arith.constant 0 : index
    %c0_273 = arith.constant 0 : index
    %607 = vector.load %arg7[%c2_271, %c0_272, %c0_273] : memref<3x32x32xbf16, #tpu.memory_space<vmem>>, vector<1x32x32xbf16>
    %608 = vector.shape_cast %607 : vector<1x32x32xbf16> to vector<32x32xbf16>
    %cst_274 = arith.constant dense<0.000000e+00> : vector<64x32xf32>
    %609 = tpu.matmul %606, %608, %cst_274 {dimension_numbers = #tpu.dot_dimension_numbers<[1], [0], [0], [1], [0, 0, 1, 1], [], []>} : vector<64x32xbf16>, vector<32x32xbf16>, vector<64x32xf32> -> vector<64x32xf32>
    %c2_275 = arith.constant 2 : index
    %c5_276 = arith.constant 5 : index
    %c0_277 = arith.constant 0 : index
    %610 = vector.load %arg4[%c2_275, %c5_276, %c0_277] : memref<3x16x128xf32, #tpu.memory_space<vmem>>, vector<1x1x32xf32>
    %611 = vector.shape_cast %610 : vector<1x1x32xf32> to vector<1x32xf32>
    %612 = vector.broadcast %611 : vector<1x32xf32> to vector<64x32xf32>
    %613 = arith.addf %609, %612 : vector<64x32xf32>
    %614 = arith.addf %454, %613 : vector<64x32xf32>
    %c2_278 = arith.constant 2 : index
    %c2_279 = arith.constant 2 : index
    %c0_280 = arith.constant 0 : index
    %615 = vector.load %arg4[%c2_278, %c2_279, %c0_280] : memref<3x16x128xf32, #tpu.memory_space<vmem>>, vector<1x1x32xf32>
    %616 = vector.shape_cast %615 : vector<1x1x32xf32> to vector<1x32xf32>
    %c2_281 = arith.constant 2 : index
    %c3_282 = arith.constant 3 : index
    %c0_283 = arith.constant 0 : index
    %617 = vector.load %arg4[%c2_281, %c3_282, %c0_283] : memref<3x16x128xf32, #tpu.memory_space<vmem>>, vector<1x1x32xf32>
    %618 = vector.shape_cast %617 : vector<1x1x32xf32> to vector<1x32xf32>
    %cst_284 = arith.constant dense<0.000000e+00> : vector<64xf32>
    %619 = vector.multi_reduction <add>, %614, %cst_284 [1] : vector<64x32xf32> to vector<64xf32>
    %620 = vector.shape_cast %619 : vector<64xf32> to vector<64x1xf32>
    %cst_285 = arith.constant 3.200000e+01 : f32
    %621 = vector.broadcast %cst_285 : f32 to vector<64x1xf32>
    %622 = arith.divf %620, %621 : vector<64x1xf32>
    %623 = vector.broadcast %622 : vector<64x1xf32> to vector<64x32xf32>
    %624 = arith.subf %614, %623 : vector<64x32xf32>
    %625 = arith.mulf %624, %624 : vector<64x32xf32>
    %cst_286 = arith.constant dense<0.000000e+00> : vector<64xf32>
    %626 = vector.multi_reduction <add>, %625, %cst_286 [1] : vector<64x32xf32> to vector<64xf32>
    %627 = vector.shape_cast %626 : vector<64xf32> to vector<64x1xf32>
    %cst_287 = arith.constant 3.200000e+01 : f32
    %628 = vector.broadcast %cst_287 : f32 to vector<64x1xf32>
    %629 = arith.divf %627, %628 : vector<64x1xf32>
    %630 = vector.broadcast %622 : vector<64x1xf32> to vector<64x32xf32>
    %631 = arith.subf %614, %630 : vector<64x32xf32>
    %cst_288 = arith.constant 9.99999974E-6 : f32
    %632 = vector.broadcast %cst_288 : f32 to vector<64x1xf32>
    %633 = arith.addf %629, %632 : vector<64x1xf32>
    %634 = math.rsqrt %633 : vector<64x1xf32>
    %635 = vector.broadcast %634 : vector<64x1xf32> to vector<64x32xf32>
    %636 = arith.mulf %631, %635 : vector<64x32xf32>
    %637 = vector.broadcast %616 : vector<1x32xf32> to vector<64x32xf32>
    %638 = arith.mulf %636, %637 : vector<64x32xf32>
    %639 = vector.broadcast %618 : vector<1x32xf32> to vector<64x32xf32>
    %640 = arith.addf %638, %639 : vector<64x32xf32>
    %641 = arith.truncf %640 : vector<64x32xf32> to vector<64x32xbf16>
    %c2_289 = arith.constant 2 : index
    %c0_290 = arith.constant 0 : index
    %c0_291 = arith.constant 0 : index
    %642 = vector.load %arg8[%c2_289, %c0_290, %c0_291] : memref<3x32x128xbf16, #tpu.memory_space<vmem>>, vector<1x32x128xbf16>
    %643 = vector.shape_cast %642 : vector<1x32x128xbf16> to vector<32x128xbf16>
    %cst_292 = arith.constant dense<0.000000e+00> : vector<64x128xf32>
    %644 = tpu.matmul %641, %643, %cst_292 {dimension_numbers = #tpu.dot_dimension_numbers<[1], [0], [0], [1], [0, 0, 1, 1], [], []>} : vector<64x32xbf16>, vector<32x128xbf16>, vector<64x128xf32> -> vector<64x128xf32>
    %c2_293 = arith.constant 2 : index
    %c8_294 = arith.constant 8 : index
    %c0_295 = arith.constant 0 : index
    %645 = vector.load %arg4[%c2_293, %c8_294, %c0_295] : memref<3x16x128xf32, #tpu.memory_space<vmem>>, vector<1x1x128xf32>
    %646 = vector.shape_cast %645 : vector<1x1x128xf32> to vector<1x128xf32>
    %647 = vector.broadcast %646 : vector<1x128xf32> to vector<64x128xf32>
    %648 = arith.addf %644, %647 : vector<64x128xf32>
    %cst_296 = arith.constant 5.000000e-01 : f32
    %649 = vector.broadcast %cst_296 : f32 to vector<64x128xf32>
    %650 = arith.mulf %649, %648 : vector<64x128xf32>
    %cst_297 = arith.constant 0.707106769 : f32
    %651 = vector.broadcast %cst_297 : f32 to vector<64x128xf32>
    %652 = arith.mulf %648, %651 : vector<64x128xf32>
    %653 = math.absf %652 : vector<64x128xf32>
    %cst_298 = arith.constant 0.327591091 : f32
    %654 = vector.broadcast %cst_298 : f32 to vector<64x128xf32>
    %655 = arith.mulf %654, %653 : vector<64x128xf32>
    %cst_299 = arith.constant 1.000000e+00 : f32
    %656 = vector.broadcast %cst_299 : f32 to vector<64x128xf32>
    %657 = arith.addf %656, %655 : vector<64x128xf32>
    %cst_300 = arith.constant 1.000000e+00 : f32
    %658 = vector.broadcast %cst_300 : f32 to vector<64x128xf32>
    %659 = arith.divf %658, %657 : vector<64x128xf32>
    %cst_301 = arith.constant 1.06140542 : f32
    %660 = vector.broadcast %cst_301 : f32 to vector<64x128xf32>
    %661 = arith.mulf %660, %659 : vector<64x128xf32>
    %cst_302 = arith.constant -1.45315206 : f32
    %662 = vector.broadcast %cst_302 : f32 to vector<64x128xf32>
    %663 = arith.addf %661, %662 : vector<64x128xf32>
    %664 = arith.mulf %663, %659 : vector<64x128xf32>
    %cst_303 = arith.constant 1.42141378 : f32
    %665 = vector.broadcast %cst_303 : f32 to vector<64x128xf32>
    %666 = arith.addf %664, %665 : vector<64x128xf32>
    %667 = arith.mulf %666, %659 : vector<64x128xf32>
    %cst_304 = arith.constant -0.284496725 : f32
    %668 = vector.broadcast %cst_304 : f32 to vector<64x128xf32>
    %669 = arith.addf %667, %668 : vector<64x128xf32>
    %670 = arith.mulf %669, %659 : vector<64x128xf32>
    %cst_305 = arith.constant 0.254829586 : f32
    %671 = vector.broadcast %cst_305 : f32 to vector<64x128xf32>
    %672 = arith.addf %670, %671 : vector<64x128xf32>
    %673 = arith.mulf %672, %659 : vector<64x128xf32>
    %cst_306 = arith.constant 0.000000e+00 : f32
    %674 = vector.broadcast %cst_306 : f32 to vector<64x128xf32>
    %675 = arith.subf %674, %653 : vector<64x128xf32>
    %676 = arith.mulf %675, %653 : vector<64x128xf32>
    %677 = math.exp %676 : vector<64x128xf32>
    %678 = arith.mulf %673, %677 : vector<64x128xf32>
    %cst_307 = arith.constant 1.000000e+00 : f32
    %679 = vector.broadcast %cst_307 : f32 to vector<64x128xf32>
    %680 = arith.subf %679, %678 : vector<64x128xf32>
    %cst_308 = arith.constant 0.000000e+00 : f32
    %681 = vector.broadcast %cst_308 : f32 to vector<64x128xf32>
    %682 = arith.cmpf olt, %652, %681 : vector<64x128xf32>
    %cst_309 = arith.constant 0.000000e+00 : f32
    %683 = vector.broadcast %cst_309 : f32 to vector<64x128xf32>
    %684 = arith.subf %683, %680 : vector<64x128xf32>
    %685 = arith.select %682, %684, %680 : vector<64x128xi1>, vector<64x128xf32>
    %cst_310 = arith.constant 1.000000e+00 : f32
    %686 = vector.broadcast %cst_310 : f32 to vector<64x128xf32>
    %687 = arith.addf %686, %685 : vector<64x128xf32>
    %688 = arith.mulf %650, %687 : vector<64x128xf32>
    %689 = arith.truncf %688 : vector<64x128xf32> to vector<64x128xbf16>
    %c2_311 = arith.constant 2 : index
    %c0_312 = arith.constant 0 : index
    %c0_313 = arith.constant 0 : index
    %690 = vector.load %arg9[%c2_311, %c0_312, %c0_313] : memref<3x128x32xbf16, #tpu.memory_space<vmem>>, vector<1x128x32xbf16>
    %691 = vector.shape_cast %690 : vector<1x128x32xbf16> to vector<128x32xbf16>
    %cst_314 = arith.constant dense<0.000000e+00> : vector<64x32xf32>
    %692 = tpu.matmul %689, %691, %cst_314 {dimension_numbers = #tpu.dot_dimension_numbers<[1], [0], [0], [1], [0, 0, 1, 1], [], []>} : vector<64x128xbf16>, vector<128x32xbf16>, vector<64x32xf32> -> vector<64x32xf32>
    %c2_315 = arith.constant 2 : index
    %c6_316 = arith.constant 6 : index
    %c0_317 = arith.constant 0 : index
    %693 = vector.load %arg4[%c2_315, %c6_316, %c0_317] : memref<3x16x128xf32, #tpu.memory_space<vmem>>, vector<1x1x32xf32>
    %694 = vector.shape_cast %693 : vector<1x1x32xf32> to vector<1x32xf32>
    %695 = vector.broadcast %694 : vector<1x32xf32> to vector<64x32xf32>
    %696 = arith.addf %692, %695 : vector<64x32xf32>
    %697 = arith.addf %614, %696 : vector<64x32xf32>
    %c0_318 = arith.constant 0 : index
    %c0_319 = arith.constant 0 : index
    %c0_320 = arith.constant 0 : index
    %698 = vector.load %arg10[%c0_318, %c0_319, %c0_320] : memref<1x64x32xf32, #tpu.memory_space<vmem>>, vector<1x64x32xf32>
    %699 = vector.shape_cast %698 : vector<1x64x32xf32> to vector<64x32xf32>
    %700 = vector.shape_cast %697 : vector<64x32xf32> to vector<1x64x32xf32>
    tpu.vector_store %arg10[%c0_318, %c0_319, %c0_320], %700 {strides = array<i32>} : memref<1x64x32xf32, #tpu.memory_space<vmem>>, vector<1x64x32xf32>,
    return
  }
  func.func @transform_0(%arg0: i32) -> (i32, i32, i32) {
    %c0_i32 = arith.constant 0 : i32
    %c0_i32_0 = arith.constant 0 : i32
    %c0_i32_1 = arith.constant 0 : i32
    return %arg0, %c0_i32, %c0_i32_0 : i32, i32, i32
  }
  func.func @transform_1(%arg0: i32) -> (i32, i32, i32) {
    %c0_i32 = arith.constant 0 : i32
    %c0_i32_0 = arith.constant 0 : i32
    %c0_i32_1 = arith.constant 0 : i32
    return %arg0, %c0_i32, %c0_i32_0 : i32, i32, i32
  }
  func.func @transform_2(%arg0: i32) -> (i32, i32, i32, i32) {
    %c0_i32 = arith.constant 0 : i32
    %c0_i32_0 = arith.constant 0 : i32
    %c0_i32_1 = arith.constant 0 : i32
    %c0_i32_2 = arith.constant 0 : i32
    %c0_i32_3 = arith.constant 0 : i32
    return %c0_i32, %c0_i32_0, %c0_i32_1, %c0_i32_2 : i32, i32, i32, i32
  }
  func.func @transform_3(%arg0: i32) -> (i32, i32, i32) {
    %c0_i32 = arith.constant 0 : i32
    %c0_i32_0 = arith.constant 0 : i32
    %c0_i32_1 = arith.constant 0 : i32
    %c0_i32_2 = arith.constant 0 : i32
    return %c0_i32, %c0_i32_0, %c0_i32_1 : i32, i32, i32
  }
  func.func @transform_4(%arg0: i32) -> (i32, i32, i32) {
    %c0_i32 = arith.constant 0 : i32
    %c0_i32_0 = arith.constant 0 : i32
    %c0_i32_1 = arith.constant 0 : i32
    %c0_i32_2 = arith.constant 0 : i32
    return %c0_i32, %c0_i32_0, %c0_i32_1 : i32, i32, i32
  }
  func.func @transform_5(%arg0: i32) -> (i32, i32, i32) {
    %c0_i32 = arith.constant 0 : i32
    %c0_i32_0 = arith.constant 0 : i32
    %c0_i32_1 = arith.constant 0 : i32
    %c0_i32_2 = arith.constant 0 : i32
    return %c0_i32, %c0_i32_0, %c0_i32_1 : i32, i32, i32
  }
  func.func @transform_6(%arg0: i32) -> (i32, i32, i32) {
    %c0_i32 = arith.constant 0 : i32
    %c0_i32_0 = arith.constant 0 : i32
    %c0_i32_1 = arith.constant 0 : i32
    %c0_i32_2 = arith.constant 0 : i32
    return %c0_i32, %c0_i32_0, %c0_i32_1 : i32, i32, i32
  }
  func.func @transform_7(%arg0: i32) -> (i32, i32, i32) {
    %c0_i32 = arith.constant 0 : i32
    %c0_i32_0 = arith.constant 0 : i32
    %c0_i32_1 = arith.constant 0 : i32
    %c0_i32_2 = arith.constant 0 : i32
    return %c0_i32, %c0_i32_0, %c0_i32_1 : i32, i32, i32
  }
  func.func @transform_8(%arg0: i32) -> (i32, i32, i32) {
    %c0_i32 = arith.constant 0 : i32
    %c0_i32_0 = arith.constant 0 : i32
    %c0_i32_1 = arith.constant 0 : i32
    %c0_i32_2 = arith.constant 0 : i32
    return %c0_i32, %c0_i32_0, %c0_i32_1 : i32, i32, i32
  }
  func.func @transform_9(%arg0: i32) -> (i32, i32, i32) {
    %c0_i32 = arith.constant 0 : i32
    %c0_i32_0 = arith.constant 0 : i32
    %c0_i32_1 = arith.constant 0 : i32
    return %arg0, %c0_i32, %c0_i32_0 : i32, i32, i32
  }
}

</mosaic_0001>

<bundles_post_ra>
// kernel: swin_transformer_forward.1
= control target key start
LH: loop header
LB: loop body
LE: loop exit
PB: predicated region body
PF: predicated region fallthrough
CT: control target
= control target key end

     0   :  { %s8911_s30 = smov 0   ;;  %s12627_s0 = inlined_call_operand.vmem [shape: f32[2,64,32], index: 0, kind: input, shape index: {}]   ;;  %s12628_s1 = inlined_call_operand.vmem [shape: f32[2,64,32], index: 1, kind: input, shape index: {}]   ;;  %s12629_s2 = inlined_call_operand.vmem [shape: bf16[3,4,64,64], index: 2, kind: input, shape index: {}]   ;;  %s12630_s3 = inlined_call_operand.vmem [shape: f32[3,16,128], index: 3, kind: input, shape index: {}]   ;;  %s12631_s4 = inlined_call_operand.vmem [shape: bf16[3,32,96], index: 4, kind: input, shape index: {}]   ;;  %s12632_s5 = inlined_call_operand.vmem [shape: bf16[3,64,32], index: 5, kind: input, shape index: {}]   ;;  %s12633_s6 = inlined_call_operand.vmem [shape: bf16[3,32,32], index: 6, kind: input, shape index: {}]   ;;  %s12634_s7 = inlined_call_operand.vmem [shape: bf16[3,32,128], index: 7, kind: input, shape index: {}]   ;;  %s12635_s8 = inlined_call_operand.vmem [shape: bf16[3,128,32], index: 8, kind: input, shape index: {}]   ;;  %s12636_s9 = inlined_call_operand.vmem [shape: f32[2,64,32], index: 9, kind: output, shape index: {}]  }
   0x1 LB: > { %s7179_s10 = sadd.s32 4294967295, %s8844_s30   ;;  %p7183_p0 = scmp.ge.s32.totalorder %s8844_s30, 1  ;;  %s8844_s30 = sphi %s8911_s30, %s19_s30  }
   0x2   : > { %p297_p1 = scmp.lt.s32.totalorder %s8844_s30, 3 }
   0x4   : > { %p298_p2 = pnand %p7183_p0, %p297_p1 }
   0x6   : > { %301 = sbr.rel (%p298_p2) target bundleno = 7082 (0x1baa), region = 56 }
   0xb   : > { %p338_p3 = scmp.lt.s32.totalorder %s7179_s10, 1  ;;  %vm372_vm0 = vcmask 261120   ;;  %v8846_v28 = vmov 32.0   ;;  %s8847_s24 = smov 88  }
   0xc   : > { %8234 = vrcp.f32 %v8846_v28  ;;  %s8848_s25 = smov 120   ;;  %s8849_s26 = smov 72  }
   0xd   : > { %s12686_s10 = smov (!%p338_p3, %s7179_s10), 1  ;;  %s8850_s27 = smov 96  }
   0xe   : > { %s8919_s11 = sshll.u32 %s12686_s10, 6  ;;  %s8851_s28 = smov 80  }
   0xf   : > { %s8925_s14 = scalar_lea.vmem %s12628_s1, %s8919_s11  ;;  %s8932_s17 = scalar_lea.vmem %s12627_s0, %s8919_s11 }
  0x10   : > { %v362_v0 = vld [vmem:[%s8925_s14] sm:$0xff]  ;;  %v356_v2 = vld [vmem:[%s8932_s17 + $0x10] sm:$0xff]  ;;  %v8938_v4 = vld [vmem:[%s8925_s14 + $0x8] sm:$0xff]  ;;  %s8852_s29 = smov 104   ;;  %s8853_s10 = smov 112  }
  0x11   : > { %v574_v1 = vsel %vm372_vm0, %v362_v0, 0.0  ;;  %v354_v3 = vld [vmem:[%s8932_s17] sm:$0xff]  ;;  %v379_v5 = vsel %vm372_vm0, %v356_v2, 0.0  ;;  %v8943_v7 = vld [vmem:[%s8932_s17 + $0x18] sm:$0xff]  ;;  %v8946_v8 = vld [vmem:[%s8932_s17 + $0x8] sm:$0xff]  ;;  %v577_v9 = vsel %vm372_vm0, %v8938_v4, 0.0 }
  0x12   : > { %575 = vadd.xlane.f32.xlu1 %v574_v1  ;;  %v373_v6 = vsel %vm372_vm0, %v354_v3, 0.0  ;;  %380 = vadd.xlane.f32.xlu2 %v379_v5  ;;  %v382_v10 = vsel %vm372_vm0, %v8943_v7, 0.0  ;;  %v376_v11 = vsel %vm372_vm0, %v8946_v8, 0.0  ;;  %v8955_v12 = vld [vmem:[%s8925_s14 + $0x18] sm:$0xff]  ;;  %v8958_v13 = vld [vmem:[%s8932_s17 + $0x20] sm:$0xff]  ;;  %v8961_v14 = vld [vmem:[%s8925_s14 + $0x10] sm:$0xff]  ;;  %v8235_v29 = vpop.eup %8234 }
  0x13   : > { %374 = vadd.xlane.f32.xlu0 %v373_v6  ;;  %v583_v15 = vsel %vm372_vm0, %v8955_v12, 0.0  ;;  %v385_v16 = vsel %vm372_vm0, %v8958_v13, 0.0  ;;  %v580_v17 = vsel %vm372_vm0, %v8961_v14, 0.0  ;;  %v8970_v18 = vld [vmem:[%s8925_s14 + $0x20] sm:$0xff]  ;;  %v8973_v19 = vld [vmem:[%s8925_s14 + $0x28] sm:$0xff]  ;;  %v8985_v24 = vld [vmem:[%s8932_s17 + $0x30] sm:$0xff]  ;;  %vm402_vm1 = vweird.f32 %v8235_v29 }
  0x14   : > { %v8976_v20 = vld [vmem:[%s8932_s17 + $0x28] sm:$0xff]  ;;  %v586_v21 = vsel %vm372_vm0, %v8970_v18, 0.0  ;;  %v589_v22 = vsel %vm372_vm0, %v8973_v19, 0.0  ;;  %v8988_v25 = vld [vmem:[%s8932_s17 + $0x38] sm:$0xff]  ;;  %v391_v26 = vsel %vm372_vm0, %v8985_v24, 0.0  ;;  %v398_v30 = vmul.f32 32.0, %v8235_v29 }
  0x15   : > { %v388_v23 = vsel %vm372_vm0, %v8976_v20, 0.0  ;;  %v394_v27 = vsel %vm372_vm0, %v8988_v25, 0.0  ;;  %v9038_v5 = vld [vmem:[%s8925_s14 + $0x38] sm:$0xff]  ;;  %s8854_s12 = smov 64   ;;  %s8855_s13 = smov 56  }
  0x16   : > { %v399_v31 = vsub.f32 1.0, %v398_v30  ;;  %s8857_s15 = smov 48   ;;  %s8858_s16 = smov 8  }
  0x17   : > { %s8859_s18 = smov 16   ;;  %s8860_s19 = smov 24  }
  0x18   : > { %v400_v32 = vmul.f32 %v8235_v29, %v399_v31 }
  0x1a   : > { %578 = vadd.xlane.f32.xlu1 %v577_v9  ;;  %383 = vadd.xlane.f32.xlu2 %v382_v10  ;;  %v401_v33 = vadd.f32 %v8235_v29, %v400_v32  ;;  %v595_v10 = vsel %vm372_vm0, %v9038_v5, 0.0 }
  0x1b   : > { %377 = vadd.xlane.f32.xlu0 %v376_v11 }
  0x1c   : > { %v8994_v34 = vsel %vm402_vm1, %v8235_v29, %v401_v33 }
  0x1d   : > { %12645 = vst [vmem:[#allocation2_spill] sm:$0xff] %v8994_v34 }
  0x22   : > { %584 = vadd.xlane.f32.xlu1 %v583_v15  ;;  %386 = vadd.xlane.f32.xlu2 %v385_v16 }
  0x23   : > { %581 = vadd.xlane.f32.xlu0 %v580_v17 }
  0x2a   : > { %587 = vadd.xlane.f32.xlu1 %v586_v21  ;;  %590 = vadd.xlane.f32.xlu2 %v589_v22 }
  0x2b   : > { %389 = vadd.xlane.f32.xlu0 %v388_v23 }
  0x32   : > { %392 = vadd.xlane.f32.xlu1 %v391_v26  ;;  %395 = vadd.xlane.f32.xlu2 %v394_v27 }
  0x85   : > { %v576_v35 = vpop.xlane.xlu1 %575  ;;  %v381_v37 = vpop.xlane.xlu2 %380 }
  0x86   : > { %v598_v36 = vmul.f32 %v576_v35, %v8994_v34  ;;  %v375_v38 = vpop.xlane.xlu0 %374  ;;  %v406_v39 = vmul.f32 %v8994_v34, %v381_v37 }
  0x87   : > { %v404_v40 = vmul.f32 %v8994_v34, %v375_v38 }
  0x88   : > { %v8999_v41 = vsub.f32 %v362_v0, %v598_v36  ;;  %v9003_v43 = vsub.f32 %v356_v2, %v406_v39 }
  0x89   : > { %v9001_v42 = vsub.f32 %v354_v3, %v404_v40 }
  0x8a   : > { %v614_v44 = vmul.f32 %v8999_v41, %v8999_v41  ;;  %v422_v52 = vmul.f32 %v9003_v43, %v9003_v43 }
  0x8b   : > { %v420_v45 = vmul.f32 %v9001_v42, %v9001_v42 }
  0x8c   : > { %v622_v46 = vsel %vm372_vm0, %v614_v44, 0.0  ;;  %v434_v56 = vsel %vm372_vm0, %v422_v52, 0.0 }
  0x8d   : > { %v579_v47 = vpop.xlane.xlu1 %578  ;;  %623 = vadd.xlane.f32.xlu2 %v622_v46  ;;  %v428_v48 = vsel %vm372_vm0, %v420_v45, 0.0  ;;  %v384_v50 = vpop.xlane.xlu2 %383 }
  0x8e   : > { %v599_v49 = vmul.f32 %v579_v47, %v8994_v34  ;;  %429 = vadd.xlane.f32.xlu0 %v428_v48  ;;  %v378_v51 = vpop.xlane.xlu0 %377  ;;  %v407_v1 = vmul.f32 %v8994_v34, %v384_v50 }
  0x8f   : > { %v405_v53 = vmul.f32 %v8994_v34, %v378_v51 }
  0x90   : > { %v9016_v54 = vsub.f32 %v8938_v4, %v599_v49  ;;  %v9035_v4 = vld [vmem:[%s8925_s14 + $0x30] sm:$0xff]  ;;  %s8856_s14 = smov 40  }
  0x91   : > { %v9019_v55 = vsub.f32 %v8946_v8, %v405_v53  ;;  %v9043_v8 = vsub.f32 %v8943_v7, %v407_v1  ;;  %v592_v9 = vsel %vm372_vm0, %v9035_v4, 0.0  ;;  %v7715_v53 = vld [vmem:[%s12632_s5 + $0x18] sm:$0xff] }
  0x92   : > { %v615_v57 = vmul.f32 %v9016_v54, %v9016_v54  ;;  %812 = vmatpush.bf16.msra.mxu0 %v7715_v53 }
  0x93   : > { %v421_v58 = vmul.f32 %v9019_v55, %v9019_v55  ;;  %v423_v22 = vmul.f32 %v9043_v8, %v9043_v8 }
  0x94   : > { %v625_v59 = vsel %vm372_vm0, %v615_v57, 0.0 }
  0x95   : > { %v585_v60 = vpop.xlane.xlu1 %584  ;;  %435 = vadd.xlane.f32.xlu2 %v434_v56  ;;  %v431_v61 = vsel %vm372_vm0, %v421_v58, 0.0  ;;  %v387_v63 = vpop.xlane.xlu2 %386  ;;  %v437_v29 = vsel %vm372_vm0, %v423_v22, 0.0  ;;  %v7713_v56 = vld [vmem:[%s12632_s5 + $0x8] sm:$0xff] }
  0x96   : > { %v601_v62 = vmul.f32 %v585_v60, %v8994_v34  ;;  %626 = vadd.xlane.f32.xlu0 %v625_v59  ;;  %432 = vadd.xlane.f32.xlu1 %v431_v61  ;;  %v582_v0 = vpop.xlane.xlu0 %581  ;;  %v408_v21 = vmul.f32 %v8994_v34, %v387_v63  ;;  %v7714_v59 = vld [vmem:[%s12632_s5 + $0x10] sm:$0xff]  ;;  %v7712_v60 = vld [vmem:[%s12632_s5] sm:$0xff] }
  0x97   : > { %v600_v2 = vmul.f32 %v582_v0, %v8994_v34  ;;  %865 = vmatpush.bf16.msra.mxu1 %v7713_v56  ;;  %813 = vmatpush.bf16.msra.mxu0 %v7714_v59 }
  0x98   : > { %v9032_v3 = vsub.f32 %v8955_v12, %v601_v62  ;;  %v9066_v28 = vsub.f32 %v8958_v13, %v408_v21 }
  0x99   : > { %v9050_v11 = vsub.f32 %v8961_v14, %v600_v2 }
  0x9a   : > { %v617_v6 = vmul.f32 %v9032_v3, %v9032_v3  ;;  %v424_v13 = vmul.f32 %v9066_v28, %v9066_v28 }
  0x9b   : > { %v616_v23 = vmul.f32 %v9050_v11, %v9050_v11  ;;  %866 = vmatpush.bf16.msra.mxu1 %v7712_v60 }
  0x9c   : > { %v631_v12 = vsel %vm372_vm0, %v617_v6, 0.0  ;;  %v440_v44 = vsel %vm372_vm0, %v424_v13, 0.0 }
  0x9d   : > { %v588_v15 = vpop.xlane.xlu1 %587  ;;  %632 = vadd.xlane.f32.xlu2 %v631_v12  ;;  %v591_v17 = vpop.xlane.xlu2 %590  ;;  %v628_v30 = vsel %vm372_vm0, %v616_v23, 0.0 }
  0x9e   : > { %v602_v16 = vmul.f32 %v588_v15, %v8994_v34  ;;  %593 = vadd.xlane.f32.xlu0 %v592_v9  ;;  %596 = vadd.xlane.f32.xlu1 %v595_v10  ;;  %v390_v7 = vpop.xlane.xlu0 %389  ;;  %v603_v35 = vmul.f32 %v591_v17, %v8994_v34 }
  0x9f   : > { %v409_v26 = vmul.f32 %v8994_v34, %v390_v7 }
  0xa0   : > { %v9060_v14 = vsub.f32 %v8970_v18, %v602_v16  ;;  %v9085_v39 = vsub.f32 %v8973_v19, %v603_v35 }
  0xa1   : > { %v9072_v32 = vsub.f32 %v8976_v20, %v409_v26 }
  0xa2   : > { %v618_v27 = vmul.f32 %v9060_v14, %v9060_v14 }
  0xa3   : > { %v425_v38 = vmul.f32 %v9072_v32, %v9072_v32 }
  0xa4   : > { %v634_v31 = vsel %vm372_vm0, %v618_v27, 0.0 }
  0xa5   : > { %635 = vadd.xlane.f32.xlu2 %v634_v31  ;;  %v393_v18 = vpop.xlane.xlu1 %392  ;;  %v396_v33 = vpop.xlane.xlu2 %395  ;;  %v443_v46 = vsel %vm372_vm0, %v425_v38, 0.0 }
  0xa6   : > { %438 = vadd.xlane.f32.xlu0 %v437_v29  ;;  %629 = vadd.xlane.f32.xlu1 %v628_v30  ;;  %v411_v36 = vmul.f32 %v8994_v34, %v396_v33  ;;  %v410_v37 = vmul.f32 %v8994_v34, %v393_v18 }
  0xa8   : > { %v9082_v20 = vsub.f32 %v8988_v25, %v411_v36  ;;  %v9091_v45 = vsub.f32 %v8985_v24, %v410_v37  ;;  %v619_v25 = vmul.f32 %v9085_v39, %v9085_v39 }
  0xaa   : > { %v427_v40 = vmul.f32 %v9082_v20, %v9082_v20  ;;  %v426_v19 = vmul.f32 %v9091_v45, %v9091_v45  ;;  %v637_v48 = vsel %vm372_vm0, %v619_v25, 0.0 }
  0xac   : > { %v449_v47 = vsel %vm372_vm0, %v427_v40, 0.0  ;;  %v446_v49 = vsel %vm372_vm0, %v426_v19, 0.0 }
  0xad   : > { %450 = vadd.xlane.f32.xlu2 %v449_v47 }
  0xae   : > { %441 = vadd.xlane.f32.xlu0 %v440_v44  ;;  %444 = vadd.xlane.f32.xlu1 %v443_v46 }
  0xb6   : > { %638 = vadd.xlane.f32.xlu0 %v637_v48  ;;  %447 = vadd.xlane.f32.xlu1 %v446_v49 }
 0x100   : > { %v624_v24 = vpop.xlane.xlu2 %623 }
 0x101   : > { %v646_v50 = vmul.f32 %v624_v24, %v8994_v34  ;;  %v430_v51 = vpop.xlane.xlu0 %429 }
 0x102   : > { %v452_v52 = vmul.f32 %v430_v51, %v8994_v34 }
 0x103   : > { %v9109_v57 = vadd.f32 1e-05, %v646_v50 }
 0x104   : > { %v9111_v58 = vadd.f32 1e-05, %v452_v52 }
 0x105   : > { %8236 = vrsqrt.f32 %v9109_v57  ;;  %vm668_vm2 = vweird.f32 %v9109_v57 }
 0x106   : > { %8238 = vrsqrt.f32 %v9111_v58  ;;  %vm474_vm4 = vweird.f32 %v9111_v58 }
 0x108   : > { %v436_v61 = vpop.xlane.xlu2 %435 }
 0x109   : > { %v454_v62 = vmul.f32 %v436_v61, %v8994_v34  ;;  %v433_v63 = vpop.xlane.xlu1 %432  ;;  %v627_v0 = vpop.xlane.xlu0 %626 }
 0x10a   : > { %v453_v1 = vmul.f32 %v433_v63, %v8994_v34  ;;  %v647_v2 = vmul.f32 %v627_v0, %v8994_v34 }
 0x10b   : > { %v9124_v6 = vpop.eup %8236  ;;  %v9126_v9 = vadd.f32 1e-05, %v454_v62 }
 0x10c   : > { %v9128_v10 = vpop.eup %8238  ;;  %v663_v12 = vmul.f32 %v9124_v6, %v9109_v57  ;;  %v9132_v15 = vadd.f32 1e-05, %v453_v1  ;;  %v9134_v16 = vadd.f32 1e-05, %v647_v2  ;;  %vm669_vm3 = vweird.f32 %v9124_v6 }
 0x10d   : > { %v469_v17 = vmul.f32 %v9128_v10, %v9111_v58  ;;  %8240 = vrsqrt.f32 %v9126_v9  ;;  %vm475_vm5 = vweird.f32 %v9128_v10  ;;  %vm494_vm6 = vweird.f32 %v9126_v9  ;;  %vm9186_vm10 = vmor %vm668_vm2, %vm669_vm3 }
 0x10e   : > { %v664_v7 = vmul.f32 %v9124_v6, %v663_v12  ;;  %8242 = vrsqrt.f32 %v9132_v15  ;;  %vm484_vm7 = vweird.f32 %v9132_v15  ;;  %vm678_vm8 = vweird.f32 %v9134_v16  ;;  %vm9204_vm11 = vmor %vm474_vm4, %vm475_vm5 }
 0x10f   : > { %v470_v21 = vmul.f32 %v9128_v10, %v469_v17  ;;  %8244 = vrsqrt.f32 %v9134_v16 }
 0x110   : > { %v665_v22 = vmul.f32 0.5, %v664_v7  ;;  %v633_v23 = vpop.xlane.xlu2 %632 }
 0x111   : > { %v471_v26 = vmul.f32 0.5, %v470_v21  ;;  %v649_v27 = vmul.f32 %v633_v23, %v8994_v34  ;;  %v597_v29 = vpop.xlane.xlu1 %596  ;;  %v594_v30 = vpop.xlane.xlu0 %593 }
 0x112   : > { %v666_v31 = vsub.f32 1.5, %v665_v22  ;;  %v605_v18 = vmul.f32 %v597_v29, %v8994_v34  ;;  %v604_v36 = vmul.f32 %v594_v30, %v8994_v34 }
 0x113   : > { %v9145_v33 = vpop.eup %8240  ;;  %v9147_v35 = vadd.f32 1e-05, %v649_v27  ;;  %v472_v37 = vsub.f32 1.5, %v471_v26 }
 0x114   : > { %v9150_v13 = vpop.eup %8242  ;;  %v489_v38 = vmul.f32 %v9145_v33, %v9126_v9  ;;  %v9156_v40 = vsub.f32 %v9038_v5, %v605_v18  ;;  %v667_v47 = vmul.f32 %v9124_v6, %v666_v31  ;;  %v9175_v48 = vsub.f32 %v9035_v4, %v604_v36  ;;  %v9237_v18 = vld [vmem:[%s12630_s3] ss:$0 sm:$0xff] }
 0x115   : > { %v9158_v44 = vpop.eup %8244  ;;  %v479_v46 = vmul.f32 %v9150_v13, %v9132_v15  ;;  %8246 = vrsqrt.f32 %v9147_v35  ;;  %v473_v49 = vmul.f32 %v9128_v10, %v472_v37  ;;  %vm485_vm9 = vweird.f32 %v9150_v13 }
 0x116   : > { %v490_v25 = vmul.f32 %v9145_v33, %v489_v38  ;;  %v673_v5 = vmul.f32 %v9158_v44, %v9134_v16  ;;  %v621_v51 = vmul.f32 %v9156_v40, %v9156_v40  ;;  %v620_v60 = vmul.f32 %v9175_v48, %v9175_v48  ;;  %vm9226_vm13 = vmor %vm484_vm7, %vm485_vm9 }
 0x117   : > { %v480_v19 = vmul.f32 %v9150_v13, %v479_v46  ;;  %v671_v62 = vsel %vm9186_vm10, %v9124_v6, %v667_v47  ;;  %v477_v21 = vsel %vm9204_vm11, %v9128_v10, %v473_v49  ;;  %vm679_vm12 = vweird.f32 %v9158_v44  ;;  %v9328_v10 = vld [vmem:[%s12630_s3 + $0x21] ss:$0 sm:$0xff] }
 0x118   : > { %v674_v24 = vmul.f32 %v9158_v44, %v673_v5  ;;  %v636_v50 = vpop.xlane.xlu2 %635  ;;  %v491_v4 = vmul.f32 0.5, %v490_v25  ;;  %v643_v0 = vsel %vm372_vm0, %v621_v51, 0.0  ;;  %v640_v6 = vsel %vm372_vm0, %v620_v60, 0.0  ;;  %vm680_vm15 = vmor %vm678_vm8, %vm679_vm12 }
 0x119   : > { %v481_v53 = vmul.f32 0.5, %v480_v19  ;;  %v650_v56 = vmul.f32 %v636_v50, %v8994_v34  ;;  %v630_v59 = vpop.xlane.xlu1 %629  ;;  %v439_v61 = vpop.xlane.xlu0 %438  ;;  %644 = vadd.xlane.f32.xlu1 %v643_v0  ;;  %641 = vadd.xlane.f32.xlu0 %v640_v6  ;;  %v742_v36 = vmul.f32 %v671_v62, %v8999_v41  ;;  %vm495_vm14 = vweird.f32 %v9145_v33 }
 0x11a   : > { %v675_v63 = vmul.f32 0.5, %v674_v24  ;;  %v648_v57 = vmul.f32 %v630_v59, %v8994_v34  ;;  %v455_v7 = vmul.f32 %v439_v61, %v8994_v34  ;;  %v492_v23 = vsub.f32 1.5, %v491_v4  ;;  %vm9259_vm1 = vmor %vm494_vm6, %vm495_vm14 }
 0x11b   : > { %v9198_v1 = vpop.eup %8246  ;;  %v482_v12 = vsub.f32 1.5, %v481_v53  ;;  %v9208_v17 = vadd.f32 1e-05, %v650_v56  ;;  %v548_v37 = vmul.f32 %v477_v21, %v9001_v42  ;;  %vm698_vm2 = vweird.f32 %v9147_v35 }
 0x11c   : > { %v676_v22 = vsub.f32 1.5, %v675_v63  ;;  %v693_v58 = vmul.f32 %v9198_v1, %v9147_v35  ;;  %v9220_v27 = vadd.f32 1e-05, %v648_v57  ;;  %v9232_v31 = vadd.f32 1e-05, %v455_v7 }
 0x11d   : > { %v483_v26 = vmul.f32 %v9150_v13, %v482_v12  ;;  %8248 = vrsqrt.f32 %v9208_v17  ;;  %v9253_v41 = vmul.f32 %v9145_v33, %v492_v23  ;;  %v750_v49 = vmul.f32 %v9237_v18, %v742_v36  ;;  %v9297_v63 = vld [vmem:[%s12630_s3 + $0x20] ss:$0 sm:$0xff] }
 0x11e   : > { %v677_v29 = vmul.f32 %v9158_v44, %v676_v22  ;;  %v694_v30 = vmul.f32 %v9198_v1, %v693_v58  ;;  %8250 = vrsqrt.f32 %v9220_v27  ;;  %v557_v50 = vmul.f32 %v9237_v18, %v548_v37 }
 0x11f   : > { %v487_v15 = vsel %vm9226_vm13, %v9150_v13, %v483_v26  ;;  %8252 = vrsqrt.f32 %v9232_v31  ;;  %vm699_vm3 = vweird.f32 %v9198_v1  ;;  %v497_v59 = vsel %vm9259_vm1, %v9145_v33, %v9253_v41 }
 0x120   : > { %v681_v38 = vsel %vm680_vm15, %v9158_v44, %v677_v29  ;;  %v695_v46 = vmul.f32 0.5, %v694_v30  ;;  %v451_v47 = vpop.xlane.xlu2 %450  ;;  %v549_v5 = vmul.f32 %v487_v15, %v9019_v55  ;;  %v9273_v55 = vld [vmem:[%s12630_s3 + $0x1] ss:$0 sm:$0xff]  ;;  %vm688_vm4 = vweird.f32 %v9220_v27  ;;  %vm9319_vm6 = vmor %vm698_vm2, %vm699_vm3 }
 0x121   : > { %v442_v25 = vpop.xlane.xlu0 %441  ;;  %v743_v13 = vmul.f32 %v681_v38, %v9016_v54  ;;  %v459_v42 = vmul.f32 %v451_v47, %v8994_v34  ;;  %v445_v44 = vpop.xlane.xlu1 %444  ;;  %vm504_vm5 = vweird.f32 %v9232_v31  ;;  %v758_v12 = vadd.f32 %v9273_v55, %v750_v49 }
 0x122   : > { %v456_v19 = vmul.f32 %v442_v25, %v8994_v34  ;;  %v457_v54 = vmul.f32 %v445_v44, %v8994_v34  ;;  %v558_v51 = vmul.f32 %v9237_v18, %v549_v5  ;;  %v696_v52 = vsub.f32 1.5, %v695_v46 }
 0x123   : > { %v9267_v24 = vpop.eup %8248  ;;  %v751_v9 = vmul.f32 %v9237_v18, %v743_v13  ;;  %v9281_v53 = vadd.f32 1e-05, %v459_v42  ;;  %v566_v6 = vadd.f32 %v9273_v55, %v557_v50  ;;  %v5067_v29 = vmul.f32 %v9297_v63, %v548_v37 }
 0x124   : > { %v703_v4 = vmul.f32 %v9267_v24, %v9208_v17  ;;  %v9283_v56 = vpop.eup %8250  ;;  %v9289_v60 = vadd.f32 1e-05, %v457_v54  ;;  %v9291_v61 = vadd.f32 1e-05, %v456_v19  ;;  %v567_v33 = vadd.f32 %v9273_v55, %v558_v51 }
 0x125   : > { %v759_v62 = vadd.f32 %v9273_v55, %v751_v9  ;;  %v9299_v57 = vpop.eup %8252  ;;  %v683_v0 = vmul.f32 %v9283_v56, %v9220_v27  ;;  %8254 = vrsqrt.f32 %v9281_v53  ;;  %v697_v7 = vmul.f32 %v9198_v1, %v696_v52 }
 0x126   : > { %v499_v2 = vmul.f32 %v9299_v57, %v9232_v31  ;;  %v704_v21 = vmul.f32 %v9267_v24, %v703_v4  ;;  %8256 = vrsqrt.f32 %v9289_v60  ;;  %vm708_vm7 = vweird.f32 %v9208_v17 }
 0x127   : > { %v684_v22 = vmul.f32 %v9283_v56, %v683_v0  ;;  %8258 = vrsqrt.f32 %v9291_v61  ;;  %v774_v26 = vpack.c.bf16 %v759_v62, %v758_v12  ;;  %vm709_vm8 = vweird.f32 %v9267_v24 }
 0x128   : > { %v500_v23 = vmul.f32 %v9299_v57, %v499_v2  ;;  %vm689_vm9 = vweird.f32 %v9283_v56  ;;  %v766_v36 = vpack.c.bf16 %v567_v33, %v566_v6  ;;  %v5068_v15 = vmul.f32 %v9297_v63, %v549_v5  ;;  %vm9405_vm2 = vmor %vm708_vm7, %vm709_vm8 }
 0x129   : > { %v639_v30 = vpop.xlane.xlu0 %638  ;;  %v685_v35 = vmul.f32 0.5, %v684_v22  ;;  %v448_v38 = vpop.xlane.xlu1 %447  ;;  %vm505_vm10 = vweird.f32 %v9299_v57  ;;  %7198 = vmatmul.msk.bf16.vlgmr.msra.gmra.mxu0 %vm372_vm0, %v774_v26  ;;  %v701_v47 = vsel %vm9319_vm6, %v9198_v1, %v697_v7  ;;  %v705_v25 = vmul.f32 0.5, %v704_v21  ;;  %vm9352_vm11 = vmor %vm688_vm4, %vm689_vm9 }
 0x12a   : > { %v501_v46 = vmul.f32 0.5, %v500_v23  ;;  %v458_v41 = vmul.f32 %v448_v38, %v8994_v34  ;;  %v651_v37 = vmul.f32 %v639_v30, %v8994_v34  ;;  %7210 = vmatmul.msk.bf16.vlgmr.msra.gmra.mxu1 %vm372_vm0, %v766_v36  ;;  %v9344_v5 = vadd.f32 %v9328_v10, %v5068_v15  ;;  %vm9369_vm13 = vmor %vm504_vm5, %vm505_vm10 }
 0x12b   : > { %v686_v13 = vsub.f32 1.5, %v685_v35  ;;  %v9346_v16 = vpop.eup %8254  ;;  %vm524_vm12 = vweird.f32 %v9289_v60  ;;  %v9358_v1 = vadd.f32 %v9328_v10, %v5067_v29  ;;  %vm514_vm14 = vweird.f32 %v9291_v61 }
 0x12c   : > { %v502_v44 = vsub.f32 1.5, %v501_v46  ;;  %v9360_v19 = vadd.f32 1e-05, %v458_v41  ;;  %v9362_v49 = vpop.eup %8256  ;;  %v539_v9 = vmul.f32 %v9346_v16, %v9281_v53  ;;  %v9376_v50 = vadd.f32 1e-05, %v651_v37 }
 0x12d   : > { %v687_v54 = vmul.f32 %v9283_v56, %v686_v13  ;;  %v8259_v51 = vpop.eup %8258  ;;  %v519_v4 = vmul.f32 %v9362_v49, %v9289_v60  ;;  %v745_v62 = vmul.f32 %v701_v47, %v9032_v3  ;;  %v550_v12 = vmul.f32 %v497_v59, %v9003_v43 }
 0x12e   : > { %v503_v52 = vmul.f32 %v9299_v57, %v502_v44  ;;  %v540_v33 = vmul.f32 %v9346_v16, %v539_v9  ;;  %v509_v2 = vmul.f32 %v8259_v51, %v9291_v61  ;;  %v706_v6 = vsub.f32 1.5, %v705_v25 }
 0x12f   : > { %v691_v0 = vsel %vm9352_vm11, %v9283_v56, %v687_v54  ;;  %v520_v21 = vmul.f32 %v9362_v49, %v519_v4  ;;  %8260 = vrsqrt.f32 %v9360_v19  ;;  %vm525_vm15 = vweird.f32 %v9362_v49 }
 0x130   : > { %v507_v7 = vsel %vm9369_vm13, %v9299_v57, %v503_v52  ;;  %v541_v3 = vmul.f32 0.5, %v540_v33  ;;  %v510_v22 = vmul.f32 %v8259_v51, %v509_v2  ;;  %8262 = vrsqrt.f32 %v9376_v50  ;;  %vm9418_vm5 = vmor %vm524_vm12, %vm525_vm15 }
 0x131   : > { %v521_v56 = vmul.f32 0.5, %v520_v21  ;;  %v744_v58 = vmul.f32 %v691_v0, %v9050_v11  ;;  %v753_v43 = vmul.f32 %v9237_v18, %v745_v62  ;;  %v551_v59 = vmul.f32 %v507_v7, %v9043_v8 }
 0x132   : > { %v542_v23 = vsub.f32 1.5, %v541_v3  ;;  %v511_v26 = vmul.f32 0.5, %v510_v22  ;;  %vm515_vm1 = vweird.f32 %v8259_v51  ;;  %v559_v57 = vmul.f32 %v9237_v18, %v550_v12 }
 0x133   : > { %v522_v30 = vsub.f32 1.5, %v521_v56  ;;  %v752_v11 = vmul.f32 %v9237_v18, %v744_v58  ;;  %v560_v35 = vmul.f32 %v9237_v18, %v551_v59  ;;  %v707_v8 = vmul.f32 %v9267_v24, %v706_v6  ;;  %vm9425_vm6 = vmor %vm514_vm14, %vm515_vm1 }
 0x134   : > { %vm544_vm3 = vweird.f32 %v9281_v53  ;;  %vm545_vm4 = vweird.f32 %v9346_v16  ;;  %v512_v36 = vsub.f32 1.5, %v511_v26  ;;  %v761_v37 = vadd.f32 %v9273_v55, %v753_v43 }
 0x135   : > { %v8261_v15 = vpop.eup %8260  ;;  %v523_v38 = vmul.f32 %v9362_v49, %v522_v30  ;;  %v760_v41 = vadd.f32 %v9273_v55, %v752_v11  ;;  %v569_v60 = vadd.f32 %v9273_v55, %v560_v35  ;;  %v543_v25 = vmul.f32 %v9346_v16, %v542_v23  ;;  %vm9437_vm7 = vmor %vm544_vm3, %vm545_vm4 }
 0x136   : > { %v8263_v47 = vpop.eup %8262  ;;  %v513_v13 = vmul.f32 %v8259_v51, %v512_v36  ;;  %v529_v42 = vmul.f32 %v8261_v15, %v9360_v19  ;;  %v568_v44 = vadd.f32 %v9273_v55, %v559_v57  ;;  %v5069_v52 = vmul.f32 %v9297_v63, %v550_v12 }
 0x137   : > { %v527_v54 = vsel %vm9418_vm5, %v9362_v49, %v523_v38  ;;  %v713_v27 = vmul.f32 %v8263_v47, %v9376_v50  ;;  %v775_v9 = vpack.c.bf16 %v761_v37, %v760_v41  ;;  %v711_v4 = vsel %vm9405_vm2, %v9267_v24, %v707_v8 }
 0x138   : > { %v517_v53 = vsel %vm9425_vm6, %v8259_v51, %v513_v13  ;;  %v530_v62 = vmul.f32 %v8261_v15, %v529_v42  ;;  %v767_v0 = vpack.c.bf16 %v569_v60, %v568_v44  ;;  %vm534_vm8 = vweird.f32 %v9360_v19 }
 0x139   : > { %v714_v33 = vmul.f32 %v8263_v47, %v713_v27  ;;  %7199 = vmatmul.msk.bf16.gmra.mxu0 %vm372_vm0, %v775_v9  ;;  %v552_v49 = vmul.f32 %v517_v53, %v9066_v28  ;;  %v553_v2 = vmul.f32 %v527_v54, %v9072_v32  ;;  %v547_v12 = vsel %vm9437_vm7, %v9346_v16, %v543_v25 }
 0x13a   : > { %v531_v6 = vmul.f32 0.5, %v530_v62  ;;  %vm535_vm9 = vweird.f32 %v8261_v15  ;;  %7211 = vmatmul.msk.bf16.gmra.mxu1 %vm372_vm0, %v767_v0  ;;  %v5070_v24 = vmul.f32 %v9297_v63, %v551_v59  ;;  %vm718_vm10 = vweird.f32 %v9376_v50 }
 0x13b   : > { %v715_v51 = vmul.f32 0.5, %v714_v33  ;;  %vm719_vm11 = vweird.f32 %v8263_v47  ;;  %v9462_v7 = vadd.f32 %v9328_v10, %v5069_v52  ;;  %v5071_v21 = vmul.f32 %v9297_v63, %v552_v49  ;;  %vm536_vm12 = vmor %vm534_vm8, %vm535_vm9  ;;  %v7717_v52 = vld [vmem:[%s12631_s4 + $0x8] sm:$0xff] }
 0x13c   : > { %v532_v28 = vsub.f32 1.5, %v531_v6  ;;  %v9465_v32 = vadd.f32 %v9328_v10, %v5070_v24  ;;  %v5072_v16 = vmul.f32 %v9297_v63, %v553_v2  ;;  %v746_v22 = vmul.f32 %v711_v4, %v9060_v14  ;;  %vm720_vm13 = vmor %vm718_vm10, %vm719_vm11  ;;  %938 = vmatpush.bf16.msra.mxu2 %v7717_v52  ;;  %v7716_v4 = vld [vmem:[%s12631_s4] sm:$0xff] }
 0x13d   : > { %v716_v3 = vsub.f32 1.5, %v715_v51  ;;  %v555_v50 = vmul.f32 %v547_v12, %v9082_v20  ;;  %v9476_v43 = vadd.f32 %v9328_v10, %v5071_v21  ;;  %v561_v19 = vmul.f32 %v9237_v18, %v552_v49 }
 0x13e   : > { %v533_v56 = vmul.f32 %v8261_v15, %v532_v28  ;;  %v9479_v59 = vadd.f32 %v9328_v10, %v5072_v16  ;;  %v562_v57 = vmul.f32 %v9237_v18, %v553_v2  ;;  %v754_v35 = vmul.f32 %v9237_v18, %v746_v22 }
 0x13f   : > { %v717_v23 = vmul.f32 %v8263_v47, %v716_v3  ;;  %v5074_v30 = vmul.f32 %v9297_v63, %v555_v50  ;;  %v570_v36 = vadd.f32 %v9273_v55, %v561_v19  ;;  %vm1013_vm5 = vcmask 64512  }
 0x140   : > { %v537_v26 = vsel %vm536_vm12, %v8261_v15, %v533_v56  ;;  %v571_v15 = vadd.f32 %v9273_v55, %v562_v57  ;;  %939 = vmatpush.bf16.msra.mxu2 %v7716_v4  ;;  %vm1067_vm6 = vcmask 523264   ;;  %vm2010_vm7 = vcmask 130048  }
 0x141   : > { %v721_v20 = vsel %vm720_vm13, %v8263_v47, %v717_v23  ;;  %v554_v29 = vmul.f32 %v537_v26, %v9091_v45  ;;  %v9497_v46 = vadd.f32 %v9328_v10, %v5074_v30  ;;  %v762_v45 = vadd.f32 %v9273_v55, %v754_v35 }
 0x142   : > { %v747_v11 = vmul.f32 %v721_v20, %v9085_v39  ;;  %v768_v37 = vpack.c.bf16 %v571_v15, %v570_v36  ;;  %v564_v47 = vmul.f32 %v9237_v18, %v555_v50  ;;  %vm2019_vm8 = vcmask 195584  }
 0x143   : > { %v5073_v8 = vmul.f32 %v9297_v63, %v554_v29  ;;  %v563_v60 = vmul.f32 %v9237_v18, %v554_v29 }
 0x144   : > { %v755_v17 = vmul.f32 %v9237_v18, %v747_v11  ;;  %v573_v25 = vadd.f32 %v9273_v55, %v564_v47 }
 0x145   : > { %v9494_v38 = vadd.f32 %v9328_v10, %v5073_v8  ;;  %v572_v10 = vadd.f32 %v9273_v55, %v563_v60 }
 0x146   : > { %v763_v39 = vadd.f32 %v9273_v55, %v755_v17 }
 0x147   : > { %v769_v13 = vpack.c.bf16 %v573_v25, %v572_v10 }
 0x148   : > { %v776_v63 = vpack.c.bf16 %v763_v39, %v762_v45 }
 0x14a   : > { %7200 = vmatmul.msk.bf16.gmra.mxu0 %vm372_vm0, %v776_v63  ;;  %7212 = vmatmul.msk.bf16.gmra.mxu1 %vm372_vm0, %v768_v37 }
 0x15a   : > { %7213 = vmatmul.msk.bf16.gmra.mxu1 %vm372_vm0, %v769_v13 }
 0x18c   : > { %v645_v42 = vpop.xlane.xlu1 %644  ;;  %v642_v61 = vpop.xlane.xlu0 %641 }
 0x18d   : > { %v653_v44 = vmul.f32 %v645_v42, %v8994_v34  ;;  %v652_v54 = vmul.f32 %v642_v61, %v8994_v34 }
 0x18f   : > { %v661_v27 = vadd.f32 1e-05, %v653_v44  ;;  %v660_v9 = vadd.f32 1e-05, %v652_v54 }
 0x191   : > { %8264 = vrsqrt.f32 %v661_v27  ;;  %vm738_vm1 = vweird.f32 %v661_v27  ;;  %vm728_vm3 = vweird.f32 %v660_v9 }
 0x192   : > { %8266 = vrsqrt.f32 %v660_v9 }
 0x197   : > { %v8265_v53 = vpop.eup %8264 }
 0x198   : > { %v8267_v62 = vpop.eup %8266  ;;  %v733_v0 = vmul.f32 %v8265_v53, %v661_v27  ;;  %vm739_vm14 = vweird.f32 %v8265_v53 }
 0x199   : > { %v723_v33 = vmul.f32 %v8267_v62, %v660_v9  ;;  %vm729_vm15 = vweird.f32 %v8267_v62  ;;  %vm740_vm2 = vmor %vm738_vm1, %vm739_vm14 }
 0x19a   : > { %v734_v49 = vmul.f32 %v8265_v53, %v733_v0  ;;  %vm730_vm4 = vmor %vm728_vm3, %vm729_vm15 }
 0x19b   : > { %v724_v2 = vmul.f32 %v8267_v62, %v723_v33 }
 0x19c   : > { %v735_v12 = vmul.f32 0.5, %v734_v49 }
 0x19d   : > { %v725_v6 = vmul.f32 0.5, %v724_v2 }
 0x19e   : > { %v736_v24 = vsub.f32 1.5, %v735_v12 }
 0x19f   : > { %v726_v51 = vsub.f32 1.5, %v725_v6 }
 0x1a0   : > { %v737_v28 = vmul.f32 %v8265_v53, %v736_v24 }
 0x1a1   : > { %v727_v21 = vmul.f32 %v8267_v62, %v726_v51 }
 0x1a2   : > { %v741_v16 = vsel %vm740_vm2, %v8265_v53, %v737_v28 }
 0x1a3   : > { %v731_v3 = vsel %vm730_vm4, %v8267_v62, %v727_v21  ;;  %v749_v22 = vmul.f32 %v741_v16, %v9156_v40  ;;  %v8212_v40 = vld [vmem:[%s12630_s3 + $0x4] ss:$0 sm:$0xff]  ;;  %v8213_v16 = vld [vmem:[%s12630_s3 + $0x7] ss:$0 sm:$0xff] }
 0x1a4   : > { %v748_v50 = vmul.f32 %v731_v3, %v9175_v48 }
 0x1a5   : > { %v757_v56 = vmul.f32 %v9237_v18, %v749_v22 }
 0x1a6   : > { %v815_v23 = vpop.f32.mrf.mxu0  ;;  %v756_v26 = vmul.f32 %v9237_v18, %v748_v50 }
 0x1a7   : > { %v868_v19 = vpop.f32.mrf.mxu1  ;;  %v765_v57 = vadd.f32 %v9273_v55, %v757_v56 }
 0x1a8   : > { %v764_v20 = vadd.f32 %v9273_v55, %v756_v26  ;;  %v869_v30 = vadd.f32 %v868_v19, %v815_v23 }
 0x1aa   : > { %v777_v29 = vpack.c.bf16 %v765_v57, %v764_v20  ;;  %v890_v8 = vadd.f32 %v8212_v40, %v869_v30 }
 0x1ac   : > { %7201 = vmatmul.msk.bf16.gmra.mxu0 %vm372_vm0, %v777_v29 }
 0x1ae   : > { %v817_v11 = vpop.f32.mrf.mxu0 }
 0x1af   : > { %v870_v48 = vpop.f32.mrf.mxu1 }
 0x1b0   : > { %v871_v35 = vadd.f32 %v870_v48, %v817_v11 }
 0x1b2   : > { %v891_v17 = vadd.f32 %v8212_v40, %v871_v35 }
 0x1b4   : > { %v898_v36 = vpack.c.bf16 %v891_v17, %v890_v8 }
 0x1b6   : > { %7222 = vmatmul.msk.bf16.vlgmr.msra.gmra.mxu2 %vm372_vm0, %v898_v36  ;;  %v820_v18 = vpop.f32.mrf.mxu0 }
 0x1b7   : > { %v873_v15 = vpop.f32.mrf.mxu1 }
 0x1b8   : > { %v874_v45 = vadd.f32 %v873_v15, %v820_v18 }
 0x1ba   : > { %v892_v37 = vadd.f32 %v8212_v40, %v874_v45 }
 0x1be   : > { %v822_v55 = vpop.f32.mrf.mxu0 }
 0x1bf   : > { %v875_v39 = vpop.f32.mrf.mxu1 }
 0x1c0   : > { %v876_v63 = vadd.f32 %v875_v39, %v822_v55 }
 0x1c2   : > { %v893_v60 = vadd.f32 %v8212_v40, %v876_v63 }
 0x1c4   : > { %v899_v47 = vpack.c.bf16 %v893_v60, %v892_v37 }
 0x1c6   : > { %7223 = vmatmul.msk.bf16.gmra.mxu2 %vm372_vm0, %v899_v47 }
 0x1c7   : > { %v825_v10 = vpop.f32.mrf.mxu0  ;;  %v878_v25 = vpop.f32.mrf.mxu1 }
 0x1c8   : > { %v879_v13 = vadd.f32 %v878_v25, %v825_v10 }
 0x1ca   : > { %v894_v54 = vadd.f32 %v8212_v40, %v879_v13 }
 0x1cf   : > { %v827_v42 = vpop.f32.mrf.mxu0  ;;  %v880_v44 = vpop.f32.mrf.mxu1 }
 0x1d0   : > { %v881_v61 = vadd.f32 %v880_v44, %v827_v42 }
 0x1d2   : > { %v895_v27 = vadd.f32 %v8212_v40, %v881_v61 }
 0x1d4   : > { %v900_v9 = vpack.c.bf16 %v895_v27, %v894_v54 }
 0x1d6   : > { %7224 = vmatmul.msk.bf16.gmra.mxu2 %vm372_vm0, %v900_v9 }
 0x1d7   : > { %v883_v52 = vpop.f32.mrf.mxu1 }
 0x1df   : > { %v885_v62 = vpop.f32.mrf.mxu1 }
 0x229   : > { %v830_v4 = vpop.f32.mrf.mxu0 }
 0x22a   : > { %v884_v53 = vadd.f32 %v883_v52, %v830_v4 }
 0x22c   : > { %v896_v49 = vadd.f32 %v8212_v40, %v884_v53 }
 0x231   : > { %v832_v0 = vpop.f32.mrf.mxu0 }
 0x232   : > { %v886_v33 = vadd.f32 %v885_v62, %v832_v0 }
 0x234   : > { %v897_v2 = vadd.f32 %v8212_v40, %v886_v33 }
 0x236   : > { %v901_v12 = vpack.c.bf16 %v897_v2, %v896_v49 }
 0x238   : > { %7225 = vmatmul.msk.bf16.gmra.mxu2 %vm372_vm0, %v901_v12 }
 0x239   : > { %v941_v6 = vpop.f32.mrf.mxu2 }
 0x23a   : > { %v942_v19 = vadd.f32 %v8213_v16, %v941_v6 }
 0x23c   : > { %v961_v40 = vpack.c.bf16 %v942_v19, %v942_v19 }
 0x23e   : > { %v993_v35 = vunpack.c.l.b16 %v961_v40 }
 0x241   : > { %v943_v24 = vpop.f32.mrf.mxu2 }
 0x242   : > { %v944_v23 = vadd.f32 %v8213_v16, %v943_v24 }
 0x244   : > { %v962_v29 = vpack.c.bf16 %v944_v23, %v944_v23 }
 0x246   : > { %v994_v11 = vunpack.c.l.b16 %v962_v29 }
 0x248   : > { %v9539_v17 = vpack.c.b16 %v994_v11, %v993_v35 }
 0x249   : > { %v946_v51 = vpop.f32.mrf.mxu2 }
 0x24a   : > { %v947_v8 = vadd.f32 %v8213_v16, %v946_v51 }
 0x24c   : > { %v963_v18 = vpack.c.bf16 %v947_v8, %v947_v8 }
 0x24e   : > { %v995_v45 = vunpack.c.l.b16 %v963_v18 }
 0x251   : > { %v948_v28 = vpop.f32.mrf.mxu2 }
 0x252   : > { %v949_v48 = vadd.f32 %v8213_v16, %v948_v28 }
 0x254   : > { %v964_v36 = vpack.c.bf16 %v949_v48, %v949_v48 }
 0x256   : > { %v996_v15 = vunpack.c.l.b16 %v964_v36 }
 0x258   : > { %v9543_v55 = vpack.c.b16 %v996_v15, %v995_v45 }
 0x259   : > { %v951_v21 = vpop.f32.mrf.mxu2 }
 0x25a   : > { %v952_v3 = vadd.f32 %v8213_v16, %v951_v21 }
 0x25c   : > { %v965_v50 = vpack.c.bf16 %v952_v3, %v952_v3 }
 0x25e   : > { %v997_v57 = vunpack.c.l.b16 %v965_v50 }
 0x261   : > { %v953_v22 = vpop.f32.mrf.mxu2 }
 0x262   : > { %v954_v56 = vadd.f32 %v8213_v16, %v953_v22 }
 0x264   : > { %v966_v26 = vpack.c.bf16 %v954_v56, %v954_v56 }
 0x266   : > { %v998_v20 = vunpack.c.l.b16 %v966_v26 }
 0x268   : > { %v9535_v30 = vpack.c.b16 %v998_v20, %v997_v57 }
 0x26a   : > { %1242 = vrot.lane.b32.xlu1 %v9535_v30, %s8847_s24 }
 0x272   : > { %1238 = vrot.lane.b32.xlu1 %v9539_v17, %s8847_s24 }
 0x27a   : > { %1232 = vrot.lane.b32.xlu1 %v9543_v55, %s8848_s25 }
 0x2bb   : > { %v956_v39 = vpop.f32.mrf.mxu2 }
 0x2bc   : > { %v957_v63 = vadd.f32 %v8213_v16, %v956_v39 }
 0x2be   : > { %v967_v60 = vpack.c.bf16 %v957_v63, %v957_v63 }
 0x2c0   : > { %v999_v25 = vunpack.c.l.b16 %v967_v60 }
 0x2c3   : > { %v958_v37 = vpop.f32.mrf.mxu2 }
 0x2c4   : > { %v959_v47 = vadd.f32 %v8213_v16, %v958_v37 }
 0x2c6   : > { %v968_v10 = vpack.c.bf16 %v959_v47, %v959_v47 }
 0x2c8   : > { %v1000_v13 = vunpack.c.l.b16 %v968_v10 }
 0x2ca   : > { %v9547_v42 = vpack.c.b16 %v1000_v13, %v999_v25 }
 0x2cc   : > { %1706 = vrot.lane.b32.xlu1 %v9547_v42, %s8849_s26  ;;  %1011 = vrot.lane.b32.xlu0 %v9547_v42, %s8850_s27 }
 0x2cd   : > { %1244 = vrot.lane.b32.xlu2 %v9547_v42, %s8847_s24 }
 0x2d4   : > { %1471 = vrot.lane.b32.xlu1 %v9543_v55, %s8851_s28  ;;  %1240 = vrot.lane.b32.xlu0 %v9543_v55, %s8847_s24 }
 0x2d5   : > { %1009 = vrot.lane.b32.xlu2 %v9535_v30, %s8850_s27 }
 0x2dc   : > { %1469 = vrot.lane.b32.xlu1 %v9539_v17, %s8851_s28  ;;  %1005 = vrot.lane.b32.xlu0 %v9539_v17, %s8850_s27  ;;  %v1243_v44 = vpop.permute.xlu1 %1242 }
 0x2dd   : > { %1007 = vrot.lane.b32.xlu2 %v9543_v55, %s8850_s27  ;;  %v1265_v52 = vsel %vm1013_vm5, %v1243_v44, 0 }
 0x2e4   : > { %1692 = vrot.lane.b32.xlu1 %v9539_v17, %s8852_s29  ;;  %1475 = vrot.lane.b32.xlu0 %v9547_v42, %s8851_s28  ;;  %v1239_v27 = vpop.permute.xlu1 %1238 }
 0x2e5   : > { %1230 = vrot.lane.b32.xlu2 %v9539_v17, %s8848_s25  ;;  %v1259_v22 = vsel %vm1013_vm5, %v1239_v27, 0 }
 0x2ec   : > { %1465 = vrot.lane.b32.xlu1 %v9535_v30, %s8853_s10  ;;  %1473 = vrot.lane.b32.xlu0 %v9535_v30, %s8851_s28  ;;  %v1233_v4 = vpop.permute.xlu1 %1232 }
 0x2ed   : > { %1234 = vrot.lane.b32.xlu2 %v9535_v30, %s8848_s25 }
 0x2f4   : > { %1162 = vrot.lane.b32.xlu1 %v9543_v55, %s8854_s12  ;;  %1700 = vrot.lane.b32.xlu0 %v9539_v17, %s8849_s26 }
 0x2f5   : > { %1704 = vrot.lane.b32.xlu2 %v9535_v30, %s8849_s26 }
 0x2fc   : > { %1698 = vrot.lane.b32.xlu1 %v9547_v42, %s8852_s29  ;;  %1236 = vrot.lane.b32.xlu0 %v9547_v42, %s8848_s25 }
 0x2fd   : > { %1702 = vrot.lane.b32.xlu2 %v9543_v55, %s8849_s26 }
 0x304   : > { %1397 = vrot.lane.b32.xlu1 %v9547_v42, %s8855_s13  ;;  %1463 = vrot.lane.b32.xlu0 %v9543_v55, %s8853_s10 }
 0x305   : > { %1461 = vrot.lane.b32.xlu2 %v9539_v17, %s8853_s10 }
 0x30c   : > { %1859 = vrot.lane.b32.xlu1 %v9547_v42, %s8856_s14  ;;  %1696 = vrot.lane.b32.xlu0 %v9535_v30, %s8852_s29 }
 0x30d   : > { %1694 = vrot.lane.b32.xlu2 %v9543_v55, %s8852_s29 }
 0x314   : > { %1395 = vrot.lane.b32.xlu0 %v9535_v30, %s8855_s13 }
 0x315   : > { %1393 = vrot.lane.b32.xlu2 %v9543_v55, %s8855_s13 }
 0x31c   : > { %1160 = vrot.lane.b32.xlu0 %v9539_v17, %s8854_s12 }
 0x31d   : > { %1164 = vrot.lane.b32.xlu2 %v9535_v30, %s8854_s12 }
 0x325   : > { %1391 = vrot.lane.b32.xlu2 %v9539_v17, %s8855_s13 }
 0x327   : > { %v1245_v61 = vpop.permute.xlu2 %1244 }
 0x328   : > { %v1268_v54 = vsel %vm1013_vm5, %v1245_v61, 0 }
 0x329   : > { %1274 = vmatpush.bf16.xpose.msrb.mxu1 %v1268_v54 }
 0x32d   : > { %1467 = vrot.lane.b32.xlu2 %v9547_v42, %s8853_s10 }
 0x32f   : > { %v1010_v9 = vpop.permute.xlu2 %1009 }
 0x330   : > { %v1033_v24 = vsel %vm1013_vm5, %v1010_v9, 0 }
 0x331   : > { %1275 = vmatpush.bf16.xpose.msrb.mxu1 %v1265_v52 }
 0x335   : > { %1166 = vrot.lane.b32.xlu2 %v9547_v42, %s8854_s12 }
 0x337   : > { %v1008_v53 = vpop.permute.xlu2 %1007 }
 0x338   : > { %v1030_v3 = vsel %vm1013_vm5, %v1008_v53, 0 }
 0x33e   : > { %v1707_v62 = vpop.permute.xlu1 %1706  ;;  %v1012_v0 = vpop.permute.xlu0 %1011 }
 0x33f   : > { %v1231_v33 = vpop.permute.xlu2 %1230  ;;  %v1036_v49 = vsel %vm1013_vm5, %v1012_v0, 0  ;;  %v1730_v50 = vsel %vm1013_vm5, %v1707_v62, 0 }
 0x340   : > { %1042 = vmatpush.bf16.xpose.msrb.mxu0 %v1036_v49  ;;  %8001 = vmatpush.bf16.xpose.msra.mxu3 %v1036_v49 }
 0x346   : > { %v1472_v2 = vpop.permute.xlu1 %1471  ;;  %v1241_v12 = vpop.permute.xlu0 %1240 }
 0x347   : > { %v1235_v6 = vpop.permute.xlu2 %1234  ;;  %v1262_v51 = vsel %vm1013_vm5, %v1241_v12, 0  ;;  %v1493_v45 = vsel %vm1013_vm5, %v1472_v2, 0 }
 0x348   : > { %1043 = vmatpush.bf16.xpose.msrb.mxu0 %v1033_v24  ;;  %8002 = vmatpush.bf16.xpose.msra.mxu3 %v1033_v24 }
 0x349   : > { %1276 = vmatpush.bf16.xpose.msrb.mxu1 %v1262_v51 }
 0x34e   : > { %v1470_v28 = vpop.permute.xlu1 %1469  ;;  %v1006_v21 = vpop.permute.xlu0 %1005 }
 0x34f   : > { %v1705_v16 = vpop.permute.xlu2 %1704  ;;  %v1027_v19 = vsel %vm1013_vm5, %v1006_v21, 0  ;;  %v1490_v60 = vsel %vm1013_vm5, %v1470_v28, 0  ;;  %v7954_v28 = vld [vmem:[%s12629_s2 + $0x8] sm:$0xff]  }
 0x350   : > { %1044 = vmatpush.bf16.xpose.msrb.mxu0 %v1030_v3  ;;  %8003 = vmatpush.bf16.xpose.msra.mxu3 %v1030_v3  ;;  %v1727_v20 = vsel %vm1013_vm5, %v1705_v16, 0 }
 0x351   : > { %1277 = vmatpush.bf16.xpose.msrb.mxu1 %v1259_v22  ;;  %v7768_v22 = vunpack.c.l.bf16 %v7954_v28 }
 0x356   : > { %v1693_v56 = vpop.permute.xlu1 %1692  ;;  %v1476_v23 = vpop.permute.xlu0 %1475 }
 0x357   : > { %v1703_v26 = vpop.permute.xlu2 %1702  ;;  %v1499_v57 = vsel %vm1013_vm5, %v1476_v23, 0 }
 0x358   : > { %7242 = vmatmul.msk.bf16.vlgmr.msrb.gmra.mxu1 %vm1013_vm5, %v1231_v33  ;;  %1045 = vmatpush.bf16.xpose.msrb.mxu0 %v1027_v19  ;;  %v1724_v35 = vsel %vm1013_vm5, %v1703_v26, 0  ;;  %v7763_v33 = vld [vmem:[%s12629_s2] sm:$0xff]  }
 0x359   : > { %1736 = vmatpush.bf16.xpose.msra.mxu1 %v1730_v50  ;;  %8004 = vmatpush.bf16.xpose.msra.mxu3 %v1027_v19  ;;  %v7764_v2 = vunpack.c.l.bf16 %v7763_v33  ;;  %v7765_v26 = vunpack.c.h.bf16 %v7763_v33 }
 0x35e   : > { %v1466_v29 = vpop.permute.xlu1 %1465  ;;  %v1474_v40 = vpop.permute.xlu0 %1473 }
 0x35f   : > { %v1462_v11 = vpop.permute.xlu2 %1461  ;;  %7226 = vmatmul.msk.bf16.vlgmr.msrb.gmra.mxu0 %vm1013_vm5, %v9539_v17  ;;  %v1496_v48 = vsel %vm1013_vm5, %v1474_v40, 0 }
 0x360   : > { %7227 = vmatmul.msk.bf16.vlgmr.msra.gmra.mxu3 %vm1013_vm5, %v9543_v55 }
 0x361   : > { %1505 = vmatpush.bf16.xpose.msrb.mxu3 %v1499_v57  ;;  %1737 = vmatpush.bf16.xpose.msra.mxu1 %v1727_v20  ;;  %v7769_v20 = vunpack.c.h.bf16 %v7954_v28 }
 0x366   : > { %v1163_v8 = vpop.permute.xlu1 %1162  ;;  %v1701_v36 = vpop.permute.xlu0 %1700 }
 0x367   : > { %v1695_v18 = vpop.permute.xlu2 %1694  ;;  %v1721_v15 = vsel %vm1013_vm5, %v1701_v36, 0 }
 0x368   : > { %7243 = vmatmul.msk.bf16.gmra.mxu1 %vm1013_vm5, %v1233_v4  ;;  %v7957_v4 = vld [vmem:[%s12629_s2 + $0x20] sm:$0xff]  }
 0x369   : > { %1506 = vmatpush.bf16.xpose.msrb.mxu3 %v1496_v48  ;;  %1738 = vmatpush.bf16.xpose.msra.mxu1 %v1724_v35  ;;  %v7780_v53 = vunpack.c.l.bf16 %v7957_v4  ;;  %v7781_v12 = vunpack.c.h.bf16 %v7957_v4 }
 0x36e   : > { %v1699_v39 = vpop.permute.xlu1 %1698  ;;  %v1237_v63 = vpop.permute.xlu0 %1236 }
 0x36f   : > { %v1394_v37 = vpop.permute.xlu2 %1393 }
 0x370   : > { %7228 = vmatmul.msk.bf16.gmra.mxu3 %vm1013_vm5, %v9535_v30 }
 0x371   : > { %1507 = vmatpush.bf16.xpose.msrb.mxu3 %v1493_v45  ;;  %1739 = vmatpush.bf16.xpose.msra.mxu1 %v1721_v15 }
 0x376   : > { %v1398_v47 = vpop.permute.xlu1 %1397  ;;  %v1464_v10 = vpop.permute.xlu0 %1463 }
 0x377   : > { %v1165_v25 = vpop.permute.xlu2 %1164  ;;  %1419 = vmatpush.bf16.msrb.mxu2 %v1398_v47 }
 0x378   : > { %7244 = vmatmul.msk.bf16.gmra.mxu1 %vm1013_vm5, %v1235_v6 }
 0x379   : > { %1508 = vmatpush.bf16.xpose.msrb.mxu3 %v1490_v60 }
 0x37e   : > { %v1697_v13 = vpop.permute.xlu0 %1696  ;;  %v1860_v9 = vpop.permute.xlu1 %1859 }
 0x37f   : > { %v1392_v44 = vpop.permute.xlu2 %1391 }
 0x380   : > { %7229 = vmatmul.msk.bf16.gmra.mxu3 %vm1013_vm5, %v9547_v42 }
 0x386   : > { %v1396_v61 = vpop.permute.xlu0 %1395 }
 0x387   : > { %v1468_v54 = vpop.permute.xlu2 %1467  ;;  %1420 = vmatpush.bf16.msrb.mxu2 %v1396_v61  ;;  %v7959_v61 = vld [vmem:[%s12629_s2 + $0x30] sm:$0xff]  }
 0x388   : > { %7245 = vmatmul.msk.bf16.gmra.mxu1 %vm1013_vm5, %v1237_v63  ;;  %v7788_v4 = vunpack.c.l.bf16 %v7959_v61 }
 0x38b   : > { %1421 = vmatpush.bf16.msrb.mxu2 %v1394_v37  ;;  %v7955_v37 = vld [vmem:[%s12629_s2 + $0x10] sm:$0xff]  }
 0x38e   : > { %v1161_v52 = vpop.permute.xlu0 %1160 }
 0x38f   : > { %v1167_v27 = vpop.permute.xlu2 %1166  ;;  %1422 = vmatpush.bf16.msrb.mxu2 %v1392_v44 }
 0x390   : > { %1188 = vmatpush.bf16.msra.mxu0 %v1167_v27  ;;  %7258 = vmatmul.msk.bf16.vlgmr.msrb.gmra.mxu3 %vm1013_vm5, %v1462_v11 }
 0x393   : > { %1881 = vmatpush.bf16.msra.mxu2 %v1860_v9 }
 0x394   : > { %1189 = vmatpush.bf16.msra.mxu0 %v1165_v25 }
 0x398   : > { %1190 = vmatpush.bf16.msra.mxu0 %v1163_v8  ;;  %7274 = vmatmul.msk.bf16.vlgmr.msra.gmra.mxu1 %vm1013_vm5, %v1693_v56 }
 0x39c   : > { %1191 = vmatpush.bf16.msra.mxu0 %v1161_v52  ;;  %v7956_v52 = vld [vmem:[%s12629_s2 + $0x18] sm:$0xff]  }
 0x39d   : > { %v7776_v33 = vunpack.c.l.bf16 %v7956_v52 }
 0x3a0   : > { %7259 = vmatmul.msk.bf16.gmra.mxu3 %vm1013_vm5, %v1464_v10  ;;  %v7772_v10 = vunpack.c.l.bf16 %v7955_v37 }
 0x3a8   : > { %7275 = vmatmul.msk.bf16.gmra.mxu1 %vm1013_vm5, %v1695_v18 }
 0x3b0   : > { %7260 = vmatmul.msk.bf16.gmra.mxu3 %vm1013_vm5, %v1466_v29  ;;  %v7958_v29 = vld [vmem:[%s12629_s2 + $0x28] sm:$0xff]  }
 0x3b1   : > { %v7785_v11 = vunpack.c.h.bf16 %v7958_v29  ;;  %v7784_v36 = vunpack.c.l.bf16 %v7958_v29 }
 0x3b8   : > { %7276 = vmatmul.msk.bf16.gmra.mxu1 %vm1013_vm5, %v1697_v13  ;;  %v7773_v13 = vunpack.c.h.bf16 %v7955_v37 }
 0x3c0   : > { %7261 = vmatmul.msk.bf16.gmra.mxu3 %vm1013_vm5, %v1468_v54 }
 0x3c8   : > { %7277 = vmatmul.msk.bf16.gmra.mxu1 %vm1013_vm5, %v1699_v39 }
 0x3d5   : > { %v1279_v62 = vpop.f32.mrf.mxu1 }
 0x3d6   : > { %v9656_v0 = vadd.f32 %v7780_v53, %v1279_v62 }
 0x3d8   : > { %v1299_v49 = vsel %vm1067_vm6, %v9656_v0, -inf }
 0x3d9   : > { %1300 = vmax.xlane.f32.xlu0 %v1299_v49 }
 0x3dc   : > { %v1047_v6 = vpop.f32.mrf.mxu0 }
 0x3dd   : > { %v9663_v24 = vadd.f32 %v7764_v2, %v1047_v6  ;;  %v1281_v51 = vpop.f32.mrf.mxu1 }
 0x3de   : > { %v9668_v21 = vadd.f32 %v7781_v12, %v1281_v51  ;;  %v7789_v51 = vunpack.c.h.bf16 %v7959_v61 }
 0x3df   : > { %v1068_v16 = vsel %vm1067_vm6, %v9663_v24, -inf }
 0x3e0   : > { %1069 = vmax.xlane.f32.xlu1 %v1068_v16  ;;  %v1302_v3 = vsel %vm1067_vm6, %v9668_v21, -inf }
 0x3e1   : > { %1303 = vmax.xlane.f32.xlu2 %v1302_v3  ;;  %v7777_v3 = vunpack.c.h.bf16 %v7956_v52 }
 0x3e3   : > { %v1052_v50 = vpop.f32.mrf.mxu3 }
 0x3e4   : > { %v9674_v56 = vadd.f32 %v7768_v22, %v1052_v50  ;;  %v1049_v57 = vpop.f32.mrf.mxu0  ;;  %v7960_v50 = vld [vmem:[%s12629_s2 + $0x38] sm:$0xff]  }
 0x3e5   : > { %v1284_v23 = vpop.f32.mrf.mxu1  ;;  %v9681_v40 = vadd.f32 %v7765_v26, %v1049_v57  ;;  %v7961_v57 = vld [vmem:[%s12629_s2 + $0x40] sm:$0xff]  }
 0x3e6   : > { %v1074_v19 = vsel %vm1067_vm6, %v9674_v56, -inf  ;;  %v9693_v63 = vadd.f32 %v7784_v36, %v1284_v23  ;;  %v7797_v61 = vunpack.c.h.bf16 %v7961_v57 }
 0x3e7   : > { %1075 = vmax.xlane.f32.xlu0 %v1074_v19  ;;  %v1071_v45 = vsel %vm1067_vm6, %v9681_v40, -inf }
 0x3e8   : > { %v1305_v25 = vsel %vm1067_vm6, %v9693_v63, -inf }
 0x3eb   : > { %v1054_v48 = vpop.f32.mrf.mxu3 }
 0x3ec   : > { %v9683_v35 = vadd.f32 %v7769_v20, %v1054_v48  ;;  %v7792_v20 = vunpack.c.l.bf16 %v7960_v50  ;;  %v7796_v48 = vunpack.c.l.bf16 %v7961_v57 }
 0x3ed   : > { %v1286_v8 = vpop.f32.mrf.mxu1 }
 0x3ee   : > { %v9685_v18 = vadd.f32 %v7785_v11, %v1286_v8  ;;  %v1077_v15 = vsel %vm1067_vm6, %v9683_v35, -inf }
 0x3ef   : > { %1078 = vmax.xlane.f32.xlu2 %v1077_v15  ;;  %1072 = vmax.xlane.f32.xlu0 %v1071_v45 }
 0x3f0   : > { %v1308_v39 = vsel %vm1067_vm6, %v9685_v18, -inf }
 0x3f1   : > { %1309 = vmax.xlane.f32.xlu1 %v1308_v39  ;;  %v7793_v39 = vunpack.c.h.bf16 %v7960_v50 }
 0x3f3   : > { %v1057_v60 = vpop.f32.mrf.mxu3 }
 0x3f4   : > { %v9700_v44 = vadd.f32 %v7772_v10, %v1057_v60 }
 0x3f5   : > { %v1289_v47 = vpop.f32.mrf.mxu1 }
 0x3f6   : > { %v1080_v62 = vsel %vm1067_vm6, %v9700_v44, -inf  ;;  %v9714_v49 = vadd.f32 %v7788_v4, %v1289_v47  ;;  %v7965_v4 = vld [vmem:[%s12629_s2 + $0x60] sm:$0xff]  }
 0x3f7   : > { %1306 = vmax.xlane.f32.xlu2 %v1305_v25 }
 0x3f8   : > { %v1311_v16 = vsel %vm1067_vm6, %v9714_v49, -inf }
 0x3fb   : > { %v1059_v54 = vpop.f32.mrf.mxu3 }
 0x3fc   : > { %v9705_v27 = vadd.f32 %v7773_v13, %v1059_v54  ;;  %v7962_v13 = vld [vmem:[%s12629_s2 + $0x48] sm:$0xff]  }
 0x3fd   : > { %v1291_v9 = vpop.f32.mrf.mxu1  ;;  %v7801_v57 = vunpack.c.h.bf16 %v7962_v13 }
 0x3fe   : > { %v1083_v53 = vsel %vm1067_vm6, %v9705_v27, -inf  ;;  %v9722_v22 = vadd.f32 %v7789_v51, %v1291_v9  ;;  %v7800_v9 = vunpack.c.l.bf16 %v7962_v13 }
 0x3ff   : > { %1084 = vmax.xlane.f32.xlu1 %v1083_v53  ;;  %1081 = vmax.xlane.f32.xlu2 %v1080_v62 }
 0x400   : > { %v1314_v11 = vsel %vm1067_vm6, %v9722_v22, -inf }
 0x403   : > { %v1062_v2 = vpop.f32.mrf.mxu3 }
 0x404   : > { %v9716_v12 = vadd.f32 %v7776_v33, %v1062_v2  ;;  %v7812_v2 = vunpack.c.l.bf16 %v7965_v4 }
 0x405   : > { %v1294_v6 = vpop.f32.mrf.mxu1 }
 0x406   : > { %v1086_v28 = vsel %vm1067_vm6, %v9716_v12, -inf  ;;  %v9736_v8 = vadd.f32 %v7792_v20, %v1294_v6  ;;  %v7813_v6 = vunpack.c.h.bf16 %v7965_v4 }
 0x407   : > { %1087 = vmax.xlane.f32.xlu0 %v1086_v28  ;;  %1312 = vmax.xlane.f32.xlu1 %v1311_v16 }
 0x408   : > { %v1317_v37 = vsel %vm1067_vm6, %v9736_v8, -inf }
 0x40b   : > { %v1064_v23 = vpop.f32.mrf.mxu3 }
 0x40c   : > { %v9727_v26 = vadd.f32 %v7777_v3, %v1064_v23 }
 0x40d   : > { %v1296_v19 = vpop.f32.mrf.mxu1 }
 0x40e   : > { %v1089_v29 = vsel %vm1067_vm6, %v9727_v26, -inf  ;;  %v9744_v47 = vadd.f32 %v7793_v39, %v1296_v19  ;;  %v7963_v19 = vld [vmem:[%s12629_s2 + $0x50] sm:$0xff]  }
 0x40f   : > { %1090 = vmax.xlane.f32.xlu2 %v1089_v29  ;;  %1315 = vmax.xlane.f32.xlu0 %v1314_v11  ;;  %v7804_v11 = vunpack.c.l.bf16 %v7963_v19 }
 0x410   : > { %v1320_v54 = vsel %vm1067_vm6, %v9744_v47, -inf }
 0x413   : > { %v1510_v36 = vpop.f32.mrf.mxu3 }
 0x414   : > { %v9738_v15 = vadd.f32 %v7796_v48, %v1510_v36 }
 0x415   : > { %v1741_v45 = vpop.f32.mrf.mxu1 }
 0x416   : > { %v1530_v60 = vsel %vm1067_vm6, %v9738_v15, -inf  ;;  %v9762_v16 = vadd.f32 %v7812_v2, %v1741_v45  ;;  %v7966_v45 = vld [vmem:[%s12629_s2 + $0x68] sm:$0xff]  }
 0x417   : > { %1318 = vmax.xlane.f32.xlu0 %v1317_v37  ;;  %1531 = vmax.xlane.f32.xlu2 %v1530_v60  ;;  %v7817_v60 = vunpack.c.h.bf16 %v7966_v45  ;;  %v7816_v13 = vunpack.c.l.bf16 %v7966_v45 }
 0x418   : > { %v1761_v29 = vsel %vm1067_vm6, %v9762_v16, -inf }
 0x41b   : > { %v1512_v10 = vpop.f32.mrf.mxu3 }
 0x41c   : > { %v9751_v52 = vadd.f32 %v7797_v61, %v1512_v10  ;;  %v7805_v61 = vunpack.c.h.bf16 %v7963_v19 }
 0x41d   : > { %v1743_v25 = vpop.f32.mrf.mxu1 }
 0x41e   : > { %v1533_v28 = vsel %vm1067_vm6, %v9751_v52, -inf  ;;  %v9764_v3 = vadd.f32 %v7813_v6, %v1743_v25 }
 0x41f   : > { %1321 = vmax.xlane.f32.xlu2 %v1320_v54 }
 0x420   : > { %v1764_v20 = vsel %vm1067_vm6, %v9764_v3, -inf }
 0x423   : > { %v1515_v53 = vpop.f32.mrf.mxu3 }
 0x424   : > { %v9756_v62 = vadd.f32 %v7800_v9, %v1515_v53  ;;  %v7967_v53 = vld [vmem:[%s12629_s2 + $0x70] sm:$0xff]  }
 0x425   : > { %v1746_v33 = vpop.f32.mrf.mxu1 }
 0x426   : > { %v1536_v51 = vsel %vm1067_vm6, %v9756_v62, -inf  ;;  %v9786_v9 = vadd.f32 %v7816_v13, %v1746_v33 }
 0x427   : > { %1537 = vmax.xlane.f32.xlu0 %v1536_v51  ;;  %1534 = vmax.xlane.f32.xlu2 %v1533_v28  ;;  %v7964_v51 = vld [vmem:[%s12629_s2 + $0x58] sm:$0xff]   ;;  %v7821_v28 = vunpack.c.h.bf16 %v7967_v53 }
 0x428   : > { %v1767_v19 = vsel %vm1067_vm6, %v9786_v9, -inf }
 0x42b   : > { %v1517_v50 = vpop.f32.mrf.mxu3 }
 0x42c   : > { %v9773_v48 = vadd.f32 %v7801_v57, %v1517_v50  ;;  %v7808_v57 = vunpack.c.l.bf16 %v7964_v51 }
 0x42d   : > { %v1748_v23 = vpop.f32.mrf.mxu1 }
 0x42e   : > { %v1539_v25 = vsel %vm1067_vm6, %v9773_v48, -inf  ;;  %v9784_v54 = vadd.f32 %v7817_v60, %v1748_v23  ;;  %v7820_v23 = vunpack.c.l.bf16 %v7967_v53 }
 0x42f   : > { %1765 = vmax.xlane.f32.xlu0 %v1764_v20  ;;  %1762 = vmax.xlane.f32.xlu2 %v1761_v29 }
 0x430   : > { %v1770_v33 = vsel %vm1067_vm6, %v9784_v54, -inf }
 0x433   : > { %v1520_v36 = vpop.f32.mrf.mxu3 }
 0x434   : > { %v9778_v39 = vadd.f32 %v7804_v11, %v1520_v36  ;;  %v7968_v36 = vld [vmem:[%s12629_s2 + $0x78] sm:$0xff]  }
 0x435   : > { %v1751_v37 = vpop.f32.mrf.mxu1  ;;  %v7824_v60 = vunpack.c.l.bf16 %v7968_v36 }
 0x436   : > { %v1542_v10 = vsel %vm1067_vm6, %v9778_v39, -inf  ;;  %v9804_v29 = vadd.f32 %v7820_v23, %v1751_v37 }
 0x437   : > { %1543 = vmax.xlane.f32.xlu1 %v1542_v10  ;;  %1540 = vmax.xlane.f32.xlu2 %v1539_v25 }
 0x438   : > { %v1773_v37 = vsel %vm1067_vm6, %v9804_v29, -inf }
 0x43b   : > { %v1522_v4 = vpop.f32.mrf.mxu3 }
 0x43c   : > { %v9791_v2 = vadd.f32 %v7805_v61, %v1522_v4  ;;  %v7809_v61 = vunpack.c.h.bf16 %v7964_v51 }
 0x43d   : > { %v1753_v6 = vpop.f32.mrf.mxu1 }
 0x43e   : > { %v1545_v50 = vsel %vm1067_vm6, %v9791_v2, -inf  ;;  %v9802_v20 = vadd.f32 %v7821_v28, %v1753_v6 }
 0x43f   : > { %1546 = vmax.xlane.f32.xlu0 %v1545_v50  ;;  %1771 = vmax.xlane.f32.xlu1 %v1770_v33 }
 0x440   : > { %1768 = vmax.xlane.f32.xlu2 %v1767_v19  ;;  %v1776_v25 = vsel %vm1067_vm6, %v9802_v20, -inf }
 0x443   : > { %v1525_v11 = vpop.f32.mrf.mxu3 }
 0x444   : > { %v9809_v45 = vadd.f32 %v7808_v57, %v1525_v11  ;;  %v7825_v57 = vunpack.c.h.bf16 %v7968_v36 }
 0x445   : > { %v1756_v10 = vpop.f32.mrf.mxu1 }
 0x446   : > { %v1548_v13 = vsel %vm1067_vm6, %v9809_v45, -inf  ;;  %v9817_v4 = vadd.f32 %v7824_v60, %v1756_v10 }
 0x447   : > { %1777 = vmax.xlane.f32.xlu1 %v1776_v25  ;;  %1549 = vmax.xlane.f32.xlu0 %v1548_v13 }
 0x448   : > { %1774 = vmax.xlane.f32.xlu2 %v1773_v37  ;;  %v1779_v23 = vsel %vm1067_vm6, %v9817_v4, -inf }
 0x44b   : > { %v1527_v53 = vpop.f32.mrf.mxu3 }
 0x44c   : > { %v9819_v6 = vadd.f32 %v7809_v61, %v1527_v53  ;;  %v1301_v28 = vpop.xlane.xlu0 %1300 }
 0x44d   : > { %v1323_v50 = vsub.f32 %v9656_v0, %v1301_v28  ;;  %v1758_v11 = vpop.f32.mrf.mxu1 }
 0x44e   : > { %v1551_v33 = vsel %vm1067_vm6, %v9819_v6, -inf  ;;  %v9826_v51 = vadd.f32 %v7825_v57, %v1758_v11 }
 0x44f   : > { %v1331_v19 = vmul.f32 1.442695, %v1323_v50  ;;  %1780 = vmax.xlane.f32.xlu0 %v1779_v23 }
 0x450   : > { %1552 = vmax.xlane.f32.xlu2 %v1551_v33  ;;  %v1782_v0 = vsel %vm1067_vm6, %v9826_v51, -inf }
 0x451   : > { %8268 = vpow2.f32 %v1331_v19 }
 0x453   : > { %v1070_v60 = vpop.xlane.xlu1 %1069 }
 0x454   : > { %v1092_v10 = vsub.f32 %v9663_v24, %v1070_v60  ;;  %v1304_v37 = vpop.xlane.xlu2 %1303 }
 0x455   : > { %v1324_v28 = vsub.f32 %v9668_v21, %v1304_v37 }
 0x456   : > { %v1100_v25 = vmul.f32 1.442695, %v1092_v10 }
 0x457   : > { %v9829_v13 = vpop.eup %8268  ;;  %v1333_v23 = vmul.f32 1.442695, %v1324_v28 }
 0x458   : > { %8270 = vpow2.f32 %v1100_v25  ;;  %1783 = vmax.xlane.f32.xlu2 %v1782_v0  ;;  %v1347_v36 = vsel %vm1067_vm6, %v9829_v13, 0.0 }
 0x459   : > { %1348 = vadd.xlane.f32.xlu0 %v1347_v36 }
 0x45a   : > { %v1076_v61 = vpop.xlane.xlu0 %1075 }
 0x45b   : > { %v1094_v53 = vsub.f32 %v9674_v56, %v1076_v61 }
 0x45d   : > { %v1104_v50 = vmul.f32 1.442695, %v1094_v53 }
 0x45e   : > { %v9837_v24 = vpop.eup %8270 }
 0x45f   : > { %8272 = vpow2.f32 %v1104_v50  ;;  %v1116_v33 = vsel %vm1067_vm6, %v9837_v24, 0.0 }
 0x460   : > { %1117 = vadd.xlane.f32.xlu1 %v1116_v33  ;;  %8274 = vpow2.f32 %v1333_v23 }
 0x462   : > { %v1073_v19 = vpop.xlane.xlu0 %1072  ;;  %v1079_v57 = vpop.xlane.xlu2 %1078 }
 0x463   : > { %v1093_v11 = vsub.f32 %v9681_v40, %v1073_v19  ;;  %v1095_v60 = vsub.f32 %v9683_v35, %v1079_v57 }
 0x464   : > { %v1310_v10 = vpop.xlane.xlu1 %1309 }
 0x465   : > { %v9843_v25 = vpop.eup %8272  ;;  %v1102_v21 = vmul.f32 1.442695, %v1093_v11  ;;  %v1106_v56 = vmul.f32 1.442695, %v1095_v60  ;;  %v1326_v0 = vsub.f32 %v9685_v18, %v1310_v10 }
 0x466   : > { %v1122_v36 = vsel %vm1067_vm6, %v9843_v25, 0.0  ;;  %v9848_v53 = vpop.eup %8274 }
 0x467   : > { %8276 = vpow2.f32 %v1102_v21  ;;  %1123 = vadd.xlane.f32.xlu2 %v1122_v36  ;;  %v1337_v37 = vmul.f32 1.442695, %v1326_v0  ;;  %v1350_v33 = vsel %vm1067_vm6, %v9848_v53, 0.0 }
 0x468   : > { %8278 = vpow2.f32 %v1106_v56 }
 0x469   : > { %8280 = vpow2.f32 %v1337_v37 }
 0x46a   : > { %v1307_v61 = vpop.xlane.xlu2 %1306 }
 0x46b   : > { %v1325_v40 = vsub.f32 %v9693_v63, %v1307_v61 }
 0x46d   : > { %v9851_v35 = vpop.eup %8276  ;;  %v1335_v28 = vmul.f32 1.442695, %v1325_v40 }
 0x46e   : > { %v9853_v50 = vpop.eup %8278  ;;  %v1119_v18 = vsel %vm1067_vm6, %v9851_v35, 0.0 }
 0x46f   : > { %8282 = vpow2.f32 %v1335_v28  ;;  %1120 = vadd.xlane.f32.xlu0 %v1119_v18  ;;  %1351 = vadd.xlane.f32.xlu2 %v1350_v33  ;;  %v1125_v23 = vsel %vm1067_vm6, %v9853_v50, 0.0  ;;  %v9861_v19 = vpop.eup %8280 }
 0x470   : > { %1126 = vadd.xlane.f32.xlu1 %v1125_v23  ;;  %v1356_v10 = vsel %vm1067_vm6, %v9861_v19, 0.0 }
 0x472   : > { %v1082_v63 = vpop.xlane.xlu2 %1081 }
 0x473   : > { %v1096_v57 = vsub.f32 %v9700_v44, %v1082_v63 }
 0x475   : > { %v9864_v11 = vpop.eup %8282  ;;  %v1108_v60 = vmul.f32 1.442695, %v1096_v57 }
 0x476   : > { %v1353_v21 = vsel %vm1067_vm6, %v9864_v11, 0.0 }
 0x477   : > { %1357 = vadd.xlane.f32.xlu0 %v1356_v10  ;;  %8284 = vpow2.f32 %v1108_v60 }
 0x478   : > { %1354 = vadd.xlane.f32.xlu1 %v1353_v21 }
 0x47a   : > { %v9870_v56 = vpop.xlane.xlu0 %1087 }
 0x47d   : > { %v9872_v0 = vpop.eup %8284 }
 0x47e   : > { %v1128_v36 = vsel %vm1067_vm6, %v9872_v0, 0.0 }
 0x480   : > { %1129 = vadd.xlane.f32.xlu1 %v1128_v36  ;;  %v1085_v36 = vpop.xlane.xlu1 %1084 }
 0x482   : > { %v1316_v44 = vpop.xlane.xlu0 %1315  ;;  %v1091_v37 = vpop.xlane.xlu2 %1090 }
 0x483   : > { %v1328_v61 = vsub.f32 %v9722_v22, %v1316_v44  ;;  %v1099_v28 = vsub.f32 %v9727_v26, %v1091_v37  ;;  %v1097_v37 = vsub.f32 %v9705_v27, %v1085_v36 }
 0x485   : > { %v1341_v40 = vmul.f32 1.442695, %v1328_v61  ;;  %v1114_v18 = vmul.f32 1.442695, %v1099_v28 }
 0x487   : > { %8286 = vpow2.f32 %v1341_v40  ;;  %1628 = vrot.lane.b32.xlu2 %v9547_v42, %s8857_s15  ;;  %v1110_v40 = vmul.f32 1.442695, %v1097_v37 }
 0x488   : > { %8288 = vpow2.f32 %v1114_v18 }
 0x48a   : > { %v1532_v33 = vpop.xlane.xlu2 %1531  ;;  %v1319_v61 = vpop.xlane.xlu0 %1318 }
 0x48b   : > { %1857 = vrot.lane.b32.xlu0 %v9535_v30, %s8856_s14  ;;  %v1554_v63 = vsub.f32 %v9738_v15, %v1532_v33 }
 0x48d   : > { %v9882_v23 = vpop.eup %8286  ;;  %v1562_v26 = vmul.f32 1.442695, %v1554_v63 }
 0x48e   : > { %v1362_v22 = vsel %vm1067_vm6, %v9882_v23, 0.0  ;;  %v9889_v42 = vpop.eup %8288 }
 0x48f   : > { %1855 = vrot.lane.b32.xlu2 %v9543_v55, %s8856_s14  ;;  %1363 = vadd.xlane.f32.xlu1 %v1362_v22  ;;  %8290 = vpow2.f32 %v1562_v26  ;;  %v1137_v60 = vsel %vm1067_vm6, %v9889_v42, 0.0  ;;  %v1313_v22 = vpop.xlane.xlu1 %1312 }
 0x490   : > { %8292 = vpow2.f32 %v1110_v40 }
 0x492   : > { %v1322_v57 = vpop.xlane.xlu2 %1321 }
 0x495   : > { %v9895_v10 = vpop.eup %8290 }
 0x496   : > { %v1578_v21 = vsel %vm1067_vm6, %v9895_v10, 0.0  ;;  %v9905_v63 = vpop.eup %8292 }
 0x497   : > { %1626 = vrot.lane.b32.xlu2 %v9535_v30, %s8857_s15  ;;  %1138 = vadd.xlane.f32.xlu1 %v1137_v60  ;;  %v1329_v30 = vsub.f32 %v9736_v8, %v1319_v61  ;;  %v1131_v27 = vsel %vm1067_vm6, %v9905_v63, 0.0 }
 0x499   : > { %v1343_v33 = vmul.f32 1.442695, %v1329_v30 }
 0x49a   : > { %v1535_v15 = vpop.xlane.xlu2 %1534  ;;  %v1538_v18 = vpop.xlane.xlu0 %1537 }
 0x49b   : > { %8294 = vpow2.f32 %v1343_v33  ;;  %v1555_v26 = vsub.f32 %v9751_v52, %v1535_v15 }
 0x49d   : > { %v1564_v37 = vmul.f32 1.442695, %v1555_v26 }
 0x49f   : > { %1853 = vrot.lane.b32.xlu2 %v9539_v17, %s8856_s14  ;;  %1579 = vadd.xlane.f32.xlu1 %v1578_v21  ;;  %v1327_v21 = vsub.f32 %v9714_v49, %v1313_v22  ;;  %8296 = vpow2.f32 %v1564_v37  ;;  %v1098_v49 = vsub.f32 %v9716_v12, %v9870_v56  ;;  %v1330_v12 = vsub.f32 %v9744_v47, %v1322_v57 }
 0x4a1   : > { %v9915_v8 = vpop.eup %8294  ;;  %v1339_v61 = vmul.f32 1.442695, %v1327_v21  ;;  %v1112_v26 = vmul.f32 1.442695, %v1098_v49 }
 0x4a2   : > { %v1763_v44 = vpop.xlane.xlu2 %1762  ;;  %v1766_v36 = vpop.xlane.xlu0 %1765  ;;  %v1365_v52 = vsel %vm1067_vm6, %v9915_v8, 0.0 }
 0x4a3   : > { %v1785_v40 = vsub.f32 %v9762_v16, %v1763_v44  ;;  %8298 = vpow2.f32 %v1339_v61  ;;  %v1786_v57 = vsub.f32 %v9764_v3, %v1766_v36 }
 0x4a5   : > { %v9926_v22 = vpop.eup %8296 }
 0x4a6   : > { %v1581_v44 = vsel %vm1067_vm6, %v9926_v22, 0.0 }
 0x4a9   : > { %v9929_v16 = vpop.eup %8298 }
 0x4aa   : > { %v9902_v28 = vpop.xlane.xlu2 %1540  ;;  %v9920_v15 = vpop.xlane.xlu1 %1543  ;;  %v1359_v37 = vsel %vm1067_vm6, %v9929_v16, 0.0 }
 0x4b2   : > { %v9924_v30 = vpop.xlane.xlu0 %1546  ;;  %v1772_v21 = vpop.xlane.xlu1 %1771 }
 0x4b3   : > { %v9908_v60 = vpop.xlane.xlu2 %1768 }
 0x4b5   : > { %1132 = vadd.xlane.f32.xlu0 %v1131_v27  ;;  %v1556_v27 = vsub.f32 %v9756_v62, %v1538_v18  ;;  %v1345_v18 = vmul.f32 1.442695, %v1330_v12 }
 0x4b7   : > { %v1566_v56 = vmul.f32 1.442695, %v1556_v27  ;;  %v1557_v27 = vsub.f32 %v9773_v48, %v9902_v28 }
 0x4b8   : > { %1622 = vrot.lane.b32.xlu1 %v9539_v17, %s8857_s15  ;;  %v1793_v17 = vmul.f32 1.442695, %v1785_v40 }
 0x4b9   : > { %v1568_v3 = vmul.f32 1.442695, %v1557_v27 }
 0x4ba   : > { %8300 = vpow2.f32 %v1793_v17  ;;  %v9936_v61 = vpop.xlane.xlu0 %1549  ;;  %v1778_v36 = vpop.xlane.xlu1 %1777 }
 0x4bb   : > { %v1775_v33 = vpop.xlane.xlu2 %1774  ;;  %8302 = vpow2.f32 %v1112_v26 }
 0x4bc   : > { %8304 = vpow2.f32 %v1566_v56 }
 0x4bd   : > { %1366 = vadd.xlane.f32.xlu0 %v1365_v52  ;;  %v1788_v52 = vsub.f32 %v9784_v54, %v1772_v21  ;;  %8306 = vpow2.f32 %v1345_v18  ;;  %v1795_v54 = vmul.f32 1.442695, %v1786_v57  ;;  %v1789_v21 = vsub.f32 %v9804_v29, %v1775_v33 }
 0x4bf   : > { %v1799_v17 = vmul.f32 1.442695, %v1788_v52  ;;  %v1801_v48 = vmul.f32 1.442695, %v1789_v21  ;;  %v1790_v52 = vsub.f32 %v9802_v20, %v1778_v36 }
 0x4c0   : > { %v9940_v62 = vpop.eup %8300 }
 0x4c1   : > { %v9943_v49 = vpop.eup %8302  ;;  %v1809_v47 = vsel %vm1067_vm6, %v9940_v62, 0.0  ;;  %8308 = vpow2.f32 %v1799_v17  ;;  %v1803_v17 = vmul.f32 1.442695, %v1790_v52 }
 0x4c2   : > { %v1134_v26 = vsel %vm1067_vm6, %v9943_v49, 0.0  ;;  %v9954_v12 = vpop.xlane.xlu0 %1780  ;;  %8310 = vpow2.f32 %v1795_v54 }
 0x4c3   : > { %v9938_v40 = vpop.xlane.xlu2 %1552  ;;  %8312 = vpow2.f32 %v1568_v3 }
 0x4c4   : > { %8314 = vpow2.f32 %v1801_v48  ;;  %v1558_v48 = vsub.f32 %v9778_v39, %v9920_v15  ;;  %v1791_v39 = vsub.f32 %v9817_v4, %v9954_v12 }
 0x4c5   : > { %1582 = vadd.xlane.f32.xlu0 %v1581_v44  ;;  %v9952_v44 = vpop.eup %8304  ;;  %8316 = vpow2.f32 %v1803_v17 }
 0x4c6   : > { %v1584_v18 = vsel %vm1067_vm6, %v9952_v44, 0.0 }
 0x4c8   : > { %1360 = vadd.xlane.f32.xlu2 %v1359_v37  ;;  %v9959_v37 = vpop.eup %8306 }
 0x4c9   : > { %v1368_v28 = vsel %vm1067_vm6, %v9959_v37, 0.0 }
 0x4cb   : > { %v9956_v56 = vpop.xlane.xlu2 %1783 }
 0x4cc   : > { %v1349_v29 = vpop.xlane.xlu0 %1348 }
 0x4cd   : > { %1810 = vadd.xlane.f32.xlu0 %v1809_v47  ;;  %v9966_v47 = vpop.eup %8308 }
 0x4ce   : > { %v9968_v57 = vpop.eup %8310  ;;  %v1818_v27 = vsel %vm1067_vm6, %v9966_v47, 0.0 }
 0x4cf   : > { %v9972_v54 = vpop.eup %8312  ;;  %v1812_v21 = vsel %vm1067_vm6, %v9968_v57, 0.0 }
 0x4d0   : > { %1135 = vadd.xlane.f32.xlu2 %v1134_v26  ;;  %v9976_v20 = vpop.eup %8314  ;;  %v1587_v3 = vsel %vm1067_vm6, %v9972_v54, 0.0 }
 0x4d1   : > { %v1821_v52 = vsel %vm1067_vm6, %v9976_v20, 0.0  ;;  %v9984_v17 = vpop.eup %8316 }
 0x4d3   : > { %v1118_v26 = vpop.xlane.xlu1 %1117 }
 0x4d4   : > { %8318 = vrcp.f32 %v1118_v26 }
 0x4d5   : > { %1585 = vadd.xlane.f32.xlu0 %v1584_v18  ;;  %8320 = vrcp.f32 %v1349_v29 }
 0x4d8   : > { %1369 = vadd.xlane.f32.xlu2 %v1368_v28 }
 0x4da   : > { %v1124_v33 = vpop.xlane.xlu2 %1123  ;;  %v8319_v26 = vpop.eup %8318 }
 0x4db   : > { %v1148_v29 = vmul.f32 %v8319_v26, %v9837_v24 }
 0x4dd   : > { %1819 = vadd.xlane.f32.xlu0 %v1818_v27  ;;  %v1570_v27 = vmul.f32 1.442695, %v1558_v48  ;;  %v1824_v48 = vsel %vm1067_vm6, %v9984_v17, 0.0 }
 0x4e0   : > { %1813 = vadd.xlane.f32.xlu2 %v1812_v21  ;;  %v8321_v21 = vpop.eup %8320 }
 0x4e1   : > { %v1379_v15 = vmul.f32 %v8321_v21, %v9829_v13 }
 0x4e2   : > { %v1121_v36 = vpop.xlane.xlu0 %1120  ;;  %1588 = vadd.xlane.f32.xlu1 %v1587_v3  ;;  %v1352_v18 = vpop.xlane.xlu2 %1351 }
 0x4e3   : > { %8322 = vrcp.f32 %v1121_v36  ;;  %v1127_v28 = vpop.xlane.xlu1 %1126 }
 0x4e4   : > { %8324 = vrcp.f32 %v1352_v18 }
 0x4e5   : > { %1822 = vadd.xlane.f32.xlu0 %v1821_v52  ;;  %8326 = vpow2.f32 %v1570_v27 }
 0x4e6   : > { %8328 = vrcp.f32 %v1124_v33 }
 0x4e7   : > { %8330 = vrcp.f32 %v1127_v28 }
 0x4e9   : > { %v8323_v41 = vpop.eup %8322 }
 0x4ea   : > { %v1149_v3 = vmul.f32 %v8323_v41, %v9851_v35  ;;  %v1629_v14 = vpop.permute.xlu2 %1628  ;;  %v8325_v58 = vpop.eup %8324  ;;  %v1805_v35 = vmul.f32 1.442695, %v1791_v39 }
 0x4eb   : > { %1650 = vmatpush.bf16.msrb.mxu0 %v1629_v14  ;;  %v1380_v18 = vmul.f32 %v8325_v58, %v9848_v53  ;;  %v1358_v52 = vpop.xlane.xlu0 %1357  ;;  %v1355_v24 = vpop.xlane.xlu1 %1354  ;;  %v1560_v58 = vsub.f32 %v9809_v45, %v9936_v61 }
 0x4ec   : > { %v1156_v36 = vpack.c.bf16 %v1149_v3, %v1148_v29  ;;  %8332 = vrcp.f32 %v1358_v52  ;;  %v9996_v14 = vpop.eup %8326 }
 0x4ed   : > { %1825 = vadd.xlane.f32.xlu0 %v1824_v48  ;;  %v1387_v41 = vpack.c.bf16 %v1380_v18, %v1379_v15  ;;  %8334 = vrcp.f32 %v1355_v24  ;;  %v8329_v13 = vpop.eup %8328  ;;  %v1590_v53 = vsel %vm1067_vm6, %v9996_v14, 0.0  ;;  %v1574_v28 = vmul.f32 1.442695, %v1560_v58 }
 0x4ee   : > { %7230 = vmatmul.msk.bf16.vlgmr.msra.gmra.mxu0 %vm1067_vm6, %v1156_v36  ;;  %8336 = vpow2.f32 %v1805_v35  ;;  %v8331_v12 = vpop.eup %8330  ;;  %v1150_v45 = vmul.f32 %v8329_v13, %v9843_v25  ;;  %v1559_v48 = vsub.f32 %v9791_v2, %v9924_v30 }
 0x4ef   : > { %7246 = vmatmul.msk.bf16.vlgmr.msrb.gmra.mxu2 %vm1067_vm6, %v1387_v41  ;;  %v1151_v27 = vmul.f32 %v8331_v12, %v9853_v50  ;;  %8338 = vpow2.f32 %v1574_v28  ;;  %v1792_v41 = vsub.f32 %v9826_v51, %v9956_v56 }
 0x4f0   : > { %v1572_v52 = vmul.f32 1.442695, %v1559_v48 }
 0x4f1   : > { %v1157_v15 = vpack.c.bf16 %v1151_v27, %v1150_v45 }
 0x4f2   : > { %v1856_v4 = vpop.permute.xlu2 %1855  ;;  %v8333_v33 = vpop.eup %8332 }
 0x4f3   : > { %v8335_v26 = vpop.eup %8334  ;;  %v1382_v3 = vmul.f32 %v8333_v33, %v9861_v19  ;;  %v1130_v58 = vpop.xlane.xlu1 %1129 }
 0x4f4   : > { %v10005_v21 = vpop.eup %8336  ;;  %v1381_v61 = vmul.f32 %v8335_v26, %v9864_v11  ;;  %v1787_v11 = vsub.f32 %v9786_v9, %v9908_v60  ;;  %v1561_v9 = vsub.f32 %v9819_v6, %v9938_v40 }
 0x4f5   : > { %1591 = vadd.xlane.f32.xlu0 %v1590_v53  ;;  %v1827_v39 = vsel %vm1067_vm6, %v10005_v21, 0.0  ;;  %v10014_v50 = vpop.eup %8338 }
 0x4f6   : > { %v1596_v25 = vsel %vm1067_vm6, %v10014_v50, 0.0  ;;  %v1797_v18 = vmul.f32 1.442695, %v1787_v11  ;;  %v1576_v51 = vmul.f32 1.442695, %v1561_v9 }
 0x4f8   : > { %1624 = vrot.lane.b32.xlu2 %v9543_v55, %s8857_s15  ;;  %v1388_v55 = vpack.c.bf16 %v1382_v3, %v1381_v61  ;;  %8340 = vpow2.f32 %v1797_v18 }
 0x4f9   : > { %8342 = vpow2.f32 %v1572_v52 }
 0x4fa   : > { %v1627_v29 = vpop.permute.xlu2 %1626 }
 0x4fb   : > { %1651 = vmatpush.bf16.msrb.mxu0 %v1627_v29 }
 0x4fd   : > { %v1858_v36 = vpop.permute.xlu0 %1857  ;;  %1828 = vadd.xlane.f32.xlu0 %v1827_v39 }
 0x4fe   : > { %7231 = vmatmul.msk.bf16.gmra.mxu0 %vm1067_vm6, %v1157_v15  ;;  %1882 = vmatpush.bf16.msra.mxu2 %v1858_v36  ;;  %v10022_v24 = vpop.eup %8340 }
 0x4ff   : > { %7247 = vmatmul.msk.bf16.gmra.mxu2 %vm1067_vm6, %v1388_v55  ;;  %v1815_v35 = vsel %vm1067_vm6, %v10022_v24, 0.0  ;;  %v10028_v13 = vpop.eup %8342 }
 0x500   : > { %v1593_v60 = vsel %vm1067_vm6, %v10028_v13, 0.0 }
 0x502   : > { %1883 = vmatpush.bf16.msra.mxu2 %v1856_v4  ;;  %v1854_v19 = vpop.permute.xlu2 %1853  ;;  %v1807_v4 = vmul.f32 1.442695, %v1792_v41  ;;  %v1364_v28 = vpop.xlane.xlu1 %1363 }
 0x504   : > { %8344 = vpow2.f32 %v1807_v4 }
 0x505   : > { %1597 = vadd.xlane.f32.xlu0 %v1596_v25  ;;  %8346 = vrcp.f32 %v1130_v58 }
 0x506   : > { %1884 = vmatpush.bf16.msra.mxu2 %v1854_v19 }
 0x50a   : > { %v10034_v30 = vpop.eup %8344  ;;  %v1139_v45 = vpop.xlane.xlu1 %1138 }
 0x50b   : > { %v8347_v56 = vpop.eup %8346  ;;  %v1830_v12 = vsel %vm1067_vm6, %v10034_v30, 0.0 }
 0x50c   : > { %v1152_v33 = vmul.f32 %v8347_v56, %v9872_v0 }
 0x512   : > { %v1580_v41 = vpop.xlane.xlu1 %1579 }
 0x521   : > { %1816 = vadd.xlane.f32.xlu2 %v1815_v35 }
 0x528   : > { %v1133_v2 = vpop.xlane.xlu0 %1132 }
 0x529   : > { %8348 = vrcp.f32 %v1133_v2  ;;  %1594 = vadd.xlane.f32.xlu2 %v1593_v60 }
 0x52a   : > { %8350 = vpow2.f32 %v1576_v51 }
 0x52b   : > { %8352 = vrcp.f32 %v1364_v28 }
 0x52f   : > { %v8349_v53 = vpop.eup %8348 }
 0x530   : > { %v1153_v6 = vmul.f32 %v8349_v53, %v9905_v63  ;;  %v10041_v26 = vpop.eup %8350  ;;  %v1367_v0 = vpop.xlane.xlu0 %1366 }
 0x531   : > { %1831 = vadd.xlane.f32.xlu2 %v1830_v12  ;;  %v1599_v27 = vsel %vm1067_vm6, %v10041_v26, 0.0  ;;  %v8353_v61 = vpop.eup %8352 }
 0x532   : > { %v1158_v40 = vpack.c.bf16 %v1153_v6, %v1152_v33  ;;  %v1384_v15 = vmul.f32 %v8353_v61, %v9882_v23 }
 0x534   : > { %7232 = vmatmul.msk.bf16.gmra.mxu0 %vm1067_vm6, %v1158_v40 }
 0x538   : > { %v1583_v48 = vpop.xlane.xlu0 %1582 }
 0x539   : > { %1600 = vadd.xlane.f32.xlu2 %v1599_v27 }
 0x53b   : > { %v1361_v29 = vpop.xlane.xlu2 %1360 }
 0x53c   : > { %8354 = vrcp.f32 %v1361_v29 }
 0x53d   : > { %8356 = vrcp.f32 %v1139_v45 }
 0x540   : > { %v1811_v2 = vpop.xlane.xlu0 %1810 }
 0x542   : > { %v8355_v3 = vpop.eup %8354 }
 0x543   : > { %v1136_v63 = vpop.xlane.xlu2 %1135  ;;  %v1383_v39 = vmul.f32 %v8355_v3, %v9929_v16  ;;  %v8357_v55 = vpop.eup %8356 }
 0x544   : > { %8358 = vrcp.f32 %v1136_v63  ;;  %v1155_v18 = vmul.f32 %v8357_v55, %v9889_v42  ;;  %v1623_v42 = vpop.permute.xlu1 %1622 }
 0x545   : > { %v1389_v36 = vpack.c.bf16 %v1384_v15, %v1383_v39  ;;  %8360 = vrcp.f32 %v1367_v0 }
 0x547   : > { %7248 = vmatmul.msk.bf16.gmra.mxu2 %vm1067_vm6, %v1389_v36 }
 0x548   : > { %v1586_v28 = vpop.xlane.xlu0 %1585 }
 0x54a   : > { %v8359_v25 = vpop.eup %8358 }
 0x54b   : > { %v1370_v19 = vpop.xlane.xlu2 %1369  ;;  %v1154_v11 = vmul.f32 %v8359_v25, %v9943_v49  ;;  %v8361_v16 = vpop.eup %8360 }
 0x54c   : > { %8362 = vrcp.f32 %v1370_v19  ;;  %v1385_v4 = vmul.f32 %v8361_v16, %v9915_v8 }
 0x54d   : > { %v1159_v52 = vpack.c.bf16 %v1155_v18, %v1154_v11  ;;  %8364 = vrcp.f32 %v1583_v48 }
 0x54e   : > { %8366 = vrcp.f32 %v1580_v41 }
 0x54f   : > { %7233 = vmatmul.msk.bf16.gmra.mxu0 %vm1067_vm6, %v1159_v52 }
 0x552   : > { %v8363_v23 = vpop.eup %8362 }
 0x553   : > { %v1814_v35 = vpop.xlane.xlu2 %1813  ;;  %v1386_v58 = vmul.f32 %v8363_v23, %v9959_v37  ;;  %v8365_v49 = vpop.eup %8364 }
 0x554   : > { %8368 = vrcp.f32 %v1814_v35  ;;  %v8367_v51 = vpop.eup %8366  ;;  %v1611_v56 = vmul.f32 %v8365_v49, %v9926_v22 }
 0x555   : > { %v1390_v9 = vpack.c.bf16 %v1386_v58, %v1385_v4  ;;  %8370 = vrcp.f32 %v1811_v2  ;;  %v1610_v8 = vmul.f32 %v8367_v51, %v9895_v10  ;;  %v1589_v6 = vpop.xlane.xlu1 %1588 }
 0x556   : > { %8372 = vrcp.f32 %v1589_v6 }
 0x557   : > { %7249 = vmatmul.msk.bf16.gmra.mxu2 %vm1067_vm6, %v1390_v9  ;;  %v1618_v37 = vpack.c.bf16 %v1611_v56, %v1610_v8  ;;  %8374 = vrcp.f32 %v1586_v28 }
 0x55a   : > { %v8369_v53 = vpop.eup %8368 }
 0x55b   : > { %v1625_v60 = vpop.permute.xlu2 %1624  ;;  %v8371_v12 = vpop.eup %8370  ;;  %v1842_v33 = vmul.f32 %v8369_v53, %v9968_v57 }
 0x55c   : > { %1652 = vmatpush.bf16.msrb.mxu0 %v1625_v60  ;;  %v1841_v40 = vmul.f32 %v8371_v12, %v9940_v62  ;;  %v8373_v22 = vpop.eup %8372  ;;  %v1820_v57 = vpop.xlane.xlu0 %1819 }
 0x55d   : > { %v8375_v29 = vpop.eup %8374  ;;  %v1613_v10 = vmul.f32 %v8373_v22, %v9972_v54  ;;  %8376 = vrcp.f32 %v1820_v57 }
 0x55e   : > { %v1849_v27 = vpack.c.bf16 %v1842_v33, %v1841_v40  ;;  %v1612_v45 = vmul.f32 %v8375_v29, %v9952_v44 }
 0x560   : > { %1653 = vmatpush.bf16.msrb.mxu0 %v1623_v42  ;;  %v1619_v61 = vpack.c.bf16 %v1613_v10, %v1612_v45 }
 0x563   : > { %7262 = vmatmul.msk.bf16.vlgmr.msrb.gmra.mxu0 %vm1067_vm6, %v1618_v37  ;;  %v8377_v54 = vpop.eup %8376 }
 0x564   : > { %v1823_v63 = vpop.xlane.xlu0 %1822  ;;  %v1844_v11 = vmul.f32 %v8377_v54, %v9966_v47 }
 0x567   : > { %7278 = vmatmul.msk.bf16.vlgmr.msra.gmra.mxu2 %vm1067_vm6, %v1849_v27 }
 0x56b   : > { %v10064_v55 = vpop.f32.mrf.mxu0 }
 0x56c   : > { %v1826_v39 = vpop.xlane.xlu0 %1825 }
 0x572   : > { %v1424_v3 = vpop.f32.mrf.mxu2 }
 0x573   : > { %7263 = vmatmul.msk.bf16.gmra.mxu0 %vm1067_vm6, %v1619_v61  ;;  %v10068_v52 = vpop.f32.mrf.mxu0 }
 0x574   : > { %v1592_v15 = vpop.xlane.xlu0 %1591 }
 0x57a   : > { %v1426_v62 = vpop.f32.mrf.mxu2 }
 0x57b   : > { %v8028_v0 = vpack.i.bf16 %v1426_v62, %v1424_v3  ;;  %v10074_v2 = vpop.f32.mrf.mxu0 }
 0x57c   : > { %v1829_v18 = vpop.xlane.xlu0 %1828 }
 0x57d   : > { %8029 = vrot.lane.b32.xlu1 %v8028_v0, %s8858_s16 }
 0x582   : > { %v1429_v37 = vpop.f32.mrf.mxu2 }
 0x583   : > { %v10080_v53 = vpop.f32.mrf.mxu0 }
 0x584   : > { %v1598_v9 = vpop.xlane.xlu0 %1597 }
 0x594   : > { %v1817_v36 = vpop.xlane.xlu2 %1816 }
 0x595   : > { %8378 = vrcp.f32 %v1817_v36 }
 0x596   : > { %8380 = vrcp.f32 %v1592_v15 }
 0x59b   : > { %v8379_v44 = vpop.eup %8378 }
 0x59c   : > { %v1595_v25 = vpop.xlane.xlu2 %1594  ;;  %v1843_v19 = vmul.f32 %v8379_v44, %v10022_v24  ;;  %v8381_v16 = vpop.eup %8380 }
 0x59d   : > { %8382 = vrcp.f32 %v1595_v25  ;;  %v1614_v35 = vmul.f32 %v8381_v16, %v9996_v14 }
 0x59e   : > { %v1850_v48 = vpack.c.bf16 %v1844_v11, %v1843_v19  ;;  %8384 = vrcp.f32 %v1826_v39  ;;  %v7719_v19 = vld [vmem:[%s12633_s6 + $0x8] sm:$0xff] }
 0x59f   : > { %8386 = vrcp.f32 %v1823_v63  ;;  %2068 = vmatpush.bf16.msra.mxu3 %v7719_v19 }
 0x5a0   : > { %7279 = vmatmul.msk.bf16.gmra.mxu2 %vm1067_vm6, %v1850_v48  ;;  %8388 = vrcp.f32 %v1598_v9 }
 0x5a3   : > { %v8383_v41 = vpop.eup %8382 }
 0x5a4   : > { %v1832_v23 = vpop.xlane.xlu2 %1831  ;;  %v1615_v4 = vmul.f32 %v8383_v41, %v10028_v13  ;;  %v8385_v24 = vpop.eup %8384 }
 0x5a5   : > { %v8387_v47 = vpop.eup %8386  ;;  %v1846_v42 = vmul.f32 %v8385_v24, %v9984_v17 }
 0x5a6   : > { %v1620_v58 = vpack.c.bf16 %v1615_v4, %v1614_v35  ;;  %v1845_v60 = vmul.f32 %v8387_v47, %v9976_v20  ;;  %v8389_v14 = vpop.eup %8388  ;;  %v7718_v47 = vld [vmem:[%s12633_s6] sm:$0xff] }
 0x5a7   : > { %v1616_v56 = vmul.f32 %v8389_v14, %v10014_v50  ;;  %v1431_v50 = vpop.f32.mrf.mxu2  ;;  %2069 = vmatpush.bf16.msra.mxu3 %v7718_v47 }
 0x5a8   : > { %7264 = vmatmul.msk.bf16.gmra.mxu0 %vm1067_vm6, %v1620_v58  ;;  %v1851_v51 = vpack.c.bf16 %v1846_v42, %v1845_v60  ;;  %v8043_v0 = vpack.i.bf16 %v1431_v50, %v1429_v37 }
 0x5ac   : > { %v1601_v49 = vpop.xlane.xlu2 %1600 }
 0x5ad   : > { %8390 = vrcp.f32 %v1601_v49 }
 0x5ae   : > { %8392 = vrcp.f32 %v1832_v23 }
 0x5af   : > { %8394 = vrcp.f32 %v1829_v18 }
 0x5b0   : > { %7280 = vmatmul.msk.bf16.gmra.mxu2 %vm1067_vm6, %v1851_v51 }
 0x5b1   : > { %v10085_v6 = vpop.f32.mrf.mxu0 }
 0x5b3   : > { %v8391_v13 = vpop.eup %8390 }
 0x5b4   : > { %v1617_v8 = vmul.f32 %v8391_v13, %v10041_v26  ;;  %v8393_v17 = vpop.eup %8392 }
 0x5b5   : > { %v8395_v20 = vpop.eup %8394  ;;  %v1848_v33 = vmul.f32 %v8393_v17, %v10034_v30 }
 0x5b6   : > { %v1621_v12 = vpack.c.bf16 %v1617_v8, %v1616_v56  ;;  %v1847_v40 = vmul.f32 %v8395_v20, %v10005_v21 }
 0x5b8   : > { %7265 = vmatmul.msk.bf16.gmra.mxu0 %vm1067_vm6, %v1621_v12  ;;  %v1852_v28 = vpack.c.bf16 %v1848_v33, %v1847_v40 }
 0x5b9   : > { %v10089_v27 = vpop.f32.mrf.mxu0 }
 0x5c0   : > { %7281 = vmatmul.msk.bf16.gmra.mxu2 %vm1067_vm6, %v1852_v28 }
 0x5ca   : > { %v1434_v22 = vpop.f32.mrf.mxu2 }
 0x5cc   : > { %v10091_v26 = vpop.f32.mrf.mxu0 }
 0x5d2   : > { %v1436_v29 = vpop.f32.mrf.mxu2 }
 0x5d3   : > { %v8058_v36 = vpack.i.bf16 %v1436_v29, %v1434_v22 }
 0x5d4   : > { %v10093_v10 = vpop.f32.mrf.mxu0 }
 0x5da   : > { %v1439_v45 = vpop.f32.mrf.mxu2 }
 0x5e0   : > { %v1655_v61 = vpop.f32.mrf.mxu0 }
 0x5e2   : > { %v1441_v3 = vpop.f32.mrf.mxu2 }
 0x5e3   : > { %v8073_v44 = vpack.i.bf16 %v1441_v3, %v1439_v45 }
 0x5e8   : > { %v1657_v30 = vpop.f32.mrf.mxu0 }
 0x5e9   : > { %v8033_v57 = vpack.i.bf16 %v1657_v30, %v1655_v61 }
 0x5ea   : > { %v1886_v62 = vpop.f32.mrf.mxu2 }
 0x5eb   : > { %8034 = vrot.lane.b32.xlu0 %v8033_v57, %s8859_s18 }
 0x5ef   : > { %v8030_v51 = vpop.permute.xlu1 %8029 }
 0x5f0   : > { %v1660_v21 = vpop.f32.mrf.mxu0  ;;  %v8032_v14 = vunpack.i.h.bf16 %v8030_v51  ;;  %v8031_v13 = vunpack.i.l.bf16 %v8030_v51 }
 0x5f2   : > { %v1888_v63 = vpop.f32.mrf.mxu2  ;;  %v2003_v37 = vsel %vm1013_vm5, %v10068_v52, %v8032_v14  ;;  %v2002_v20 = vsel %vm1013_vm5, %v10064_v55, %v8031_v13 }
 0x5f3   : > { %v8038_v39 = vpack.i.bf16 %v1888_v63, %v1886_v62  ;;  %8044 = vrot.lane.b32.xlu0 %v8043_v0, %s8858_s16 }
 0x5f5   : > { %8039 = vrot.lane.b32.xlu2 %v8038_v39, %s8860_s19 }
 0x5f8   : > { %v1662_v15 = vpop.f32.mrf.mxu0 }
 0x5f9   : > { %v8048_v54 = vpack.i.bf16 %v1662_v15, %v1660_v21 }
 0x5fb   : > { %8059 = vrot.lane.b32.xlu0 %v8058_v36, %s8858_s16  ;;  %8049 = vrot.lane.b32.xlu1 %v8048_v54, %s8859_s18 }
 0x603   : > { %8074 = vrot.lane.b32.xlu0 %v8073_v44, %s8858_s16 }
 0x623   : > { %v1891_v25 = vpop.f32.mrf.mxu2 }
 0x625   : > { %v1665_v11 = vpop.f32.mrf.mxu0 }
 0x62b   : > { %v1893_v18 = vpop.f32.mrf.mxu2 }
 0x62c   : > { %v8053_v48 = vpack.i.bf16 %v1893_v18, %v1891_v25 }
 0x62d   : > { %v1667_v16 = vpop.f32.mrf.mxu0 }
 0x62e   : > { %v8063_v41 = vpack.i.bf16 %v1667_v16, %v1665_v11  ;;  %8054 = vrot.lane.b32.xlu2 %v8053_v48, %s8860_s19 }
 0x630   : > { %8064 = vrot.lane.b32.xlu1 %v8063_v41, %s8859_s18 }
 0x633   : > { %v1896_v23 = vpop.f32.mrf.mxu2 }
 0x635   : > { %v1670_v35 = vpop.f32.mrf.mxu0 }
 0x63b   : > { %v1898_v4 = vpop.f32.mrf.mxu2 }
 0x63c   : > { %v8068_v58 = vpack.i.bf16 %v1898_v4, %v1896_v23 }
 0x63d   : > { %v1672_v24 = vpop.f32.mrf.mxu0 }
 0x63e   : > { %v8078_v9 = vpack.i.bf16 %v1672_v24, %v1670_v35  ;;  %8069 = vrot.lane.b32.xlu2 %v8068_v58, %s8860_s19 }
 0x640   : > { %8079 = vrot.lane.b32.xlu1 %v8078_v9, %s8859_s18 }
 0x643   : > { %v1901_v42 = vpop.f32.mrf.mxu2 }
 0x64b   : > { %v1903_v49 = vpop.f32.mrf.mxu2 }
 0x64c   : > { %v8083_v60 = vpack.i.bf16 %v1903_v49, %v1901_v42 }
 0x64e   : > { %8084 = vrot.lane.b32.xlu2 %v8083_v60, %s8860_s19 }
 0x64f   : > { %v8040_v56 = vpop.permute.xlu2 %8039 }
 0x650   : > { %v8042_v33 = vunpack.i.h.bf16 %v8040_v56  ;;  %v8041_v40 = vunpack.i.l.bf16 %v8040_v56 }
 0x65d   : > { %v8035_v8 = vpop.permute.xlu0 %8034 }
 0x65e   : > { %v8037_v12 = vunpack.i.h.bf16 %v8035_v8  ;;  %v8036_v17 = vunpack.i.l.bf16 %v8035_v8 }
 0x660   : > { %v2012_v28 = vsel %vm2010_vm7, %v2003_v37, %v8037_v12  ;;  %v2011_v50 = vsel %vm2010_vm7, %v2002_v20, %v8036_v17 }
 0x661   : > { %v2020_v22 = vsel %vm2019_vm8, %v2011_v50, %v8041_v40  ;;  %v2021_v29 = vsel %vm2019_vm8, %v2012_v28, %v8042_v33 }
 0x662   : > { %v2028_v45 = vpack.c.bf16 %v2021_v29, %v2020_v22  ;;  %v8828_v22 = vld [vmem:[%s8932_s17] sm:$0xff] }
 0x664   : > { %7290 = vmatmul.msk.bf16.vlgmr.msra.gmra.mxu3 %vm372_vm0, %v2028_v45 }
 0x665   : > { %v8045_v61 = vpop.permute.xlu0 %8044 }
 0x666   : > { %v8047_v30 = vunpack.i.h.bf16 %v8045_v61  ;;  %v8046_v52 = vunpack.i.l.bf16 %v8045_v61 }
 0x668   : > { %v2005_v21 = vsel %vm1013_vm5, %v10080_v53, %v8047_v30  ;;  %v2004_v0 = vsel %vm1013_vm5, %v10074_v2, %v8046_v52  ;;  %v8829_v30 = vld [vmem:[%s8932_s17 + $0x8] sm:$0xff] }
 0x66d   : > { %v8050_v3 = vpop.permute.xlu1 %8049  ;;  %v8060_v19 = vpop.permute.xlu0 %8059 }
 0x66e   : > { %v8052_v57 = vunpack.i.h.bf16 %v8050_v3  ;;  %v8051_v62 = vunpack.i.l.bf16 %v8050_v3  ;;  %v8062_v11 = vunpack.i.h.bf16 %v8060_v19  ;;  %v8061_v18 = vunpack.i.l.bf16 %v8060_v19 }
 0x670   : > { %v2013_v15 = vsel %vm2010_vm7, %v2004_v0, %v8051_v62  ;;  %v2014_v36 = vsel %vm2010_vm7, %v2005_v21, %v8052_v57  ;;  %v2007_v41 = vsel %vm1013_vm5, %v10089_v27, %v8062_v11  ;;  %v2006_v23 = vsel %vm1013_vm5, %v10085_v6, %v8061_v18  ;;  %v8830_v21 = vld [vmem:[%s8932_s17 + $0x10] sm:$0xff]  ;;  %v8832_v11 = vld [vmem:[%s8932_s17 + $0x20] sm:$0xff] }
 0x675   : > { %v8075_v49 = vpop.permute.xlu0 %8074 }
 0x676   : > { %v8077_v60 = vunpack.i.h.bf16 %v8075_v49  ;;  %v8076_v51 = vunpack.i.l.bf16 %v8075_v49 }
 0x678   : > { %v2009_v56 = vsel %vm1013_vm5, %v10093_v10, %v8077_v60  ;;  %v2008_v8 = vsel %vm1013_vm5, %v10091_v26, %v8076_v51  ;;  %v8214_v10 = vld [vmem:[%s12630_s3 + $0x5] ss:$0 sm:$0xff] }
 0x688   : > { %v8055_v55 = vpop.permute.xlu2 %8054 }
 0x689   : > { %v8057_v63 = vunpack.i.h.bf16 %v8055_v55  ;;  %v8056_v39 = vunpack.i.l.bf16 %v8055_v55 }
 0x68b   : > { %v2022_v54 = vsel %vm2019_vm8, %v2013_v15, %v8056_v39  ;;  %v2023_v44 = vsel %vm2019_vm8, %v2014_v36, %v8057_v63  ;;  %v8831_v36 = vld [vmem:[%s8932_s17 + $0x18] sm:$0xff] }
 0x68c   : > { %v2029_v25 = vpack.c.bf16 %v2023_v44, %v2022_v54 }
 0x68e   : > { %7291 = vmatmul.msk.bf16.gmra.mxu3 %vm372_vm0, %v2029_v25 }
 0x698   : > { %v8070_v53 = vpop.permute.xlu2 %8069 }
 0x699   : > { %v8072_v35 = vunpack.i.h.bf16 %v8070_v53  ;;  %v8071_v4 = vunpack.i.l.bf16 %v8070_v53 }
 0x6a2   : > { %v8065_v48 = vpop.permute.xlu1 %8064 }
 0x6a3   : > { %v8067_v16 = vunpack.i.h.bf16 %v8065_v48  ;;  %v8066_v2 = vunpack.i.l.bf16 %v8065_v48 }
 0x6a5   : > { %v2015_v58 = vsel %vm2010_vm7, %v2006_v23, %v8066_v2  ;;  %v2016_v24 = vsel %vm2010_vm7, %v2007_v41, %v8067_v16  ;;  %v8833_v2 = vld [vmem:[%s8932_s17 + $0x28] sm:$0xff] }
 0x6a6   : > { %v2024_v9 = vsel %vm2019_vm8, %v2015_v58, %v8071_v4  ;;  %v2025_v47 = vsel %vm2019_vm8, %v2016_v24, %v8072_v35  ;;  %v8834_v58 = vld [vmem:[%s8932_s17 + $0x30] sm:$0xff] }
 0x6a7   : > { %v2030_v42 = vpack.c.bf16 %v2025_v47, %v2024_v9 }
 0x6a8   : > { %v8085_v27 = vpop.permute.xlu2 %8084 }
 0x6a9   : > { %7292 = vmatmul.msk.bf16.gmra.mxu3 %vm372_vm0, %v2030_v42  ;;  %v8087_v12 = vunpack.i.h.bf16 %v8085_v27  ;;  %v8086_v17 = vunpack.i.l.bf16 %v8085_v27 }
 0x6b2   : > { %v8080_v14 = vpop.permute.xlu1 %8079 }
 0x6b3   : > { %v8082_v6 = vunpack.i.h.bf16 %v8080_v14  ;;  %v8081_v13 = vunpack.i.l.bf16 %v8080_v14 }
 0x6b5   : > { %v2017_v37 = vsel %vm2010_vm7, %v2008_v8, %v8081_v13  ;;  %v2018_v20 = vsel %vm2010_vm7, %v2009_v56, %v8082_v6  ;;  %v8835_v56 = vld [vmem:[%s8932_s17 + $0x38] sm:$0xff] }
 0x6b6   : > { %v2026_v33 = vsel %vm2019_vm8, %v2017_v37, %v8086_v17  ;;  %v2027_v40 = vsel %vm2019_vm8, %v2018_v20, %v8087_v12 }
 0x6b7   : > { %v2031_v28 = vpack.c.bf16 %v2027_v40, %v2026_v33 }
 0x6b9   : > { %7293 = vmatmul.msk.bf16.gmra.mxu3 %vm372_vm0, %v2031_v28 }
 0x6e7   : > { %v2071_v26 = vpop.f32.mrf.mxu3 }
 0x6e8   : > { %v2072_v50 = vadd.f32 %v8214_v10, %v2071_v26 }
 0x6ea   : > { %v10152_v29 = vadd.f32 %v8828_v22, %v2072_v50 }
 0x6ec   : > { %v2101_v45 = vsel %vm372_vm0, %v10152_v29, 0.0 }
 0x6ed   : > { %2102 = vadd.xlane.f32.xlu0 %v2101_v45 }
 0x6ef   : > { %v2073_v61 = vpop.f32.mrf.mxu3 }
 0x6f0   : > { %v2074_v3 = vadd.f32 %v8214_v10, %v2073_v61 }
 0x6f2   : > { %v10157_v52 = vadd.f32 %v8829_v30, %v2074_v3 }
 0x6f4   : > { %v2104_v57 = vsel %vm372_vm0, %v10157_v52, 0.0 }
 0x6f5   : > { %2105 = vadd.xlane.f32.xlu1 %v2104_v57 }
 0x711   : > { %v2076_v62 = vpop.f32.mrf.mxu3 }
 0x712   : > { %v2077_v55 = vadd.f32 %v8214_v10, %v2076_v62 }
 0x714   : > { %v10162_v0 = vadd.f32 %v8830_v21, %v2077_v55 }
 0x716   : > { %v2107_v63 = vsel %vm372_vm0, %v10162_v0, 0.0 }
 0x717   : > { %2108 = vadd.xlane.f32.xlu2 %v2107_v63 }
 0x719   : > { %v2078_v39 = vpop.f32.mrf.mxu3 }
 0x71a   : > { %v2079_v15 = vadd.f32 %v8214_v10, %v2078_v39 }
 0x71c   : > { %v10167_v54 = vadd.f32 %v8831_v36, %v2079_v15 }
 0x71e   : > { %v2110_v44 = vsel %vm372_vm0, %v10167_v54, 0.0 }
 0x71f   : > { %2111 = vadd.xlane.f32.xlu0 %v2110_v44 }
 0x72c   : > { %v2081_v25 = vpop.f32.mrf.mxu3 }
 0x72d   : > { %v2082_v19 = vadd.f32 %v8214_v10, %v2081_v25 }
 0x72f   : > { %v10172_v18 = vadd.f32 %v8832_v11, %v2082_v19 }
 0x731   : > { %v2113_v53 = vsel %vm372_vm0, %v10172_v18, 0.0 }
 0x732   : > { %2114 = vadd.xlane.f32.xlu1 %v2113_v53 }
 0x734   : > { %v2083_v48 = vpop.f32.mrf.mxu3 }
 0x735   : > { %v2084_v16 = vadd.f32 %v8214_v10, %v2083_v48 }
 0x737   : > { %v10177_v41 = vadd.f32 %v8833_v2, %v2084_v16  ;;  %v7721_v16 = vld [vmem:[%s12634_s7 + $0x8] sm:$0xff] }
 0x738   : > { %2335 = vmatpush.bf16.msra.mxu0 %v7721_v16 }
 0x739   : > { %v2116_v23 = vsel %vm372_vm0, %v10177_v41, 0.0 }
 0x73a   : > { %2117 = vadd.xlane.f32.xlu2 %v2116_v23 }
 0x73c   : > { %v2086_v35 = vpop.f32.mrf.mxu3 }
 0x73d   : > { %v2087_v4 = vadd.f32 %v8214_v10, %v2086_v35 }
 0x73f   : > { %v10182_v24 = vadd.f32 %v8834_v58, %v2087_v4  ;;  %v7720_v4 = vld [vmem:[%s12634_s7] sm:$0xff] }
 0x740   : > { %2336 = vmatpush.bf16.msra.mxu0 %v7720_v4 }
 0x741   : > { %v2119_v9 = vsel %vm372_vm0, %v10182_v24, 0.0 }
 0x742   : > { %2120 = vadd.xlane.f32.xlu2 %v2119_v9 }
 0x744   : > { %v2088_v60 = vpop.f32.mrf.mxu3 }
 0x745   : > { %v2089_v27 = vadd.f32 %v8214_v10, %v2088_v60 }
 0x747   : > { %v10195_v8 = vadd.f32 %v8835_v56, %v2089_v27 }
 0x749   : > { %v2122_v20 = vsel %vm372_vm0, %v10195_v8, 0.0 }
 0x760   : > { %v2103_v47 = vpop.xlane.xlu0 %2102 }
 0x761   : > { %v2125_v42 = vmul.f32 %v2103_v47, %v8994_v34 }
 0x763   : > { %v10188_v49 = vsub.f32 %v10152_v29, %v2125_v42 }
 0x765   : > { %v2141_v51 = vmul.f32 %v10188_v49, %v10188_v49 }
 0x767   : > { %v2149_v14 = vsel %vm372_vm0, %v2141_v51, 0.0 }
 0x768   : > { %v2106_v6 = vpop.xlane.xlu1 %2105  ;;  %2150 = vadd.xlane.f32.xlu0 %v2149_v14 }
 0x769   : > { %v2126_v13 = vmul.f32 %v2106_v6, %v8994_v34 }
 0x76b   : > { %v10198_v12 = vsub.f32 %v10157_v52, %v2126_v13 }
 0x76d   : > { %v2142_v17 = vmul.f32 %v10198_v12, %v10198_v12 }
 0x76f   : > { %v2152_v37 = vsel %vm372_vm0, %v2142_v17, 0.0 }
 0x770   : > { %2153 = vadd.xlane.f32.xlu1 %v2152_v37  ;;  %2123 = vadd.xlane.f32.xlu0 %v2122_v20 }
 0x78a   : > { %v2109_v33 = vpop.xlane.xlu2 %2108 }
 0x78b   : > { %v2127_v40 = vmul.f32 %v2109_v33, %v8994_v34 }
 0x78d   : > { %v10207_v28 = vsub.f32 %v10162_v0, %v2127_v40 }
 0x78f   : > { %v2143_v10 = vmul.f32 %v10207_v28, %v10207_v28 }
 0x791   : > { %v2155_v26 = vsel %vm372_vm0, %v2143_v10, 0.0 }
 0x792   : > { %2156 = vadd.xlane.f32.xlu1 %v2155_v26  ;;  %v2112_v50 = vpop.xlane.xlu0 %2111 }
 0x793   : > { %v2128_v22 = vmul.f32 %v2112_v50, %v8994_v34 }
 0x795   : > { %v10214_v45 = vsub.f32 %v10167_v54, %v2128_v22 }
 0x797   : > { %v2144_v61 = vmul.f32 %v10214_v45, %v10214_v45 }
 0x799   : > { %v2158_v3 = vsel %vm372_vm0, %v2144_v61, 0.0  ;;  %v10258_v61 = vld [vmem:[%s12630_s3 + $0x2] ss:$0 sm:$0xff] }
 0x79a   : > { %2159 = vadd.xlane.f32.xlu2 %v2158_v3 }
 0x7a5   : > { %v2115_v30 = vpop.xlane.xlu1 %2114 }
 0x7a6   : > { %v2129_v57 = vmul.f32 %v2115_v30, %v8994_v34 }
 0x7a8   : > { %v10221_v62 = vsub.f32 %v10172_v18, %v2129_v57 }
 0x7aa   : > { %v2145_v55 = vmul.f32 %v10221_v62, %v10221_v62 }
 0x7ac   : > { %v2161_v21 = vsel %vm372_vm0, %v2145_v55, 0.0  ;;  %v10264_v55 = vld [vmem:[%s12630_s3 + $0x3] ss:$0 sm:$0xff] }
 0x7ad   : > { %v2118_v63 = vpop.xlane.xlu2 %2117  ;;  %2162 = vadd.xlane.f32.xlu0 %v2161_v21 }
 0x7ae   : > { %v2130_v39 = vmul.f32 %v2118_v63, %v8994_v34 }
 0x7b0   : > { %v10228_v15 = vsub.f32 %v10177_v41, %v2130_v39 }
 0x7b2   : > { %v2146_v36 = vmul.f32 %v10228_v15, %v10228_v15 }
 0x7b4   : > { %v2164_v44 = vsel %vm372_vm0, %v2146_v36, 0.0 }
 0x7b5   : > { %v2121_v25 = vpop.xlane.xlu2 %2120  ;;  %2165 = vadd.xlane.f32.xlu1 %v2164_v44 }
 0x7b6   : > { %v2131_v19 = vmul.f32 %v2121_v25, %v8994_v34 }
 0x7b8   : > { %v10235_v11 = vsub.f32 %v10182_v24, %v2131_v19 }
 0x7ba   : > { %v2147_v53 = vmul.f32 %v10235_v11, %v10235_v11 }
 0x7bc   : > { %v2167_v48 = vsel %vm372_vm0, %v2147_v53, 0.0 }
 0x7bd   : > { %2168 = vadd.xlane.f32.xlu2 %v2167_v48 }
 0x7db   : > { %v2151_v2 = vpop.xlane.xlu0 %2150 }
 0x7dc   : > { %v2173_v23 = vmul.f32 %v2151_v2, %v8994_v34 }
 0x7de   : > { %v2181_v35 = vadd.f32 1e-05, %v2173_v23 }
 0x7e0   : > { %8396 = vrsqrt.f32 %v2181_v35  ;;  %vm2195_vm10 = vweird.f32 %v2181_v35 }
 0x7e3   : > { %v2154_v58 = vpop.xlane.xlu1 %2153  ;;  %v2124_v9 = vpop.xlane.xlu0 %2123 }
 0x7e4   : > { %v2174_v47 = vmul.f32 %v2154_v58, %v8994_v34  ;;  %v2132_v42 = vmul.f32 %v2124_v9, %v8994_v34 }
 0x7e6   : > { %v8397_v60 = vpop.eup %8396  ;;  %v2182_v51 = vadd.f32 1e-05, %v2174_v47  ;;  %v10250_v27 = vsub.f32 %v10195_v8, %v2132_v42 }
 0x7e7   : > { %v2190_v14 = vmul.f32 %v8397_v60, %v2181_v35  ;;  %vm2196_vm9 = vweird.f32 %v8397_v60 }
 0x7e8   : > { %8398 = vrsqrt.f32 %v2182_v51  ;;  %v2148_v6 = vmul.f32 %v10250_v27, %v10250_v27  ;;  %vm2197_vm11 = vmor %vm2195_vm10, %vm2196_vm9  ;;  %vm2205_vm13 = vweird.f32 %v2182_v51 }
 0x7e9   : > { %v2191_v13 = vmul.f32 %v8397_v60, %v2190_v14 }
 0x7ea   : > { %v2170_v56 = vsel %vm372_vm0, %v2148_v6, 0.0 }
 0x7eb   : > { %v2192_v17 = vmul.f32 0.5, %v2191_v13  ;;  %2171 = vadd.xlane.f32.xlu0 %v2170_v56 }
 0x7ed   : > { %v2193_v37 = vsub.f32 1.5, %v2192_v17 }
 0x7ee   : > { %v8399_v20 = vpop.eup %8398 }
 0x7ef   : > { %v2194_v33 = vmul.f32 %v8397_v60, %v2193_v37  ;;  %v2200_v40 = vmul.f32 %v8399_v20, %v2182_v51  ;;  %vm2206_vm12 = vweird.f32 %v8399_v20 }
 0x7f0   : > { %vm2207_vm14 = vmor %vm2205_vm13, %vm2206_vm12 }
 0x7f1   : > { %v2201_v10 = vmul.f32 %v8399_v20, %v2200_v40  ;;  %v2198_v26 = vsel %vm2197_vm11, %v8397_v60, %v2194_v33 }
 0x7f2   : > { %v2269_v3 = vmul.f32 %v2198_v26, %v10188_v49 }
 0x7f3   : > { %v2202_v50 = vmul.f32 0.5, %v2201_v10 }
 0x7f4   : > { %v2278_v21 = vmul.f32 %v10258_v61, %v2269_v3 }
 0x7f5   : > { %v2203_v22 = vsub.f32 1.5, %v2202_v50 }
 0x7f6   : > { %v2287_v36 = vadd.f32 %v10264_v55, %v2278_v21 }
 0x7f7   : > { %v2204_v30 = vmul.f32 %v8399_v20, %v2203_v22 }
 0x7f9   : > { %v2208_v57 = vsel %vm2207_vm14, %v8399_v20, %v2204_v30 }
 0x7fa   : > { %v2270_v63 = vmul.f32 %v2208_v57, %v10198_v12 }
 0x7fc   : > { %v2279_v39 = vmul.f32 %v10258_v61, %v2270_v63 }
 0x7fe   : > { %v2288_v44 = vadd.f32 %v10264_v55, %v2279_v39 }
 0x800   : > { %v2295_v49 = vpack.c.bf16 %v2288_v44, %v2287_v36 }
 0x802   : > { %7302 = vmatmul.msk.bf16.vlgmr.msra.gmra.mxu0 %vm372_vm0, %v2295_v49 }
 0x805   : > { %v2157_v25 = vpop.xlane.xlu1 %2156 }
 0x806   : > { %v2175_v19 = vmul.f32 %v2157_v25, %v8994_v34 }
 0x808   : > { %v2183_v53 = vadd.f32 1e-05, %v2175_v19 }
 0x80a   : > { %8400 = vrsqrt.f32 %v2183_v53  ;;  %vm2215_vm1 = vweird.f32 %v2183_v53 }
 0x80d   : > { %v2160_v48 = vpop.xlane.xlu2 %2159 }
 0x80e   : > { %v2176_v16 = vmul.f32 %v2160_v48, %v8994_v34 }
 0x810   : > { %v8401_v2 = vpop.eup %8400  ;;  %v2184_v23 = vadd.f32 1e-05, %v2176_v16 }
 0x811   : > { %v2210_v12 = vmul.f32 %v8401_v2, %v2183_v53  ;;  %vm2216_vm15 = vweird.f32 %v8401_v2 }
 0x812   : > { %8402 = vrsqrt.f32 %v2184_v23  ;;  %vm2217_vm2 = vmor %vm2215_vm1, %vm2216_vm15  ;;  %vm2225_vm4 = vweird.f32 %v2184_v23 }
 0x813   : > { %v2211_v35 = vmul.f32 %v8401_v2, %v2210_v12 }
 0x815   : > { %v2212_v4 = vmul.f32 0.5, %v2211_v35 }
 0x817   : > { %v2213_v58 = vsub.f32 1.5, %v2212_v4 }
 0x818   : > { %v8403_v9 = vpop.eup %8402 }
 0x819   : > { %v2214_v47 = vmul.f32 %v8401_v2, %v2213_v58  ;;  %v2220_v42 = vmul.f32 %v8403_v9, %v2184_v23  ;;  %vm2226_vm3 = vweird.f32 %v8403_v9 }
 0x81a   : > { %vm2227_vm9 = vmor %vm2225_vm4, %vm2226_vm3 }
 0x81b   : > { %v2221_v60 = vmul.f32 %v8403_v9, %v2220_v42  ;;  %v2218_v51 = vsel %vm2217_vm2, %v8401_v2, %v2214_v47 }
 0x81c   : > { %v2271_v13 = vmul.f32 %v2218_v51, %v10207_v28 }
 0x81d   : > { %v2222_v14 = vmul.f32 0.5, %v2221_v60 }
 0x81e   : > { %v2280_v10 = vmul.f32 %v10258_v61, %v2271_v13 }
 0x81f   : > { %v2223_v6 = vsub.f32 1.5, %v2222_v14 }
 0x820   : > { %v2163_v56 = vpop.xlane.xlu0 %2162  ;;  %v2289_v22 = vadd.f32 %v10264_v55, %v2280_v10 }
 0x821   : > { %v2224_v17 = vmul.f32 %v8403_v9, %v2223_v6  ;;  %v2177_v37 = vmul.f32 %v2163_v56, %v8994_v34 }
 0x823   : > { %v2228_v20 = vsel %vm2227_vm9, %v8403_v9, %v2224_v17  ;;  %v2185_v33 = vadd.f32 1e-05, %v2177_v37 }
 0x824   : > { %v2272_v40 = vmul.f32 %v2228_v20, %v10214_v45 }
 0x825   : > { %8404 = vrsqrt.f32 %v2185_v33  ;;  %vm2235_vm11 = vweird.f32 %v2185_v33 }
 0x826   : > { %v2281_v26 = vmul.f32 %v10258_v61, %v2272_v40 }
 0x828   : > { %v2166_v50 = vpop.xlane.xlu1 %2165  ;;  %v2290_v28 = vadd.f32 %v10264_v55, %v2281_v26 }
 0x829   : > { %v2178_v3 = vmul.f32 %v2166_v50, %v8994_v34 }
 0x82a   : > { %v2296_v30 = vpack.c.bf16 %v2290_v28, %v2289_v22 }
 0x82b   : > { %v8405_v57 = vpop.eup %8404  ;;  %v2186_v21 = vadd.f32 1e-05, %v2178_v3 }
 0x82c   : > { %v2230_v63 = vmul.f32 %v8405_v57, %v2185_v33  ;;  %7303 = vmatmul.msk.bf16.gmra.mxu0 %vm372_vm0, %v2296_v30  ;;  %vm2236_vm10 = vweird.f32 %v8405_v57 }
 0x82d   : > { %8406 = vrsqrt.f32 %v2186_v21  ;;  %vm2237_vm12 = vmor %vm2235_vm11, %vm2236_vm10  ;;  %vm2245_vm14 = vweird.f32 %v2186_v21 }
 0x82e   : > { %v2231_v45 = vmul.f32 %v8405_v57, %v2230_v63 }
 0x830   : > { %v2232_v39 = vmul.f32 0.5, %v2231_v45  ;;  %v2169_v60 = vpop.xlane.xlu2 %2168 }
 0x832   : > { %v2233_v36 = vsub.f32 1.5, %v2232_v39 }
 0x833   : > { %v8407_v44 = vpop.eup %8406 }
 0x834   : > { %v2234_v49 = vmul.f32 %v8405_v57, %v2233_v36  ;;  %v2240_v25 = vmul.f32 %v8407_v44, %v2186_v21  ;;  %vm2246_vm13 = vweird.f32 %v8407_v44 }
 0x835   : > { %vm2247_vm15 = vmor %vm2245_vm14, %vm2246_vm13 }
 0x836   : > { %v2241_v19 = vmul.f32 %v8407_v44, %v2240_v25  ;;  %v2238_v53 = vsel %vm2237_vm12, %v8405_v57, %v2234_v49  ;;  %v10301_v49 = vld [vmem:[%s12630_s3 + $0x8] ss:$0 sm:$0xff] }
 0x837   : > { %v2273_v2 = vmul.f32 %v2238_v53, %v10221_v62  ;;  %v2179_v62 = vmul.f32 %v2169_v60, %v8994_v34 }
 0x838   : > { %v2242_v48 = vmul.f32 0.5, %v2241_v19 }
 0x839   : > { %v2282_v4 = vmul.f32 %v10258_v61, %v2273_v2  ;;  %v2187_v51 = vadd.f32 1e-05, %v2179_v62 }
 0x83a   : > { %v2243_v16 = vsub.f32 1.5, %v2242_v48 }
 0x83b   : > { %v2291_v9 = vadd.f32 %v10264_v55, %v2282_v4  ;;  %8408 = vrsqrt.f32 %v2187_v51  ;;  %vm2255_vm2 = vweird.f32 %v2187_v51 }
 0x83c   : > { %v2244_v23 = vmul.f32 %v8407_v44, %v2243_v16 }
 0x83e   : > { %v2248_v12 = vsel %vm2247_vm15, %v8407_v44, %v2244_v23 }
 0x83f   : > { %v2274_v35 = vmul.f32 %v2248_v12, %v10228_v15  ;;  %v7729_v12 = vld [vmem:[%s12635_s8 + $0x38] sm:$0xff] }
 0x840   : > { %2748 = vmatpush.bf16.msrb.mxu1 %v7729_v12 }
 0x841   : > { %v2283_v58 = vmul.f32 %v10258_v61, %v2274_v35  ;;  %v8409_v14 = vpop.eup %8408 }
 0x842   : > { %v2250_v6 = vmul.f32 %v8409_v14, %v2187_v51  ;;  %vm2256_vm1 = vweird.f32 %v8409_v14 }
 0x843   : > { %v2292_v47 = vadd.f32 %v10264_v55, %v2283_v58  ;;  %vm2257_vm3 = vmor %vm2255_vm2, %vm2256_vm1 }
 0x844   : > { %v2251_v13 = vmul.f32 %v8409_v14, %v2250_v6 }
 0x845   : > { %v2297_v42 = vpack.c.bf16 %v2292_v47, %v2291_v9  ;;  %v7728_v47 = vld [vmem:[%s12635_s8 + $0x30] sm:$0xff] }
 0x846   : > { %v2252_v37 = vmul.f32 0.5, %v2251_v13  ;;  %2749 = vmatpush.bf16.msrb.mxu1 %v7728_v47 }
 0x847   : > { %7304 = vmatmul.msk.bf16.gmra.mxu0 %vm372_vm0, %v2297_v42 }
 0x848   : > { %v2253_v20 = vsub.f32 1.5, %v2252_v37 }
 0x84a   : > { %v2254_v40 = vmul.f32 %v8409_v14, %v2253_v20 }
 0x84c   : > { %v2258_v50 = vsel %vm2257_vm3, %v8409_v14, %v2254_v40  ;;  %v7727_v14 = vld [vmem:[%s12635_s8 + $0x28] sm:$0xff] }
 0x84d   : > { %v2275_v3 = vmul.f32 %v2258_v50, %v10235_v11  ;;  %2750 = vmatpush.bf16.msrb.mxu1 %v7727_v14 }
 0x84f   : > { %v2284_v63 = vmul.f32 %v10258_v61, %v2275_v3 }
 0x851   : > { %v2293_v39 = vadd.f32 %v10264_v55, %v2284_v63 }
 0x85e   : > { %v2172_v15 = vpop.xlane.xlu0 %2171 }
 0x85f   : > { %v2180_v56 = vmul.f32 %v2172_v15, %v8994_v34 }
 0x861   : > { %v2188_v17 = vadd.f32 1e-05, %v2180_v56 }
 0x863   : > { %8410 = vrsqrt.f32 %v2188_v17  ;;  %vm2265_vm9 = vweird.f32 %v2188_v17 }
 0x869   : > { %v8411_v33 = vpop.eup %8410 }
 0x86a   : > { %v2260_v10 = vmul.f32 %v8411_v33, %v2188_v17  ;;  %vm2266_vm4 = vweird.f32 %v8411_v33 }
 0x86b   : > { %vm2267_vm10 = vmor %vm2265_vm9, %vm2266_vm4 }
 0x86c   : > { %v2261_v26 = vmul.f32 %v8411_v33, %v2260_v10 }
 0x86e   : > { %v2262_v22 = vmul.f32 0.5, %v2261_v26 }
 0x870   : > { %v2263_v28 = vsub.f32 1.5, %v2262_v22 }
 0x872   : > { %v2264_v30 = vmul.f32 %v8411_v33, %v2263_v28 }
 0x874   : > { %v2268_v57 = vsel %vm2267_vm10, %v8411_v33, %v2264_v30  ;;  %v7726_v33 = vld [vmem:[%s12635_s8 + $0x20] sm:$0xff]  ;;  %v7725_v30 = vld [vmem:[%s12635_s8 + $0x18] sm:$0xff] }
 0x875   : > { %v2276_v21 = vmul.f32 %v2268_v57, %v10250_v27  ;;  %2751 = vmatpush.bf16.msrb.mxu1 %v7726_v33 }
 0x877   : > { %v2285_v45 = vmul.f32 %v10258_v61, %v2276_v21 }
 0x879   : > { %v2294_v36 = vadd.f32 %v10264_v55, %v2285_v45  ;;  %2752 = vmatpush.bf16.msrb.mxu1 %v7725_v30 }
 0x87b   : > { %v2298_v44 = vpack.c.bf16 %v2294_v36, %v2293_v39 }
 0x87d   : > { %7305 = vmatmul.msk.bf16.gmra.mxu0 %vm372_vm0, %v2298_v44 }
 0x87f   : > { %v2338_v11 = vpop.f32.mrf.mxu0 }
 0x880   : > { %v10305_v25 = vadd.f32 %v10301_v49, %v2338_v11 }
 0x882   : > { %v10308_v27 = vmul.f32 0.70710677, %v10305_v25 }
 0x884   : > { %v2374_v61 = vand.u32 2147483647, %v10308_v27  ;;  %vm2638_vm4 = vcmp.lt.f32.partialorder %v10308_v27, 0.0 }
 0x886   : > { %v2382_v19 = vmul.f32 0.3275911, %v2374_v61  ;;  %v2590_v17 = vsub.f32 0.0, %v2374_v61 }
 0x887   : > { %v2340_v53 = vpop.f32.mrf.mxu0 }
 0x888   : > { %v2390_v55 = vadd.f32 1.0, %v2382_v19  ;;  %v10312_v48 = vadd.f32 %v10301_v49, %v2340_v53  ;;  %v2598_v50 = vmul.f32 %v2590_v17, %v2374_v61  ;;  %v7724_v61 = vld [vmem:[%s12635_s8 + $0x10] sm:$0xff] }
 0x889   : > { %2753 = vmatpush.bf16.msrb.mxu1 %v7724_v61 }
 0x88a   : > { %8412 = vrcp.f32 %v2390_v55  ;;  %v10315_v16 = vmul.f32 0.70710677, %v10312_v48  ;;  %v2409_v42 = vand.u32 2147483648, %v2390_v55  ;;  %v2407_v62 = vand.u32 2147483647, %v2390_v55 }
 0x88b   : > { %vm2403_vm12 = vweird.f32 %v2390_v55  ;;  %v2606_v45 = vmul.f32 1.442695, %v2598_v50 }
 0x88c   : > { %v2375_v2 = vand.u32 2147483647, %v10315_v16  ;;  %v2410_v6 = vor.u32 1.1754944e-38, %v2409_v42  ;;  %vm2408_vm14 = vcmp.eq.f32.partialorder %v2407_v62, 8.507059e+37  ;;  %vm2639_vm9 = vcmp.lt.f32.partialorder %v10315_v16, 0.0 }
 0x88e   : > { %v2383_v23 = vmul.f32 0.3275911, %v2375_v2  ;;  %v2591_v11 = vsub.f32 0.0, %v2375_v2 }
 0x890   : > { %v8413_v35 = vpop.eup %8412  ;;  %v2391_v58 = vadd.f32 1.0, %v2383_v23  ;;  %v2599_v12 = vmul.f32 %v2591_v11, %v2375_v2 }
 0x891   : > { %v2399_v4 = vmul.f32 %v8413_v35, %v2390_v55  ;;  %vm2404_vm11 = vweird.f32 %v8413_v35 }
 0x892   : > { %8414 = vrcp.f32 %v2391_v58  ;;  %vm2405_vm13 = vmor %vm2403_vm12, %vm2404_vm11  ;;  %v2424_v26 = vand.u32 2147483648, %v2391_v58  ;;  %v2422_v28 = vand.u32 2147483647, %v2391_v58  ;;  %vm2418_vm1 = vweird.f32 %v2391_v58 }
 0x893   : > { %v2400_v9 = vsub.f32 1.0, %v2399_v4  ;;  %8416 = vpow2.f32 %v2606_v45  ;;  %v2608_v62 = vmul.f32 1.442695, %v2599_v12 }
 0x894   : > { %v2425_v63 = vor.u32 1.1754944e-38, %v2424_v26  ;;  %vm2423_vm3 = vcmp.eq.f32.partialorder %v2422_v28, 8.507059e+37 }
 0x895   : > { %v2401_v60 = vmul.f32 %v8413_v35, %v2400_v9  ;;  %8418 = vpow2.f32 %v2608_v62 }
 0x897   : > { %v2402_v51 = vadd.f32 %v8413_v35, %v2401_v60 }
 0x898   : > { %v8415_v13 = vpop.eup %8414 }
 0x899   : > { %v2406_v15 = vsel %vm2405_vm13, %v8413_v35, %v2402_v51  ;;  %v2414_v37 = vmul.f32 %v8415_v13, %v2391_v58  ;;  %vm2419_vm15 = vweird.f32 %v8415_v13  ;;  %v7723_v35 = vld [vmem:[%s12635_s8 + $0x8] sm:$0xff]  ;;  %v7722_v51 = vld [vmem:[%s12635_s8] sm:$0xff]  ;;  %v8417_v14 = vpop.eup %8416 }
 0x89a   : > { %v2411_v56 = vsel %vm2408_vm14, %v2410_v6, %v2406_v15  ;;  %vm2420_vm2 = vmor %vm2418_vm1, %vm2419_vm15  ;;  %2754 = vmatpush.bf16.msrb.mxu1 %v7723_v35 }
 0x89b   : > { %v2518_v20 = vmul.f32 1.0614054, %v2411_v56  ;;  %v2415_v40 = vsub.f32 1.0, %v2414_v37  ;;  %v8419_v28 = vpop.eup %8418 }
 0x89d   : > { %v2526_v10 = vadd.f32 -1.4531521, %v2518_v20  ;;  %v2416_v22 = vmul.f32 %v8415_v13, %v2415_v40 }
 0x89e   : > { %2755 = vmatpush.bf16.msrb.mxu1 %v7722_v51 }
 0x89f   : > { %v2534_v3 = vmul.f32 %v2526_v10, %v2411_v56  ;;  %v2417_v57 = vadd.f32 %v8415_v13, %v2416_v22 }
 0x8a1   : > { %v2542_v21 = vadd.f32 1.4214138, %v2534_v3  ;;  %v2421_v39 = vsel %vm2420_vm2, %v8415_v13, %v2417_v57 }
 0x8a2   : > { %v2426_v44 = vsel %vm2423_vm3, %v2425_v63, %v2421_v39 }
 0x8a3   : > { %v2550_v36 = vmul.f32 %v2542_v21, %v2411_v56  ;;  %v2519_v19 = vmul.f32 1.0614054, %v2426_v44 }
 0x8a5   : > { %v2558_v53 = vadd.f32 -0.28449672, %v2550_v36  ;;  %v2527_v55 = vadd.f32 -1.4531521, %v2519_v19 }
 0x8a7   : > { %v2566_v23 = vmul.f32 %v2558_v53, %v2411_v56  ;;  %v2535_v4 = vmul.f32 %v2527_v55, %v2426_v44  ;;  %v2358_v53 = vmul.f32 0.5, %v10305_v25  ;;  %v2359_v55 = vmul.f32 0.5, %v10312_v48 }
 0x8a9   : > { %v2574_v58 = vadd.f32 0.2548296, %v2566_v23  ;;  %v2343_v9 = vpop.f32.mrf.mxu0  ;;  %v2543_v47 = vadd.f32 1.4214138, %v2535_v4 }
 0x8aa   : > { %v10340_v42 = vadd.f32 %v10301_v49, %v2343_v9 }
 0x8ab   : > { %v2582_v60 = vmul.f32 %v2574_v58, %v2411_v56  ;;  %v2551_v2 = vmul.f32 %v2543_v47, %v2426_v44 }
 0x8ac   : > { %v10346_v6 = vmul.f32 0.70710677, %v10340_v42 }
 0x8ad   : > { %v2622_v13 = vmul.f32 %v8417_v14, %v2582_v60  ;;  %v2559_v15 = vadd.f32 -0.28449672, %v2551_v2 }
 0x8ae   : > { %v2376_v17 = vand.u32 2147483647, %v10346_v6 }
 0x8af   : > { %v2630_v37 = vsub.f32 1.0, %v2622_v13  ;;  %v2567_v20 = vmul.f32 %v2559_v15, %v2426_v44 }
 0x8b0   : > { %v2384_v33 = vmul.f32 0.3275911, %v2376_v17  ;;  %v2592_v48 = vsub.f32 0.0, %v2376_v17 }
 0x8b1   : > { %v2345_v56 = vpop.f32.mrf.mxu0  ;;  %v2575_v40 = vadd.f32 0.2548296, %v2567_v20  ;;  %v2646_v50 = vsub.f32 0.0, %v2630_v37 }
 0x8b2   : > { %v2392_v10 = vadd.f32 1.0, %v2384_v33  ;;  %v10350_v26 = vadd.f32 %v10301_v49, %v2345_v56  ;;  %v2600_v56 = vmul.f32 %v2592_v48, %v2376_v17 }
 0x8b3   : > { %v2583_v22 = vmul.f32 %v2575_v40, %v2426_v44  ;;  %v2654_v57 = vsel %vm2638_vm4, %v2646_v50, %v2630_v37 }
 0x8b4   : > { %8420 = vrcp.f32 %v2392_v10  ;;  %v10353_v30 = vmul.f32 0.70710677, %v10350_v26  ;;  %v2662_v11 = vadd.f32 1.0, %v2654_v57  ;;  %v2437_v12 = vand.u32 2147483647, %v2392_v10 }
 0x8b5   : > { %v2623_v3 = vmul.f32 %v8419_v28, %v2583_v22  ;;  %v2439_v35 = vand.u32 2147483648, %v2392_v10  ;;  %vm2433_vm11 = vweird.f32 %v2392_v10 }
 0x8b6   : > { %v10357_v63 = vand.u32 2147483647, %v10353_v30  ;;  %v2670_v4 = vmul.f32 %v2662_v11, %v2358_v53  ;;  %vm2438_vm13 = vcmp.eq.f32.partialorder %v2437_v12, 8.507059e+37 }
 0x8b7   : > { %v2631_v21 = vsub.f32 1.0, %v2623_v3  ;;  %v2440_v16 = vor.u32 1.1754944e-38, %v2439_v35 }
 0x8b8   : > { %v2385_v36 = vmul.f32 0.3275911, %v10357_v63  ;;  %v2593_v53 = vsub.f32 0.0, %v10357_v63 }
 0x8b9   : > { %v2647_v39 = vsub.f32 0.0, %v2631_v21 }
 0x8ba   : > { %v8421_v45 = vpop.eup %8420  ;;  %v2393_v19 = vadd.f32 1.0, %v2385_v36 }
 0x8bb   : > { %v2429_v44 = vmul.f32 %v8421_v45, %v2392_v10  ;;  %v2655_v61 = vsel %vm2639_vm9, %v2647_v39, %v2631_v21  ;;  %vm2434_vm10 = vweird.f32 %v8421_v45 }
 0x8bc   : > { %v2663_v27 = vadd.f32 1.0, %v2655_v61  ;;  %8422 = vrcp.f32 %v2393_v19  ;;  %vm2435_vm12 = vmor %vm2433_vm11, %vm2434_vm10  ;;  %v2452_v40 = vand.u32 2147483647, %v2393_v19  ;;  %v2454_v10 = vand.u32 2147483648, %v2393_v19 }
 0x8bd   : > { %v2430_v23 = vsub.f32 1.0, %v2429_v44  ;;  %vm2448_vm15 = vweird.f32 %v2393_v19  ;;  %vm2640_vm11 = vcmp.lt.f32.partialorder %v10346_v6, 0.0  ;;  %v2361_v6 = vmul.f32 0.5, %v10350_v26 }
 0x8be   : > { %v2671_v58 = vmul.f32 %v2663_v27, %v2359_v55  ;;  %v2455_v39 = vor.u32 1.1754944e-38, %v2454_v10  ;;  %vm2453_vm2 = vcmp.eq.f32.partialorder %v2452_v40, 8.507059e+37 }
 0x8bf   : > { %v2431_v9 = vmul.f32 %v8421_v45, %v2430_v23 }
 0x8c0   : > { %v2678_v47 = vpack.c.bf16 %v2671_v58, %v2670_v4  ;;  %v2601_v4 = vmul.f32 %v2593_v53, %v10357_v63 }
 0x8c1   : > { %v2432_v60 = vadd.f32 %v8421_v45, %v2431_v9 }
 0x8c2   : > { %2756 = vmatmul.bf16.vlgmr.msrb.gmra.mxu1 %v2678_v47  ;;  %v8423_v25 = vpop.eup %8422 }
 0x8c3   : > { %v2436_v62 = vsel %vm2435_vm12, %v8421_v45, %v2432_v60  ;;  %v2444_v13 = vmul.f32 %v8423_v25, %v2393_v19  ;;  %vm2449_vm14 = vweird.f32 %v8423_v25  ;;  %v2610_v45 = vmul.f32 1.442695, %v2600_v56 }
 0x8c4   : > { %v2441_v51 = vsel %vm2438_vm13, %v2440_v16, %v2436_v62  ;;  %v2348_v14 = vpop.f32.mrf.mxu0  ;;  %vm2450_vm1 = vmor %vm2448_vm15, %vm2449_vm14  ;;  %vm2641_vm13 = vcmp.lt.f32.partialorder %v10353_v30, 0.0 }
 0x8c5   : > { %v2520_v2 = vmul.f32 1.0614054, %v2441_v51  ;;  %v10364_v15 = vadd.f32 %v10301_v49, %v2348_v14  ;;  %v2445_v20 = vsub.f32 1.0, %v2444_v13  ;;  %v2612_v14 = vmul.f32 1.442695, %v2601_v4 }
 0x8c7   : > { %v2528_v37 = vadd.f32 -1.4531521, %v2520_v2  ;;  %v10367_v33 = vmul.f32 0.70710677, %v10364_v15  ;;  %v2446_v22 = vmul.f32 %v8423_v25, %v2445_v20 }
 0x8c9   : > { %v2536_v50 = vmul.f32 %v2528_v37, %v2441_v51  ;;  %v10370_v28 = vand.u32 2147483647, %v10367_v33  ;;  %v2447_v57 = vadd.f32 %v8423_v25, %v2446_v22 }
 0x8cb   : > { %v2544_v3 = vadd.f32 1.4214138, %v2536_v50  ;;  %v2386_v21 = vmul.f32 0.3275911, %v10370_v28  ;;  %v2451_v44 = vsel %vm2450_vm1, %v8423_v25, %v2447_v57  ;;  %v2594_v53 = vsub.f32 0.0, %v10370_v28 }
 0x8cc   : > { %v2350_v36 = vpop.f32.mrf.mxu0  ;;  %v2456_v61 = vsel %vm2453_vm2, %v2455_v39, %v2451_v44  ;;  %vm2642_vm2 = vcmp.lt.f32.partialorder %v10367_v33, 0.0 }
 0x8cd   : > { %v2552_v11 = vmul.f32 %v2544_v3, %v2441_v51  ;;  %v2394_v17 = vadd.f32 1.0, %v2386_v21  ;;  %v10375_v55 = vadd.f32 %v10301_v49, %v2350_v36  ;;  %v2521_v23 = vmul.f32 1.0614054, %v2456_v61 }
 0x8cf   : > { %v2560_v27 = vadd.f32 -0.28449672, %v2552_v11  ;;  %8424 = vrcp.f32 %v2394_v17  ;;  %v2529_v12 = vadd.f32 -1.4531521, %v2521_v23  ;;  %v10378_v35 = vmul.f32 0.70710677, %v10375_v55 }
 0x8d0   : > { %8426 = vpow2.f32 %v2610_v45  ;;  %v2469_v10 = vand.u32 2147483648, %v2394_v17  ;;  %v2467_v50 = vand.u32 2147483647, %v2394_v17  ;;  %vm2463_vm4 = vweird.f32 %v2394_v17 }
 0x8d1   : > { %v2568_v19 = vmul.f32 %v2560_v27, %v2441_v51  ;;  %v2537_v9 = vmul.f32 %v2529_v12, %v2456_v61  ;;  %v10382_v47 = vand.u32 2147483647, %v10378_v35 }
 0x8d2   : > { %v2470_v21 = vor.u32 1.1754944e-38, %v2469_v10  ;;  %vm2468_vm10 = vcmp.eq.f32.partialorder %v2467_v50, 8.507059e+37 }
 0x8d3   : > { %v2576_v58 = vadd.f32 0.2548296, %v2568_v19  ;;  %v2545_v62 = vadd.f32 1.4214138, %v2537_v9  ;;  %v2387_v25 = vmul.f32 0.3275911, %v10382_v47 }
 0x8d5   : > { %v8425_v60 = vpop.eup %8424  ;;  %v2584_v16 = vmul.f32 %v2576_v58, %v2441_v51  ;;  %v2553_v37 = vmul.f32 %v2545_v62, %v2456_v61  ;;  %v2395_v20 = vadd.f32 1.0, %v2387_v25 }
 0x8d6   : > { %v8427_v48 = vpop.eup %8426  ;;  %v2459_v2 = vmul.f32 %v8425_v60, %v2394_v17  ;;  %vm2464_vm3 = vweird.f32 %v8425_v60 }
 0x8d7   : > { %v2624_v13 = vmul.f32 %v8427_v48, %v2584_v16  ;;  %v2561_v40 = vadd.f32 -0.28449672, %v2553_v37  ;;  %8428 = vrcp.f32 %v2395_v20  ;;  %vm2465_vm9 = vmor %vm2463_vm4, %vm2464_vm3  ;;  %v2602_v16 = vmul.f32 %v2594_v53, %v10370_v28 }
 0x8d8   : > { %v2460_v56 = vsub.f32 1.0, %v2459_v2  ;;  %8430 = vpow2.f32 %v2612_v14  ;;  %v2360_v48 = vmul.f32 0.5, %v10340_v42  ;;  %vm2478_vm14 = vweird.f32 %v2395_v20 }
 0x8d9   : > { %v2632_v22 = vsub.f32 1.0, %v2624_v13  ;;  %v2569_v3 = vmul.f32 %v2561_v40, %v2456_v61  ;;  %v2614_v40 = vmul.f32 1.442695, %v2602_v16  ;;  %v2595_v42 = vsub.f32 0.0, %v10382_v47 }
 0x8da   : > { %v2461_v63 = vmul.f32 %v8425_v60, %v2460_v56  ;;  %vm2643_vm3 = vcmp.lt.f32.partialorder %v10378_v35, 0.0 }
 0x8db   : > { %v2577_v57 = vadd.f32 0.2548296, %v2569_v3  ;;  %v2648_v36 = vsub.f32 0.0, %v2632_v22  ;;  %8432 = vpow2.f32 %v2614_v40  ;;  %v2603_v26 = vmul.f32 %v2595_v42, %v10382_v47 }
 0x8dc   : > { %v2462_v51 = vadd.f32 %v8425_v60, %v2461_v63 }
 0x8dd   : > { %v8429_v39 = vpop.eup %8428  ;;  %v2585_v11 = vmul.f32 %v2577_v57, %v2456_v61  ;;  %v2656_v17 = vsel %vm2640_vm11, %v2648_v36, %v2632_v22  ;;  %v2482_v61 = vand.u32 2147483647, %v2395_v20 }
 0x8de   : > { %v2466_v45 = vsel %vm2465_vm9, %v8425_v60, %v2462_v51  ;;  %v8431_v27 = vpop.eup %8430  ;;  %v2474_v19 = vmul.f32 %v8429_v39, %v2395_v20  ;;  %v2484_v60 = vand.u32 2147483648, %v2395_v20  ;;  %vm2479_vm12 = vweird.f32 %v8429_v39 }
 0x8df   : > { %v2471_v44 = vsel %vm2468_vm10, %v2470_v21, %v2466_v45  ;;  %v2625_v12 = vmul.f32 %v8431_v27, %v2585_v11  ;;  %v2664_v2 = vadd.f32 1.0, %v2656_v17  ;;  %vm2480_vm15 = vmor %vm2478_vm14, %vm2479_vm12  ;;  %vm2483_vm1 = vcmp.eq.f32.partialorder %v2482_v61, 8.507059e+37 }
 0x8e0   : > { %v2522_v23 = vmul.f32 1.0614054, %v2471_v44  ;;  %v2475_v58 = vsub.f32 1.0, %v2474_v19  ;;  %v2485_v28 = vor.u32 1.1754944e-38, %v2484_v60 }
 0x8e1   : > { %v2633_v9 = vsub.f32 1.0, %v2625_v12  ;;  %v2672_v3 = vmul.f32 %v2664_v2, %v2360_v48 }
 0x8e2   : > { %v2530_v4 = vadd.f32 -1.4531521, %v2522_v23  ;;  %v2476_v25 = vmul.f32 %v8429_v39, %v2475_v58  ;;  %v2616_v23 = vmul.f32 1.442695, %v2603_v26 }
 0x8e3   : > { %v2649_v14 = vsub.f32 0.0, %v2633_v9 }
 0x8e4   : > { %v2538_v62 = vmul.f32 %v2530_v4, %v2471_v44  ;;  %v2477_v37 = vadd.f32 %v8429_v39, %v2476_v25  ;;  %8434 = vpow2.f32 %v2616_v23 }
 0x8e5   : > { %v2657_v56 = vsel %vm2641_vm13, %v2649_v14, %v2633_v9 }
 0x8e6   : > { %v2546_v13 = vadd.f32 1.4214138, %v2538_v62  ;;  %v2665_v10 = vadd.f32 1.0, %v2657_v56  ;;  %v2481_v50 = vsel %vm2480_vm15, %v8429_v39, %v2477_v37  ;;  %v8433_v39 = vpop.eup %8432  ;;  %v2362_v56 = vmul.f32 0.5, %v10364_v15 }
 0x8e7   : > { %v2486_v22 = vsel %vm2483_vm1, %v2485_v28, %v2481_v50 }
 0x8e8   : > { %v2554_v63 = vmul.f32 %v2546_v13, %v2471_v44  ;;  %v2673_v30 = vmul.f32 %v2665_v10, %v2361_v6  ;;  %v2523_v57 = vmul.f32 1.0614054, %v2486_v22  ;;  %v2363_v10 = vmul.f32 0.5, %v10375_v55 }
 0x8ea   : > { %v2562_v51 = vadd.f32 -0.28449672, %v2554_v63  ;;  %v2531_v20 = vadd.f32 -1.4531521, %v2523_v57  ;;  %v2679_v45 = vpack.c.bf16 %v2673_v30, %v2672_v3  ;;  %v8435_v25 = vpop.eup %8434 }
 0x8ec   : > { %v2570_v21 = vmul.f32 %v2562_v51, %v2471_v44  ;;  %v2539_v11 = vmul.f32 %v2531_v20, %v2486_v22  ;;  %2761 = vmatmul.bf16.gmra.mxu1 %v2679_v45 }
 0x8ee   : > { %v2578_v36 = vadd.f32 0.2548296, %v2570_v21  ;;  %v2547_v27 = vadd.f32 1.4214138, %v2539_v11 }
 0x8f0   : > { %v2586_v53 = vmul.f32 %v2578_v36, %v2471_v44  ;;  %v2555_v12 = vmul.f32 %v2547_v27, %v2486_v22 }
 0x8f2   : > { %v2626_v19 = vmul.f32 %v8433_v39, %v2586_v53  ;;  %v2563_v4 = vadd.f32 -0.28449672, %v2555_v12 }
 0x8f4   : > { %v2634_v58 = vsub.f32 1.0, %v2626_v19  ;;  %v2571_v17 = vmul.f32 %v2563_v4, %v2486_v22 }
 0x8f6   : > { %v2579_v9 = vadd.f32 0.2548296, %v2571_v17  ;;  %v2650_v16 = vsub.f32 0.0, %v2634_v58 }
 0x8f8   : > { %v2587_v60 = vmul.f32 %v2579_v9, %v2486_v22  ;;  %v2658_v48 = vsel %vm2642_vm2, %v2650_v16, %v2634_v58 }
 0x8f9   : > { %v2666_v37 = vadd.f32 1.0, %v2658_v48 }
 0x8fa   : > { %v2353_v62 = vpop.f32.mrf.mxu0  ;;  %v2627_v61 = vmul.f32 %v8435_v25, %v2587_v60 }
 0x8fb   : > { %v10394_v47 = vadd.f32 %v10301_v49, %v2353_v62  ;;  %v2674_v22 = vmul.f32 %v2666_v37, %v2362_v56 }
 0x8fc   : > { %v2635_v14 = vsub.f32 1.0, %v2627_v61 }
 0x8fd   : > { %v10398_v44 = vmul.f32 0.70710677, %v10394_v47 }
 0x8fe   : > { %v2651_v13 = vsub.f32 0.0, %v2635_v14 }
 0x8ff   : > { %v2380_v2 = vand.u32 2147483647, %v10398_v44  ;;  %vm2644_vm1 = vcmp.lt.f32.partialorder %v10398_v44, 0.0 }
 0x900   : > { %v2659_v40 = vsel %vm2643_vm3, %v2651_v13, %v2635_v14 }
 0x901   : > { %v2388_v6 = vmul.f32 0.3275911, %v2380_v2  ;;  %v2667_v63 = vadd.f32 1.0, %v2659_v40  ;;  %v2596_v39 = vsub.f32 0.0, %v2380_v2 }
 0x902   : > { %v2355_v28 = vpop.f32.mrf.mxu0 }
 0x903   : > { %v2396_v33 = vadd.f32 1.0, %v2388_v6  ;;  %v10405_v50 = vadd.f32 %v10301_v49, %v2355_v28  ;;  %v2675_v42 = vmul.f32 %v2667_v63, %v2363_v10  ;;  %v2604_v17 = vmul.f32 %v2596_v39, %v2380_v2 }
 0x905   : > { %8436 = vrcp.f32 %v2396_v33  ;;  %v10408_v3 = vmul.f32 0.70710677, %v10405_v50  ;;  %v2680_v30 = vpack.c.bf16 %v2675_v42, %v2674_v22  ;;  %v2499_v20 = vand.u32 2147483648, %v2396_v33 }
 0x906   : > { %v2497_v49 = vand.u32 2147483647, %v2396_v33  ;;  %vm2493_vm9 = vweird.f32 %v2396_v33  ;;  %v2618_v48 = vmul.f32 1.442695, %v2604_v17 }
 0x907   : > { %v2381_v35 = vand.u32 2147483647, %v10408_v3  ;;  %2766 = vmatmul.bf16.gmra.mxu1 %v2680_v30  ;;  %v2500_v36 = vor.u32 1.1754944e-38, %v2499_v20  ;;  %vm2645_vm2 = vcmp.lt.f32.partialorder %v10408_v3, 0.0 }
 0x908   : > { %vm2498_vm11 = vcmp.eq.f32.partialorder %v2497_v49, 8.507059e+37 }
 0x909   : > { %v2389_v15 = vmul.f32 0.3275911, %v2381_v35  ;;  %v2597_v6 = vsub.f32 0.0, %v2381_v35 }
 0x90b   : > { %v8437_v51 = vpop.eup %8436  ;;  %v2397_v21 = vadd.f32 1.0, %v2389_v15  ;;  %v2605_v10 = vmul.f32 %v2597_v6, %v2381_v35 }
 0x90c   : > { %v2489_v57 = vmul.f32 %v8437_v51, %v2396_v33  ;;  %vm2494_vm4 = vweird.f32 %v8437_v51 }
 0x90d   : > { %8438 = vrcp.f32 %v2397_v21  ;;  %vm2495_vm10 = vmor %vm2493_vm9, %vm2494_vm4  ;;  %v2514_v58 = vand.u32 2147483648, %v2397_v21  ;;  %v2512_v16 = vand.u32 2147483647, %v2397_v21  ;;  %vm2508_vm13 = vweird.f32 %v2397_v21 }
 0x90e   : > { %v2490_v55 = vsub.f32 1.0, %v2489_v57  ;;  %8440 = vpow2.f32 %v2618_v48  ;;  %v2620_v30 = vmul.f32 1.442695, %v2605_v10 }
 0x90f   : > { %v2515_v61 = vor.u32 1.1754944e-38, %v2514_v58  ;;  %vm2513_vm15 = vcmp.eq.f32.partialorder %v2512_v16, 8.507059e+37  ;;  %v8218_v16 = vld [vmem:[%s12630_s3 + $0x6] ss:$0 sm:$0xff] }
 0x910   : > { %v2491_v45 = vmul.f32 %v8437_v51, %v2490_v55  ;;  %8442 = vpow2.f32 %v2620_v30 }
 0x912   : > { %v2492_v26 = vadd.f32 %v8437_v51, %v2491_v45 }
 0x913   : > { %v8439_v11 = vpop.eup %8438 }
 0x914   : > { %v2496_v53 = vsel %vm2495_vm10, %v8437_v51, %v2492_v26  ;;  %v2504_v23 = vmul.f32 %v8439_v11, %v2397_v21  ;;  %vm2509_vm12 = vweird.f32 %v8439_v11  ;;  %v8441_v15 = vpop.eup %8440 }
 0x915   : > { %v2501_v27 = vsel %vm2498_vm11, %v2500_v36, %v2496_v53  ;;  %vm2510_vm14 = vmor %vm2508_vm13, %vm2509_vm12 }
 0x916   : > { %v2524_v19 = vmul.f32 1.0614054, %v2501_v27  ;;  %v2505_v12 = vsub.f32 1.0, %v2504_v23  ;;  %v8443_v36 = vpop.eup %8442 }
 0x918   : > { %v2532_v4 = vadd.f32 -1.4531521, %v2524_v19  ;;  %v2506_v9 = vmul.f32 %v8439_v11, %v2505_v12  ;;  %v2364_v19 = vmul.f32 0.5, %v10394_v47  ;;  %v2365_v12 = vmul.f32 0.5, %v10405_v50 }
 0x91a   : > { %v2540_v60 = vmul.f32 %v2532_v4, %v2501_v27  ;;  %v2507_v62 = vadd.f32 %v8439_v11, %v2506_v9 }
 0x91c   : > { %v2548_v25 = vadd.f32 1.4214138, %v2540_v60  ;;  %v2511_v14 = vsel %vm2510_vm14, %v8439_v11, %v2507_v62 }
 0x91d   : > { %v2516_v37 = vsel %vm2513_vm15, %v2515_v61, %v2511_v14 }
 0x91e   : > { %v2556_v13 = vmul.f32 %v2548_v25, %v2501_v27  ;;  %v2525_v56 = vmul.f32 1.0614054, %v2516_v37 }
 0x920   : > { %v2564_v40 = vadd.f32 -0.28449672, %v2556_v13  ;;  %v2533_v28 = vadd.f32 -1.4531521, %v2525_v56 }
 0x922   : > { %v2572_v2 = vmul.f32 %v2564_v40, %v2501_v27  ;;  %v2541_v63 = vmul.f32 %v2533_v28, %v2516_v37 }
 0x924   : > { %v2580_v33 = vadd.f32 0.2548296, %v2572_v2  ;;  %v2549_v22 = vadd.f32 1.4214138, %v2541_v63 }
 0x926   : > { %v2588_v42 = vmul.f32 %v2580_v33, %v2501_v27  ;;  %v2557_v51 = vmul.f32 %v2549_v22, %v2516_v37 }
 0x928   : > { %v2628_v57 = vmul.f32 %v8441_v15, %v2588_v42  ;;  %v2565_v21 = vadd.f32 -0.28449672, %v2557_v51 }
 0x92a   : > { %v2636_v55 = vsub.f32 1.0, %v2628_v57  ;;  %v2573_v20 = vmul.f32 %v2565_v21, %v2516_v37 }
 0x92c   : > { %v2581_v45 = vadd.f32 0.2548296, %v2573_v20  ;;  %v2652_v49 = vsub.f32 0.0, %v2636_v55 }
 0x92e   : > { %v2589_v26 = vmul.f32 %v2581_v45, %v2516_v37  ;;  %v2660_v35 = vsel %vm2644_vm1, %v2652_v49, %v2636_v55 }
 0x92f   : > { %v2668_v23 = vadd.f32 1.0, %v2660_v35 }
 0x930   : > { %v2629_v11 = vmul.f32 %v8443_v36, %v2589_v26 }
 0x931   : > { %v2676_v58 = vmul.f32 %v2668_v23, %v2364_v19 }
 0x932   : > { %v2637_v53 = vsub.f32 1.0, %v2629_v11 }
 0x934   : > { %v2653_v39 = vsub.f32 0.0, %v2637_v53 }
 0x936   : > { %v2661_v27 = vsel %vm2645_vm2, %v2653_v39, %v2637_v53 }
 0x937   : > { %v2669_v4 = vadd.f32 1.0, %v2661_v27 }
 0x939   : > { %v2677_v17 = vmul.f32 %v2669_v4, %v2365_v12 }
 0x93b   : > { %v2681_v9 = vpack.c.bf16 %v2677_v17, %v2676_v58 }
 0x93d   : > { %2771 = vmatmul.bf16.gmra.mxu1 %v2681_v9 }
 0x93f   : > { %v2757_v44 = vpop.f32.mrf.mxu1 }
 0x940   : > { %v2758_v60 = vadd.f32 %v8218_v16, %v2757_v44 }
 0x942   : > { %v10419_v62 = vadd.f32 %v2758_v60, %v10152_v29 }
 0x944   : > { %v2788_v3 = vsel %vm372_vm0, %v10419_v62, 0.0 }
 0x945   : > { %2789 = vadd.xlane.f32.xlu1 %v2788_v3 }
 0x947   : > { %v2759_v47 = vpop.f32.mrf.mxu1 }
 0x948   : > { %v2760_v50 = vadd.f32 %v8218_v16, %v2759_v47 }
 0x94a   : > { %v10424_v25 = vadd.f32 %v2760_v50, %v10157_v52 }
 0x94c   : > { %v2791_v61 = vsel %vm372_vm0, %v10424_v25, 0.0 }
 0x94d   : > { %2792 = vadd.xlane.f32.xlu2 %v2791_v61 }
 0x969   : > { %v2762_v48 = vpop.f32.mrf.mxu1 }
 0x96a   : > { %v2763_v14 = vadd.f32 %v8218_v16, %v2762_v48 }
 0x96c   : > { %v10429_v13 = vadd.f32 %v2763_v14, %v10162_v0 }
 0x96e   : > { %12668 = vst [vmem:[#allocation3_spill] sm:$0xff] %v10429_v13  ;;  %v2794_v29 = vsel %vm372_vm0, %v10429_v13, 0.0 }
 0x96f   : > { %2795 = vadd.xlane.f32.xlu0 %v2794_v29 }
 0x971   : > { %v2764_v37 = vpop.f32.mrf.mxu1 }
 0x972   : > { %v2765_v6 = vadd.f32 %v8218_v16, %v2764_v37 }
 0x974   : > { %v10434_v56 = vadd.f32 %v2765_v6, %v10167_v54 }
 0x976   : > { %12669 = vst [vmem:[#allocation4_spill] sm:$0xff] %v10434_v56  ;;  %v2797_v52 = vsel %vm372_vm0, %v10434_v56, 0.0 }
 0x977   : > { %2798 = vadd.xlane.f32.xlu1 %v2797_v52 }
 0x984   : > { %v2767_v40 = vpop.f32.mrf.mxu1 }
 0x985   : > { %v2768_v28 = vadd.f32 %v8218_v16, %v2767_v40 }
 0x987   : > { %v10439_v2 = vadd.f32 %v2768_v28, %v10172_v18 }
 0x989   : > { %12670 = vst [vmem:[#allocation5_spill] sm:$0xff] %v10439_v2  ;;  %v2800_v0 = vsel %vm372_vm0, %v10439_v2, 0.0 }
 0x98a   : > { %2801 = vadd.xlane.f32.xlu2 %v2800_v0 }
 0x98c   : > { %v2769_v10 = vpop.f32.mrf.mxu1 }
 0x98d   : > { %v2770_v63 = vadd.f32 %v8218_v16, %v2769_v10  ;;  %v7731_v10 = vld [vmem:[%s12631_s4 + $0x18] sm:$0xff] }
 0x98e   : > { %3023 = vmatpush.bf16.msrb.mxu2 %v7731_v10 }
 0x98f   : > { %v10444_v33 = vadd.f32 %v2770_v63, %v10177_v41 }
 0x991   : > { %12671 = vst [vmem:[#allocation6_spill] sm:$0xff] %v10444_v33  ;;  %v2803_v54 = vsel %vm372_vm0, %v10444_v33, 0.0 }
 0x992   : > { %2804 = vadd.xlane.f32.xlu0 %v2803_v54  ;;  %v7730_v54 = vld [vmem:[%s12631_s4 + $0x10] sm:$0xff] }
 0x993   : > { %3024 = vmatpush.bf16.msrb.mxu2 %v7730_v54 }
 0x9b8   : > { %v2790_v22 = vpop.xlane.xlu1 %2789 }
 0x9b9   : > { %v2812_v42 = vmul.f32 %v2790_v22, %v8994_v34 }
 0x9ba   : > { %v2772_v30 = vpop.f32.mrf.mxu1 }
 0x9bb   : > { %v10450_v18 = vsub.f32 %v10419_v62, %v2812_v42  ;;  %v2773_v15 = vadd.f32 %v8218_v16, %v2772_v30 }
 0x9bd   : > { %v10453_v51 = vadd.f32 %v2773_v15, %v10182_v24  ;;  %v2828_v57 = vmul.f32 %v10450_v18, %v10450_v18 }
 0x9bf   : > { %12672 = vst [vmem:[#allocation7_spill] sm:$0xff] %v10453_v51  ;;  %v2836_v41 = vsel %vm372_vm0, %v2828_v57, 0.0  ;;  %v2806_v21 = vsel %vm372_vm0, %v10453_v51, 0.0 }
 0x9c0   : > { %v2793_v55 = vpop.xlane.xlu2 %2792  ;;  %2837 = vadd.xlane.f32.xlu1 %v2836_v41  ;;  %2807 = vadd.xlane.f32.xlu0 %v2806_v21 }
 0x9c1   : > { %v2813_v20 = vmul.f32 %v2793_v55, %v8994_v34 }
 0x9c2   : > { %v2774_v45 = vpop.f32.mrf.mxu1 }
 0x9c3   : > { %v10462_v49 = vsub.f32 %v10424_v25, %v2813_v20  ;;  %v2775_v26 = vadd.f32 %v8218_v16, %v2774_v45 }
 0x9c5   : > { %v10465_v24 = vadd.f32 %v2775_v26, %v10195_v8  ;;  %v2829_v36 = vmul.f32 %v10462_v49, %v10462_v49 }
 0x9c7   : > { %12673 = vst [vmem:[#allocation8_spill] sm:$0xff] %v10465_v24  ;;  %v2839_v11 = vsel %vm372_vm0, %v2829_v36, 0.0  ;;  %v2809_v35 = vsel %vm372_vm0, %v10465_v24, 0.0 }
 0x9c8   : > { %2840 = vadd.xlane.f32.xlu2 %v2839_v11  ;;  %2810 = vadd.xlane.f32.xlu1 %v2809_v35 }
 0x9e2   : > { %v2796_v53 = vpop.xlane.xlu0 %2795 }
 0x9e3   : > { %v2814_v39 = vmul.f32 %v2796_v53, %v8994_v34 }
 0x9e5   : > { %v10474_v23 = vsub.f32 %v10429_v13, %v2814_v39 }
 0x9e7   : > { %v2830_v8 = vmul.f32 %v10474_v23, %v10474_v23 }
 0x9e9   : > { %v2842_v27 = vsel %vm372_vm0, %v2830_v8, 0.0 }
 0x9ea   : > { %v2799_v19 = vpop.xlane.xlu1 %2798  ;;  %2843 = vadd.xlane.f32.xlu2 %v2842_v27 }
 0x9eb   : > { %v2815_v12 = vmul.f32 %v2799_v19, %v8994_v34 }
 0x9ed   : > { %v10481_v4 = vsub.f32 %v10434_v56, %v2815_v12 }
 0x9ef   : > { %v2831_v58 = vmul.f32 %v10481_v4, %v10481_v4 }
 0x9f1   : > { %v2845_v17 = vsel %vm372_vm0, %v2831_v58, 0.0  ;;  %v10525_v58 = vld [vmem:[%s12630_s3 + $0x10] ss:$0 sm:$0xff] }
 0x9f2   : > { %2846 = vadd.xlane.f32.xlu0 %v2845_v17 }
 0x9fd   : > { %v2802_v9 = vpop.xlane.xlu2 %2801 }
 0x9fe   : > { %v2816_v16 = vmul.f32 %v2802_v9, %v8994_v34 }
 0xa00   : > { %v10488_v44 = vsub.f32 %v10439_v2, %v2816_v16 }
 0xa02   : > { %v2832_v60 = vmul.f32 %v10488_v44, %v10488_v44 }
 0xa04   : > { %v2848_v3 = vsel %vm372_vm0, %v2832_v60, 0.0  ;;  %v10531_v60 = vld [vmem:[%s12630_s3 + $0x11] ss:$0 sm:$0xff] }
 0xa05   : > { %2849 = vadd.xlane.f32.xlu1 %v2848_v3  ;;  %v2805_v47 = vpop.xlane.xlu0 %2804 }
 0xa06   : > { %v2817_v50 = vmul.f32 %v2805_v47, %v8994_v34 }
 0xa08   : > { %v10495_v61 = vsub.f32 %v10444_v33, %v2817_v50 }
 0xa0a   : > { %v2833_v48 = vmul.f32 %v10495_v61, %v10495_v61 }
 0xa0c   : > { %v2851_v14 = vsel %vm372_vm0, %v2833_v48, 0.0 }
 0xa0d   : > { %2852 = vadd.xlane.f32.xlu2 %v2851_v14 }
 0xa33   : > { %v2838_v29 = vpop.xlane.xlu1 %2837  ;;  %v2808_v37 = vpop.xlane.xlu0 %2807 }
 0xa34   : > { %v2860_v6 = vmul.f32 %v2838_v29, %v8994_v34  ;;  %v2818_v52 = vmul.f32 %v2808_v37, %v8994_v34 }
 0xa36   : > { %v2868_v40 = vadd.f32 1e-05, %v2860_v6  ;;  %v10503_v28 = vsub.f32 %v10453_v51, %v2818_v52 }
 0xa38   : > { %8444 = vrsqrt.f32 %v2868_v40  ;;  %v2834_v0 = vmul.f32 %v10503_v28, %v10503_v28  ;;  %vm2882_vm4 = vweird.f32 %v2868_v40 }
 0xa3a   : > { %v2854_v63 = vsel %vm372_vm0, %v2834_v0, 0.0 }
 0xa3b   : > { %v2841_v22 = vpop.xlane.xlu2 %2840  ;;  %v2811_v42 = vpop.xlane.xlu1 %2810  ;;  %2855 = vadd.xlane.f32.xlu0 %v2854_v63 }
 0xa3c   : > { %v2861_v30 = vmul.f32 %v2841_v22, %v8994_v34  ;;  %v2819_v15 = vmul.f32 %v2811_v42, %v8994_v34 }
 0xa3e   : > { %v8445_v57 = vpop.eup %8444  ;;  %v2869_v41 = vadd.f32 1e-05, %v2861_v30  ;;  %v10517_v21 = vsub.f32 %v10465_v24, %v2819_v15 }
 0xa3f   : > { %v2877_v55 = vmul.f32 %v8445_v57, %v2868_v40  ;;  %vm2883_vm3 = vweird.f32 %v8445_v57 }
 0xa40   : > { %8446 = vrsqrt.f32 %v2869_v41  ;;  %v2835_v20 = vmul.f32 %v10517_v21, %v10517_v21  ;;  %vm2884_vm9 = vmor %vm2882_vm4, %vm2883_vm3  ;;  %vm2892_vm11 = vweird.f32 %v2869_v41 }
 0xa41   : > { %v2878_v45 = vmul.f32 %v8445_v57, %v2877_v55 }
 0xa42   : > { %v2857_v26 = vsel %vm372_vm0, %v2835_v20, 0.0 }
 0xa43   : > { %v2879_v36 = vmul.f32 0.5, %v2878_v45  ;;  %2858 = vadd.xlane.f32.xlu1 %v2857_v26 }
 0xa45   : > { %v2880_v11 = vsub.f32 1.5, %v2879_v36 }
 0xa46   : > { %v8447_v35 = vpop.eup %8446 }
 0xa47   : > { %v2881_v53 = vmul.f32 %v8445_v57, %v2880_v11  ;;  %v2887_v39 = vmul.f32 %v8447_v35, %v2869_v41  ;;  %vm2893_vm10 = vweird.f32 %v8447_v35 }
 0xa48   : > { %vm2894_vm12 = vmor %vm2892_vm11, %vm2893_vm10 }
 0xa49   : > { %v2888_v8 = vmul.f32 %v8447_v35, %v2887_v39  ;;  %v2885_v27 = vsel %vm2884_vm9, %v8445_v57, %v2881_v53 }
 0xa4a   : > { %v2956_v17 = vmul.f32 %v2885_v27, %v10450_v18 }
 0xa4b   : > { %v2889_v19 = vmul.f32 0.5, %v2888_v8 }
 0xa4c   : > { %v2965_v3 = vmul.f32 %v10525_v58, %v2956_v17 }
 0xa4d   : > { %v2890_v12 = vsub.f32 1.5, %v2889_v19 }
 0xa4e   : > { %v2974_v48 = vadd.f32 %v10531_v60, %v2965_v3 }
 0xa4f   : > { %v2891_v9 = vmul.f32 %v8447_v35, %v2890_v12 }
 0xa51   : > { %v2895_v16 = vsel %vm2894_vm12, %v8447_v35, %v2891_v9 }
 0xa52   : > { %v2957_v47 = vmul.f32 %v2895_v16, %v10462_v49 }
 0xa54   : > { %v2966_v50 = vmul.f32 %v10525_v58, %v2957_v47 }
 0xa56   : > { %v2975_v14 = vadd.f32 %v10531_v60, %v2966_v50 }
 0xa58   : > { %v2982_v18 = vpack.c.bf16 %v2975_v14, %v2974_v48 }
 0xa5a   : > { %7353 = vmatmul.msk.bf16.vlgmr.msrb.gmra.mxu2 %vm372_vm0, %v2982_v18 }
 0xa5d   : > { %v2844_v29 = vpop.xlane.xlu2 %2843 }
 0xa5e   : > { %v2862_v37 = vmul.f32 %v2844_v29, %v8994_v34 }
 0xa60   : > { %v2870_v6 = vadd.f32 1e-05, %v2862_v37 }
 0xa62   : > { %8448 = vrsqrt.f32 %v2870_v6  ;;  %vm2902_vm14 = vweird.f32 %v2870_v6 }
 0xa65   : > { %v2847_v52 = vpop.xlane.xlu0 %2846 }
 0xa66   : > { %v2863_v40 = vmul.f32 %v2847_v52, %v8994_v34 }
 0xa68   : > { %v8449_v0 = vpop.eup %8448  ;;  %v2871_v10 = vadd.f32 1e-05, %v2863_v40 }
 0xa69   : > { %v2897_v49 = vmul.f32 %v8449_v0, %v2870_v6  ;;  %vm2903_vm13 = vweird.f32 %v8449_v0 }
 0xa6a   : > { %8450 = vrsqrt.f32 %v2871_v10  ;;  %vm2904_vm15 = vmor %vm2902_vm14, %vm2903_vm13  ;;  %vm2912_vm2 = vweird.f32 %v2871_v10 }
 0xa6b   : > { %v2898_v63 = vmul.f32 %v8449_v0, %v2897_v49 }
 0xa6d   : > { %v2899_v54 = vmul.f32 0.5, %v2898_v63 }
 0xa6f   : > { %v2900_v22 = vsub.f32 1.5, %v2899_v54 }
 0xa70   : > { %v8451_v42 = vpop.eup %8450 }
 0xa71   : > { %v2901_v30 = vmul.f32 %v8449_v0, %v2900_v22  ;;  %v2907_v15 = vmul.f32 %v8451_v42, %v2871_v10  ;;  %vm2913_vm1 = vweird.f32 %v8451_v42 }
 0xa72   : > { %vm2914_vm3 = vmor %vm2912_vm2, %vm2913_vm1 }
 0xa73   : > { %v2908_v57 = vmul.f32 %v8451_v42, %v2907_v15  ;;  %v2905_v41 = vsel %vm2904_vm15, %v8449_v0, %v2901_v30 }
 0xa74   : > { %v2958_v45 = vmul.f32 %v2905_v41, %v10474_v23 }
 0xa75   : > { %v2909_v55 = vmul.f32 0.5, %v2908_v57 }
 0xa76   : > { %v2967_v8 = vmul.f32 %v10525_v58, %v2958_v45 }
 0xa77   : > { %v2910_v20 = vsub.f32 1.5, %v2909_v55 }
 0xa78   : > { %v2850_v26 = vpop.xlane.xlu1 %2849  ;;  %v2976_v12 = vadd.f32 %v10531_v60, %v2967_v8 }
 0xa79   : > { %v2911_v36 = vmul.f32 %v8451_v42, %v2910_v20  ;;  %v2864_v11 = vmul.f32 %v2850_v26, %v8994_v34 }
 0xa7b   : > { %v2915_v35 = vsel %vm2914_vm3, %v8451_v42, %v2911_v36  ;;  %v2872_v53 = vadd.f32 1e-05, %v2864_v11 }
 0xa7c   : > { %v2959_v39 = vmul.f32 %v2915_v35, %v10481_v4 }
 0xa7d   : > { %8452 = vrsqrt.f32 %v2872_v53  ;;  %vm2922_vm9 = vweird.f32 %v2872_v53 }
 0xa7e   : > { %v2968_v27 = vmul.f32 %v10525_v58, %v2959_v39 }
 0xa80   : > { %v2853_v19 = vpop.xlane.xlu2 %2852  ;;  %v2977_v23 = vadd.f32 %v10531_v60, %v2968_v27 }
 0xa81   : > { %v2865_v17 = vmul.f32 %v2853_v19, %v8994_v34 }
 0xa82   : > { %v2983_v9 = vpack.c.bf16 %v2977_v23, %v2976_v12 }
 0xa83   : > { %v8453_v16 = vpop.eup %8452  ;;  %v2873_v3 = vadd.f32 1e-05, %v2865_v17 }
 0xa84   : > { %v2917_v47 = vmul.f32 %v8453_v16, %v2872_v53  ;;  %7354 = vmatmul.msk.bf16.gmra.mxu2 %vm372_vm0, %v2983_v9  ;;  %vm2923_vm4 = vweird.f32 %v8453_v16 }
 0xa85   : > { %8454 = vrsqrt.f32 %v2873_v3  ;;  %vm2924_vm10 = vmor %vm2922_vm9, %vm2923_vm4  ;;  %vm2932_vm12 = vweird.f32 %v2873_v3 }
 0xa86   : > { %v2918_v4 = vmul.f32 %v8453_v16, %v2917_v47 }
 0xa88   : > { %v2919_v50 = vmul.f32 0.5, %v2918_v4 }
 0xa8a   : > { %v2920_v48 = vsub.f32 1.5, %v2919_v50 }
 0xa8b   : > { %v8455_v14 = vpop.eup %8454 }
 0xa8c   : > { %v2921_v18 = vmul.f32 %v8453_v16, %v2920_v48  ;;  %v2927_v29 = vmul.f32 %v8455_v14, %v2873_v3  ;;  %vm2933_vm11 = vweird.f32 %v8455_v14 }
 0xa8d   : > { %vm2934_vm13 = vmor %vm2932_vm12, %vm2933_vm11 }
 0xa8e   : > { %v2928_v37 = vmul.f32 %v8455_v14, %v2927_v29  ;;  %v2925_v6 = vsel %vm2924_vm10, %v8453_v16, %v2921_v18 }
 0xa8f   : > { %v2960_v0 = vmul.f32 %v2925_v6, %v10488_v44 }
 0xa90   : > { %v2929_v52 = vmul.f32 0.5, %v2928_v37 }
 0xa91   : > { %v2969_v54 = vmul.f32 %v10525_v58, %v2960_v0 }
 0xa92   : > { %v2930_v40 = vsub.f32 1.5, %v2929_v52 }
 0xa93   : > { %v2978_v42 = vadd.f32 %v10531_v60, %v2969_v54 }
 0xa94   : > { %v2931_v10 = vmul.f32 %v8455_v14, %v2930_v40 }
 0xa96   : > { %v2935_v49 = vsel %vm2934_vm13, %v8455_v14, %v2931_v10 }
 0xa97   : > { %v2961_v63 = vmul.f32 %v2935_v49, %v10495_v61 }
 0xa99   : > { %v2970_v22 = vmul.f32 %v10525_v58, %v2961_v63 }
 0xa9b   : > { %v2979_v30 = vadd.f32 %v10531_v60, %v2970_v22 }
 0xa9d   : > { %v2984_v15 = vpack.c.bf16 %v2979_v30, %v2978_v42 }
 0xa9f   : > { %7355 = vmatmul.msk.bf16.gmra.mxu2 %vm372_vm0, %v2984_v15 }
 0xaae   : > { %v2856_v57 = vpop.xlane.xlu0 %2855 }
 0xaaf   : > { %v2866_v44 = vmul.f32 %v2856_v57, %v8994_v34 }
 0xab1   : > { %v2874_v41 = vadd.f32 1e-05, %v2866_v44 }
 0xab3   : > { %8456 = vrsqrt.f32 %v2874_v41  ;;  %vm2942_vm15 = vweird.f32 %v2874_v41 }
 0xab6   : > { %v2859_v55 = vpop.xlane.xlu1 %2858 }
 0xab7   : > { %v2867_v20 = vmul.f32 %v2859_v55, %v8994_v34 }
 0xab9   : > { %v8457_v61 = vpop.eup %8456  ;;  %v2875_v45 = vadd.f32 1e-05, %v2867_v20 }
 0xaba   : > { %v2937_v26 = vmul.f32 %v8457_v61, %v2874_v41  ;;  %vm2943_vm14 = vweird.f32 %v8457_v61 }
 0xabb   : > { %8458 = vrsqrt.f32 %v2875_v45  ;;  %vm2944_vm1 = vmor %vm2942_vm15, %vm2943_vm14  ;;  %vm2952_vm3 = vweird.f32 %v2875_v45 }
 0xabc   : > { %v2938_v36 = vmul.f32 %v8457_v61, %v2937_v26 }
 0xabe   : > { %v2939_v11 = vmul.f32 0.5, %v2938_v36 }
 0xac0   : > { %v2940_v35 = vsub.f32 1.5, %v2939_v11 }
 0xac1   : > { %v8459_v53 = vpop.eup %8458 }
 0xac2   : > { %v2941_v39 = vmul.f32 %v8457_v61, %v2940_v35  ;;  %v2947_v8 = vmul.f32 %v8459_v53, %v2875_v45  ;;  %vm2953_vm2 = vweird.f32 %v8459_v53 }
 0xac3   : > { %vm2954_vm4 = vmor %vm2952_vm3, %vm2953_vm2 }
 0xac4   : > { %v2948_v27 = vmul.f32 %v8459_v53, %v2947_v8  ;;  %v2945_v19 = vsel %vm2944_vm1, %v8457_v61, %v2941_v39 }
 0xac5   : > { %v2962_v17 = vmul.f32 %v2945_v19, %v10503_v28 }
 0xac6   : > { %v2949_v12 = vmul.f32 0.5, %v2948_v27 }
 0xac7   : > { %v2971_v47 = vmul.f32 %v10525_v58, %v2962_v17 }
 0xac8   : > { %v2950_v23 = vsub.f32 1.5, %v2949_v12 }
 0xac9   : > { %v2980_v50 = vadd.f32 %v10531_v60, %v2971_v47 }
 0xaca   : > { %v2951_v9 = vmul.f32 %v8459_v53, %v2950_v23 }
 0xacc   : > { %v2955_v16 = vsel %vm2954_vm4, %v8459_v53, %v2951_v9 }
 0xacd   : > { %v2963_v3 = vmul.f32 %v2955_v16, %v10517_v21  ;;  %v8221_v21 = vld [vmem:[%s12630_s3 + $0x17] ss:$0 sm:$0xff] }
 0xacf   : > { %v2972_v4 = vmul.f32 %v10525_v58, %v2963_v3 }
 0xad1   : > { %v2981_v48 = vadd.f32 %v10531_v60, %v2972_v4 }
 0xad3   : > { %v2985_v14 = vpack.c.bf16 %v2981_v48, %v2980_v50 }
 0xad5   : > { %7356 = vmatmul.msk.bf16.gmra.mxu2 %vm372_vm0, %v2985_v14 }
 0xadd   : > { %v3026_v18 = vpop.f32.mrf.mxu2 }
 0xade   : > { %v3027_v63 = vadd.f32 %v8221_v21, %v3026_v18 }
 0xae0   : > { %v3046_v30 = vpack.c.bf16 %v3027_v63, %v3027_v63 }
 0xae2   : > { %v3079_v44 = vunpack.c.l.b16 %v3046_v30 }
 0xae5   : > { %v3028_v29 = vpop.f32.mrf.mxu2 }
 0xae6   : > { %v3029_v10 = vadd.f32 %v8221_v21, %v3028_v29 }
 0xae8   : > { %v3047_v22 = vpack.c.bf16 %v3029_v10, %v3029_v10 }
 0xaea   : > { %v3080_v15 = vunpack.c.l.b16 %v3047_v22 }
 0xaec   : > { %v10573_v55 = vpack.c.b16 %v3080_v15, %v3079_v44 }
 0xb07   : > { %v3031_v28 = vpop.f32.mrf.mxu2 }
 0xb08   : > { %v3032_v41 = vadd.f32 %v8221_v21, %v3031_v28 }
 0xb0a   : > { %v3048_v61 = vpack.c.bf16 %v3032_v41, %v3032_v41 }
 0xb0c   : > { %v3081_v26 = vunpack.c.l.b16 %v3048_v61 }
 0xb0f   : > { %v3033_v37 = vpop.f32.mrf.mxu2 }
 0xb10   : > { %v3034_v57 = vadd.f32 %v8221_v21, %v3033_v37 }
 0xb12   : > { %v3049_v20 = vpack.c.bf16 %v3034_v57, %v3034_v57 }
 0xb14   : > { %v3082_v45 = vunpack.c.l.b16 %v3049_v20 }
 0xb16   : > { %v10577_v36 = vpack.c.b16 %v3082_v45, %v3081_v26 }
 0xb22   : > { %v3036_v6 = vpop.f32.mrf.mxu2 }
 0xb23   : > { %v3037_v52 = vadd.f32 %v8221_v21, %v3036_v6 }
 0xb25   : > { %v3050_v0 = vpack.c.bf16 %v3037_v52, %v3037_v52 }
 0xb27   : > { %v3083_v60 = vunpack.c.l.b16 %v3050_v0 }
 0xb2a   : > { %v3038_v40 = vpop.f32.mrf.mxu2 }
 0xb2b   : > { %v3039_v58 = vadd.f32 %v8221_v21, %v3038_v40 }
 0xb2d   : > { %v3051_v49 = vpack.c.bf16 %v3039_v58, %v3039_v58 }
 0xb2f   : > { %v3084_v54 = vunpack.c.l.b16 %v3051_v49 }
 0xb31   : > { %v10569_v42 = vpack.c.b16 %v3084_v54, %v3083_v60 }
 0xb33   : > { %3095 = vrot.lane.b32.xlu1 %v10569_v42, %s8850_s27 }
 0xb3b   : > { %3091 = vrot.lane.b32.xlu1 %v10573_v55, %s8850_s27 }
 0xb43   : > { %3316 = vrot.lane.b32.xlu1 %v10577_v36, %s8848_s25 }
 0xb4b   : > { %3555 = vrot.lane.b32.xlu1 %v10577_v36, %s8851_s28 }
 0xb53   : > { %3553 = vrot.lane.b32.xlu1 %v10573_v55, %s8851_s28 }
 0xb58   : > { %v3041_v11 = vpop.f32.mrf.mxu2 }
 0xb59   : > { %v3042_v35 = vadd.f32 %v8221_v21, %v3041_v11 }
 0xb5b   : > { %3776 = vrot.lane.b32.xlu1 %v10573_v55, %s8852_s29  ;;  %v3052_v39 = vpack.c.bf16 %v3042_v35, %v3042_v35 }
 0xb5d   : > { %v3085_v19 = vunpack.c.l.b16 %v3052_v39 }
 0xb60   : > { %v3043_v53 = vpop.f32.mrf.mxu2 }
 0xb61   : > { %v3044_v8 = vadd.f32 %v8221_v21, %v3043_v53 }
 0xb63   : > { %v3053_v27 = vpack.c.bf16 %v3044_v8, %v3044_v8  ;;  %3549 = vrot.lane.b32.xlu1 %v10569_v42, %s8853_s10 }
 0xb65   : > { %v3086_v12 = vunpack.c.l.b16 %v3053_v27 }
 0xb67   : > { %v10589_v23 = vpack.c.b16 %v3086_v12, %v3085_v19 }
 0xb69   : > { %3328 = vrot.lane.b32.xlu0 %v10589_v23, %s8847_s24  ;;  %3097 = vrot.lane.b32.xlu2 %v10589_v23, %s8850_s27 }
 0xb6b   : > { %3244 = vrot.lane.b32.xlu1 %v10573_v55, %s8854_s12 }
 0xb71   : > { %3326 = vrot.lane.b32.xlu0 %v10569_v42, %s8847_s24  ;;  %3093 = vrot.lane.b32.xlu2 %v10577_v36, %s8850_s27 }
 0xb73   : > { %3790 = vrot.lane.b32.xlu1 %v10589_v23, %s8849_s26 }
 0xb79   : > { %3324 = vrot.lane.b32.xlu0 %v10577_v36, %s8847_s24  ;;  %3322 = vrot.lane.b32.xlu2 %v10573_v55, %s8847_s24 }
 0xb7b   : > { %3941 = vrot.lane.b32.xlu1 %v10569_v42, %s8856_s14 }
 0xb81   : > { %3314 = vrot.lane.b32.xlu0 %v10573_v55, %s8848_s25  ;;  %3557 = vrot.lane.b32.xlu2 %v10569_v42, %s8851_s28 }
 0xb83   : > { %3782 = vrot.lane.b32.xlu1 %v10589_v23, %s8852_s29 }
 0xb89   : > { %3318 = vrot.lane.b32.xlu0 %v10569_v42, %s8848_s25  ;;  %3784 = vrot.lane.b32.xlu2 %v10573_v55, %s8849_s26 }
 0xb8b   : > { %3481 = vrot.lane.b32.xlu1 %v10589_v23, %s8855_s13 }
 0xb91   : > { %3788 = vrot.lane.b32.xlu0 %v10569_v42, %s8849_s26  ;;  %3547 = vrot.lane.b32.xlu2 %v10577_v36, %s8853_s10 }
 0xb99   : > { %3786 = vrot.lane.b32.xlu0 %v10577_v36, %s8849_s26  ;;  %3780 = vrot.lane.b32.xlu2 %v10569_v42, %s8852_s29 }
 0xba1   : > { %3545 = vrot.lane.b32.xlu0 %v10573_v55, %s8853_s10  ;;  %3479 = vrot.lane.b32.xlu2 %v10569_v42, %s8855_s13 }
 0xba5   : > { %v3096_v17 = vpop.permute.xlu1 %3095 }
 0xba6   : > { %v3118_v14 = vsel %vm1013_vm5, %v3096_v17, 0 }
 0xba9   : > { %3778 = vrot.lane.b32.xlu0 %v10577_v36, %s8852_s29  ;;  %3559 = vrot.lane.b32.xlu2 %v10589_v23, %s8851_s28 }
 0xbad   : > { %v3092_v9 = vpop.permute.xlu1 %3091 }
 0xbae   : > { %v3112_v40 = vsel %vm1013_vm5, %v3092_v9, 0 }
 0xbb1   : > { %3477 = vrot.lane.b32.xlu0 %v10577_v36, %s8855_s13  ;;  %3320 = vrot.lane.b32.xlu2 %v10589_v23, %s8848_s25 }
 0xbb5   : > { %v3317_v16 = vpop.permute.xlu1 %3316 }
 0xbb9   : > { %3248 = vrot.lane.b32.xlu0 %v10569_v42, %s8854_s12 }
 0xbbd   : > { %v10643_v3 = vpop.permute.xlu1 %3555 }
 0xbbe   : > { %v3577_v17 = vsel %vm1013_vm5, %v10643_v3, 0 }
 0xbc1   : > { %3475 = vrot.lane.b32.xlu0 %v10573_v55, %s8855_s13 }
 0xbc3   : > { %v3098_v47 = vpop.permute.xlu2 %3097 }
 0xbc4   : > { %v3121_v4 = vsel %vm1013_vm5, %v3098_v47, 0 }
 0xbc5   : > { %3127 = vmatpush.bf16.xpose.msrb.mxu3 %v3121_v4  ;;  %v10648_v50 = vpop.permute.xlu1 %3553 }
 0xbc9   : > { %3246 = vrot.lane.b32.xlu0 %v10577_v36, %s8854_s12 }
 0xbcb   : > { %v3094_v48 = vpop.permute.xlu2 %3093 }
 0xbcc   : > { %v3115_v28 = vsel %vm1013_vm5, %v3094_v48, 0 }
 0xbcd   : > { %3128 = vmatpush.bf16.xpose.msrb.mxu3 %v3118_v14  ;;  %v10653_v18 = vpop.permute.xlu1 %3776 }
 0xbd1   : > { %3551 = vrot.lane.b32.xlu0 %v10589_v23, %s8853_s10 }
 0xbd3   : > { %v3323_v29 = vpop.permute.xlu2 %3322 }
 0xbd4   : > { %v3343_v44 = vsel %vm1013_vm5, %v3323_v29, 0 }
 0xbd5   : > { %3129 = vmatpush.bf16.xpose.msrb.mxu3 %v3115_v28  ;;  %v10658_v37 = vpop.permute.xlu1 %3549 }
 0xbd9   : > { %3250 = vrot.lane.b32.xlu0 %v10589_v23, %s8854_s12 }
 0xbdb   : > { %v3329_v6 = vpop.permute.xlu0 %3328  ;;  %v3558_v21 = vpop.permute.xlu2 %3557 }
 0xbdc   : > { %v3352_v52 = vsel %vm1013_vm5, %v3329_v6, 0  ;;  %v3580_v27 = vsel %vm1013_vm5, %v3558_v21, 0 }
 0xbdd   : > { %3130 = vmatpush.bf16.xpose.msrb.mxu3 %v3112_v40  ;;  %3358 = vmatpush.bf16.xpose.msra.mxu1 %v3352_v52  ;;  %v10664_v0 = vpop.permute.xlu1 %3244 }
 0xbe1   : > { %3943 = vrot.lane.b32.xlu0 %v10589_v23, %s8856_s14 }
 0xbe3   : > { %v3327_v58 = vpop.permute.xlu0 %3326  ;;  %v3785_v10 = vpop.permute.xlu2 %3784 }
 0xbe4   : > { %7365 = vmatmul.msk.bf16.vlgmr.msrb.gmra.mxu3 %vm1013_vm5, %v10573_v55  ;;  %v3349_v49 = vsel %vm1013_vm5, %v3327_v58, 0  ;;  %v3805_v9 = vsel %vm1013_vm5, %v3785_v10, 0 }
 0xbe5   : > { %3359 = vmatpush.bf16.xpose.msra.mxu1 %v3349_v49  ;;  %v3791_v63 = vpop.permute.xlu1 %3790 }
 0xbe6   : > { %v3814_v41 = vsel %vm1013_vm5, %v3791_v63, 0 }
 0xbeb   : > { %v3325_v60 = vpop.permute.xlu0 %3324  ;;  %v3548_v54 = vpop.permute.xlu2 %3547 }
 0xbec   : > { %v3346_v22 = vsel %vm1013_vm5, %v3325_v60, 0 }
 0xbed   : > { %3360 = vmatpush.bf16.xpose.msra.mxu1 %v3346_v22  ;;  %v3942_v30 = vpop.permute.xlu1 %3941 }
 0xbf3   : > { %v3315_v15 = vpop.permute.xlu0 %3314  ;;  %v3781_v57 = vpop.permute.xlu2 %3780 }
 0xbf4   : > { %7366 = vmatmul.msk.bf16.gmra.mxu3 %vm1013_vm5, %v10577_v36 }
 0xbf5   : > { %3361 = vmatpush.bf16.xpose.msra.mxu1 %v3343_v44  ;;  %v3783_v20 = vpop.permute.xlu1 %3782  ;;  %v7970_v44 = vld [vmem:[%s12629_s2 + $0x88] sm:$0xff]  }
 0xbfb   : > { %v3319_v61 = vpop.permute.xlu0 %3318  ;;  %v3480_v45 = vpop.permute.xlu2 %3479 }
 0xbfc   : > { %7381 = vmatmul.msk.bf16.vlgmr.msra.gmra.mxu1 %vm1013_vm5, %v3315_v15 }
 0xbfd   : > { %3820 = vmatpush.bf16.xpose.msrb.mxu1 %v3814_v41  ;;  %v3482_v26 = vpop.permute.xlu1 %3481 }
 0xbfe   : > { %3503 = vmatpush.bf16.msra.mxu2 %v3482_v26 }
 0xc02   : > { %3504 = vmatpush.bf16.msra.mxu2 %v3480_v45  ;;  %v7832_v45 = vunpack.c.l.bf16 %v7970_v44 }
 0xc03   : > { %v3789_v11 = vpop.permute.xlu0 %3788  ;;  %v3560_v35 = vpop.permute.xlu2 %3559 }
 0xc04   : > { %v3583_v53 = vsel %vm1013_vm5, %v3560_v35, 0  ;;  %7367 = vmatmul.msk.bf16.gmra.mxu3 %vm1013_vm5, %v10569_v42  ;;  %v3811_v39 = vsel %vm1013_vm5, %v3789_v11, 0 }
 0xc05   : > { %3589 = vmatpush.bf16.xpose.msra.mxu3 %v3583_v53  ;;  %3821 = vmatpush.bf16.xpose.msrb.mxu1 %v3811_v39 }
 0xc0b   : > { %v3787_v8 = vpop.permute.xlu0 %3786  ;;  %v3321_v48 = vpop.permute.xlu2 %3320 }
 0xc0c   : > { %7382 = vmatmul.msk.bf16.gmra.mxu1 %vm1013_vm5, %v3317_v16  ;;  %v3808_v19 = vsel %vm1013_vm5, %v3787_v8, 0  ;;  %v3574_v16 = vsel %vm1013_vm5, %v10648_v50, 0 }
 0xc0d   : > { %3590 = vmatpush.bf16.xpose.msra.mxu3 %v3580_v27  ;;  %3822 = vmatpush.bf16.xpose.msrb.mxu1 %v3808_v19  ;;  %v7833_v19 = vunpack.c.h.bf16 %v7970_v44 }
 0xc13   : > { %v3546_v12 = vpop.permute.xlu0 %3545 }
 0xc14   : > { %7368 = vmatmul.msk.bf16.gmra.mxu3 %vm1013_vm5, %v10589_v23 }
 0xc15   : > { %3591 = vmatpush.bf16.xpose.msra.mxu3 %v3577_v17  ;;  %3823 = vmatpush.bf16.xpose.msrb.mxu1 %v3805_v9 }
 0xc1b   : > { %v3779_v47 = vpop.permute.xlu0 %3778 }
 0xc1c   : > { %7383 = vmatmul.msk.bf16.gmra.mxu1 %vm1013_vm5, %v3319_v61  ;;  %v7974_v61 = vld [vmem:[%s12629_s2 + $0xa8] sm:$0xff]  }
 0xc1d   : > { %3592 = vmatpush.bf16.xpose.msra.mxu3 %v3574_v16  ;;  %v7848_v35 = vunpack.c.l.bf16 %v7974_v61  ;;  %v7849_v9 = vunpack.c.h.bf16 %v7974_v61 }
 0xc23   : > { %v3478_v4 = vpop.permute.xlu0 %3477 }
 0xc24   : > { %3505 = vmatpush.bf16.msra.mxu2 %v3478_v4  ;;  %7397 = vmatmul.msk.bf16.vlgmr.msra.gmra.mxu3 %vm1013_vm5, %v3546_v12  ;;  %v7971_v4 = vld [vmem:[%s12629_s2 + $0x90] sm:$0xff]  }
 0xc2b   : > { %v3249_v14 = vpop.permute.xlu0 %3248 }
 0xc2c   : > { %7384 = vmatmul.msk.bf16.gmra.mxu1 %vm1013_vm5, %v3321_v48 }
 0xc33   : > { %v3476_v3 = vpop.permute.xlu0 %3475 }
 0xc34   : > { %3506 = vmatpush.bf16.msra.mxu2 %v3476_v3  ;;  %7398 = vmatmul.msk.bf16.gmra.mxu3 %vm1013_vm5, %v3548_v54  ;;  %v7975_v3 = vld [vmem:[%s12629_s2 + $0xb0] sm:$0xff]  }
 0xc3b   : > { %v3247_v29 = vpop.permute.xlu0 %3246 }
 0xc3c   : > { %7413 = vmatmul.msk.bf16.vlgmr.msrb.gmra.mxu1 %vm1013_vm5, %v10653_v18  ;;  %v7969_v18 = vld [vmem:[%s12629_s2 + $0x80] sm:$0xff]  }
 0xc3d   : > { %v7829_v54 = vunpack.c.h.bf16 %v7969_v18 }
 0xc43   : > { %v3552_v28 = vpop.permute.xlu0 %3551 }
 0xc44   : > { %7399 = vmatmul.msk.bf16.gmra.mxu3 %vm1013_vm5, %v10658_v37  ;;  %v7828_v37 = vunpack.c.l.bf16 %v7969_v18 }
 0xc4b   : > { %v3251_v50 = vpop.permute.xlu0 %3250 }
 0xc4c   : > { %3272 = vmatpush.bf16.msrb.mxu0 %v3251_v50  ;;  %7414 = vmatmul.msk.bf16.gmra.mxu1 %vm1013_vm5, %v3779_v47 }
 0xc50   : > { %3273 = vmatpush.bf16.msrb.mxu0 %v3249_v14 }
 0xc53   : > { %v3944_v6 = vpop.permute.xlu0 %3943 }
 0xc54   : > { %3274 = vmatpush.bf16.msrb.mxu0 %v3247_v29  ;;  %7400 = vmatmul.msk.bf16.gmra.mxu3 %vm1013_vm5, %v3552_v28  ;;  %v7836_v29 = vunpack.c.l.bf16 %v7971_v4 }
 0xc55   : > { %3965 = vmatpush.bf16.msrb.mxu2 %v3944_v6  ;;  %v7852_v6 = vunpack.c.l.bf16 %v7975_v3 }
 0xc58   : > { %3275 = vmatpush.bf16.msrb.mxu0 %v10664_v0  ;;  %v7973_v0 = vld [vmem:[%s12629_s2 + $0xa0] sm:$0xff]  }
 0xc59   : > { %3966 = vmatpush.bf16.msrb.mxu2 %v3942_v30  ;;  %v7844_v10 = vunpack.c.l.bf16 %v7973_v0  ;;  %v7845_v30 = vunpack.c.h.bf16 %v7973_v0 }
 0xc5c   : > { %7415 = vmatmul.msk.bf16.gmra.mxu1 %vm1013_vm5, %v3781_v57 }
 0xc67   : > { %v3132_v21 = vpop.f32.mrf.mxu3 }
 0xc68   : > { %v10706_v52 = vadd.f32 %v7828_v37, %v3132_v21 }
 0xc6a   : > { %v3152_v40 = vsel %vm1067_vm6, %v10706_v52, -inf }
 0xc6b   : > { %3153 = vmax.xlane.f32.xlu1 %v3152_v40 }
 0xc6c   : > { %7416 = vmatmul.msk.bf16.gmra.mxu1 %vm1013_vm5, %v3783_v20 }
 0xc6f   : > { %v3134_v58 = vpop.f32.mrf.mxu3 }
 0xc70   : > { %v10718_v57 = vadd.f32 %v7829_v54, %v3134_v58  ;;  %v7837_v58 = vunpack.c.h.bf16 %v7971_v4 }
 0xc72   : > { %v3155_v11 = vsel %vm1067_vm6, %v10718_v57, -inf }
 0xc77   : > { %v3137_v49 = vpop.f32.mrf.mxu3 }
 0xc78   : > { %v10732_v39 = vadd.f32 %v7832_v45, %v3137_v49  ;;  %v7853_v49 = vunpack.c.h.bf16 %v7975_v3 }
 0xc79   : > { %v3363_v63 = vpop.f32.mrf.mxu1 }
 0xc7a   : > { %v10714_v60 = vadd.f32 %v7844_v10, %v3363_v63  ;;  %v3158_v17 = vsel %vm1067_vm6, %v10732_v39, -inf }
 0xc7c   : > { %v3383_v22 = vsel %vm1067_vm6, %v10714_v60, -inf }
 0xc7d   : > { %3384 = vmax.xlane.f32.xlu2 %v3383_v22 }
 0xc7f   : > { %v3139_v15 = vpop.f32.mrf.mxu3 }
 0xc80   : > { %v10740_v16 = vadd.f32 %v7833_v19, %v3139_v15  ;;  %v7976_v15 = vld [vmem:[%s12629_s2 + $0xb8] sm:$0xff]  }
 0xc81   : > { %v3365_v41 = vpop.f32.mrf.mxu1  ;;  %v7856_v61 = vunpack.c.l.bf16 %v7976_v15  ;;  %v7857_v19 = vunpack.c.h.bf16 %v7976_v15 }
 0xc82   : > { %v10723_v20 = vadd.f32 %v7845_v30, %v3365_v41  ;;  %v3161_v50 = vsel %vm1067_vm6, %v10740_v16, -inf }
 0xc84   : > { %v3386_v26 = vsel %vm1067_vm6, %v10723_v20, -inf }
 0xc85   : > { %3387 = vmax.xlane.f32.xlu0 %v3386_v26  ;;  %3156 = vmax.xlane.f32.xlu2 %v3155_v11  ;;  %v7972_v26 = vld [vmem:[%s12629_s2 + $0x98] sm:$0xff]  }
 0xc86   : > { %v7841_v3 = vunpack.c.h.bf16 %v7972_v26 }
 0xc87   : > { %v3142_v53 = vpop.f32.mrf.mxu3 }
 0xc88   : > { %v10754_v37 = vadd.f32 %v7836_v29, %v3142_v53  ;;  %v7840_v53 = vunpack.c.l.bf16 %v7972_v26 }
 0xc89   : > { %v3368_v8 = vpop.f32.mrf.mxu1 }
 0xc8a   : > { %v10734_v27 = vadd.f32 %v7848_v35, %v3368_v8  ;;  %v3164_v10 = vsel %vm1067_vm6, %v10754_v37, -inf }
 0xc8c   : > { %v3389_v12 = vsel %vm1067_vm6, %v10734_v27, -inf }
 0xc8d   : > { %3390 = vmax.xlane.f32.xlu0 %v3389_v12  ;;  %3159 = vmax.xlane.f32.xlu2 %v3158_v17 }
 0xc8f   : > { %v3144_v47 = vpop.f32.mrf.mxu3 }
 0xc90   : > { %v10762_v54 = vadd.f32 %v7837_v58, %v3144_v47  ;;  %v7977_v47 = vld [vmem:[%s12629_s2 + $0xc0] sm:$0xff]  }
 0xc91   : > { %v3370_v48 = vpop.f32.mrf.mxu1 }
 0xc92   : > { %v10745_v14 = vadd.f32 %v7849_v9, %v3370_v48  ;;  %v3167_v44 = vsel %vm1067_vm6, %v10762_v54, -inf  ;;  %v7981_v48 = vld [vmem:[%s12629_s2 + $0xe0] sm:$0xff]  }
 0xc94   : > { %v3392_v28 = vsel %vm1067_vm6, %v10745_v14, -inf }
 0xc95   : > { %3393 = vmax.xlane.f32.xlu1 %v3392_v28  ;;  %3162 = vmax.xlane.f32.xlu0 %v3161_v50  ;;  %v7860_v50 = vunpack.c.l.bf16 %v7977_v47 }
 0xc97   : > { %v3147_v18 = vpop.f32.mrf.mxu3 }
 0xc98   : > { %v10780_v17 = vadd.f32 %v7840_v53, %v3147_v18 }
 0xc99   : > { %v3373_v21 = vpop.f32.mrf.mxu1 }
 0xc9a   : > { %v10756_v40 = vadd.f32 %v7852_v6, %v3373_v21  ;;  %v3170_v28 = vsel %vm1067_vm6, %v10780_v17, -inf  ;;  %v7876_v6 = vunpack.c.l.bf16 %v7981_v48 }
 0xc9c   : > { %v3395_v0 = vsel %vm1067_vm6, %v10756_v40, -inf }
 0xc9d   : > { %3396 = vmax.xlane.f32.xlu1 %v3395_v0  ;;  %3165 = vmax.xlane.f32.xlu0 %v3164_v10 }
 0xc9f   : > { %v3149_v63 = vpop.f32.mrf.mxu3 }
 0xca0   : > { %v10794_v21 = vadd.f32 %v7841_v3, %v3149_v63  ;;  %v7877_v63 = vunpack.c.h.bf16 %v7981_v48  ;;  %v7979_v3 = vld [vmem:[%s12629_s2 + $0xd0] sm:$0xff]  }
 0xca1   : > { %v3375_v22 = vpop.f32.mrf.mxu1 }
 0xca2   : > { %v10764_v30 = vadd.f32 %v7853_v49, %v3375_v22  ;;  %v7861_v49 = vunpack.c.h.bf16 %v7977_v47  ;;  %v3173_v15 = vsel %vm1067_vm6, %v10794_v21, -inf }
 0xca4   : > { %v3398_v41 = vsel %vm1067_vm6, %v10764_v30, -inf }
 0xca5   : > { %3168 = vmax.xlane.f32.xlu1 %v3167_v44  ;;  %3399 = vmax.xlane.f32.xlu2 %v3398_v41 }
 0xca7   : > { %v3594_v45 = vpop.f32.mrf.mxu3 }
 0xca8   : > { %v10796_v58 = vadd.f32 %v7860_v50, %v3594_v45  ;;  %v7869_v50 = vunpack.c.h.bf16 %v7979_v3 }
 0xca9   : > { %v3378_v11 = vpop.f32.mrf.mxu1 }
 0xcaa   : > { %v10776_v35 = vadd.f32 %v7856_v61, %v3378_v11  ;;  %v3614_v44 = vsel %vm1067_vm6, %v10796_v58, -inf  ;;  %v7982_v11 = vld [vmem:[%s12629_s2 + $0xe8] sm:$0xff]  }
 0xcac   : > { %v3401_v8 = vsel %vm1067_vm6, %v10776_v35, -inf }
 0xcad   : > { %3402 = vmax.xlane.f32.xlu2 %v3401_v8 }
 0xcaf   : > { %v3596_v12 = vpop.f32.mrf.mxu3 }
 0xcb0   : > { %v10806_v61 = vadd.f32 %v7861_v49, %v3596_v12  ;;  %v7978_v12 = vld [vmem:[%s12629_s2 + $0xc8] sm:$0xff]  }
 0xcb1   : > { %v3380_v9 = vpop.f32.mrf.mxu1 }
 0xcb2   : > { %v10785_v4 = vadd.f32 %v7857_v19, %v3380_v9  ;;  %v3617_v53 = vsel %vm1067_vm6, %v10806_v61, -inf  ;;  %v7880_v19 = vunpack.c.l.bf16 %v7982_v11 }
 0xcb4   : > { %v3404_v29 = vsel %vm1067_vm6, %v10785_v4, -inf }
 0xcb5   : > { %3405 = vmax.xlane.f32.xlu0 %v3404_v29  ;;  %3171 = vmax.xlane.f32.xlu2 %v3170_v28  ;;  %v7864_v29 = vunpack.c.l.bf16 %v7978_v12 }
 0xcb7   : > { %v3599_v18 = vpop.f32.mrf.mxu3 }
 0xcb8   : > { %v10827_v49 = vadd.f32 %v7864_v29, %v3599_v18 }
 0xcb9   : > { %v3825_v0 = vpop.f32.mrf.mxu1 }
 0xcba   : > { %v10798_v10 = vadd.f32 %v7876_v6, %v3825_v0  ;;  %v7881_v6 = vunpack.c.h.bf16 %v7982_v11 }
 0xcbc   : > { %v3845_v22 = vsel %vm1067_vm6, %v10798_v10, -inf }
 0xcbd   : > { %3846 = vmax.xlane.f32.xlu1 %v3845_v22  ;;  %3174 = vmax.xlane.f32.xlu0 %v3173_v15 }
 0xcbe   : > { %3615 = vmax.xlane.f32.xlu2 %v3614_v44 }
 0xcbf   : > { %v3601_v41 = vpop.f32.mrf.mxu3 }
 0xcc1   : > { %v3827_v45 = vpop.f32.mrf.mxu1 }
 0xcc2   : > { %v10808_v26 = vadd.f32 %v7877_v63, %v3827_v45  ;;  %v7865_v45 = vunpack.c.h.bf16 %v7978_v12 }
 0xcc4   : > { %v3848_v8 = vsel %vm1067_vm6, %v10808_v26, -inf  ;;  %v10839_v18 = vadd.f32 %v7865_v45, %v3601_v41 }
 0xcc5   : > { %3618 = vmax.xlane.f32.xlu1 %v3617_v53  ;;  %3849 = vmax.xlane.f32.xlu0 %v3848_v8  ;;  %v7868_v53 = vunpack.c.l.bf16 %v7979_v3  ;;  %v3620_v8 = vsel %vm1067_vm6, %v10827_v49, -inf }
 0xcc6   : > { %v3623_v3 = vsel %vm1067_vm6, %v10839_v18, -inf }
 0xcc7   : > { %v3604_v9 = vpop.f32.mrf.mxu3 }
 0xcc9   : > { %v3830_v47 = vpop.f32.mrf.mxu1 }
 0xcca   : > { %v10820_v48 = vadd.f32 %v7880_v19, %v3830_v47  ;;  %v10841_v19 = vadd.f32 %v7868_v53, %v3604_v9  ;;  %v7983_v47 = vld [vmem:[%s12629_s2 + $0xf0] sm:$0xff]  }
 0xccc   : > { %v3851_v28 = vsel %vm1067_vm6, %v10820_v48, -inf  ;;  %v3626_v12 = vsel %vm1067_vm6, %v10841_v19, -inf }
 0xccd   : > { %3852 = vmax.xlane.f32.xlu0 %v3851_v28  ;;  %v7884_v28 = vunpack.c.l.bf16 %v7983_v47 }
 0xccf   : > { %v3606_v0 = vpop.f32.mrf.mxu3 }
 0xcd0   : > { %v10829_v22 = vadd.f32 %v7869_v50, %v3606_v0  ;;  %v7885_v50 = vunpack.c.h.bf16 %v7983_v47  ;;  %v7984_v0 = vld [vmem:[%s12629_s2 + $0xf8] sm:$0xff]  }
 0xcd1   : > { %v3832_v15 = vpop.f32.mrf.mxu1  ;;  %v7888_v45 = vunpack.c.l.bf16 %v7984_v0 }
 0xcd2   : > { %v10831_v44 = vadd.f32 %v7881_v6, %v3832_v15  ;;  %v3629_v63 = vsel %vm1067_vm6, %v10829_v22, -inf }
 0xcd3   : > { %3630 = vmax.xlane.f32.xlu1 %v3629_v63 }
 0xcd4   : > { %v3854_v11 = vsel %vm1067_vm6, %v10831_v44, -inf }
 0xcd5   : > { %3621 = vmax.xlane.f32.xlu0 %v3620_v8  ;;  %3855 = vmax.xlane.f32.xlu2 %v3854_v11  ;;  %v7980_v8 = vld [vmem:[%s12629_s2 + $0xd8] sm:$0xff]  }
 0xcd9   : > { %v3835_v29 = vpop.f32.mrf.mxu1 }
 0xcda   : > { %v10850_v6 = vadd.f32 %v7884_v28, %v3835_v29  ;;  %v3609_v29 = vpop.f32.mrf.mxu3 }
 0xcdc   : > { %v3857_v63 = vsel %vm1067_vm6, %v10850_v6, -inf }
 0xcdd   : > { %3627 = vmax.xlane.f32.xlu0 %v3626_v12  ;;  %3624 = vmax.xlane.f32.xlu2 %v3623_v3  ;;  %v7872_v12 = vunpack.c.l.bf16 %v7980_v8 }
 0xcde   : > { %v3154_v53 = vpop.xlane.xlu1 %3153 }
 0xcdf   : > { %v3176_v28 = vsub.f32 %v10706_v52, %v3154_v53 }
 0xce1   : > { %v3837_v41 = vpop.f32.mrf.mxu1 }
 0xce2   : > { %v10852_v9 = vadd.f32 %v7885_v50, %v3837_v41  ;;  %v7889_v50 = vunpack.c.h.bf16 %v7984_v0  ;;  %v3184_v41 = vmul.f32 1.442695, %v3176_v28  ;;  %v3611_v34 = vpop.f32.mrf.mxu3 }
 0xce4   : > { %v3860_v15 = vsel %vm1067_vm6, %v10852_v9, -inf  ;;  %8460 = vpow2.f32 %v3184_v41 }
 0xce5   : > { %3861 = vmax.xlane.f32.xlu0 %v3860_v15  ;;  %3858 = vmax.xlane.f32.xlu2 %v3857_v63  ;;  %v10869_v15 = vadd.f32 %v7872_v12, %v3609_v29 }
 0xce7   : > { %v3632_v52 = vsel %vm1067_vm6, %v10869_v15, -inf }
 0xce9   : > { %v3840_v11 = vpop.f32.mrf.mxu1 }
 0xcea   : > { %v10864_v47 = vadd.f32 %v7888_v45, %v3840_v11  ;;  %v7873_v11 = vunpack.c.h.bf16 %v7980_v8 }
 0xcec   : > { %v3863_v3 = vsel %vm1067_vm6, %v10864_v47, -inf  ;;  %v10878_v29 = vadd.f32 %v7873_v11, %v3611_v34 }
 0xced   : > { %3864 = vmax.xlane.f32.xlu1 %v3863_v3 }
 0xcee   : > { %v3635_v41 = vsel %vm1067_vm6, %v10878_v29, -inf }
 0xcf0   : > { %v3385_v63 = vpop.xlane.xlu2 %3384 }
 0xcf1   : > { %v3842_v31 = vpop.f32.mrf.mxu1  ;;  %v3407_v45 = vsub.f32 %v10714_v60, %v3385_v63 }
 0xcf2   : > { %v10871_v24 = vadd.f32 %v7889_v50, %v3842_v31  ;;  %v10880_v31 = vpop.eup %8460 }
 0xcf3   : > { %v3415_v0 = vmul.f32 1.442695, %v3407_v45  ;;  %v3200_v50 = vsel %vm1067_vm6, %v10880_v31, 0.0 }
 0xcf4   : > { %v3866_v53 = vsel %vm1067_vm6, %v10871_v24, -inf }
 0xcf5   : > { %3633 = vmax.xlane.f32.xlu1 %v3632_v52  ;;  %3867 = vmax.xlane.f32.xlu2 %v3866_v53  ;;  %8462 = vpow2.f32 %v3415_v0 }
 0xcf8   : > { %v3388_v28 = vpop.xlane.xlu0 %3387  ;;  %v3157_v12 = vpop.xlane.xlu2 %3156 }
 0xcf9   : > { %v3408_v3 = vsub.f32 %v10723_v20, %v3388_v28  ;;  %v3177_v8 = vsub.f32 %v10718_v57, %v3157_v12 }
 0xcfb   : > { %v3417_v60 = vmul.f32 1.442695, %v3408_v3  ;;  %v3186_v34 = vmul.f32 1.442695, %v3177_v8  ;;  %v10888_v45 = vpop.eup %8462 }
 0xcfc   : > { %v3431_v52 = vsel %vm1067_vm6, %v10888_v45, 0.0 }
 0xcfd   : > { %8464 = vpow2.f32 %v3417_v60  ;;  %3201 = vadd.xlane.f32.xlu1 %v3200_v50  ;;  %3636 = vmax.xlane.f32.xlu2 %v3635_v41 }
 0xcfe   : > { %8466 = vpow2.f32 %v3186_v34 }
 0xd00   : > { %v3391_v63 = vpop.xlane.xlu0 %3390  ;;  %v3160_v0 = vpop.xlane.xlu2 %3159 }
 0xd01   : > { %v3409_v20 = vsub.f32 %v10734_v27, %v3391_v63  ;;  %v3178_v60 = vsub.f32 %v10732_v39, %v3160_v0 }
 0xd03   : > { %v10890_v11 = vpop.eup %8464  ;;  %v3419_v53 = vmul.f32 1.442695, %v3409_v20  ;;  %v3188_v8 = vmul.f32 1.442695, %v3178_v60 }
 0xd04   : > { %v3434_v57 = vsel %vm1067_vm6, %v10890_v11, 0.0  ;;  %v10897_v3 = vpop.eup %8466 }
 0xd05   : > { %3435 = vadd.xlane.f32.xlu0 %v3434_v57  ;;  %3432 = vadd.xlane.f32.xlu2 %v3431_v52  ;;  %8468 = vpow2.f32 %v3419_v53  ;;  %v3203_v27 = vsel %vm1067_vm6, %v10897_v3, 0.0 }
 0xd06   : > { %8470 = vpow2.f32 %v3188_v8 }
 0xd08   : > { %v3394_v28 = vpop.xlane.xlu1 %3393  ;;  %v3163_v12 = vpop.xlane.xlu0 %3162 }
 0xd09   : > { %v3410_v20 = vsub.f32 %v10745_v14, %v3394_v28  ;;  %v3179_v14 = vsub.f32 %v10740_v16, %v3163_v12 }
 0xd0b   : > { %v10902_v34 = vpop.eup %8468  ;;  %v3421_v53 = vmul.f32 1.442695, %v3410_v20 }
 0xd0c   : > { %v3437_v39 = vsel %vm1067_vm6, %v10902_v34, 0.0  ;;  %v10911_v60 = vpop.eup %8470 }
 0xd0d   : > { %3204 = vadd.xlane.f32.xlu2 %v3203_v27  ;;  %v3206_v28 = vsel %vm1067_vm6, %v10911_v60, 0.0 }
 0xd10   : > { %v3397_v50 = vpop.xlane.xlu1 %3396  ;;  %v3166_v41 = vpop.xlane.xlu0 %3165 }
 0xd11   : > { %v3411_v63 = vsub.f32 %v10756_v40, %v3397_v50  ;;  %v3180_v52 = vsub.f32 %v10754_v37, %v3166_v41 }
 0xd13   : > { %v3423_v57 = vmul.f32 1.442695, %v3411_v63  ;;  %v3192_v0 = vmul.f32 1.442695, %v3180_v52 }
 0xd15   : > { %8472 = vpow2.f32 %v3423_v57  ;;  %3438 = vadd.xlane.f32.xlu2 %v3437_v39 }
 0xd16   : > { %3710 = vrot.lane.b32.xlu1 %v10569_v42, %s8857_s15  ;;  %8474 = vpow2.f32 %v3421_v53  ;;  %v3190_v42 = vmul.f32 1.442695, %v3179_v14 }
 0xd17   : > { %8476 = vpow2.f32 %v3192_v0 }
 0xd18   : > { %8478 = vpow2.f32 %v3190_v42  ;;  %v3400_v50 = vpop.xlane.xlu2 %3399  ;;  %v3169_v57 = vpop.xlane.xlu1 %3168 }
 0xd19   : > { %v3181_v39 = vsub.f32 %v10762_v54, %v3169_v57 }
 0xd1b   : > { %v10913_v40 = vpop.eup %8472  ;;  %v3194_v53 = vmul.f32 1.442695, %v3181_v39 }
 0xd1c   : > { %v3443_v37 = vsel %vm1067_vm6, %v10913_v40, 0.0  ;;  %v10922_v27 = vpop.eup %8474 }
 0xd1d   : > { %3444 = vadd.xlane.f32.xlu0 %v3443_v37  ;;  %3207 = vadd.xlane.f32.xlu2 %v3206_v28  ;;  %v10924_v8 = vpop.eup %8476  ;;  %v3440_v12 = vsel %vm1067_vm6, %v10922_v27, 0.0  ;;  %8480 = vpow2.f32 %v3194_v53 }
 0xd1e   : > { %3937 = vrot.lane.b32.xlu1 %v10573_v55, %s8856_s14  ;;  %v3212_v16 = vsel %vm1067_vm6, %v10924_v8, 0.0  ;;  %v10930_v41 = vpop.eup %8478 }
 0xd1f   : > { %v3209_v63 = vsel %vm1067_vm6, %v10930_v41, 0.0 }
 0xd20   : > { %v3403_v20 = vpop.xlane.xlu2 %3402 }
 0xd21   : > { %v3413_v14 = vsub.f32 %v10776_v35, %v3403_v20 }
 0xd23   : > { %v3427_v28 = vmul.f32 1.442695, %v3413_v14 }
 0xd25   : > { %3213 = vadd.xlane.f32.xlu0 %v3212_v16  ;;  %3441 = vadd.xlane.f32.xlu2 %v3440_v12  ;;  %v10940_v16 = vpop.eup %8480  ;;  %8482 = vpow2.f32 %v3427_v28 }
 0xd28   : > { %v10934_v52 = vpop.xlane.xlu0 %3405  ;;  %v3172_v0 = vpop.xlane.xlu2 %3171 }
 0xd2b   : > { %v10951_v20 = vpop.eup %8482 }
 0xd2c   : > { %v3449_v39 = vsel %vm1067_vm6, %v10951_v20, 0.0 }
 0xd2d   : > { %3210 = vadd.xlane.f32.xlu2 %v3209_v63 }
 0xd30   : > { %v3175_v37 = vpop.xlane.xlu0 %3174  ;;  %v3847_v42 = vpop.xlane.xlu1 %3846 }
 0xd31   : > { %v10942_v12 = vpop.xlane.xlu2 %3615  ;;  %v3869_v54 = vsub.f32 %v10798_v10, %v3847_v42  ;;  %v3183_v53 = vsub.f32 %v10794_v21, %v3175_v37 }
 0xd33   : > { %v3877_v35 = vmul.f32 1.442695, %v3869_v54  ;;  %v3198_v28 = vmul.f32 1.442695, %v3183_v53 }
 0xd35   : > { %8484 = vpow2.f32 %v3877_v35  ;;  %v3412_v35 = vsub.f32 %v10764_v30, %v3400_v50 }
 0xd36   : > { %8486 = vpow2.f32 %v3198_v28 }
 0xd37   : > { %v3425_v21 = vmul.f32 1.442695, %v3412_v35 }
 0xd38   : > { %v10949_v63 = vpop.xlane.xlu0 %3849  ;;  %v3619_v42 = vpop.xlane.xlu1 %3618 }
 0xd39   : > { %3712 = vrot.lane.b32.xlu0 %v10589_v23, %s8857_s15  ;;  %v3215_v23 = vsel %vm1067_vm6, %v10940_v16, 0.0 }
 0xd3b   : > { %v10960_v10 = vpop.eup %8484 }
 0xd3c   : > { %v3893_v54 = vsel %vm1067_vm6, %v10960_v10, 0.0  ;;  %v10966_v2 = vpop.eup %8486 }
 0xd3d   : > { %v3221_v13 = vsel %vm1067_vm6, %v10966_v2, 0.0 }
 0xd40   : > { %v10958_v14 = vpop.xlane.xlu0 %3852 }
 0xd45   : > { %3939 = vrot.lane.b32.xlu2 %v10577_v36, %s8856_s14 }
 0xd46   : > { %v10968_v37 = vpop.xlane.xlu1 %3630 }
 0xd48   : > { %3216 = vadd.xlane.f32.xlu1 %v3215_v23  ;;  %v10953_v57 = vpop.xlane.xlu2 %3855  ;;  %v3639_v23 = vsub.f32 %v10806_v61, %v3619_v42  ;;  %v3622_v33 = vpop.xlane.xlu0 %3621  ;;  %v3182_v61 = vsub.f32 %v10780_v17, %v3172_v0  ;;  %v3414_v17 = vsub.f32 %v10785_v4, %v10934_v52 }
 0xd49   : > { %v3640_v53 = vsub.f32 %v10827_v49, %v3622_v33 }
 0xd4a   : > { %v3196_v42 = vmul.f32 1.442695, %v3182_v61 }
 0xd4b   : > { %v3650_v28 = vmul.f32 1.442695, %v3640_v53 }
 0xd50   : > { %3450 = vadd.xlane.f32.xlu1 %v3449_v39  ;;  %v3625_v51 = vpop.xlane.xlu2 %3624  ;;  %v3648_v39 = vmul.f32 1.442695, %v3639_v23  ;;  %v10974_v30 = vpop.xlane.xlu0 %3627 }
 0xd51   : > { %v3641_v33 = vsub.f32 %v10839_v18, %v3625_v51 }
 0xd52   : > { %8488 = vpow2.f32 %v3648_v39 }
 0xd53   : > { %8490 = vpow2.f32 %v3425_v21  ;;  %v3652_v0 = vmul.f32 1.442695, %v3641_v33  ;;  %v3429_v21 = vmul.f32 1.442695, %v3414_v17 }
 0xd54   : > { %8492 = vpow2.f32 %v3650_v28  ;;  %v3638_v28 = vsub.f32 %v10796_v58, %v10942_v12  ;;  %v3870_v12 = vsub.f32 %v10808_v26, %v10949_v63 }
 0xd55   : > { %8494 = vpow2.f32 %v3196_v42 }
 0xd56   : > { %8496 = vpow2.f32 %v3652_v0  ;;  %v3646_v33 = vmul.f32 1.442695, %v3638_v28  ;;  %v3879_v28 = vmul.f32 1.442695, %v3870_v12 }
 0xd57   : > { %8498 = vpow2.f32 %v3429_v21 }
 0xd58   : > { %3894 = vadd.xlane.f32.xlu1 %v3893_v54  ;;  %v3859_v56 = vpop.xlane.xlu2 %3858  ;;  %v10976_v50 = vpop.eup %8488 }
 0xd59   : > { %v10983_v49 = vpop.eup %8490  ;;  %v3862_v53 = vpop.xlane.xlu0 %3861  ;;  %v3873_v51 = vsub.f32 %v10850_v6, %v3859_v56 }
 0xd5a   : > { %v3446_v35 = vsel %vm1067_vm6, %v10983_v49, 0.0  ;;  %v10991_v39 = vpop.eup %8492 }
 0xd5b   : > { %v10998_v61 = vpop.eup %8494  ;;  %v3668_v52 = vsel %vm1067_vm6, %v10991_v39, 0.0  ;;  %v3885_v42 = vmul.f32 1.442695, %v3873_v51 }
 0xd5c   : > { %v3218_v56 = vsel %vm1067_vm6, %v10998_v61, 0.0  ;;  %v11006_v6 = vpop.eup %8496 }
 0xd5d   : > { %8500 = vpow2.f32 %v3885_v42  ;;  %v11009_v0 = vpop.eup %8498  ;;  %v3671_v58 = vsel %vm1067_vm6, %v11006_v6, 0.0 }
 0xd60   : > { %v10978_v54 = vpop.xlane.xlu1 %3864 }
 0xd63   : > { %3222 = vadd.xlane.f32.xlu0 %v3221_v13  ;;  %v3665_v13 = vsel %vm1067_vm6, %v10976_v50, 0.0 }
 0xd68   : > { %v10980_v23 = vpop.xlane.xlu2 %3867  ;;  %v3634_v4 = vpop.xlane.xlu1 %3633 }
 0xd6b   : > { %3666 = vadd.xlane.f32.xlu0 %v3665_v13 }
 0xd6e   : > { %3447 = vadd.xlane.f32.xlu2 %v3446_v35 }
 0xd70   : > { %v10994_v18 = vpop.xlane.xlu2 %3636  ;;  %v3202_v21 = vpop.xlane.xlu1 %3201 }
 0xd71   : > { %3706 = vrot.lane.b32.xlu1 %v10573_v55, %s8857_s15  ;;  %v3874_v55 = vsub.f32 %v10852_v9, %v3862_v53  ;;  %v3452_v9 = vsel %vm1067_vm6, %v11009_v0, 0.0  ;;  %v11017_v53 = vpop.eup %8500 }
 0xd73   : > { %3669 = vadd.xlane.f32.xlu0 %v3668_v52  ;;  %v3887_v35 = vmul.f32 1.442695, %v3874_v55  ;;  %v3905_v55 = vsel %vm1067_vm6, %v11017_v53, 0.0 }
 0xd76   : > { %3219 = vadd.xlane.f32.xlu2 %v3218_v56 }
 0xd78   : > { %v3436_v13 = vpop.xlane.xlu0 %3435  ;;  %v3433_v17 = vpop.xlane.xlu2 %3432 }
 0xd79   : > { %8502 = vrcp.f32 %v3436_v13 }
 0xd7a   : > { %8504 = vrcp.f32 %v3433_v17 }
 0xd7b   : > { %3672 = vadd.xlane.f32.xlu0 %v3671_v58  ;;  %8506 = vpow2.f32 %v3646_v33  ;;  %v3643_v33 = vsub.f32 %v10829_v22, %v10968_v37 }
 0xd7c   : > { %8508 = vrcp.f32 %v3202_v21 }
 0xd7d   : > { %8510 = vpow2.f32 %v3887_v35  ;;  %v3656_v58 = vmul.f32 1.442695, %v3643_v33 }
 0xd7e   : > { %3453 = vadd.xlane.f32.xlu2 %v3452_v9  ;;  %v3644_v9 = vsub.f32 %v10869_v15, %v3634_v4  ;;  %v3875_v15 = vsub.f32 %v10864_v47, %v10978_v54 }
 0xd7f   : > { %v8503_v51 = vpop.eup %8502 }
 0xd80   : > { %v8505_v52 = vpop.eup %8504  ;;  %v3464_v42 = vmul.f32 %v8503_v51, %v10890_v11  ;;  %v3205_v56 = vpop.xlane.xlu2 %3204  ;;  %v3889_v4 = vmul.f32 1.442695, %v3875_v15 }
 0xd81   : > { %v3463_v26 = vmul.f32 %v8505_v52, %v10888_v45  ;;  %8512 = vrcp.f32 %v3205_v56  ;;  %v11023_v63 = vpop.eup %8506  ;;  %v3872_v45 = vsub.f32 %v10831_v44, %v10953_v57  ;;  %v3658_v56 = vmul.f32 1.442695, %v3644_v9 }
 0xd82   : > { %8514 = vpow2.f32 %v3879_v28  ;;  %v8509_v17 = vpop.eup %8508  ;;  %v3662_v11 = vsel %vm1067_vm6, %v11023_v63, 0.0 }
 0xd83   : > { %v3471_v13 = vpack.c.bf16 %v3464_v42, %v3463_v26  ;;  %3906 = vadd.xlane.f32.xlu0 %v3905_v55  ;;  %v11030_v12 = vpop.eup %8510  ;;  %v3232_v37 = vmul.f32 %v8509_v17, %v10880_v31  ;;  %8516 = vpow2.f32 %v3656_v58  ;;  %v3883_v42 = vmul.f32 1.442695, %v3872_v45 }
 0xd84   : > { %v3908_v28 = vsel %vm1067_vm6, %v11030_v12, 0.0  ;;  %v3645_v55 = vsub.f32 %v10878_v29, %v10994_v18 }
 0xd85   : > { %7385 = vmatmul.msk.bf16.vlgmr.msra.gmra.mxu2 %vm1067_vm6, %v3471_v13  ;;  %8518 = vpow2.f32 %v3883_v42 }
 0xd86   : > { %3663 = vadd.xlane.f32.xlu2 %v3662_v11  ;;  %8520 = vpow2.f32 %v3658_v56  ;;  %v3660_v58 = vmul.f32 1.442695, %v3645_v55 }
 0xd87   : > { %v8513_v22 = vpop.eup %8512 }
 0xd88   : > { %v3233_v35 = vmul.f32 %v8513_v22, %v10897_v3  ;;  %v3439_v21 = vpop.xlane.xlu2 %3438  ;;  %v11037_v51 = vpop.eup %8514 }
 0xd89   : > { %v3896_v44 = vsel %vm1067_vm6, %v11037_v51, 0.0  ;;  %v11044_v31 = vpop.eup %8516  ;;  %8522 = vrcp.f32 %v3439_v21  ;;  %v3711_v21 = vpop.permute.xlu1 %3710 }
 0xd8a   : > { %v3240_v52 = vpack.c.bf16 %v3233_v35, %v3232_v37  ;;  %v3677_v57 = vsel %vm1067_vm6, %v11044_v31, 0.0  ;;  %8524 = vpow2.f32 %v3889_v4 }
 0xd8b   : > { %3909 = vadd.xlane.f32.xlu0 %v3908_v28  ;;  %v11050_v33 = vpop.eup %8518 }
 0xd8c   : > { %7369 = vmatmul.msk.bf16.vlgmr.msrb.gmra.mxu0 %vm1067_vm6, %v3240_v52  ;;  %v11052_v26 = vpop.eup %8520  ;;  %v3902_v47 = vsel %vm1067_vm6, %v11050_v33, 0.0 }
 0xd8d   : > { %v3680_v54 = vsel %vm1067_vm6, %v11052_v26, 0.0 }
 0xd8e   : > { %3897 = vadd.xlane.f32.xlu2 %v3896_v44 }
 0xd8f   : > { %v8523_v11 = vpop.eup %8522 }
 0xd90   : > { %v3208_v3 = vpop.xlane.xlu2 %3207  ;;  %v11056_v13 = vpop.xlane.xlu0 %3444  ;;  %v3465_v29 = vmul.f32 %v8523_v11, %v10902_v34 }
 0xd91   : > { %v11062_v22 = vpop.eup %8524  ;;  %v3938_v4 = vpop.permute.xlu1 %3937 }
 0xd92   : > { %v3911_v35 = vsel %vm1067_vm6, %v11062_v22, 0.0 }
 0xd93   : > { %3678 = vadd.xlane.f32.xlu0 %v3677_v57 }
 0xd98   : > { %v3442_v17 = vpop.xlane.xlu2 %3441  ;;  %v3214_v9 = vpop.xlane.xlu0 %3213 }
 0xd99   : > { %8526 = vrcp.f32 %v3442_v17 }
 0xd9a   : > { %8528 = vrcp.f32 %v3208_v3 }
 0xd9b   : > { %3903 = vadd.xlane.f32.xlu1 %v3902_v47  ;;  %3681 = vadd.xlane.f32.xlu0 %v3680_v54  ;;  %8530 = vpow2.f32 %v3660_v58  ;;  %v3642_v58 = vsub.f32 %v10841_v19, %v10974_v30 }
 0xd9f   : > { %v8527_v45 = vpop.eup %8526 }
 0xda0   : > { %v3466_v18 = vmul.f32 %v8527_v45, %v10922_v27  ;;  %v3211_v37 = vpop.xlane.xlu2 %3210  ;;  %v8529_v28 = vpop.eup %8528  ;;  %v3654_v45 = vmul.f32 1.442695, %v3642_v58 }
 0xda1   : > { %8532 = vrcp.f32 %v3211_v37  ;;  %v11071_v42 = vpop.eup %8530  ;;  %v3234_v27 = vmul.f32 %v8529_v28, %v10911_v60  ;;  %v3871_v60 = vsub.f32 %v10820_v48, %v10958_v14  ;;  %v3876_v48 = vsub.f32 %v10871_v24, %v10980_v23 }
 0xda2   : > { %v3472_v52 = vpack.c.bf16 %v3466_v18, %v3465_v29  ;;  %v3683_v15 = vsel %vm1067_vm6, %v11071_v42, 0.0  ;;  %8534 = vrcp.f32 %v3214_v9 }
 0xda3   : > { %3912 = vadd.xlane.f32.xlu1 %v3911_v35  ;;  %v3881_v55 = vmul.f32 1.442695, %v3871_v60 }
 0xda4   : > { %7386 = vmatmul.msk.bf16.gmra.mxu2 %vm1067_vm6, %v3472_v52 }
 0xda6   : > { %3708 = vrot.lane.b32.xlu2 %v10577_v36, %s8857_s15 }
 0xda7   : > { %v8533_v34 = vpop.eup %8532 }
 0xda8   : > { %v3235_v56 = vmul.f32 %v8533_v34, %v10930_v41  ;;  %v3940_v44 = vpop.permute.xlu2 %3939  ;;  %v8535_v41 = vpop.eup %8534 }
 0xda9   : > { %3967 = vmatpush.bf16.msrb.mxu2 %v3940_v44  ;;  %v3236_v47 = vmul.f32 %v8535_v41, %v10924_v8  ;;  %v3891_v8 = vmul.f32 1.442695, %v3876_v48 }
 0xdaa   : > { %v3241_v57 = vpack.c.bf16 %v3235_v56, %v3234_v27 }
 0xdab   : > { %v3713_v3 = vpop.permute.xlu0 %3712  ;;  %3684 = vadd.xlane.f32.xlu1 %v3683_v15 }
 0xdac   : > { %3734 = vmatpush.bf16.msra.mxu0 %v3713_v3 }
 0xdad   : > { %7370 = vmatmul.msk.bf16.gmra.mxu0 %vm1067_vm6, %v3241_v57  ;;  %3968 = vmatpush.bf16.msrb.mxu2 %v3938_v4 }
 0xdb0   : > { %3735 = vmatpush.bf16.msra.mxu0 %v3711_v21 }
 0xdbb   : > { %v3217_v36 = vpop.xlane.xlu1 %3216 }
 0xdbc   : > { %8536 = vrcp.f32 %v3217_v36 }
 0xdbd   : > { %8538 = vpow2.f32 %v3881_v55 }
 0xdbe   : > { %8540 = vpow2.f32 %v3654_v45 }
 0xdbf   : > { %8542 = vpow2.f32 %v3891_v8 }
 0xdc0   : > { %8544 = vrcp.f32 %v11056_v13 }
 0xdc2   : > { %v8537_v17 = vpop.eup %8536 }
 0xdc3   : > { %v3237_v54 = vmul.f32 %v8537_v17, %v10940_v16  ;;  %v11085_v29 = vpop.eup %8538  ;;  %v3451_v34 = vpop.xlane.xlu1 %3450 }
 0xdc4   : > { %v3899_v14 = vsel %vm1067_vm6, %v11085_v29, 0.0  ;;  %v11091_v16 = vpop.eup %8540 }
 0xdc5   : > { %v3242_v11 = vpack.c.bf16 %v3237_v54, %v3236_v47  ;;  %v3674_v19 = vsel %vm1067_vm6, %v11091_v16, 0.0  ;;  %v11095_v30 = vpop.eup %8542 }
 0xdc6   : > { %v3914_v18 = vsel %vm1067_vm6, %v11095_v30, 0.0  ;;  %v8545_v37 = vpop.eup %8544 }
 0xdc7   : > { %7371 = vmatmul.msk.bf16.gmra.mxu0 %vm1067_vm6, %v3242_v11  ;;  %v3467_v21 = vmul.f32 %v8545_v37, %v10913_v40 }
 0xdcb   : > { %v3895_v55 = vpop.xlane.xlu1 %3894 }
 0xdcf   : > { %3900 = vadd.xlane.f32.xlu2 %v3899_v14 }
 0xdd6   : > { %v3223_v23 = vpop.xlane.xlu0 %3222 }
 0xdd7   : > { %3675 = vadd.xlane.f32.xlu2 %v3674_v19 }
 0xdde   : > { %v3667_v60 = vpop.xlane.xlu0 %3666 }
 0xddf   : > { %3915 = vadd.xlane.f32.xlu2 %v3914_v18 }
 0xde1   : > { %v3448_v24 = vpop.xlane.xlu2 %3447 }
 0xde2   : > { %8546 = vrcp.f32 %v3448_v24 }
 0xde3   : > { %8548 = vrcp.f32 %v3223_v23  ;;  %v3707_v19 = vpop.permute.xlu1 %3706 }
 0xde8   : > { %v8547_v35 = vpop.eup %8546 }
 0xde9   : > { %v3468_v9 = vmul.f32 %v8547_v35, %v10983_v49  ;;  %v3220_v52 = vpop.xlane.xlu2 %3219  ;;  %v8549_v27 = vpop.eup %8548 }
 0xdea   : > { %8550 = vrcp.f32 %v3220_v52  ;;  %v3239_v13 = vmul.f32 %v8549_v27, %v10966_v2 }
 0xdeb   : > { %v3473_v28 = vpack.c.bf16 %v3468_v9, %v3467_v21  ;;  %8552 = vrcp.f32 %v3451_v34 }
 0xded   : > { %7387 = vmatmul.msk.bf16.gmra.mxu2 %vm1067_vm6, %v3473_v28 }
 0xdf0   : > { %v8551_v56 = vpop.eup %8550 }
 0xdf1   : > { %v3238_v44 = vmul.f32 %v8551_v56, %v10998_v61  ;;  %v3454_v15 = vpop.xlane.xlu2 %3453  ;;  %v8553_v40 = vpop.eup %8552 }
 0xdf2   : > { %8554 = vrcp.f32 %v3454_v15  ;;  %v3469_v57 = vmul.f32 %v8553_v40, %v10951_v20  ;;  %v3670_v61 = vpop.xlane.xlu0 %3669 }
 0xdf3   : > { %v3243_v3 = vpack.c.bf16 %v3239_v13, %v3238_v44  ;;  %8556 = vrcp.f32 %v3895_v55 }
 0xdf5   : > { %7372 = vmatmul.msk.bf16.gmra.mxu0 %vm1067_vm6, %v3243_v3 }
 0xdf8   : > { %v8555_v49 = vpop.eup %8554 }
 0xdf9   : > { %v3470_v4 = vmul.f32 %v8555_v49, %v11009_v0  ;;  %v3664_v36 = vpop.xlane.xlu2 %3663  ;;  %v8557_v17 = vpop.eup %8556 }
 0xdfa   : > { %8558 = vrcp.f32 %v3664_v36  ;;  %v3925_v20 = vmul.f32 %v8557_v17, %v10960_v10  ;;  %v3673_v18 = vpop.xlane.xlu0 %3672 }
 0xdfb   : > { %v3474_v41 = vpack.c.bf16 %v3470_v4, %v3469_v57 }
 0xdfd   : > { %7388 = vmatmul.msk.bf16.gmra.mxu2 %vm1067_vm6, %v3474_v41 }
 0xe00   : > { %v8559_v47 = vpop.eup %8558 }
 0xe01   : > { %v3898_v2 = vpop.xlane.xlu2 %3897  ;;  %v3694_v48 = vmul.f32 %v8559_v47, %v11023_v63 }
 0xe02   : > { %8560 = vrcp.f32 %v3898_v2  ;;  %v3907_v21 = vpop.xlane.xlu0 %3906 }
 0xe03   : > { %8562 = vrcp.f32 %v3667_v60 }
 0xe04   : > { %8564 = vrcp.f32 %v3673_v18 }
 0xe05   : > { %8566 = vrcp.f32 %v3670_v61 }
 0xe08   : > { %v8561_v54 = vpop.eup %8560  ;;  %v3508_v58 = vpop.f32.mrf.mxu2 }
 0xe09   : > { %v3926_v0 = vmul.f32 %v8561_v54, %v11037_v51  ;;  %v3709_v11 = vpop.permute.xlu2 %3708  ;;  %v8563_v45 = vpop.eup %8562 }
 0xe0a   : > { %3736 = vmatpush.bf16.msra.mxu0 %v3709_v11  ;;  %v3695_v8 = vmul.f32 %v8563_v45, %v10976_v50  ;;  %v8565_v10 = vpop.eup %8564  ;;  %v3910_v9 = vpop.xlane.xlu0 %3909 }
 0xe0b   : > { %v3933_v14 = vpack.c.bf16 %v3926_v0, %v3925_v20  ;;  %v8567_v51 = vpop.eup %8566  ;;  %v3697_v63 = vmul.f32 %v8565_v10, %v11006_v6  ;;  %v11119_v27 = vpop.f32.mrf.mxu0 }
 0xe0c   : > { %v3702_v24 = vpack.c.bf16 %v3695_v8, %v3694_v48  ;;  %v3696_v50 = vmul.f32 %v8567_v51, %v10991_v39  ;;  %v12674_v51 = vpack.c.bf16 %v9344_v5, %v9358_v1  ;;  %v12676_v1 = vpack.c.bf16 %v9479_v59, %v9476_v43  ;;  %v7733_v59 = vld [vmem:[%s12633_s6 + $0x18] sm:$0xff] }
 0xe0d   : > { %7417 = vmatmul.msk.bf16.vlgmr.msrb.gmra.mxu2 %vm1067_vm6, %v3933_v14  ;;  %4151 = vmatpush.bf16.msrb.mxu3 %v7733_v59 }
 0xe0e   : > { %3737 = vmatpush.bf16.msra.mxu0 %v3707_v19  ;;  %v3703_v35 = vpack.c.bf16 %v3697_v63, %v3696_v50  ;;  %v3904_v52 = vpop.xlane.xlu1 %3903 }
 0xe0f   : > { %8568 = vrcp.f32 %v3904_v52 }
 0xe10   : > { %v3510_v23 = vpop.f32.mrf.mxu2 }
 0xe11   : > { %v8088_v37 = vpack.i.bf16 %v3510_v23, %v3508_v58  ;;  %7401 = vmatmul.msk.bf16.vlgmr.msra.gmra.mxu0 %vm1067_vm6, %v3702_v24 }
 0xe12   : > { %v3679_v34 = vpop.xlane.xlu0 %3678 }
 0xe13   : > { %8089 = vrot.lane.b32.xlu2 %v8088_v37, %s8858_s16  ;;  %v11124_v49 = vpop.f32.mrf.mxu0 }
 0xe15   : > { %v8569_v56 = vpop.eup %8568 }
 0xe16   : > { %v3928_v44 = vmul.f32 %v8569_v56, %v11050_v33  ;;  %v3913_v6 = vpop.xlane.xlu1 %3912  ;;  %v7747_v33 = vld [vmem:[%s12632_s5 + $0x58] sm:$0xff] }
 0xe17   : > { %5130 = vmatpush.bf16.msra.mxu2 %v7747_v33 }
 0xe1a   : > { %v3682_v55 = vpop.xlane.xlu0 %3681 }
 0xe21   : > { %7402 = vmatmul.msk.bf16.gmra.mxu0 %vm1067_vm6, %v3703_v35  ;;  %v12675_v35 = vpack.c.bf16 %v9465_v32, %v9462_v7 }
 0xe27   : > { %v3513_v20 = vpop.f32.mrf.mxu2 }
 0xe2a   : > { %v11133_v17 = vpop.f32.mrf.mxu0 }
 0xe2f   : > { %v3515_v8 = vpop.f32.mrf.mxu2 }
 0xe30   : > { %v8103_v56 = vpack.i.bf16 %v3515_v8, %v3513_v20 }
 0xe32   : > { %v11142_v45 = vpop.f32.mrf.mxu0 }
 0xe42   : > { %v3901_v28 = vpop.xlane.xlu2 %3900 }
 0xe43   : > { %8570 = vrcp.f32 %v3901_v28 }
 0xe44   : > { %8572 = vrcp.f32 %v3679_v34  ;;  %v11147_v24 = vpop.f32.mrf.mxu0 }
 0xe49   : > { %v8571_v13 = vpop.eup %8570 }
 0xe4a   : > { %v3927_v39 = vmul.f32 %v8571_v13, %v11085_v29  ;;  %v3676_v15 = vpop.xlane.xlu2 %3675  ;;  %v8573_v40 = vpop.eup %8572 }
 0xe4b   : > { %8574 = vrcp.f32 %v3676_v15  ;;  %v3699_v4 = vmul.f32 %v8573_v40, %v11044_v31  ;;  %v3685_v29 = vpop.xlane.xlu1 %3684 }
 0xe4c   : > { %v3934_v3 = vpack.c.bf16 %v3928_v44, %v3927_v39  ;;  %8576 = vrcp.f32 %v3910_v9  ;;  %v11150_v37 = vpop.f32.mrf.mxu0 }
 0xe4d   : > { %8578 = vrcp.f32 %v3907_v21 }
 0xe4e   : > { %7418 = vmatmul.msk.bf16.gmra.mxu2 %vm1067_vm6, %v3934_v3  ;;  %8580 = vrcp.f32 %v3685_v29 }
 0xe4f   : > { %8582 = vrcp.f32 %v3682_v55 }
 0xe51   : > { %v8575_v57 = vpop.eup %8574 }
 0xe52   : > { %v3698_v36 = vmul.f32 %v8575_v57, %v11091_v16  ;;  %v8577_v41 = vpop.eup %8576  ;;  %v7746_v16 = vld [vmem:[%s12632_s5 + $0x50] sm:$0xff]  ;;  %v3916_v47 = vpop.xlane.xlu2 %3915 }
 0xe53   : > { %v8579_v2 = vpop.eup %8578  ;;  %v3930_v61 = vmul.f32 %v8577_v41, %v11030_v12  ;;  %5131 = vmatpush.bf16.msra.mxu2 %v7746_v16  ;;  %8584 = vrcp.f32 %v3916_v47  ;;  %v7732_v41 = vld [vmem:[%s12633_s6 + $0x10] sm:$0xff] }
 0xe54   : > { %v3704_v60 = vpack.c.bf16 %v3699_v4, %v3698_v36  ;;  %v3929_v31 = vmul.f32 %v8579_v2, %v11017_v53  ;;  %v8581_v58 = vpop.eup %8580  ;;  %8586 = vrcp.f32 %v3913_v6  ;;  %v12677_v6 = vpack.c.bf16 %v9497_v46, %v9494_v38  ;;  %4152 = vmatpush.bf16.msrb.mxu3 %v7732_v41 }
 0xe55   : > { %v8583_v0 = vpop.eup %8582  ;;  %v3701_v12 = vmul.f32 %v8581_v58, %v11071_v42 }
 0xe56   : > { %7403 = vmatmul.msk.bf16.gmra.mxu0 %vm1067_vm6, %v3704_v60  ;;  %v3935_v54 = vpack.c.bf16 %v3930_v61, %v3929_v31  ;;  %v3700_v11 = vmul.f32 %v8583_v0, %v11052_v26 }
 0xe58   : > { %v3705_v53 = vpack.c.bf16 %v3701_v12, %v3700_v11 }
 0xe59   : > { %v8585_v48 = vpop.eup %8584 }
 0xe5a   : > { %v8587_v14 = vpop.eup %8586  ;;  %v3932_v19 = vmul.f32 %v8585_v48, %v11095_v30 }
 0xe5b   : > { %v3931_v18 = vmul.f32 %v8587_v14, %v11062_v22 }
 0xe5d   : > { %v3936_v23 = vpack.c.bf16 %v3932_v19, %v3931_v18 }
 0xe5e   : > { %7419 = vmatmul.msk.bf16.gmra.mxu2 %vm1067_vm6, %v3935_v54 }
 0xe66   : > { %7404 = vmatmul.msk.bf16.gmra.mxu0 %vm1067_vm6, %v3705_v53 }
 0xe6d   : > { %v8090_v61 = vpop.permute.xlu2 %8089 }
 0xe6e   : > { %7420 = vmatmul.msk.bf16.gmra.mxu2 %vm1067_vm6, %v3936_v23  ;;  %v8092_v31 = vunpack.i.h.bf16 %v8090_v61  ;;  %v8091_v16 = vunpack.i.l.bf16 %v8090_v61 }
 0xe70   : > { %v3518_v42 = vpop.f32.mrf.mxu2  ;;  %v4087_v20 = vsel %vm1013_vm5, %v11124_v49, %v8092_v31  ;;  %v4086_v0 = vsel %vm1013_vm5, %v11119_v27, %v8091_v16 }
 0xe72   : > { %v11152_v10 = vpop.f32.mrf.mxu0 }
 0xe78   : > { %v3520_v26 = vpop.f32.mrf.mxu2 }
 0xe79   : > { %v8118_v13 = vpack.i.bf16 %v3520_v26, %v3518_v42 }
 0xe7a   : > { %v11158_v30 = vpop.f32.mrf.mxu0 }
 0xe7e   : > { %7524 = vmatmul.msk.bf16.vlgmr.msra.gmra.mxu2 %vm372_vm0, %v12674_v51 }
 0xe80   : > { %v3523_v63 = vpop.f32.mrf.mxu2 }
 0xe88   : > { %v3525_v22 = vpop.f32.mrf.mxu2 }
 0xe89   : > { %v8133_v44 = vpack.i.bf16 %v3525_v22, %v3523_v63 }
 0xe8e   : > { %v3739_v50 = vpop.f32.mrf.mxu0  ;;  %7525 = vmatmul.msk.bf16.gmra.mxu2 %vm372_vm0, %v12675_v35 }
 0xe90   : > { %v3970_v21 = vpop.f32.mrf.mxu2 }
 0xe96   : > { %v3741_v9 = vpop.f32.mrf.mxu0 }
 0xe97   : > { %v8093_v52 = vpack.i.bf16 %v3741_v9, %v3739_v50 }
 0xe98   : > { %v3972_v28 = vpop.f32.mrf.mxu2 }
 0xe99   : > { %v8098_v34 = vpack.i.bf16 %v3972_v28, %v3970_v21  ;;  %8094 = vrot.lane.b32.xlu0 %v8093_v52, %s8859_s18 }
 0xe9b   : > { %8099 = vrot.lane.b32.xlu1 %v8098_v34, %s8860_s19 }
 0xe9e   : > { %v3744_v5 = vpop.f32.mrf.mxu0  ;;  %7526 = vmatmul.msk.bf16.gmra.mxu2 %vm372_vm0, %v12676_v1 }
 0xea1   : > { %8104 = vrot.lane.b32.xlu0 %v8103_v56, %s8858_s16 }
 0xea3   : > { %8119 = vrot.lane.b32.xlu1 %v8118_v13, %s8858_s16 }
 0xea6   : > { %v3746_v7 = vpop.f32.mrf.mxu0 }
 0xea7   : > { %v8108_v32 = vpack.i.bf16 %v3746_v7, %v3744_v5 }
 0xea9   : > { %8109 = vrot.lane.b32.xlu2 %v8108_v32, %s8859_s18 }
 0xeab   : > { %8134 = vrot.lane.b32.xlu1 %v8133_v44, %s8858_s16 }
 0xeae   : > { %7527 = vmatmul.msk.bf16.gmra.mxu2 %vm372_vm0, %v12677_v6 }
 0xed1   : > { %v3975_v43 = vpop.f32.mrf.mxu2 }
 0xed3   : > { %v3749_v39 = vpop.f32.mrf.mxu0 }
 0xed9   : > { %v3977_v15 = vpop.f32.mrf.mxu2 }
 0xeda   : > { %v8113_v3 = vpack.i.bf16 %v3977_v15, %v3975_v43 }
 0xedb   : > { %v3751_v40 = vpop.f32.mrf.mxu0 }
 0xedc   : > { %v8123_v57 = vpack.i.bf16 %v3751_v40, %v3749_v39  ;;  %8114 = vrot.lane.b32.xlu0 %v8113_v3, %s8860_s19 }
 0xede   : > { %8124 = vrot.lane.b32.xlu2 %v8123_v57, %s8859_s18 }
 0xee1   : > { %v3980_v4 = vpop.f32.mrf.mxu2 }
 0xee3   : > { %v3754_v36 = vpop.f32.mrf.mxu0 }
 0xee9   : > { %v3982_v38 = vpop.f32.mrf.mxu2 }
 0xeea   : > { %v8128_v46 = vpack.i.bf16 %v3982_v38, %v3980_v4 }
 0xeeb   : > { %v3756_v33 = vpop.f32.mrf.mxu0 }
 0xeec   : > { %v8138_v29 = vpack.i.bf16 %v3756_v33, %v3754_v36  ;;  %8129 = vrot.lane.b32.xlu0 %v8128_v46, %s8860_s19 }
 0xeee   : > { %8139 = vrot.lane.b32.xlu2 %v8138_v29, %s8859_s18 }
 0xef1   : > { %v3985_v60 = vpop.f32.mrf.mxu2 }
 0xef9   : > { %v3987_v55 = vpop.f32.mrf.mxu2 }
 0xefa   : > { %v8143_v2 = vpack.i.bf16 %v3987_v55, %v3985_v60 }
 0xefc   : > { %8144 = vrot.lane.b32.xlu0 %v8143_v2, %s8860_s19 }
 0xf03   : > { %v8110_v26 = vpop.permute.xlu2 %8109 }
 0xf04   : > { %v8112_v63 = vunpack.i.h.bf16 %v8110_v26  ;;  %v8111_v22 = vunpack.i.l.bf16 %v8110_v26 }
 0xf0b   : > { %v8095_v47 = vpop.permute.xlu0 %8094 }
 0xf0c   : > { %v8097_v54 = vunpack.i.h.bf16 %v8095_v47  ;;  %v8096_v58 = vunpack.i.l.bf16 %v8095_v47 }
 0xf0d   : > { %v8100_v12 = vpop.permute.xlu1 %8099 }
 0xf0e   : > { %v4094_v11 = vsel %vm2010_vm7, %v4086_v0, %v8096_v58  ;;  %v4095_v53 = vsel %vm2010_vm7, %v4087_v20, %v8097_v54  ;;  %v8102_v48 = vunpack.i.h.bf16 %v8100_v12  ;;  %v8101_v14 = vunpack.i.l.bf16 %v8100_v12 }
 0xf10   : > { %v4102_v8 = vsel %vm2019_vm8, %v4094_v11, %v8101_v14  ;;  %v4103_v19 = vsel %vm2019_vm8, %v4095_v53, %v8102_v48 }
 0xf11   : > { %v4110_v18 = vpack.c.bf16 %v4103_v19, %v4102_v8  ;;  %v12678_v8 = vld [vmem:[#allocation3_spill] sm:$0xff] }
 0xf13   : > { %7434 = vmatmul.msk.bf16.vlgmr.msrb.gmra.mxu3 %vm372_vm0, %v4110_v18  ;;  %v8105_v23 = vpop.permute.xlu0 %8104 }
 0xf14   : > { %v8107_v42 = vunpack.i.h.bf16 %v8105_v23  ;;  %v8106_v49 = vunpack.i.l.bf16 %v8105_v23 }
 0xf16   : > { %v4089_v27 = vsel %vm1013_vm5, %v11142_v45, %v8107_v42  ;;  %v4088_v51 = vsel %vm1013_vm5, %v11133_v17, %v8106_v49  ;;  %v8120_v45 = vpop.permute.xlu1 %8119  ;;  %v12679_v42 = vld [vmem:[#allocation4_spill] sm:$0xff] }
 0xf17   : > { %v4096_v9 = vsel %vm2010_vm7, %v4088_v51, %v8111_v22  ;;  %v4097_v52 = vsel %vm2010_vm7, %v4089_v27, %v8112_v63  ;;  %v8122_v56 = vunpack.i.h.bf16 %v8120_v45  ;;  %v8121_v17 = vunpack.i.l.bf16 %v8120_v45  ;;  %v12680_v51 = vld [vmem:[#allocation5_spill] sm:$0xff] }
 0xf19   : > { %v4091_v44 = vsel %vm1013_vm5, %v11150_v37, %v8122_v56  ;;  %v4090_v6 = vsel %vm1013_vm5, %v11147_v24, %v8121_v17  ;;  %v12683_v17 = vld [vmem:[#allocation2_spill] sm:$0xff] }
 0xf1e   : > { %v8135_v4 = vpop.permute.xlu1 %8134 }
 0xf1f   : > { %v8137_v38 = vunpack.i.h.bf16 %v8135_v4  ;;  %v8136_v37 = vunpack.i.l.bf16 %v8135_v4 }
 0xf21   : > { %v4093_v29 = vsel %vm1013_vm5, %v11158_v30, %v8137_v38  ;;  %v4092_v60 = vsel %vm1013_vm5, %v11152_v10, %v8136_v37  ;;  %v8222_v30 = vld [vmem:[%s12630_s3 + $0x15] ss:$0 sm:$0xff] }
 0xf38   : > { %v8125_v1 = vpop.permute.xlu2 %8124 }
 0xf39   : > { %v8127_v13 = vunpack.i.h.bf16 %v8125_v1  ;;  %v8126_v7 = vunpack.i.l.bf16 %v8125_v1 }
 0xf3b   : > { %v4099_v39 = vsel %vm2010_vm7, %v4091_v44, %v8127_v13  ;;  %v4098_v15 = vsel %vm2010_vm7, %v4090_v6, %v8126_v7 }
 0xf48   : > { %v8140_v36 = vpop.permute.xlu2 %8139 }
 0xf49   : > { %v8142_v46 = vunpack.i.h.bf16 %v8140_v36  ;;  %v8141_v33 = vunpack.i.l.bf16 %v8140_v36 }
 0xf4b   : > { %v4101_v2 = vsel %vm2010_vm7, %v4093_v29, %v8142_v46  ;;  %v4100_v61 = vsel %vm2010_vm7, %v4092_v60, %v8141_v33 }
 0xf4e   : > { %v8115_v50 = vpop.permute.xlu0 %8114 }
 0xf4f   : > { %v8117_v35 = vunpack.i.h.bf16 %v8115_v50  ;;  %v8116_v21 = vunpack.i.l.bf16 %v8115_v50 }
 0xf51   : > { %v4104_v28 = vsel %vm2019_vm8, %v4096_v9, %v8116_v21  ;;  %v4105_v34 = vsel %vm2019_vm8, %v4097_v52, %v8117_v35  ;;  %v12681_v21 = vld [vmem:[#allocation6_spill] sm:$0xff] }
 0xf52   : > { %v4111_v5 = vpack.c.bf16 %v4105_v34, %v4104_v28 }
 0xf54   : > { %7435 = vmatmul.msk.bf16.gmra.mxu3 %vm372_vm0, %v4111_v5  ;;  %v12682_v5 = vld [vmem:[#allocation7_spill] sm:$0xff] }
 0xf5e   : > { %v8130_v32 = vpop.permute.xlu0 %8129 }
 0xf5f   : > { %v8132_v43 = vunpack.i.h.bf16 %v8130_v32  ;;  %v8131_v59 = vunpack.i.l.bf16 %v8130_v32 }
 0xf61   : > { %v4106_v3 = vsel %vm2019_vm8, %v4098_v15, %v8131_v59  ;;  %v4107_v40 = vsel %vm2019_vm8, %v4099_v39, %v8132_v43  ;;  %v12684_v15 = vld [vmem:[#allocation8_spill] sm:$0xff] }
 0xf62   : > { %v4112_v57 = vpack.c.bf16 %v4107_v40, %v4106_v3 }
 0xf64   : > { %7436 = vmatmul.msk.bf16.gmra.mxu3 %vm372_vm0, %v4112_v57 }
 0xf6e   : > { %v8145_v24 = vpop.permute.xlu0 %8144 }
 0xf6f   : > { %v8147_v41 = vunpack.i.h.bf16 %v8145_v24  ;;  %v8146_v55 = vunpack.i.l.bf16 %v8145_v24 }
 0xf71   : > { %v4108_v31 = vsel %vm2019_vm8, %v4100_v61, %v8146_v55  ;;  %v4109_v16 = vsel %vm2019_vm8, %v4101_v2, %v8147_v41 }
 0xf72   : > { %v4113_v47 = vpack.c.bf16 %v4109_v16, %v4108_v31 }
 0xf74   : > { %7437 = vmatmul.msk.bf16.gmra.mxu3 %vm372_vm0, %v4113_v47 }
 0xf96   : > { %v4154_v54 = vpop.f32.mrf.mxu3 }
 0xf97   : > { %v4155_v58 = vadd.f32 %v8222_v30, %v4154_v54 }
 0xf99   : > { %v11229_v10 = vadd.f32 %v4155_v58, %v10419_v62 }
 0xf9b   : > { %v4184_v20 = vsel %vm372_vm0, %v11229_v10, 0.0 }
 0xf9c   : > { %4185 = vadd.xlane.f32.xlu1 %v4184_v20 }
 0xf9e   : > { %v4156_v0 = vpop.f32.mrf.mxu3 }
 0xf9f   : > { %v4157_v12 = vadd.f32 %v8222_v30, %v4156_v0 }
 0xfa1   : > { %v11234_v11 = vadd.f32 %v4157_v12, %v10424_v25 }
 0xfa3   : > { %v4187_v53 = vsel %vm372_vm0, %v11234_v11, 0.0 }
 0xfa4   : > { %4188 = vadd.xlane.f32.xlu2 %v4187_v53 }
 0xfd7   : > { %v4159_v48 = vpop.f32.mrf.mxu3 }
 0xfd8   : > { %v4160_v14 = vadd.f32 %v8222_v30, %v4159_v48 }
 0xfda   : > { %v11239_v19 = vadd.f32 %v4160_v14, %v12678_v8 }
 0xfdc   : > { %v4190_v62 = vsel %vm372_vm0, %v11239_v19, 0.0 }
 0xfdd   : > { %4191 = vadd.xlane.f32.xlu0 %v4190_v62 }
 0xfdf   : > { %v4161_v18 = vpop.f32.mrf.mxu3 }
 0xfe0   : > { %v4162_v23 = vadd.f32 %v8222_v30, %v4161_v18  ;;  %v7735_v18 = vld [vmem:[%s12634_s7 + $0x18] sm:$0xff] }
 0xfe1   : > { %4419 = vmatpush.bf16.msrb.mxu0 %v7735_v18 }
 0xfe2   : > { %v11244_v49 = vadd.f32 %v4162_v23, %v12679_v42 }
 0xfe4   : > { %v4193_v25 = vsel %vm372_vm0, %v11244_v49, 0.0 }
 0xfe5   : > { %4194 = vadd.xlane.f32.xlu2 %v4193_v25 }
 0xfe7   : > { %v4164_v26 = vpop.f32.mrf.mxu3 }
 0xfe8   : > { %v4165_v27 = vadd.f32 %v8222_v30, %v4164_v26  ;;  %v7734_v26 = vld [vmem:[%s12634_s7 + $0x10] sm:$0xff] }
 0xfe9   : > { %4420 = vmatpush.bf16.msrb.mxu0 %v7734_v26 }
 0xfea   : > { %v11249_v63 = vadd.f32 %v4165_v27, %v12680_v51 }
 0xfec   : > { %v4196_v22 = vsel %vm372_vm0, %v11249_v63, 0.0 }
 0xfed   : > { %4197 = vadd.xlane.f32.xlu1 %v4196_v22 }
 0xfef   : > { %v4166_v50 = vpop.f32.mrf.mxu3 }
 0xff0   : > { %v4167_v35 = vadd.f32 %v8222_v30, %v4166_v50 }
 0xff2   : > { %v11254_v9 = vadd.f32 %v4167_v35, %v12681_v21 }
 0xff4   : > { %v4199_v52 = vsel %vm372_vm0, %v11254_v9, 0.0 }
 0xff5   : > { %4200 = vadd.xlane.f32.xlu0 %v4199_v52 }
 0xff7   : > { %v4169_v28 = vpop.f32.mrf.mxu3 }
 0xff8   : > { %v4170_v34 = vadd.f32 %v8222_v30, %v4169_v28 }
 0xffa   : > { %v11259_v45 = vadd.f32 %v4170_v34, %v12682_v5 }
 0xffc   : > { %v4202_v1 = vsel %vm372_vm0, %v11259_v45, 0.0 }
 0xffd   : > { %4203 = vadd.xlane.f32.xlu0 %v4202_v1 }
 0xfff   : > { %v4171_v32 = vpop.f32.mrf.mxu3 }
0x1000   : > { %v4172_v6 = vadd.f32 %v8222_v30, %v4171_v32 }
0x1002   : > { %v11272_v3 = vadd.f32 %v4172_v6, %v12684_v15 }
0x1004   : > { %v4205_v36 = vsel %vm372_vm0, %v11272_v3, 0.0 }
0x100f   : > { %v4186_v56 = vpop.xlane.xlu1 %4185 }
0x1010   : > { %v4208_v13 = vmul.f32 %v4186_v56, %v12683_v17 }
0x1012   : > { %v11265_v7 = vsub.f32 %v11229_v10, %v4208_v13 }
0x1014   : > { %v4224_v44 = vmul.f32 %v11265_v7, %v11265_v7 }
0x1016   : > { %v4232_v43 = vsel %vm372_vm0, %v4224_v44, 0.0 }
0x1017   : > { %v4189_v59 = vpop.xlane.xlu2 %4188  ;;  %4233 = vadd.xlane.f32.xlu2 %v4232_v43 }
0x1018   : > { %v4209_v39 = vmul.f32 %v4189_v59, %v12683_v17 }
0x101a   : > { %v11275_v40 = vsub.f32 %v11234_v11, %v4209_v39 }
0x101c   : > { %v4225_v57 = vmul.f32 %v11275_v40, %v11275_v40 }
0x101e   : > { %v4235_v4 = vsel %vm372_vm0, %v4225_v57, 0.0  ;;  %v11335_v57 = vld [vmem:[%s12630_s3 + $0x12] ss:$0 sm:$0xff] }
0x101f   : > { %4236 = vadd.xlane.f32.xlu1 %v4235_v4  ;;  %4206 = vadd.xlane.f32.xlu2 %v4205_v36 }
0x1050   : > { %v4192_v38 = vpop.xlane.xlu0 %4191 }
0x1051   : > { %v4210_v37 = vmul.f32 %v4192_v38, %v12683_v17 }
0x1053   : > { %v11284_v46 = vsub.f32 %v11239_v19, %v4210_v37  ;;  %v11341_v37 = vld [vmem:[%s12630_s3 + $0x13] ss:$0 sm:$0xff] }
0x1055   : > { %v4226_v33 = vmul.f32 %v11284_v46, %v11284_v46 }
0x1057   : > { %v4238_v24 = vsel %vm372_vm0, %v4226_v33, 0.0 }
0x1058   : > { %v4195_v29 = vpop.xlane.xlu2 %4194  ;;  %4239 = vadd.xlane.f32.xlu1 %v4238_v24 }
0x1059   : > { %v4211_v60 = vmul.f32 %v4195_v29, %v12683_v17 }
0x105b   : > { %v11291_v41 = vsub.f32 %v11244_v49, %v4211_v60 }
0x105d   : > { %v4227_v55 = vmul.f32 %v11291_v41, %v11291_v41 }
0x105f   : > { %v4241_v2 = vsel %vm372_vm0, %v4227_v55, 0.0 }
0x1060   : > { %4242 = vadd.xlane.f32.xlu0 %v4241_v2  ;;  %v4198_v61 = vpop.xlane.xlu1 %4197 }
0x1061   : > { %v4212_v31 = vmul.f32 %v4198_v61, %v12683_v17 }
0x1063   : > { %v11298_v16 = vsub.f32 %v11249_v63, %v4212_v31 }
0x1065   : > { %v4228_v47 = vmul.f32 %v11298_v16, %v11298_v16 }
0x1067   : > { %v4244_v30 = vsel %vm372_vm0, %v4228_v47, 0.0 }
0x1068   : > { %v4201_v54 = vpop.xlane.xlu0 %4200  ;;  %4245 = vadd.xlane.f32.xlu2 %v4244_v30 }
0x1069   : > { %v4213_v58 = vmul.f32 %v4201_v54, %v12683_v17 }
0x106b   : > { %v11305_v20 = vsub.f32 %v11254_v9, %v4213_v58 }
0x106d   : > { %v4229_v0 = vmul.f32 %v11305_v20, %v11305_v20 }
0x106f   : > { %v4247_v12 = vsel %vm372_vm0, %v4229_v0, 0.0 }
0x1070   : > { %v4204_v53 = vpop.xlane.xlu0 %4203  ;;  %4248 = vadd.xlane.f32.xlu1 %v4247_v12 }
0x1071   : > { %v4214_v48 = vmul.f32 %v4204_v53, %v12683_v17 }
0x1073   : > { %v11312_v14 = vsub.f32 %v11259_v45, %v4214_v48 }
0x1075   : > { %v4230_v8 = vmul.f32 %v11312_v14, %v11312_v14 }
0x1077   : > { %v4250_v62 = vsel %vm372_vm0, %v4230_v8, 0.0 }
0x1078   : > { %4251 = vadd.xlane.f32.xlu0 %v4250_v62 }
0x108a   : > { %v4234_v23 = vpop.xlane.xlu2 %4233 }
0x108b   : > { %v4256_v42 = vmul.f32 %v4234_v23, %v12683_v17 }
0x108d   : > { %v4264_v25 = vadd.f32 1e-05, %v4256_v42 }
0x108f   : > { %8588 = vrsqrt.f32 %v4264_v25  ;;  %vm4278_vm10 = vweird.f32 %v4264_v25 }
0x1092   : > { %v4207_v27 = vpop.xlane.xlu2 %4206  ;;  %v4237_v51 = vpop.xlane.xlu1 %4236 }
0x1093   : > { %v4215_v22 = vmul.f32 %v4207_v27, %v12683_v17  ;;  %v4257_v50 = vmul.f32 %v4237_v51, %v12683_v17 }
0x1095   : > { %v8589_v35 = vpop.eup %8588  ;;  %v11327_v21 = vsub.f32 %v11272_v3, %v4215_v22  ;;  %v4265_v52 = vadd.f32 1e-05, %v4257_v50 }
0x1096   : > { %v4273_v28 = vmul.f32 %v8589_v35, %v4264_v25  ;;  %vm4279_vm9 = vweird.f32 %v8589_v35 }
0x1097   : > { %8590 = vrsqrt.f32 %v4265_v52  ;;  %v4231_v34 = vmul.f32 %v11327_v21, %v11327_v21  ;;  %vm4280_vm11 = vmor %vm4278_vm10, %vm4279_vm9  ;;  %vm4288_vm13 = vweird.f32 %v4265_v52 }
0x1098   : > { %v4274_v5 = vmul.f32 %v8589_v35, %v4273_v28 }
0x1099   : > { %v4253_v1 = vsel %vm372_vm0, %v4231_v34, 0.0 }
0x109a   : > { %v4275_v56 = vmul.f32 0.5, %v4274_v5  ;;  %4254 = vadd.xlane.f32.xlu2 %v4253_v1 }
0x109c   : > { %v4276_v13 = vsub.f32 1.5, %v4275_v56 }
0x109d   : > { %v8591_v32 = vpop.eup %8590 }
0x109e   : > { %v4277_v44 = vmul.f32 %v8589_v35, %v4276_v13  ;;  %v4283_v6 = vmul.f32 %v8591_v32, %v4265_v52  ;;  %vm4289_vm12 = vweird.f32 %v8591_v32 }
0x109f   : > { %vm4290_vm14 = vmor %vm4288_vm13, %vm4289_vm12 }
0x10a0   : > { %v4284_v43 = vmul.f32 %v8591_v32, %v4283_v6  ;;  %v4281_v59 = vsel %vm4280_vm11, %v8589_v35, %v4277_v44 }
0x10a1   : > { %v4352_v4 = vmul.f32 %v4281_v59, %v11265_v7 }
0x10a2   : > { %v4285_v39 = vmul.f32 0.5, %v4284_v43 }
0x10a3   : > { %v4361_v33 = vmul.f32 %v11335_v57, %v4352_v4 }
0x10a4   : > { %v4286_v15 = vsub.f32 1.5, %v4285_v39 }
0x10a5   : > { %v4370_v60 = vadd.f32 %v11341_v37, %v4361_v33 }
0x10a6   : > { %v4287_v36 = vmul.f32 %v8591_v32, %v4286_v15 }
0x10a8   : > { %v4291_v38 = vsel %vm4290_vm14, %v8591_v32, %v4287_v36 }
0x10a9   : > { %v4353_v24 = vmul.f32 %v4291_v38, %v11275_v40 }
0x10ab   : > { %v4362_v29 = vmul.f32 %v11335_v57, %v4353_v24 }
0x10ad   : > { %v4371_v55 = vadd.f32 %v11341_v37, %v4362_v29 }
0x10af   : > { %v4378_v7 = vpack.c.bf16 %v4371_v55, %v4370_v60 }
0x10b1   : > { %7453 = vmatmul.msk.bf16.vlgmr.msrb.gmra.mxu0 %vm372_vm0, %v4378_v7 }
0x10cb   : > { %v4240_v2 = vpop.xlane.xlu1 %4239 }
0x10cc   : > { %v4258_v61 = vmul.f32 %v4240_v2, %v12683_v17 }
0x10ce   : > { %v4266_v31 = vadd.f32 1e-05, %v4258_v61 }
0x10d0   : > { %8592 = vrsqrt.f32 %v4266_v31  ;;  %vm4298_vm1 = vweird.f32 %v4266_v31 }
0x10d3   : > { %v4243_v47 = vpop.xlane.xlu0 %4242 }
0x10d4   : > { %v4259_v30 = vmul.f32 %v4243_v47, %v12683_v17 }
0x10d6   : > { %v8593_v54 = vpop.eup %8592  ;;  %v4267_v58 = vadd.f32 1e-05, %v4259_v30 }
0x10d7   : > { %v4293_v40 = vmul.f32 %v8593_v54, %v4266_v31  ;;  %vm4299_vm15 = vweird.f32 %v8593_v54 }
0x10d8   : > { %8594 = vrsqrt.f32 %v4267_v58  ;;  %vm4300_vm2 = vmor %vm4298_vm1, %vm4299_vm15  ;;  %vm4308_vm4 = vweird.f32 %v4267_v58 }
0x10d9   : > { %v4294_v0 = vmul.f32 %v8593_v54, %v4293_v40 }
0x10db   : > { %v4295_v12 = vmul.f32 0.5, %v4294_v0  ;;  %v4246_v53 = vpop.xlane.xlu2 %4245 }
0x10dc   : > { %v4260_v48 = vmul.f32 %v4246_v53, %v12683_v17 }
0x10dd   : > { %v4296_v8 = vsub.f32 1.5, %v4295_v12 }
0x10de   : > { %v8595_v62 = vpop.eup %8594  ;;  %v4268_v18 = vadd.f32 1e-05, %v4260_v48 }
0x10df   : > { %v4297_v23 = vmul.f32 %v8593_v54, %v4296_v8  ;;  %v4303_v42 = vmul.f32 %v8595_v62, %v4267_v58  ;;  %vm4309_vm3 = vweird.f32 %v8595_v62 }
0x10e0   : > { %8596 = vrsqrt.f32 %v4268_v18  ;;  %vm4310_vm9 = vmor %vm4308_vm4, %vm4309_vm3  ;;  %vm4318_vm11 = vweird.f32 %v4268_v18 }
0x10e1   : > { %v4304_v25 = vmul.f32 %v8595_v62, %v4303_v42  ;;  %v4301_v26 = vsel %vm4300_vm2, %v8593_v54, %v4297_v23 }
0x10e2   : > { %v4354_v52 = vmul.f32 %v4301_v26, %v11284_v46 }
0x10e3   : > { %v4305_v27 = vmul.f32 0.5, %v4304_v25  ;;  %v4249_v51 = vpop.xlane.xlu1 %4248 }
0x10e4   : > { %v4261_v22 = vmul.f32 %v4249_v51, %v12683_v17  ;;  %v4363_v32 = vmul.f32 %v11335_v57, %v4354_v52 }
0x10e5   : > { %v4306_v50 = vsub.f32 1.5, %v4305_v27 }
0x10e6   : > { %v8597_v35 = vpop.eup %8596  ;;  %v4269_v28 = vadd.f32 1e-05, %v4261_v22  ;;  %v4372_v39 = vadd.f32 %v11341_v37, %v4363_v32 }
0x10e7   : > { %v4307_v34 = vmul.f32 %v8595_v62, %v4306_v50  ;;  %v4313_v5 = vmul.f32 %v8597_v35, %v4268_v18  ;;  %vm4319_vm10 = vweird.f32 %v8597_v35 }
0x10e8   : > { %8598 = vrsqrt.f32 %v4269_v28  ;;  %vm4320_vm12 = vmor %vm4318_vm11, %vm4319_vm10  ;;  %vm4328_vm14 = vweird.f32 %v4269_v28 }
0x10e9   : > { %v4311_v1 = vsel %vm4310_vm9, %v8595_v62, %v4307_v34  ;;  %v4314_v56 = vmul.f32 %v8597_v35, %v4313_v5 }
0x10ea   : > { %v4355_v13 = vmul.f32 %v4311_v1, %v11291_v41 }
0x10eb   : > { %v4315_v44 = vmul.f32 0.5, %v4314_v56  ;;  %v4252_v29 = vpop.xlane.xlu0 %4251 }
0x10ec   : > { %v4364_v6 = vmul.f32 %v11335_v57, %v4355_v13  ;;  %v4262_v7 = vmul.f32 %v4252_v29, %v12683_v17  ;;  %v11378_v13 = vld [vmem:[%s12630_s3 + $0x18] ss:$0 sm:$0xff] }
0x10ed   : > { %v4316_v43 = vsub.f32 1.5, %v4315_v44 }
0x10ee   : > { %v8599_v59 = vpop.eup %8598  ;;  %v4373_v46 = vadd.f32 %v11341_v37, %v4364_v6  ;;  %v4270_v47 = vadd.f32 1e-05, %v4262_v7  ;;  %v7742_v7 = vld [vmem:[%s12635_s8 + $0x70] sm:$0xff] }
0x10ef   : > { %v4317_v15 = vmul.f32 %v8597_v35, %v4316_v43  ;;  %v4323_v4 = vmul.f32 %v8599_v59, %v4269_v28  ;;  %vm4329_vm13 = vweird.f32 %v8599_v59 }
0x10f0   : > { %v4379_v36 = vpack.c.bf16 %v4373_v46, %v4372_v39  ;;  %vm4330_vm15 = vmor %vm4328_vm14, %vm4329_vm13  ;;  %8600 = vrsqrt.f32 %v4270_v47  ;;  %vm4338_vm2 = vweird.f32 %v4270_v47 }
0x10f1   : > { %v4324_v38 = vmul.f32 %v8599_v59, %v4323_v4  ;;  %v4321_v41 = vsel %vm4320_vm12, %v8597_v35, %v4317_v15 }
0x10f2   : > { %7454 = vmatmul.msk.bf16.gmra.mxu0 %vm372_vm0, %v4379_v36  ;;  %v4356_v60 = vmul.f32 %v4321_v41, %v11298_v16 }
0x10f3   : > { %v4325_v33 = vmul.f32 0.5, %v4324_v38 }
0x10f4   : > { %v4365_v31 = vmul.f32 %v11335_v57, %v4356_v60 }
0x10f5   : > { %v4326_v24 = vsub.f32 1.5, %v4325_v33  ;;  %v7743_v33 = vld [vmem:[%s12635_s8 + $0x78] sm:$0xff] }
0x10f6   : > { %v4374_v54 = vadd.f32 %v11341_v37, %v4365_v31  ;;  %v8601_v16 = vpop.eup %8600  ;;  %4833 = vmatpush.bf16.msra.mxu1 %v7743_v33 }
0x10f7   : > { %v4327_v55 = vmul.f32 %v8599_v59, %v4326_v24  ;;  %v4333_v0 = vmul.f32 %v8601_v16, %v4270_v47  ;;  %vm4339_vm1 = vweird.f32 %v8601_v16 }
0x10f8   : > { %vm4340_vm3 = vmor %vm4338_vm2, %vm4339_vm1 }
0x10f9   : > { %v4331_v2 = vsel %vm4330_vm15, %v8599_v59, %v4327_v55  ;;  %v4334_v12 = vmul.f32 %v8601_v16, %v4333_v0 }
0x10fa   : > { %v4357_v61 = vmul.f32 %v4331_v2, %v11305_v20  ;;  %4834 = vmatpush.bf16.msra.mxu1 %v7742_v7 }
0x10fb   : > { %v4335_v8 = vmul.f32 0.5, %v4334_v12 }
0x10fc   : > { %v4366_v30 = vmul.f32 %v11335_v57, %v4357_v61 }
0x10fd   : > { %v4336_v62 = vsub.f32 1.5, %v4335_v8 }
0x10fe   : > { %v4375_v58 = vadd.f32 %v11341_v37, %v4366_v30 }
0x10ff   : > { %v4337_v23 = vmul.f32 %v8601_v16, %v4336_v62  ;;  %v7740_v62 = vld [vmem:[%s12635_s8 + $0x60] sm:$0xff] }
0x1100   : > { %v4380_v40 = vpack.c.bf16 %v4375_v58, %v4374_v54 }
0x1101   : > { %v4341_v26 = vsel %vm4340_vm3, %v8601_v16, %v4337_v23 }
0x1102   : > { %7455 = vmatmul.msk.bf16.gmra.mxu0 %vm372_vm0, %v4380_v40  ;;  %v4358_v22 = vmul.f32 %v4341_v26, %v11312_v14  ;;  %v7741_v40 = vld [vmem:[%s12635_s8 + $0x68] sm:$0xff]  ;;  %v7739_v26 = vld [vmem:[%s12635_s8 + $0x58] sm:$0xff] }
0x1103   : > { %4835 = vmatpush.bf16.msra.mxu1 %v7741_v40 }
0x1104   : > { %v4367_v28 = vmul.f32 %v11335_v57, %v4358_v22 }
0x1106   : > { %v4376_v5 = vadd.f32 %v11341_v37, %v4367_v28  ;;  %v7738_v28 = vld [vmem:[%s12635_s8 + $0x50] sm:$0xff] }
0x1107   : > { %4836 = vmatpush.bf16.msra.mxu1 %v7740_v62 }
0x110b   : > { %4837 = vmatpush.bf16.msra.mxu1 %v7739_v26 }
0x110d   : > { %v4255_v53 = vpop.xlane.xlu2 %4254 }
0x110e   : > { %v4263_v48 = vmul.f32 %v4255_v53, %v12683_v17 }
0x110f   : > { %4838 = vmatpush.bf16.msra.mxu1 %v7738_v28 }
0x1110   : > { %v4271_v20 = vadd.f32 1e-05, %v4263_v48 }
0x1112   : > { %8602 = vrsqrt.f32 %v4271_v20  ;;  %vm4348_vm9 = vweird.f32 %v4271_v20 }
0x1118   : > { %v8603_v18 = vpop.eup %8602 }
0x1119   : > { %v4343_v42 = vmul.f32 %v8603_v18, %v4271_v20  ;;  %vm4349_vm4 = vweird.f32 %v8603_v18 }
0x111a   : > { %vm4350_vm10 = vmor %vm4348_vm9, %vm4349_vm4 }
0x111b   : > { %v4344_v25 = vmul.f32 %v8603_v18, %v4343_v42 }
0x111d   : > { %v4345_v27 = vmul.f32 0.5, %v4344_v25 }
0x111f   : > { %v4346_v51 = vsub.f32 1.5, %v4345_v27 }
0x1121   : > { %v4347_v50 = vmul.f32 %v8603_v18, %v4346_v51 }
0x1123   : > { %v4351_v35 = vsel %vm4350_vm10, %v8603_v18, %v4347_v50 }
0x1124   : > { %v4359_v52 = vmul.f32 %v4351_v35, %v11327_v21 }
0x1126   : > { %v4368_v34 = vmul.f32 %v11335_v57, %v4359_v52 }
0x1128   : > { %v4377_v1 = vadd.f32 %v11341_v37, %v4368_v34 }
0x112a   : > { %v4381_v56 = vpack.c.bf16 %v4377_v1, %v4376_v5 }
0x112c   : > { %7456 = vmatmul.msk.bf16.gmra.mxu0 %vm372_vm0, %v4381_v56 }
0x112e   : > { %v4422_v14 = vpop.f32.mrf.mxu0 }
0x112f   : > { %v11382_v32 = vadd.f32 %v11378_v13, %v4422_v14 }
0x1131   : > { %v11385_v21 = vmul.f32 0.70710677, %v11382_v32 }
0x1133   : > { %v4458_v57 = vand.u32 2147483647, %v11385_v21  ;;  %vm4722_vm4 = vcmp.lt.f32.partialorder %v11385_v21, 0.0 }
0x1135   : > { %v4466_v44 = vmul.f32 0.3275911, %v4458_v57  ;;  %v4674_v47 = vsub.f32 0.0, %v4458_v57 }
0x1136   : > { %v4424_v6 = vpop.f32.mrf.mxu0 }
0x1137   : > { %v4474_v37 = vadd.f32 1.0, %v4466_v44  ;;  %v11389_v43 = vadd.f32 %v11378_v13, %v4424_v6  ;;  %v4682_v12 = vmul.f32 %v4674_v47, %v4458_v57  ;;  %v7737_v57 = vld [vmem:[%s12635_s8 + $0x48] sm:$0xff]  ;;  %v4442_v47 = vmul.f32 0.5, %v11382_v32 }
0x1138   : > { %4839 = vmatpush.bf16.msra.mxu1 %v7737_v57 }
0x1139   : > { %8604 = vrcp.f32 %v4474_v37  ;;  %v11392_v59 = vmul.f32 0.70710677, %v11389_v43  ;;  %v4493_v41 = vand.u32 2147483648, %v4474_v37  ;;  %v4491_v29 = vand.u32 2147483647, %v4474_v37 }
0x113a   : > { %vm4487_vm12 = vweird.f32 %v4474_v37  ;;  %v4690_v42 = vmul.f32 1.442695, %v4682_v12 }
0x113b   : > { %v4459_v39 = vand.u32 2147483647, %v11392_v59  ;;  %v4494_v55 = vor.u32 1.1754944e-38, %v4493_v41  ;;  %vm4492_vm14 = vcmp.eq.f32.partialorder %v4491_v29, 8.507059e+37  ;;  %vm4723_vm9 = vcmp.lt.f32.partialorder %v11392_v59, 0.0 }
0x113d   : > { %v4467_v46 = vmul.f32 0.3275911, %v4459_v39  ;;  %v4675_v22 = vsub.f32 0.0, %v4459_v39 }
0x113f   : > { %v8605_v15 = vpop.eup %8604  ;;  %v4475_v36 = vadd.f32 1.0, %v4467_v46  ;;  %v4683_v5 = vmul.f32 %v4675_v22, %v4459_v39 }
0x1140   : > { %v4483_v4 = vmul.f32 %v8605_v15, %v4474_v37  ;;  %vm4488_vm11 = vweird.f32 %v8605_v15 }
0x1141   : > { %8606 = vrcp.f32 %v4475_v36  ;;  %vm4489_vm13 = vmor %vm4487_vm12, %vm4488_vm11  ;;  %v4508_v0 = vand.u32 2147483648, %v4475_v36  ;;  %v4506_v48 = vand.u32 2147483647, %v4475_v36  ;;  %vm4502_vm1 = vweird.f32 %v4475_v36 }
0x1142   : > { %v4484_v38 = vsub.f32 1.0, %v4483_v4  ;;  %8608 = vpow2.f32 %v4690_v42  ;;  %v4692_v6 = vmul.f32 1.442695, %v4683_v5 }
0x1143   : > { %v4509_v23 = vor.u32 1.1754944e-38, %v4508_v0  ;;  %vm4507_vm3 = vcmp.eq.f32.partialorder %v4506_v48, 8.507059e+37 }
0x1144   : > { %v4485_v24 = vmul.f32 %v8605_v15, %v4484_v38  ;;  %8610 = vpow2.f32 %v4692_v6 }
0x1146   : > { %v4486_v60 = vadd.f32 %v8605_v15, %v4485_v24 }
0x1147   : > { %v8607_v2 = vpop.eup %8606 }
0x1148   : > { %v4490_v61 = vsel %vm4489_vm13, %v8605_v15, %v4486_v60  ;;  %v4498_v30 = vmul.f32 %v8607_v2, %v4475_v36  ;;  %vm4503_vm15 = vweird.f32 %v8607_v2  ;;  %v8609_v37 = vpop.eup %8608  ;;  %v7736_v36 = vld [vmem:[%s12635_s8 + $0x40] sm:$0xff] }
0x1149   : > { %v4495_v31 = vsel %vm4492_vm14, %v4494_v55, %v4490_v61  ;;  %vm4504_vm2 = vmor %vm4502_vm1, %vm4503_vm15  ;;  %4840 = vmatpush.bf16.msra.mxu1 %v7736_v36 }
0x114a   : > { %v4602_v54 = vmul.f32 1.0614054, %v4495_v31  ;;  %v4499_v58 = vsub.f32 1.0, %v4498_v30  ;;  %v8611_v29 = vpop.eup %8610  ;;  %v4443_v30 = vmul.f32 0.5, %v11389_v43 }
0x114c   : > { %v4610_v16 = vadd.f32 -1.4531521, %v4602_v54  ;;  %v4500_v53 = vmul.f32 %v8607_v2, %v4499_v58 }
0x114e   : > { %v4618_v20 = vmul.f32 %v4610_v16, %v4495_v31  ;;  %v4501_v8 = vadd.f32 %v8607_v2, %v4500_v53 }
0x1150   : > { %v4626_v18 = vadd.f32 1.4214138, %v4618_v20  ;;  %v4505_v25 = vsel %vm4504_vm2, %v8607_v2, %v4501_v8 }
0x1151   : > { %v4510_v51 = vsel %vm4507_vm3, %v4509_v23, %v4505_v25 }
0x1152   : > { %v4634_v27 = vmul.f32 %v4626_v18, %v4495_v31  ;;  %v4603_v50 = vmul.f32 1.0614054, %v4510_v51 }
0x1154   : > { %v4642_v35 = vadd.f32 -0.28449672, %v4634_v27  ;;  %v4611_v52 = vadd.f32 -1.4531521, %v4603_v50 }
0x1156   : > { %v4650_v34 = vmul.f32 %v4642_v35, %v4495_v31  ;;  %v4619_v1 = vmul.f32 %v4611_v52, %v4510_v51 }
0x1158   : > { %v4658_v56 = vadd.f32 0.2548296, %v4650_v34  ;;  %v4627_v14 = vadd.f32 1.4214138, %v4619_v1 }
0x115a   : > { %v4666_v44 = vmul.f32 %v4658_v56, %v4495_v31  ;;  %v4635_v46 = vmul.f32 %v4627_v14, %v4510_v51 }
0x115c   : > { %v4706_v15 = vmul.f32 %v8609_v37, %v4666_v44  ;;  %v4643_v4 = vadd.f32 -0.28449672, %v4635_v46 }
0x115e   : > { %v4714_v39 = vsub.f32 1.0, %v4706_v15  ;;  %v4651_v38 = vmul.f32 %v4643_v4, %v4510_v51 }
0x1160   : > { %v4659_v41 = vadd.f32 0.2548296, %v4651_v38  ;;  %v4730_v33 = vsub.f32 0.0, %v4714_v39 }
0x1162   : > { %v4667_v24 = vmul.f32 %v4659_v41, %v4510_v51  ;;  %v4738_v55 = vsel %vm4722_vm4, %v4730_v33, %v4714_v39 }
0x1163   : > { %v4746_v61 = vadd.f32 1.0, %v4738_v55 }
0x1164   : > { %v4707_v60 = vmul.f32 %v8611_v29, %v4667_v24 }
0x1165   : > { %v4754_v58 = vmul.f32 %v4746_v61, %v4442_v47 }
0x1166   : > { %v4715_v7 = vsub.f32 1.0, %v4707_v60 }
0x1168   : > { %v4731_v2 = vsub.f32 0.0, %v4715_v7 }
0x116a   : > { %v4739_v31 = vsel %vm4723_vm9, %v4731_v2, %v4715_v7 }
0x116b   : > { %v4747_v54 = vadd.f32 1.0, %v4739_v31 }
0x116d   : > { %v4755_v40 = vmul.f32 %v4747_v54, %v4443_v30 }
0x116f   : > { %v4427_v16 = vpop.f32.mrf.mxu0  ;;  %v4762_v0 = vpack.c.bf16 %v4755_v40, %v4754_v58 }
0x1170   : > { %v11424_v12 = vadd.f32 %v11378_v13, %v4427_v16 }
0x1171   : > { %4841 = vmatmul.bf16.vlgmr.msra.gmra.mxu1 %v4762_v0 }
0x1172   : > { %v11427_v21 = vmul.f32 0.70710677, %v11424_v12 }
0x1174   : > { %v4460_v53 = vand.u32 2147483647, %v11427_v21 }
0x1176   : > { %v4468_v59 = vmul.f32 0.3275911, %v4460_v53  ;;  %v4676_v6 = vsub.f32 0.0, %v4460_v53 }
0x1177   : > { %v4429_v48 = vpop.f32.mrf.mxu0 }
0x1178   : > { %v4476_v20 = vadd.f32 1.0, %v4468_v59  ;;  %v11431_v32 = vadd.f32 %v11378_v13, %v4429_v48  ;;  %v4684_v38 = vmul.f32 %v4676_v6, %v4460_v53 }
0x117a   : > { %8612 = vrcp.f32 %v4476_v20  ;;  %v11434_v43 = vmul.f32 0.70710677, %v11431_v32  ;;  %v4523_v22 = vand.u32 2147483648, %v4476_v20  ;;  %v4521_v52 = vand.u32 2147483647, %v4476_v20 }
0x117b   : > { %vm4517_vm11 = vweird.f32 %v4476_v20  ;;  %v4694_v31 = vmul.f32 1.442695, %v4684_v38 }
0x117c   : > { %v11437_v8 = vand.u32 2147483647, %v11434_v43  ;;  %v4524_v1 = vor.u32 1.1754944e-38, %v4523_v22  ;;  %vm4522_vm13 = vcmp.eq.f32.partialorder %v4521_v52, 8.507059e+37 }
0x117e   : > { %v4469_v62 = vmul.f32 0.3275911, %v11437_v8  ;;  %v4677_v58 = vsub.f32 0.0, %v11437_v8 }
0x117f   : > { %v4432_v18 = vpop.f32.mrf.mxu0 }
0x1180   : > { %v8613_v23 = vpop.eup %8612  ;;  %v11441_v42 = vadd.f32 %v11378_v13, %v4432_v18  ;;  %v4477_v26 = vadd.f32 1.0, %v4469_v62 }
0x1181   : > { %v4513_v25 = vmul.f32 %v8613_v23, %v4476_v20  ;;  %vm4518_vm10 = vweird.f32 %v8613_v23 }
0x1182   : > { %v11444_v27 = vmul.f32 0.70710677, %v11441_v42  ;;  %8614 = vrcp.f32 %v4477_v26  ;;  %vm4519_vm12 = vmor %vm4517_vm11, %vm4518_vm10  ;;  %v4538_v41 = vand.u32 2147483648, %v4477_v26  ;;  %v4536_v24 = vand.u32 2147483647, %v4477_v26 }
0x1183   : > { %v4514_v51 = vsub.f32 1.0, %v4513_v25  ;;  %vm4532_vm15 = vweird.f32 %v4477_v26  ;;  %v4685_v25 = vmul.f32 %v4677_v58, %v11437_v8 }
0x1184   : > { %v11447_v50 = vand.u32 2147483647, %v11444_v27  ;;  %v4539_v47 = vor.u32 1.1754944e-38, %v4538_v41  ;;  %vm4537_vm2 = vcmp.eq.f32.partialorder %v4536_v24, 8.507059e+37 }
0x1185   : > { %v4515_v35 = vmul.f32 %v8613_v23, %v4514_v51 }
0x1186   : > { %v4470_v28 = vmul.f32 0.3275911, %v11447_v50 }
0x1187   : > { %v4516_v34 = vadd.f32 %v8613_v23, %v4515_v35  ;;  %v4434_v5 = vpop.f32.mrf.mxu0 }
0x1188   : > { %v4478_v56 = vadd.f32 1.0, %v4470_v28  ;;  %v11451_v14 = vadd.f32 %v11378_v13, %v4434_v5  ;;  %v8615_v57 = vpop.eup %8614 }
0x1189   : > { %v4520_v44 = vsel %vm4519_vm12, %v8613_v23, %v4516_v34  ;;  %v4528_v46 = vmul.f32 %v8615_v57, %v4477_v26  ;;  %vm4533_vm14 = vweird.f32 %v8615_v57 }
0x118a   : > { %v4525_v37 = vsel %vm4522_vm13, %v4524_v1, %v4520_v44  ;;  %8616 = vrcp.f32 %v4478_v56  ;;  %v11454_v36 = vmul.f32 0.70710677, %v11451_v14  ;;  %vm4534_vm1 = vmor %vm4532_vm15, %vm4533_vm14  ;;  %v4553_v48 = vand.u32 2147483648, %v4478_v56 }
0x118b   : > { %v4604_v15 = vmul.f32 1.0614054, %v4525_v37  ;;  %v4529_v4 = vsub.f32 1.0, %v4528_v46  ;;  %v4551_v18 = vand.u32 2147483647, %v4478_v56  ;;  %vm4547_vm4 = vweird.f32 %v4478_v56 }
0x118c   : > { %v11457_v29 = vand.u32 2147483647, %v11454_v36  ;;  %v4554_v35 = vor.u32 1.1754944e-38, %v4553_v48  ;;  %v4696_v1 = vmul.f32 1.442695, %v4685_v25  ;;  %v4678_v44 = vsub.f32 0.0, %v11447_v50 }
0x118d   : > { %v4612_v39 = vadd.f32 -1.4531521, %v4604_v15  ;;  %v4530_v33 = vmul.f32 %v8615_v57, %v4529_v4  ;;  %vm4552_vm10 = vcmp.eq.f32.partialorder %v4551_v18, 8.507059e+37  ;;  %vm4724_vm15 = vcmp.lt.f32.partialorder %v11427_v21, 0.0 }
0x118e   : > { %v4471_v2 = vmul.f32 0.3275911, %v11457_v29  ;;  %v4444_v21 = vmul.f32 0.5, %v11424_v12 }
0x118f   : > { %v4620_v60 = vmul.f32 %v4612_v39, %v4525_v37  ;;  %v4531_v7 = vadd.f32 %v8615_v57, %v4530_v33  ;;  %v4686_v33 = vmul.f32 %v4678_v44, %v11447_v50 }
0x1190   : > { %v8617_v55 = vpop.eup %8616  ;;  %v4479_v40 = vadd.f32 1.0, %v4471_v2 }
0x1191   : > { %v4628_v61 = vadd.f32 1.4214138, %v4620_v60  ;;  %v4543_v30 = vmul.f32 %v8617_v55, %v4478_v56  ;;  %v4535_v54 = vsel %vm4534_vm1, %v8615_v57, %v4531_v7  ;;  %vm4548_vm3 = vweird.f32 %v8617_v55 }
0x1192   : > { %v4540_v0 = vsel %vm4537_vm2, %v4539_v47, %v4535_v54  ;;  %8618 = vrcp.f32 %v4479_v40  ;;  %vm4549_vm9 = vmor %vm4547_vm4, %vm4548_vm3  ;;  %v4568_v24 = vand.u32 2147483648, %v4479_v40  ;;  %v4566_v7 = vand.u32 2147483647, %v4479_v40 }
0x1193   : > { %v4636_v16 = vmul.f32 %v4628_v61, %v4525_v37  ;;  %v4544_v53 = vsub.f32 1.0, %v4543_v30  ;;  %v4605_v59 = vmul.f32 1.0614054, %v4540_v0  ;;  %8620 = vpow2.f32 %v4694_v31 }
0x1194   : > { %8622 = vpow2.f32 %v4696_v1  ;;  %vm4562_vm12 = vweird.f32 %v4479_v40  ;;  %v4698_v30 = vmul.f32 1.442695, %v4686_v33  ;;  %v4569_v54 = vor.u32 1.1754944e-38, %v4568_v24 }
0x1195   : > { %v4644_v20 = vadd.f32 -0.28449672, %v4636_v16  ;;  %v4545_v62 = vmul.f32 %v8617_v55, %v4544_v53  ;;  %v4613_v23 = vadd.f32 -1.4531521, %v4605_v59  ;;  %vm4567_vm14 = vcmp.eq.f32.partialorder %v4566_v7, 8.507059e+37 }
0x1196   : > { %8624 = vpow2.f32 %v4698_v30  ;;  %vm4725_vm1 = vcmp.lt.f32.partialorder %v11434_v43, 0.0  ;;  %vm4726_vm2 = vcmp.lt.f32.partialorder %v11444_v27, 0.0  ;;  %vm4727_vm3 = vcmp.lt.f32.partialorder %v11454_v36, 0.0 }
0x1197   : > { %v4652_v26 = vmul.f32 %v4644_v20, %v4525_v37  ;;  %v4546_v51 = vadd.f32 %v8617_v55, %v4545_v62  ;;  %v4621_v22 = vmul.f32 %v4613_v23, %v4540_v0  ;;  %v4679_v20 = vsub.f32 0.0, %v11457_v29 }
0x1198   : > { %v8619_v34 = vpop.eup %8618 }
0x1199   : > { %v4660_v52 = vadd.f32 0.2548296, %v4652_v26  ;;  %v4550_v28 = vsel %vm4549_vm9, %v8617_v55, %v4546_v51  ;;  %v4629_v5 = vadd.f32 1.4214138, %v4621_v22  ;;  %v4558_v15 = vmul.f32 %v8619_v34, %v4479_v40  ;;  %v8621_v4 = vpop.eup %8620 }
0x119a   : > { %v4555_v57 = vsel %vm4552_vm10, %v4554_v35, %v4550_v28  ;;  %vm4563_vm11 = vweird.f32 %v8619_v34  ;;  %v8623_v53 = vpop.eup %8622  ;;  %v4687_v22 = vmul.f32 %v4679_v20, %v11457_v29  ;;  %v4445_v29 = vmul.f32 0.5, %v11431_v32 }
0x119b   : > { %v4668_v6 = vmul.f32 %v4660_v52, %v4525_v37  ;;  %v4606_v46 = vmul.f32 1.0614054, %v4555_v57  ;;  %v4637_v8 = vmul.f32 %v4629_v5, %v4540_v0  ;;  %v4559_v56 = vsub.f32 1.0, %v4558_v15  ;;  %vm4564_vm13 = vmor %vm4562_vm12, %vm4563_vm11 }
0x119c   : > { %v4700_v15 = vmul.f32 1.442695, %v4687_v22 }
0x119d   : > { %v4708_v39 = vmul.f32 %v8621_v4, %v4668_v6  ;;  %v4614_v38 = vadd.f32 -1.4531521, %v4606_v46  ;;  %v4645_v41 = vadd.f32 -0.28449672, %v4637_v8  ;;  %v4560_v55 = vmul.f32 %v8619_v34, %v4559_v56  ;;  %v8625_v6 = vpop.eup %8624 }
0x119e   : > { %8626 = vpow2.f32 %v4700_v15 }
0x119f   : > { %v4622_v60 = vmul.f32 %v4614_v38, %v4555_v57  ;;  %v4716_v2 = vsub.f32 1.0, %v4708_v39  ;;  %v4653_v61 = vmul.f32 %v4645_v41, %v4540_v0  ;;  %v4561_v37 = vadd.f32 %v8619_v34, %v4560_v55 }
0x11a1   : > { %v4630_v31 = vadd.f32 1.4214138, %v4622_v60  ;;  %v4661_v47 = vadd.f32 0.2548296, %v4653_v61  ;;  %v4565_v16 = vsel %vm4564_vm13, %v8619_v34, %v4561_v37  ;;  %v4732_v59 = vsub.f32 0.0, %v4716_v2 }
0x11a2   : > { %v4570_v48 = vsel %vm4567_vm14, %v4569_v54, %v4565_v16 }
0x11a3   : > { %v4638_v58 = vmul.f32 %v4630_v31, %v4555_v57  ;;  %v4669_v50 = vmul.f32 %v4661_v47, %v4540_v0  ;;  %v4607_v18 = vmul.f32 1.0614054, %v4570_v48  ;;  %v4740_v26 = vsel %vm4724_vm15, %v4732_v59, %v4716_v2 }
0x11a4   : > { %v4748_v5 = vadd.f32 1.0, %v4740_v26  ;;  %v8627_v37 = vpop.eup %8626 }
0x11a5   : > { %v4646_v62 = vadd.f32 -0.28449672, %v4638_v58  ;;  %v4709_v23 = vmul.f32 %v8623_v53, %v4669_v50  ;;  %v4615_v25 = vadd.f32 -1.4531521, %v4607_v18 }
0x11a6   : > { %v4756_v41 = vmul.f32 %v4748_v5, %v4444_v21 }
0x11a7   : > { %v4654_v40 = vmul.f32 %v4646_v62, %v4555_v57  ;;  %v4717_v51 = vsub.f32 1.0, %v4709_v23  ;;  %v4623_v52 = vmul.f32 %v4615_v25, %v4570_v48 }
0x11a9   : > { %v4662_v35 = vadd.f32 0.2548296, %v4654_v40  ;;  %v4437_v28 = vpop.f32.mrf.mxu0  ;;  %v4733_v34 = vsub.f32 0.0, %v4717_v51  ;;  %v4631_v44 = vadd.f32 1.4214138, %v4623_v52  ;;  %v4447_v40 = vmul.f32 0.5, %v11451_v14 }
0x11aa   : > { %v11468_v0 = vadd.f32 %v11378_v13, %v4437_v28 }
0x11ab   : > { %v4670_v1 = vmul.f32 %v4662_v35, %v4555_v57  ;;  %v4741_v46 = vsel %vm4725_vm1, %v4733_v34, %v4717_v51  ;;  %v4639_v38 = vmul.f32 %v4631_v44, %v4570_v48 }
0x11ac   : > { %v11473_v4 = vmul.f32 0.70710677, %v11468_v0  ;;  %v4749_v8 = vadd.f32 1.0, %v4741_v46 }
0x11ad   : > { %v4710_v39 = vmul.f32 %v8625_v6, %v4670_v1  ;;  %v4647_v43 = vadd.f32 -0.28449672, %v4639_v38 }
0x11ae   : > { %v4464_v56 = vand.u32 2147483647, %v11473_v4  ;;  %v4757_v33 = vmul.f32 %v4749_v8, %v4445_v29  ;;  %vm4728_vm1 = vcmp.lt.f32.partialorder %v11473_v4, 0.0 }
0x11af   : > { %v4718_v24 = vsub.f32 1.0, %v4710_v39  ;;  %v4655_v60 = vmul.f32 %v4647_v43, %v4570_v48 }
0x11b0   : > { %v4472_v57 = vmul.f32 0.3275911, %v4464_v56  ;;  %v4763_v55 = vpack.c.bf16 %v4757_v33, %v4756_v41  ;;  %v4680_v1 = vsub.f32 0.0, %v4464_v56 }
0x11b1   : > { %v4439_v12 = vpop.f32.mrf.mxu0  ;;  %v4663_v61 = vadd.f32 0.2548296, %v4655_v60  ;;  %v4734_v32 = vsub.f32 0.0, %v4718_v24 }
0x11b2   : > { %v4480_v7 = vadd.f32 1.0, %v4472_v57  ;;  %v11478_v2 = vadd.f32 %v11378_v13, %v4439_v12  ;;  %4846 = vmatmul.bf16.gmra.mxu1 %v4763_v55  ;;  %v4688_v46 = vmul.f32 %v4680_v1, %v4464_v56 }
0x11b3   : > { %v4671_v31 = vmul.f32 %v4663_v61, %v4570_v48  ;;  %v4742_v58 = vsel %vm4726_vm2, %v4734_v32, %v4718_v24  ;;  %v4446_v48 = vmul.f32 0.5, %v11441_v42 }
0x11b4   : > { %8628 = vrcp.f32 %v4480_v7  ;;  %v11481_v47 = vmul.f32 0.70710677, %v11478_v2  ;;  %v4750_v20 = vadd.f32 1.0, %v4742_v58  ;;  %v4583_v27 = vand.u32 2147483648, %v4480_v7 }
0x11b5   : > { %v4711_v30 = vmul.f32 %v8627_v37, %v4671_v31  ;;  %v4581_v51 = vand.u32 2147483647, %v4480_v7  ;;  %vm4577_vm9 = vweird.f32 %v4480_v7  ;;  %v4702_v33 = vmul.f32 1.442695, %v4688_v46 }
0x11b6   : > { %v4465_v54 = vand.u32 2147483647, %v11481_v47  ;;  %v4758_v22 = vmul.f32 %v4750_v20, %v4446_v48  ;;  %v4584_v28 = vor.u32 1.1754944e-38, %v4583_v27  ;;  %vm4729_vm2 = vcmp.lt.f32.partialorder %v11481_v47, 0.0 }
0x11b7   : > { %v4719_v16 = vsub.f32 1.0, %v4711_v30  ;;  %vm4582_vm11 = vcmp.eq.f32.partialorder %v4581_v51, 8.507059e+37 }
0x11b8   : > { %v4473_v59 = vmul.f32 0.3275911, %v4465_v54  ;;  %v4681_v12 = vsub.f32 0.0, %v4465_v54 }
0x11b9   : > { %v4735_v13 = vsub.f32 0.0, %v4719_v16 }
0x11ba   : > { %v8629_v53 = vpop.eup %8628  ;;  %v4481_v62 = vadd.f32 1.0, %v4473_v59  ;;  %v4689_v32 = vmul.f32 %v4681_v12, %v4465_v54 }
0x11bb   : > { %v4573_v50 = vmul.f32 %v8629_v53, %v4480_v7  ;;  %v4743_v18 = vsel %vm4727_vm3, %v4735_v13, %v4719_v16  ;;  %vm4578_vm4 = vweird.f32 %v8629_v53 }
0x11bc   : > { %v4751_v25 = vadd.f32 1.0, %v4743_v18  ;;  %8630 = vrcp.f32 %v4481_v62  ;;  %vm4579_vm10 = vmor %vm4577_vm9, %vm4578_vm4  ;;  %v4598_v15 = vand.u32 2147483648, %v4481_v62  ;;  %v4596_v39 = vand.u32 2147483647, %v4481_v62 }
0x11bd   : > { %v4574_v23 = vsub.f32 1.0, %v4573_v50  ;;  %vm4592_vm13 = vweird.f32 %v4481_v62  ;;  %8632 = vpow2.f32 %v4702_v33 }
0x11be   : > { %v4759_v35 = vmul.f32 %v4751_v25, %v4447_v40  ;;  %v4599_v43 = vor.u32 1.1754944e-38, %v4598_v15  ;;  %vm4597_vm15 = vcmp.eq.f32.partialorder %v4596_v39, 8.507059e+37 }
0x11bf   : > { %v4575_v26 = vmul.f32 %v8629_v53, %v4574_v23 }
0x11c0   : > { %v4764_v36 = vpack.c.bf16 %v4759_v35, %v4758_v22  ;;  %v4448_v35 = vmul.f32 0.5, %v11468_v0 }
0x11c1   : > { %v4576_v52 = vadd.f32 %v8629_v53, %v4575_v26 }
0x11c2   : > { %v8631_v42 = vpop.eup %8630  ;;  %4851 = vmatmul.bf16.gmra.mxu1 %v4764_v36 }
0x11c3   : > { %v4580_v34 = vsel %vm4579_vm10, %v8629_v53, %v4576_v52  ;;  %v4588_v44 = vmul.f32 %v8631_v42, %v4481_v62  ;;  %vm4593_vm12 = vweird.f32 %v8631_v42  ;;  %v8633_v16 = vpop.eup %8632  ;;  %v4704_v53 = vmul.f32 1.442695, %v4689_v32 }
0x11c4   : > { %v4585_v5 = vsel %vm4582_vm11, %v4584_v28, %v4580_v34  ;;  %vm4594_vm14 = vmor %vm4592_vm13, %vm4593_vm12  ;;  %v4449_v52 = vmul.f32 0.5, %v11478_v2 }
0x11c5   : > { %v4608_v14 = vmul.f32 1.0614054, %v4585_v5  ;;  %v4589_v21 = vsub.f32 1.0, %v4588_v44  ;;  %8634 = vpow2.f32 %v4704_v53 }
0x11c7   : > { %v4616_v6 = vadd.f32 -1.4531521, %v4608_v14  ;;  %v4590_v8 = vmul.f32 %v8631_v42, %v4589_v21 }
0x11c9   : > { %v4624_v29 = vmul.f32 %v4616_v6, %v4585_v5  ;;  %v4591_v41 = vadd.f32 %v8631_v42, %v4590_v8 }
0x11cb   : > { %v4632_v38 = vadd.f32 1.4214138, %v4624_v29  ;;  %v4595_v24 = vsel %vm4594_vm14, %v8631_v42, %v4591_v41  ;;  %v8635_v40 = vpop.eup %8634 }
0x11cc   : > { %v4600_v60 = vsel %vm4597_vm15, %v4599_v43, %v4595_v24 }
0x11cd   : > { %v4640_v57 = vmul.f32 %v4632_v38, %v4585_v5  ;;  %v4609_v7 = vmul.f32 1.0614054, %v4600_v60 }
0x11cf   : > { %v4648_v55 = vadd.f32 -0.28449672, %v4640_v57  ;;  %v4617_v61 = vadd.f32 -1.4531521, %v4609_v7 }
0x11d1   : > { %v4656_v56 = vmul.f32 %v4648_v55, %v4585_v5  ;;  %v4625_v37 = vmul.f32 %v4617_v61, %v4600_v60 }
0x11d3   : > { %v4664_v31 = vadd.f32 0.2548296, %v4656_v56  ;;  %v4633_v58 = vadd.f32 1.4214138, %v4625_v37 }
0x11d5   : > { %v4672_v30 = vmul.f32 %v4664_v31, %v4585_v5  ;;  %v4641_v13 = vmul.f32 %v4633_v58, %v4600_v60  ;;  %v8226_v5 = vld [vmem:[%s12630_s3 + $0x16] ss:$0 sm:$0xff] }
0x11d7   : > { %v4712_v59 = vmul.f32 %v8633_v16, %v4672_v30  ;;  %v4649_v50 = vadd.f32 -0.28449672, %v4641_v13 }
0x11d9   : > { %v4720_v20 = vsub.f32 1.0, %v4712_v59  ;;  %v4657_v62 = vmul.f32 %v4649_v50, %v4600_v60 }
0x11db   : > { %v4665_v48 = vadd.f32 0.2548296, %v4657_v62  ;;  %v4736_v18 = vsub.f32 0.0, %v4720_v20 }
0x11dd   : > { %v4673_v23 = vmul.f32 %v4665_v48, %v4600_v60  ;;  %v4744_v54 = vsel %vm4728_vm1, %v4736_v18, %v4720_v20 }
0x11de   : > { %v4752_v51 = vadd.f32 1.0, %v4744_v54 }
0x11df   : > { %v4713_v25 = vmul.f32 %v8635_v40, %v4673_v23 }
0x11e0   : > { %v4760_v36 = vmul.f32 %v4752_v51, %v4448_v35 }
0x11e1   : > { %v4721_v27 = vsub.f32 1.0, %v4713_v25 }
0x11e3   : > { %v4737_v26 = vsub.f32 0.0, %v4721_v27 }
0x11e5   : > { %v4745_v22 = vsel %vm4729_vm2, %v4737_v26, %v4721_v27 }
0x11e6   : > { %v4753_v28 = vadd.f32 1.0, %v4745_v22 }
0x11e8   : > { %v4761_v34 = vmul.f32 %v4753_v28, %v4449_v52 }
0x11ea   : > { %v4765_v42 = vpack.c.bf16 %v4761_v34, %v4760_v36 }
0x11ec   : > { %4856 = vmatmul.bf16.gmra.mxu1 %v4765_v42 }
0x11ee   : > { %v4842_v4 = vpop.f32.mrf.mxu1 }
0x11ef   : > { %v4843_v1 = vadd.f32 %v8226_v5, %v4842_v4 }
0x11f1   : > { %v11496_v14 = vadd.f32 %v4843_v1, %v11229_v10 }
0x11f3   : > { %v4873_v47 = vsel %vm372_vm0, %v11496_v14, 0.0 }
0x11f4   : > { %4874 = vadd.xlane.f32.xlu1 %v4873_v47 }
0x11f6   : > { %v4844_v0 = vpop.f32.mrf.mxu1 }
0x11f7   : > { %v4845_v2 = vadd.f32 %v8226_v5, %v4844_v0 }
0x11f9   : > { %v11501_v44 = vadd.f32 %v4845_v2, %v11234_v11 }
0x11fb   : > { %v4876_v6 = vsel %vm372_vm0, %v11501_v44, 0.0 }
0x11fc   : > { %4877 = vadd.xlane.f32.xlu0 %v4876_v6  ;;  %v7745_v6 = vld [vmem:[%s12632_s5 + $0x48] sm:$0xff] }
0x11fd   : > { %5183 = vmatpush.bf16.msra.mxu3 %v7745_v6 }
0x122f   : > { %v4847_v21 = vpop.f32.mrf.mxu1 }
0x1230   : > { %v4848_v46 = vadd.f32 %v8226_v5, %v4847_v21 }
0x1232   : > { %v11506_v15 = vadd.f32 %v4848_v46, %v11239_v19  ;;  %v7744_v46 = vld [vmem:[%s12632_s5 + $0x40] sm:$0xff] }
0x1233   : > { %5184 = vmatpush.bf16.msra.mxu3 %v7744_v46 }
0x1234   : > { %v4879_v10 = vsel %vm372_vm0, %v11506_v15, 0.0 }
0x1235   : > { %4880 = vadd.xlane.f32.xlu2 %v4879_v10 }
0x1237   : > { %v4849_v29 = vpop.f32.mrf.mxu1 }
0x1238   : > { %v4850_v8 = vadd.f32 %v8226_v5, %v4849_v29 }
0x123a   : > { %v11511_v39 = vadd.f32 %v4850_v8, %v11244_v49 }
0x123c   : > { %v4882_v11 = vsel %vm372_vm0, %v11511_v39, 0.0 }
0x123d   : > { %4883 = vadd.xlane.f32.xlu1 %v4882_v11 }
0x123f   : > { %v4852_v38 = vpop.f32.mrf.mxu1 }
0x1240   : > { %v4853_v41 = vadd.f32 %v8226_v5, %v4852_v38 }
0x1242   : > { %v11516_v33 = vadd.f32 %v4853_v41, %v11249_v63 }
0x1244   : > { %v4885_v19 = vsel %vm372_vm0, %v11516_v33, 0.0 }
0x1245   : > { %4886 = vadd.xlane.f32.xlu0 %v4885_v19 }
0x1247   : > { %v4854_v43 = vpop.f32.mrf.mxu1 }
0x1248   : > { %v4855_v57 = vadd.f32 %v8226_v5, %v4854_v43 }
0x124a   : > { %v11521_v24 = vadd.f32 %v4855_v57, %v11254_v9 }
0x124c   : > { %v4888_v49 = vsel %vm372_vm0, %v11521_v24, 0.0 }
0x124d   : > { %4889 = vadd.xlane.f32.xlu2 %v4888_v49 }
0x1267   : > { %v4875_v60 = vpop.xlane.xlu1 %4874 }
0x1268   : > { %v4897_v12 = vmul.f32 %v4875_v60, %v12683_v17 }
0x1269   : > { %v4857_v63 = vpop.f32.mrf.mxu1 }
0x126a   : > { %v11527_v55 = vsub.f32 %v11496_v14, %v4897_v12  ;;  %v4858_v7 = vadd.f32 %v8226_v5, %v4857_v63 }
0x126c   : > { %v4913_v56 = vmul.f32 %v11527_v55, %v11527_v55  ;;  %v11532_v61 = vadd.f32 %v4858_v7, %v11259_v45 }
0x126e   : > { %v4921_v9 = vsel %vm372_vm0, %v4913_v56, 0.0  ;;  %v4891_v31 = vsel %vm372_vm0, %v11532_v61, 0.0 }
0x126f   : > { %v4878_v32 = vpop.xlane.xlu0 %4877  ;;  %4922 = vadd.xlane.f32.xlu1 %v4921_v9  ;;  %4892 = vadd.xlane.f32.xlu2 %v4891_v31 }
0x1270   : > { %v4898_v37 = vmul.f32 %v4878_v32, %v12683_v17 }
0x1271   : > { %v4859_v58 = vpop.f32.mrf.mxu1 }
0x1272   : > { %v11539_v30 = vsub.f32 %v11501_v44, %v4898_v37  ;;  %v4860_v16 = vadd.f32 %v8226_v5, %v4859_v58 }
0x1274   : > { %v4914_v53 = vmul.f32 %v11539_v30, %v11539_v30  ;;  %v11544_v45 = vadd.f32 %v4860_v16, %v11272_v3 }
0x1276   : > { %v4924_v59 = vsel %vm372_vm0, %v4914_v53, 0.0  ;;  %v4894_v13 = vsel %vm372_vm0, %v11544_v45, 0.0 }
0x1277   : > { %4925 = vadd.xlane.f32.xlu0 %v4924_v59  ;;  %4895 = vadd.xlane.f32.xlu1 %v4894_v13 }
0x12a8   : > { %v4881_v50 = vpop.xlane.xlu2 %4880 }
0x12a9   : > { %v4899_v20 = vmul.f32 %v4881_v50, %v12683_v17  ;;  %v11603_v50 = vld [vmem:[%s12630_s3 + $0x20] ss:$0 sm:$0xff] }
0x12ab   : > { %v11551_v62 = vsub.f32 %v11506_v15, %v4899_v20 }
0x12ad   : > { %v4915_v48 = vmul.f32 %v11551_v62, %v11551_v62 }
0x12af   : > { %v4927_v18 = vsel %vm372_vm0, %v4915_v48, 0.0 }
0x12b0   : > { %4928 = vadd.xlane.f32.xlu0 %v4927_v18  ;;  %v4884_v3 = vpop.xlane.xlu1 %4883 }
0x12b1   : > { %v4900_v23 = vmul.f32 %v4884_v3, %v12683_v17  ;;  %v11611_v3 = vld [vmem:[%s12630_s3 + $0x21] ss:$0 sm:$0xff] }
0x12b3   : > { %v11558_v40 = vsub.f32 %v11511_v39, %v4900_v23 }
0x12b5   : > { %v4916_v25 = vmul.f32 %v11558_v40, %v11558_v40 }
0x12b7   : > { %v4930_v54 = vsel %vm372_vm0, %v4916_v25, 0.0 }
0x12b8   : > { %4931 = vadd.xlane.f32.xlu2 %v4930_v54  ;;  %v4887_v27 = vpop.xlane.xlu0 %4886 }
0x12b9   : > { %v4901_v26 = vmul.f32 %v4887_v27, %v12683_v17 }
0x12bb   : > { %v11565_v51 = vsub.f32 %v11516_v33, %v4901_v26 }
0x12bd   : > { %v4917_v22 = vmul.f32 %v11565_v51, %v11565_v51 }
0x12bf   : > { %v4933_v35 = vsel %vm372_vm0, %v4917_v22, 0.0 }
0x12c0   : > { %v4890_v52 = vpop.xlane.xlu2 %4889  ;;  %4934 = vadd.xlane.f32.xlu1 %v4933_v35 }
0x12c1   : > { %v4902_v28 = vmul.f32 %v4890_v52, %v12683_v17 }
0x12c3   : > { %v11572_v36 = vsub.f32 %v11521_v24, %v4902_v28 }
0x12c5   : > { %v4918_v34 = vmul.f32 %v11572_v36, %v11572_v36 }
0x12c7   : > { %v4936_v42 = vsel %vm372_vm0, %v4918_v34, 0.0 }
0x12c8   : > { %4937 = vadd.xlane.f32.xlu0 %v4936_v42 }
0x12e2   : > { %v4923_v5 = vpop.xlane.xlu1 %4922  ;;  %v4893_v4 = vpop.xlane.xlu2 %4892 }
0x12e3   : > { %v4945_v1 = vmul.f32 %v4923_v5, %v12683_v17  ;;  %v4903_v47 = vmul.f32 %v4893_v4, %v12683_v17 }
0x12e5   : > { %v4953_v0 = vadd.f32 1e-05, %v4945_v1  ;;  %v11580_v2 = vsub.f32 %v11532_v61, %v4903_v47 }
0x12e7   : > { %8636 = vrsqrt.f32 %v4953_v0  ;;  %v4919_v21 = vmul.f32 %v11580_v2, %v11580_v2  ;;  %vm4967_vm4 = vweird.f32 %v4953_v0 }
0x12e9   : > { %v4939_v29 = vsel %vm372_vm0, %v4919_v21, 0.0 }
0x12ea   : > { %v4926_v10 = vpop.xlane.xlu0 %4925  ;;  %4940 = vadd.xlane.f32.xlu2 %v4939_v29  ;;  %v4896_v11 = vpop.xlane.xlu1 %4895 }
0x12eb   : > { %v4946_v8 = vmul.f32 %v4926_v10, %v12683_v17  ;;  %v4904_v38 = vmul.f32 %v4896_v11, %v12683_v17 }
0x12ed   : > { %v8637_v41 = vpop.eup %8636  ;;  %v4954_v19 = vadd.f32 1e-05, %v4946_v8  ;;  %v11594_v57 = vsub.f32 %v11544_v45, %v4904_v38 }
0x12ee   : > { %v4962_v43 = vmul.f32 %v8637_v41, %v4953_v0  ;;  %vm4968_vm3 = vweird.f32 %v8637_v41 }
0x12ef   : > { %8638 = vrsqrt.f32 %v4954_v19  ;;  %v4920_v60 = vmul.f32 %v11594_v57, %v11594_v57  ;;  %vm4969_vm9 = vmor %vm4967_vm4, %vm4968_vm3  ;;  %vm4977_vm11 = vweird.f32 %v4954_v19 }
0x12f0   : > { %v4963_v49 = vmul.f32 %v8637_v41, %v4962_v43 }
0x12f1   : > { %v4942_v63 = vsel %vm372_vm0, %v4920_v60, 0.0 }
0x12f2   : > { %v4964_v12 = vmul.f32 0.5, %v4963_v49  ;;  %4943 = vadd.xlane.f32.xlu1 %v4942_v63 }
0x12f4   : > { %v4965_v7 = vsub.f32 1.5, %v4964_v12 }
0x12f5   : > { %v8639_v56 = vpop.eup %8638 }
0x12f6   : > { %v4966_v9 = vmul.f32 %v8637_v41, %v4965_v7  ;;  %v4972_v32 = vmul.f32 %v8639_v56, %v4954_v19  ;;  %vm4978_vm10 = vweird.f32 %v8639_v56 }
0x12f7   : > { %vm4979_vm12 = vmor %vm4977_vm11, %vm4978_vm10 }
0x12f8   : > { %v4973_v31 = vmul.f32 %v8639_v56, %v4972_v32  ;;  %v4970_v37 = vsel %vm4969_vm9, %v8637_v41, %v4966_v9 }
0x12f9   : > { %v5041_v53 = vmul.f32 %v4970_v37, %v11527_v55 }
0x12fa   : > { %v4974_v58 = vmul.f32 0.5, %v4973_v31 }
0x12fb   : > { %v5050_v20 = vmul.f32 %v11603_v50, %v5041_v53 }
0x12fc   : > { %v4975_v16 = vsub.f32 1.5, %v4974_v58 }
0x12fd   : > { %v5059_v55 = vadd.f32 %v11611_v3, %v5050_v20 }
0x12fe   : > { %v4976_v59 = vmul.f32 %v8639_v56, %v4975_v16 }
0x1300   : > { %v4980_v13 = vsel %vm4979_vm12, %v8639_v56, %v4976_v59 }
0x1301   : > { %v5042_v48 = vmul.f32 %v4980_v13, %v11539_v30 }
0x1303   : > { %v5051_v18 = vmul.f32 %v11603_v50, %v5042_v48 }
0x1305   : > { %v5060_v23 = vadd.f32 %v11611_v3, %v5051_v18 }
0x1307   : > { %v5083_v25 = vpack.c.bf16 %v5060_v23, %v5059_v55 }
0x1309   : > { %7536 = vmatmul.msk.bf16.vlgmr.msra.gmra.mxu3 %vm372_vm0, %v5083_v25 }
0x1323   : > { %v4929_v54 = vpop.xlane.xlu0 %4928 }
0x1324   : > { %v4947_v27 = vmul.f32 %v4929_v54, %v12683_v17 }
0x1326   : > { %v4955_v26 = vadd.f32 1e-05, %v4947_v27 }
0x1328   : > { %8640 = vrsqrt.f32 %v4955_v26  ;;  %vm4987_vm14 = vweird.f32 %v4955_v26 }
0x132b   : > { %v4932_v30 = vpop.xlane.xlu2 %4931 }
0x132c   : > { %v4948_v22 = vmul.f32 %v4932_v30, %v12683_v17 }
0x132e   : > { %v8641_v35 = vpop.eup %8640  ;;  %v4956_v52 = vadd.f32 1e-05, %v4948_v22 }
0x132f   : > { %v4982_v28 = vmul.f32 %v8641_v35, %v4955_v26  ;;  %vm4988_vm13 = vweird.f32 %v8641_v35 }
0x1330   : > { %8642 = vrsqrt.f32 %v4956_v52  ;;  %vm4989_vm15 = vmor %vm4987_vm14, %vm4988_vm13  ;;  %vm4997_vm2 = vweird.f32 %v4956_v52 }
0x1331   : > { %v4983_v34 = vmul.f32 %v8641_v35, %v4982_v28 }
0x1333   : > { %v4984_v42 = vmul.f32 0.5, %v4983_v34  ;;  %v4935_v5 = vpop.xlane.xlu1 %4934 }
0x1334   : > { %v4949_v1 = vmul.f32 %v4935_v5, %v12683_v17 }
0x1335   : > { %v4985_v4 = vsub.f32 1.5, %v4984_v42 }
0x1336   : > { %v8643_v47 = vpop.eup %8642  ;;  %v4957_v21 = vadd.f32 1e-05, %v4949_v1 }
0x1337   : > { %v4986_v0 = vmul.f32 %v8641_v35, %v4985_v4  ;;  %v4992_v6 = vmul.f32 %v8643_v47, %v4956_v52  ;;  %vm4998_vm1 = vweird.f32 %v8643_v47 }
0x1338   : > { %8644 = vrsqrt.f32 %v4957_v21  ;;  %vm4999_vm3 = vmor %vm4997_vm2, %vm4998_vm1  ;;  %vm5007_vm9 = vweird.f32 %v4957_v21 }
0x1339   : > { %v4993_v46 = vmul.f32 %v8643_v47, %v4992_v6  ;;  %v4990_v10 = vsel %vm4989_vm15, %v8641_v35, %v4986_v0 }
0x133a   : > { %v5043_v41 = vmul.f32 %v4990_v10, %v11551_v62 }
0x133b   : > { %v4994_v29 = vmul.f32 0.5, %v4993_v46  ;;  %v4938_v8 = vpop.xlane.xlu0 %4937 }
0x133c   : > { %v4950_v38 = vmul.f32 %v4938_v8, %v12683_v17  ;;  %v5052_v56 = vmul.f32 %v11603_v50, %v5043_v41 }
0x133d   : > { %v4995_v11 = vsub.f32 1.5, %v4994_v29 }
0x133e   : > { %v8645_v19 = vpop.eup %8644  ;;  %v4958_v49 = vadd.f32 1e-05, %v4950_v38  ;;  %v5061_v37 = vadd.f32 %v11611_v3, %v5052_v56  ;;  %v7749_v38 = vld [vmem:[%s12631_s4 + $0x28] sm:$0xff]  ;;  %v5133_v56 = vpop.f32.mrf.mxu2 }
0x133f   : > { %v4996_v43 = vmul.f32 %v8643_v47, %v4995_v11  ;;  %v5002_v60 = vmul.f32 %v8645_v19, %v4957_v21  ;;  %vm5008_vm4 = vweird.f32 %v8645_v19  ;;  %5257 = vmatpush.bf16.msra.mxu0 %v7749_v38 }
0x1340   : > { %8646 = vrsqrt.f32 %v4958_v49  ;;  %vm5009_vm10 = vmor %vm5007_vm9, %vm5008_vm4  ;;  %vm5017_vm12 = vweird.f32 %v4958_v49 }
0x1341   : > { %v5000_v12 = vsel %vm4999_vm3, %v8643_v47, %v4996_v43  ;;  %v5003_v7 = vmul.f32 %v8645_v19, %v5002_v60 }
0x1342   : > { %v5044_v63 = vmul.f32 %v5000_v12, %v11558_v40 }
0x1343   : > { %v5004_v9 = vmul.f32 0.5, %v5003_v7 }
0x1344   : > { %v5053_v32 = vmul.f32 %v11603_v50, %v5044_v63 }
0x1345   : > { %v5005_v31 = vsub.f32 1.5, %v5004_v9 }
0x1346   : > { %v5062_v62 = vadd.f32 %v11611_v3, %v5053_v32  ;;  %v8647_v58 = vpop.eup %8646 }
0x1347   : > { %v5006_v16 = vmul.f32 %v8645_v19, %v5005_v31  ;;  %v5012_v53 = vmul.f32 %v8647_v58, %v4958_v49  ;;  %vm5018_vm11 = vweird.f32 %v8647_v58  ;;  %v8227_v31 = vld [vmem:[%s12630_s3 + $0x24] ss:$0 sm:$0xff] }
0x1348   : > { %v5084_v59 = vpack.c.bf16 %v5062_v62, %v5061_v37  ;;  %vm5019_vm13 = vmor %vm5017_vm12, %vm5018_vm11 }
0x1349   : > { %v5013_v13 = vmul.f32 %v8647_v58, %v5012_v53  ;;  %v5010_v40 = vsel %vm5009_vm10, %v8645_v19, %v5006_v16  ;;  %v7748_v19 = vld [vmem:[%s12631_s4 + $0x20] sm:$0xff] }
0x134a   : > { %7537 = vmatmul.msk.bf16.gmra.mxu3 %vm372_vm0, %v5084_v59  ;;  %v5045_v18 = vmul.f32 %v5010_v40, %v11565_v51  ;;  %5258 = vmatpush.bf16.msra.mxu0 %v7748_v19 }
0x134b   : > { %v5014_v20 = vmul.f32 0.5, %v5013_v13 }
0x134c   : > { %v5054_v54 = vmul.f32 %v11603_v50, %v5045_v18 }
0x134d   : > { %v5015_v48 = vsub.f32 1.5, %v5014_v20 }
0x134e   : > { %v5063_v26 = vadd.f32 %v11611_v3, %v5054_v54 }
0x134f   : > { %v5016_v55 = vmul.f32 %v8647_v58, %v5015_v48 }
0x1351   : > { %v5020_v23 = vsel %vm5019_vm13, %v8647_v58, %v5016_v55 }
0x1352   : > { %v5046_v25 = vmul.f32 %v5020_v23, %v11572_v36 }
0x1354   : > { %v5055_v27 = vmul.f32 %v11603_v50, %v5046_v25 }
0x1356   : > { %v5064_v30 = vadd.f32 %v11611_v3, %v5055_v27 }
0x1358   : > { %v5085_v22 = vpack.c.bf16 %v5064_v30, %v5063_v26 }
0x135a   : > { %7538 = vmatmul.msk.bf16.gmra.mxu3 %vm372_vm0, %v5085_v22 }
0x135d   : > { %v4941_v35 = vpop.xlane.xlu2 %4940 }
0x135e   : > { %v4951_v51 = vmul.f32 %v4941_v35, %v12683_v17 }
0x1360   : > { %v4959_v52 = vadd.f32 1e-05, %v4951_v51 }
0x1362   : > { %8648 = vrsqrt.f32 %v4959_v52  ;;  %vm5027_vm15 = vweird.f32 %v4959_v52 }
0x1365   : > { %v4944_v28 = vpop.xlane.xlu1 %4943 }
0x1366   : > { %v4952_v34 = vmul.f32 %v4944_v28, %v12683_v17 }
0x1368   : > { %v8649_v36 = vpop.eup %8648  ;;  %v4960_v42 = vadd.f32 1e-05, %v4952_v34 }
0x1369   : > { %v5022_v5 = vmul.f32 %v8649_v36, %v4959_v52  ;;  %vm5028_vm14 = vweird.f32 %v8649_v36 }
0x136a   : > { %8650 = vrsqrt.f32 %v4960_v42  ;;  %vm5029_vm1 = vmor %vm5027_vm15, %vm5028_vm14  ;;  %vm5037_vm3 = vweird.f32 %v4960_v42 }
0x136b   : > { %v5023_v4 = vmul.f32 %v8649_v36, %v5022_v5 }
0x136d   : > { %v5024_v1 = vmul.f32 0.5, %v5023_v4 }
0x136f   : > { %v5025_v47 = vsub.f32 1.5, %v5024_v1 }
0x1370   : > { %v8651_v0 = vpop.eup %8650 }
0x1371   : > { %v5026_v6 = vmul.f32 %v8649_v36, %v5025_v47  ;;  %v5032_v21 = vmul.f32 %v8651_v0, %v4960_v42  ;;  %vm5038_vm2 = vweird.f32 %v8651_v0 }
0x1372   : > { %vm5039_vm4 = vmor %vm5037_vm3, %vm5038_vm2 }
0x1373   : > { %v5033_v46 = vmul.f32 %v8651_v0, %v5032_v21  ;;  %v5030_v10 = vsel %vm5029_vm1, %v8649_v36, %v5026_v6 }
0x1374   : > { %v5047_v11 = vmul.f32 %v5030_v10, %v11580_v2 }
0x1375   : > { %v5034_v29 = vmul.f32 0.5, %v5033_v46 }
0x1376   : > { %v5056_v60 = vmul.f32 %v11603_v50, %v5047_v11 }
0x1377   : > { %v5035_v8 = vsub.f32 1.5, %v5034_v29  ;;  %v8228_v29 = vld [vmem:[%s12630_s3 + $0x27] ss:$0 sm:$0xff] }
0x1378   : > { %v5065_v2 = vadd.f32 %v11611_v3, %v5056_v60 }
0x1379   : > { %v5036_v41 = vmul.f32 %v8651_v0, %v5035_v8 }
0x137b   : > { %v5040_v43 = vsel %vm5039_vm4, %v8651_v0, %v5036_v41 }
0x137c   : > { %v5048_v49 = vmul.f32 %v5040_v43, %v11594_v57  ;;  %v5135_v57 = vpop.f32.mrf.mxu2 }
0x137e   : > { %v5057_v12 = vmul.f32 %v11603_v50, %v5048_v49 }
0x1380   : > { %v5066_v63 = vadd.f32 %v11611_v3, %v5057_v12 }
0x1382   : > { %v5086_v7 = vpack.c.bf16 %v5066_v63, %v5065_v2 }
0x1384   : > { %7539 = vmatmul.msk.bf16.gmra.mxu3 %vm372_vm0, %v5086_v7  ;;  %v5138_v53 = vpop.f32.mrf.mxu2 }
0x138c   : > { %v5186_v9 = vpop.f32.mrf.mxu3  ;;  %v5140_v59 = vpop.f32.mrf.mxu2 }
0x138d   : > { %v5187_v32 = vadd.f32 %v5186_v9, %v5133_v56 }
0x138f   : > { %v5208_v58 = vadd.f32 %v8227_v31, %v5187_v32 }
0x1394   : > { %v5188_v37 = vpop.f32.mrf.mxu3  ;;  %v5143_v23 = vpop.f32.mrf.mxu2 }
0x1395   : > { %v5189_v62 = vadd.f32 %v5188_v37, %v5135_v57 }
0x1397   : > { %v5209_v50 = vadd.f32 %v8227_v31, %v5189_v62 }
0x1399   : > { %v5216_v16 = vpack.c.bf16 %v5209_v50, %v5208_v58 }
0x139b   : > { %7554 = vmatmul.msk.bf16.vlgmr.msra.gmra.mxu0 %vm372_vm0, %v5216_v16 }
0x139c   : > { %v5145_v27 = vpop.f32.mrf.mxu2 }
0x13a4   : > { %v5148_v52 = vpop.f32.mrf.mxu2 }
0x13ac   : > { %v5150_v36 = vpop.f32.mrf.mxu2 }
0x13cd   : > { %v5191_v3 = vpop.f32.mrf.mxu3 }
0x13ce   : > { %v5192_v13 = vadd.f32 %v5191_v3, %v5138_v53 }
0x13d0   : > { %v5210_v48 = vadd.f32 %v8227_v31, %v5192_v13 }
0x13d5   : > { %v5193_v40 = vpop.f32.mrf.mxu3 }
0x13d6   : > { %v5194_v20 = vadd.f32 %v5193_v40, %v5140_v59 }
0x13d8   : > { %v5211_v18 = vadd.f32 %v8227_v31, %v5194_v20 }
0x13da   : > { %v5217_v55 = vpack.c.bf16 %v5211_v18, %v5210_v48 }
0x13dc   : > { %7555 = vmatmul.msk.bf16.gmra.mxu0 %vm372_vm0, %v5217_v55 }
0x13dd   : > { %v5196_v25 = vpop.f32.mrf.mxu3 }
0x13de   : > { %v5197_v54 = vadd.f32 %v5196_v25, %v5143_v23 }
0x13e0   : > { %v5212_v22 = vadd.f32 %v8227_v31, %v5197_v54 }
0x13e5   : > { %v5198_v26 = vpop.f32.mrf.mxu3 }
0x13e6   : > { %v5199_v30 = vadd.f32 %v5198_v26, %v5145_v27 }
0x13e8   : > { %v5213_v35 = vadd.f32 %v8227_v31, %v5199_v30 }
0x13ea   : > { %v5218_v51 = vpack.c.bf16 %v5213_v35, %v5212_v22 }
0x13ec   : > { %7556 = vmatmul.msk.bf16.gmra.mxu0 %vm372_vm0, %v5218_v51 }
0x1407   : > { %v5201_v28 = vpop.f32.mrf.mxu3 }
0x1408   : > { %v5202_v34 = vadd.f32 %v5201_v28, %v5148_v52 }
0x140a   : > { %v5214_v4 = vadd.f32 %v8227_v31, %v5202_v34 }
0x140f   : > { %v5203_v42 = vpop.f32.mrf.mxu3 }
0x1410   : > { %v5204_v5 = vadd.f32 %v5203_v42, %v5150_v36 }
0x1412   : > { %v5215_v1 = vadd.f32 %v8227_v31, %v5204_v5 }
0x1414   : > { %v5219_v47 = vpack.c.bf16 %v5215_v1, %v5214_v4 }
0x1416   : > { %7557 = vmatmul.msk.bf16.gmra.mxu0 %vm372_vm0, %v5219_v47 }
0x1418   : > { %v5260_v0 = vpop.f32.mrf.mxu0 }
0x1419   : > { %v5261_v49 = vadd.f32 %v8228_v29, %v5260_v0 }
0x141b   : > { %v5280_v7 = vpack.c.bf16 %v5261_v49, %v5261_v49 }
0x141d   : > { %v5313_v32 = vunpack.c.l.b16 %v5280_v7 }
0x1420   : > { %v5262_v6 = vpop.f32.mrf.mxu0 }
0x1421   : > { %v5263_v19 = vadd.f32 %v8228_v29, %v5262_v6 }
0x1423   : > { %v5281_v2 = vpack.c.bf16 %v5263_v19, %v5263_v19 }
0x1425   : > { %v5314_v56 = vunpack.c.l.b16 %v5281_v2 }
0x1427   : > { %v11663_v57 = vpack.c.b16 %v5314_v56, %v5313_v32 }
0x1459   : > { %v5265_v21 = vpop.f32.mrf.mxu0 }
0x145a   : > { %v5266_v31 = vadd.f32 %v8228_v29, %v5265_v21 }
0x145c   : > { %v5282_v62 = vpack.c.bf16 %v5266_v31, %v5266_v31 }
0x145e   : > { %v5315_v50 = vunpack.c.l.b16 %v5282_v62 }
0x1461   : > { %v5267_v46 = vpop.f32.mrf.mxu0 }
0x1462   : > { %v5268_v9 = vadd.f32 %v8228_v29, %v5267_v46 }
0x1464   : > { %v5283_v37 = vpack.c.bf16 %v5268_v9, %v5268_v9 }
0x1466   : > { %v5316_v58 = vunpack.c.l.b16 %v5283_v37 }
0x1468   : > { %v11667_v16 = vpack.c.b16 %v5316_v58, %v5315_v50 }
0x1469   : > { %v5270_v10 = vpop.f32.mrf.mxu0 }
0x146a   : > { %v5271_v8 = vadd.f32 %v8228_v29, %v5270_v10 }
0x146c   : > { %v5284_v38 = vpack.c.bf16 %v5271_v8, %v5271_v8 }
0x146e   : > { %v5317_v60 = vunpack.c.l.b16 %v5284_v38 }
0x1471   : > { %v5272_v11 = vpop.f32.mrf.mxu0 }
0x1472   : > { %v5273_v41 = vadd.f32 %v8228_v29, %v5272_v11 }
0x1474   : > { %v5285_v43 = vpack.c.bf16 %v5273_v41, %v5273_v41 }
0x1476   : > { %v5318_v12 = vunpack.c.l.b16 %v5285_v43 }
0x1478   : > { %v11659_v63 = vpack.c.b16 %v5318_v12, %v5317_v60 }
0x147a   : > { %5329 = vrot.lane.b32.xlu1 %v11659_v63, %s8850_s27 }
0x1482   : > { %5325 = vrot.lane.b32.xlu1 %v11663_v57, %s8850_s27 }
0x148a   : > { %5550 = vrot.lane.b32.xlu1 %v11667_v16, %s8848_s25 }
0x1492   : > { %5789 = vrot.lane.b32.xlu1 %v11667_v16, %s8851_s28 }
0x1493   : > { %v5275_v53 = vpop.f32.mrf.mxu0 }
0x1494   : > { %v5276_v3 = vadd.f32 %v8228_v29, %v5275_v53 }
0x1496   : > { %v5286_v13 = vpack.c.bf16 %v5276_v3, %v5276_v3 }
0x1498   : > { %v5319_v48 = vunpack.c.l.b16 %v5286_v13 }
0x149a   : > { %5787 = vrot.lane.b32.xlu1 %v11663_v57, %s8851_s28 }
0x149b   : > { %v5277_v59 = vpop.f32.mrf.mxu0 }
0x149c   : > { %v5278_v40 = vadd.f32 %v8228_v29, %v5277_v59 }
0x149e   : > { %v5287_v20 = vpack.c.bf16 %v5278_v40, %v5278_v40 }
0x14a0   : > { %v5320_v18 = vunpack.c.l.b16 %v5287_v20 }
0x14a2   : > { %v11675_v55 = vpack.c.b16 %v5320_v18, %v5319_v48 }
0x14a4   : > { %6024 = vrot.lane.b32.xlu1 %v11675_v55, %s8849_s26  ;;  %5562 = vrot.lane.b32.xlu2 %v11675_v55, %s8847_s24 }
0x14a5   : > { %5331 = vrot.lane.b32.xlu0 %v11675_v55, %s8850_s27 }
0x14ac   : > { %6010 = vrot.lane.b32.xlu1 %v11663_v57, %s8852_s29  ;;  %5327 = vrot.lane.b32.xlu2 %v11667_v16, %s8850_s27 }
0x14ad   : > { %5560 = vrot.lane.b32.xlu0 %v11659_v63, %s8847_s24 }
0x14b4   : > { %5783 = vrot.lane.b32.xlu1 %v11659_v63, %s8853_s10  ;;  %5556 = vrot.lane.b32.xlu2 %v11663_v57, %s8847_s24 }
0x14b5   : > { %5558 = vrot.lane.b32.xlu0 %v11667_v16, %s8847_s24 }
0x14bc   : > { %6016 = vrot.lane.b32.xlu1 %v11675_v55, %s8852_s29  ;;  %5793 = vrot.lane.b32.xlu2 %v11675_v55, %s8851_s28 }
0x14bd   : > { %5548 = vrot.lane.b32.xlu0 %v11663_v57, %s8848_s25 }
0x14c4   : > { %5484 = vrot.lane.b32.xlu1 %v11675_v55, %s8854_s12  ;;  %5791 = vrot.lane.b32.xlu2 %v11659_v63, %s8851_s28 }
0x14c5   : > { %5552 = vrot.lane.b32.xlu0 %v11659_v63, %s8848_s25 }
0x14cc   : > { %5715 = vrot.lane.b32.xlu1 %v11675_v55, %s8855_s13  ;;  %5554 = vrot.lane.b32.xlu2 %v11675_v55, %s8848_s25 }
0x14cd   : > { %6022 = vrot.lane.b32.xlu0 %v11659_v63, %s8849_s26 }
0x14d4   : > { %6177 = vrot.lane.b32.xlu1 %v11675_v55, %s8856_s14  ;;  %6018 = vrot.lane.b32.xlu2 %v11663_v57, %s8849_s26 }
0x14d5   : > { %6020 = vrot.lane.b32.xlu0 %v11667_v16, %s8849_s26  ;;  %s352_s26 = scalar_lea.vmem %s12636_s9, %s8919_s11 }
0x14dc   : > { %5781 = vrot.lane.b32.xlu2 %v11667_v16, %s8853_s10 }
0x14dd   : > { %5779 = vrot.lane.b32.xlu0 %v11663_v57, %s8853_s10 }
0x14e4   : > { %6014 = vrot.lane.b32.xlu2 %v11659_v63, %s8852_s29 }
0x14e5   : > { %6012 = vrot.lane.b32.xlu0 %v11667_v16, %s8852_s29 }
0x14ec   : > { %5482 = vrot.lane.b32.xlu2 %v11659_v63, %s8854_s12  ;;  %v5330_v23 = vpop.permute.xlu1 %5329 }
0x14ed   : > { %5480 = vrot.lane.b32.xlu0 %v11667_v16, %s8854_s12  ;;  %v5352_v1 = vsel %vm1013_vm5, %v5330_v23, 0 }
0x14f4   : > { %5709 = vrot.lane.b32.xlu2 %v11663_v57, %s8855_s13  ;;  %v5326_v25 = vpop.permute.xlu1 %5325 }
0x14f5   : > { %5713 = vrot.lane.b32.xlu0 %v11659_v63, %s8855_s13  ;;  %v5346_v38 = vsel %vm1013_vm5, %v5326_v25, 0 }
0x14fc   : > { %5944 = vrot.lane.b32.xlu2 %v11659_v63, %s8857_s15  ;;  %v11737_v54 = vpop.permute.xlu1 %5550 }
0x14fd   : > { %5478 = vrot.lane.b32.xlu0 %v11663_v57, %s8854_s12 }
0x14fe   : > { %v5563_v27 = vpop.permute.xlu2 %5562 }
0x14ff   : > { %v5586_v26 = vsel %vm1013_vm5, %v5563_v27, 0 }
0x1500   : > { %5592 = vmatpush.bf16.xpose.msrb.mxu3 %v5586_v26  ;;  %v7985_v26 = vld [vmem:[%s12629_s2 + $0x100] sm:$0xff]  }
0x1504   : > { %5942 = vrot.lane.b32.xlu2 %v11667_v16, %s8857_s15  ;;  %v5790_v30 = vpop.permute.xlu1 %5789 }
0x1505   : > { %5711 = vrot.lane.b32.xlu0 %v11667_v16, %s8855_s13  ;;  %v5811_v31 = vsel %vm1013_vm5, %v5790_v30, 0  ;;  %v7892_v30 = vunpack.c.l.bf16 %v7985_v26 }
0x1506   : > { %v5328_v22 = vpop.permute.xlu2 %5327 }
0x1507   : > { %v5349_v46 = vsel %vm1013_vm5, %v5328_v22, 0 }
0x150c   : > { %v5788_v35 = vpop.permute.xlu1 %5787 }
0x150d   : > { %6175 = vrot.lane.b32.xlu0 %v11659_v63, %s8856_s14  ;;  %v5808_v50 = vsel %vm1013_vm5, %v5788_v35, 0  ;;  %v7989_v35 = vld [vmem:[%s12629_s2 + $0x120] sm:$0xff]  }
0x150e   : > { %v5557_v51 = vpop.permute.xlu2 %5556 }
0x150f   : > { %v5577_v41 = vsel %vm1013_vm5, %v5557_v51, 0 }
0x1515   : > { %5785 = vrot.lane.b32.xlu0 %v11675_v55, %s8853_s10 }
0x1516   : > { %v5794_v52 = vpop.permute.xlu2 %5793  ;;  %v6025_v28 = vpop.permute.xlu1 %6024 }
0x1517   : > { %v5332_v34 = vpop.permute.xlu0 %5331  ;;  %v5817_v19 = vsel %vm1013_vm5, %v5794_v52, 0  ;;  %v6048_v43 = vsel %vm1013_vm5, %v6025_v28, 0  ;;  %v7908_v28 = vunpack.c.l.bf16 %v7989_v35 }
0x1518   : > { %v5355_v36 = vsel %vm1013_vm5, %v5332_v34, 0  ;;  %v7893_v34 = vunpack.c.h.bf16 %v7985_v26 }
0x1519   : > { %5361 = vmatpush.bf16.xpose.msrb.mxu1 %v5355_v36 }
0x151d   : > { %5946 = vrot.lane.b32.xlu0 %v11675_v55, %s8857_s15 }
0x151e   : > { %v5792_v42 = vpop.permute.xlu2 %5791  ;;  %v11753_v5 = vpop.permute.xlu1 %6010 }
0x151f   : > { %v5561_v4 = vpop.permute.xlu0 %5560  ;;  %v5814_v2 = vsel %vm1013_vm5, %v5792_v42, 0 }
0x1520   : > { %v5583_v47 = vsel %vm1013_vm5, %v5561_v4, 0 }
0x1521   : > { %5362 = vmatpush.bf16.xpose.msrb.mxu1 %v5352_v1  ;;  %5593 = vmatpush.bf16.xpose.msrb.mxu3 %v5583_v47  ;;  %v7986_v47 = vld [vmem:[%s12629_s2 + $0x108] sm:$0xff]  }
0x1526   : > { %v5555_v0 = vpop.permute.xlu2 %5554  ;;  %v11757_v6 = vpop.permute.xlu1 %5783 }
0x1527   : > { %v5559_v21 = vpop.permute.xlu0 %5558 }
0x1528   : > { %v5580_v10 = vsel %vm1013_vm5, %v5559_v21, 0  ;;  %v7896_v21 = vunpack.c.l.bf16 %v7986_v47 }
0x1529   : > { %5363 = vmatpush.bf16.xpose.msrb.mxu1 %v5349_v46  ;;  %5594 = vmatpush.bf16.xpose.msrb.mxu3 %v5580_v10 }
0x152e   : > { %v6019_v29 = vpop.permute.xlu2 %6018  ;;  %v11761_v8 = vpop.permute.xlu1 %6016 }
0x152f   : > { %v5549_v11 = vpop.permute.xlu0 %5548  ;;  %v6039_v3 = vsel %vm1013_vm5, %v6019_v29, 0 }
0x1531   : > { %5364 = vmatpush.bf16.xpose.msrb.mxu1 %v5346_v38  ;;  %5595 = vmatpush.bf16.xpose.msrb.mxu3 %v5577_v41 }
0x1536   : > { %v5782_v49 = vpop.permute.xlu2 %5781  ;;  %v5485_v60 = vpop.permute.xlu1 %5484 }
0x1537   : > { %v5553_v12 = vpop.permute.xlu0 %5552  ;;  %5506 = vmatpush.bf16.msrb.mxu2 %v5485_v60 }
0x1538   : > { %7566 = vmatmul.msk.bf16.vlgmr.msrb.gmra.mxu1 %vm1013_vm5, %v11663_v57  ;;  %7582 = vmatmul.msk.bf16.vlgmr.msrb.gmra.mxu3 %vm1013_vm5, %v5549_v11 }
0x1539   : > { %5823 = vmatpush.bf16.xpose.msra.mxu1 %v5817_v19  ;;  %6054 = vmatpush.bf16.xpose.msra.mxu3 %v6048_v43  ;;  %v7897_v43 = vunpack.c.h.bf16 %v7986_v47 }
0x153e   : > { %v6015_v7 = vpop.permute.xlu2 %6014  ;;  %v5716_v56 = vpop.permute.xlu1 %5715 }
0x153f   : > { %v6023_v9 = vpop.permute.xlu0 %6022  ;;  %5737 = vmatpush.bf16.msrb.mxu0 %v5716_v56  ;;  %v7987_v56 = vld [vmem:[%s12629_s2 + $0x110] sm:$0xff]  }
0x1540   : > { %v6045_v32 = vsel %vm1013_vm5, %v6023_v9, 0 }
0x1541   : > { %5824 = vmatpush.bf16.xpose.msra.mxu1 %v5814_v2  ;;  %6055 = vmatpush.bf16.xpose.msra.mxu3 %v6045_v32 }
0x1546   : > { %v5483_v37 = vpop.permute.xlu2 %5482  ;;  %v6178_v18 = vpop.permute.xlu1 %6177 }
0x1547   : > { %v6021_v62 = vpop.permute.xlu0 %6020  ;;  %5507 = vmatpush.bf16.msrb.mxu2 %v5483_v37 }
0x1548   : > { %v6042_v58 = vsel %vm1013_vm5, %v6021_v62, 0  ;;  %7567 = vmatmul.msk.bf16.gmra.mxu1 %vm1013_vm5, %v11667_v16  ;;  %7583 = vmatmul.msk.bf16.gmra.mxu3 %vm1013_vm5, %v11737_v54 }
0x1549   : > { %5825 = vmatpush.bf16.xpose.msra.mxu1 %v5811_v31  ;;  %6056 = vmatpush.bf16.xpose.msra.mxu3 %v6042_v58  ;;  %v7900_v31 = vunpack.c.l.bf16 %v7987_v56 }
0x154f   : > { %v5780_v53 = vpop.permute.xlu0 %5779 }
0x1551   : > { %5826 = vmatpush.bf16.xpose.msra.mxu1 %v5808_v50  ;;  %6057 = vmatpush.bf16.xpose.msra.mxu3 %v6039_v3  ;;  %v7991_v50 = vld [vmem:[%s12629_s2 + $0x130] sm:$0xff]  }
0x1557   : > { %v6013_v59 = vpop.permute.xlu0 %6012 }
0x1558   : > { %7568 = vmatmul.msk.bf16.gmra.mxu1 %vm1013_vm5, %v11659_v63  ;;  %7584 = vmatmul.msk.bf16.gmra.mxu3 %vm1013_vm5, %v5553_v12  ;;  %v5710_v63 = vpop.permute.xlu2 %5709 }
0x155f   : > { %v5481_v13 = vpop.permute.xlu0 %5480 }
0x1560   : > { %5508 = vmatpush.bf16.msrb.mxu2 %v5481_v13  ;;  %v7916_v13 = vunpack.c.l.bf16 %v7991_v50 }
0x1567   : > { %v5714_v40 = vpop.permute.xlu0 %5713 }
0x1568   : > { %7569 = vmatmul.msk.bf16.gmra.mxu1 %vm1013_vm5, %v11675_v55  ;;  %7585 = vmatmul.msk.bf16.gmra.mxu3 %vm1013_vm5, %v5555_v0  ;;  %v5945_v55 = vpop.permute.xlu2 %5944 }
0x1569   : > { %5738 = vmatpush.bf16.msrb.mxu0 %v5714_v40  ;;  %v7901_v40 = vunpack.c.h.bf16 %v7987_v56 }
0x156f   : > { %v5479_v20 = vpop.permute.xlu0 %5478 }
0x1570   : > { %5509 = vmatpush.bf16.msrb.mxu2 %v5479_v20  ;;  %v5943_v27 = vpop.permute.xlu2 %5942 }
0x1577   : > { %v5712_v48 = vpop.permute.xlu0 %5711 }
0x1578   : > { %5739 = vmatpush.bf16.msrb.mxu0 %v5712_v48  ;;  %7598 = vmatmul.msk.bf16.vlgmr.msra.gmra.mxu1 %vm1013_vm5, %v5780_v53 }
0x1579   : > { %7614 = vmatmul.msk.bf16.vlgmr.msra.gmra.mxu3 %vm1013_vm5, %v11753_v5 }
0x157c   : > { %5740 = vmatpush.bf16.msrb.mxu0 %v5710_v63 }
0x157f   : > { %v6176_v23 = vpop.permute.xlu0 %6175 }
0x1580   : > { %6199 = vmatpush.bf16.msra.mxu0 %v6178_v18 }
0x1584   : > { %6200 = vmatpush.bf16.msra.mxu0 %v6176_v23 }
0x1587   : > { %v5786_v25 = vpop.permute.xlu0 %5785 }
0x1588   : > { %7599 = vmatmul.msk.bf16.gmra.mxu1 %vm1013_vm5, %v5782_v49 }
0x1589   : > { %7615 = vmatmul.msk.bf16.gmra.mxu3 %vm1013_vm5, %v6013_v59 }
0x158f   : > { %v5947_v54 = vpop.permute.xlu0 %5946 }
0x1590   : > { %5968 = vmatpush.bf16.msra.mxu2 %v5947_v54  ;;  %v7917_v54 = vunpack.c.h.bf16 %v7991_v50 }
0x1594   : > { %5969 = vmatpush.bf16.msra.mxu2 %v5945_v55 }
0x1598   : > { %7600 = vmatmul.msk.bf16.gmra.mxu1 %vm1013_vm5, %v11757_v6  ;;  %5970 = vmatpush.bf16.msra.mxu2 %v5943_v27  ;;  %v7909_v6 = vunpack.c.h.bf16 %v7989_v35  ;;  %v7992_v35 = vld [vmem:[%s12629_s2 + $0x138] sm:$0xff]  }
0x1599   : > { %7616 = vmatmul.msk.bf16.gmra.mxu3 %vm1013_vm5, %v6015_v7 }
0x15a8   : > { %7601 = vmatmul.msk.bf16.gmra.mxu1 %vm1013_vm5, %v5786_v25  ;;  %v7988_v25 = vld [vmem:[%s12629_s2 + $0x118] sm:$0xff]  }
0x15a9   : > { %7617 = vmatmul.msk.bf16.gmra.mxu3 %vm1013_vm5, %v11761_v8  ;;  %v7990_v8 = vld [vmem:[%s12629_s2 + $0x128] sm:$0xff]   ;;  %v7904_v27 = vunpack.c.l.bf16 %v7988_v25 }
0x15aa   : > { %v7912_v19 = vunpack.c.l.bf16 %v7990_v8  ;;  %v7913_v32 = vunpack.c.h.bf16 %v7990_v8 }
0x15b5   : > { %v5366_v22 = vpop.f32.mrf.mxu1 }
0x15b6   : > { %v11803_v51 = vadd.f32 %v7892_v30, %v5366_v22 }
0x15b8   : > { %v5386_v52 = vsel %vm1067_vm6, %v11803_v51, -inf }
0x15b9   : > { %5387 = vmax.xlane.f32.xlu2 %v5386_v52 }
0x15bb   : > { %v5597_v36 = vpop.f32.mrf.mxu3 }
0x15bc   : > { %v11807_v42 = vadd.f32 %v7908_v28, %v5597_v36  ;;  %v7920_v36 = vunpack.c.l.bf16 %v7992_v35 }
0x15bd   : > { %v5368_v5 = vpop.f32.mrf.mxu1 }
0x15be   : > { %v11809_v4 = vadd.f32 %v7893_v34, %v5368_v5  ;;  %v5617_v1 = vsel %vm1067_vm6, %v11807_v42, -inf }
0x15bf   : > { %5618 = vmax.xlane.f32.xlu1 %v5617_v1 }
0x15c0   : > { %v5389_v0 = vsel %vm1067_vm6, %v11809_v4, -inf }
0x15c1   : > { %5390 = vmax.xlane.f32.xlu0 %v5389_v0  ;;  %v7905_v0 = vunpack.c.h.bf16 %v7988_v25 }
0x15c3   : > { %v5599_v46 = vpop.f32.mrf.mxu3 }
0x15c4   : > { %v11818_v10 = vadd.f32 %v7909_v6, %v5599_v46 }
0x15c5   : > { %v5371_v29 = vpop.f32.mrf.mxu1 }
0x15c6   : > { %v11823_v11 = vadd.f32 %v7896_v21, %v5371_v29  ;;  %v5620_v38 = vsel %vm1067_vm6, %v11818_v10, -inf  ;;  %v7993_v21 = vld [vmem:[%s12629_s2 + $0x140] sm:$0xff]  }
0x15c7   : > { %5621 = vmax.xlane.f32.xlu2 %v5620_v38  ;;  %v7924_v29 = vunpack.c.l.bf16 %v7993_v21 }
0x15c8   : > { %v5392_v41 = vsel %vm1067_vm6, %v11823_v11, -inf }
0x15c9   : > { %5393 = vmax.xlane.f32.xlu0 %v5392_v41  ;;  %v7921_v41 = vunpack.c.h.bf16 %v7992_v35 }
0x15cb   : > { %v5602_v49 = vpop.f32.mrf.mxu3 }
0x15cc   : > { %v11829_v60 = vadd.f32 %v7912_v19, %v5602_v49  ;;  %v7997_v49 = vld [vmem:[%s12629_s2 + $0x160] sm:$0xff]  }
0x15cd   : > { %v5373_v12 = vpop.f32.mrf.mxu1 }
0x15ce   : > { %v11831_v2 = vadd.f32 %v7897_v43, %v5373_v12  ;;  %v5623_v7 = vsel %vm1067_vm6, %v11829_v60, -inf }
0x15cf   : > { %5624 = vmax.xlane.f32.xlu2 %v5623_v7  ;;  %v7940_v7 = vunpack.c.l.bf16 %v7997_v49 }
0x15d0   : > { %v5395_v9 = vsel %vm1067_vm6, %v11831_v2, -inf }
0x15d1   : > { %5396 = vmax.xlane.f32.xlu1 %v5395_v9 }
0x15d3   : > { %v5604_v37 = vpop.f32.mrf.mxu3 }
0x15d4   : > { %v11840_v62 = vadd.f32 %v7913_v32, %v5604_v37  ;;  %v7925_v37 = vunpack.c.h.bf16 %v7993_v21 }
0x15d5   : > { %v5376_v58 = vpop.f32.mrf.mxu1 }
0x15d6   : > { %v11845_v53 = vadd.f32 %v7900_v31, %v5376_v58  ;;  %v5626_v3 = vsel %vm1067_vm6, %v11840_v62, -inf }
0x15d7   : > { %5627 = vmax.xlane.f32.xlu0 %v5626_v3  ;;  %v7941_v3 = vunpack.c.h.bf16 %v7997_v49 }
0x15d8   : > { %v5398_v59 = vsel %vm1067_vm6, %v11845_v53, -inf }
0x15d9   : > { %5399 = vmax.xlane.f32.xlu1 %v5398_v59 }
0x15db   : > { %v5607_v20 = vpop.f32.mrf.mxu3 }
0x15dc   : > { %v11851_v48 = vadd.f32 %v7916_v13, %v5607_v20  ;;  %v7994_v20 = vld [vmem:[%s12629_s2 + $0x148] sm:$0xff]  }
0x15dd   : > { %v5378_v63 = vpop.f32.mrf.mxu1  ;;  %v7928_v25 = vunpack.c.l.bf16 %v7994_v20 }
0x15de   : > { %v11853_v18 = vadd.f32 %v7901_v40, %v5378_v63  ;;  %v5629_v23 = vsel %vm1067_vm6, %v11851_v48, -inf }
0x15df   : > { %5630 = vmax.xlane.f32.xlu0 %v5629_v23 }
0x15e0   : > { %v5401_v55 = vsel %vm1067_vm6, %v11853_v18, -inf }
0x15e1   : > { %5402 = vmax.xlane.f32.xlu2 %v5401_v55 }
0x15e3   : > { %v5609_v26 = vpop.f32.mrf.mxu3 }
0x15e4   : > { %v11862_v30 = vadd.f32 %v7917_v54, %v5609_v26  ;;  %v7929_v54 = vunpack.c.h.bf16 %v7994_v20 }
0x15e5   : > { %v5381_v22 = vpop.f32.mrf.mxu1 }
0x15e6   : > { %v11867_v52 = vadd.f32 %v7904_v27, %v5381_v22  ;;  %v5632_v28 = vsel %vm1067_vm6, %v11862_v30, -inf  ;;  %v7998_v22 = vld [vmem:[%s12629_s2 + $0x168] sm:$0xff]  }
0x15e7   : > { %5633 = vmax.xlane.f32.xlu1 %v5632_v28 }
0x15e8   : > { %v5404_v34 = vsel %vm1067_vm6, %v11867_v52, -inf }
0x15e9   : > { %5405 = vmax.xlane.f32.xlu2 %v5404_v34  ;;  %v7944_v34 = vunpack.c.l.bf16 %v7998_v22 }
0x15eb   : > { %v5612_v5 = vpop.f32.mrf.mxu3 }
0x15ec   : > { %v11873_v1 = vadd.f32 %v7920_v36, %v5612_v5 }
0x15ed   : > { %v5383_v47 = vpop.f32.mrf.mxu1 }
0x15ee   : > { %v5635_v6 = vsel %vm1067_vm6, %v11873_v1, -inf  ;;  %v11880_v46 = vadd.f32 %v7905_v0, %v5383_v47  ;;  %v7945_v47 = vunpack.c.h.bf16 %v7998_v22 }
0x15ef   : > { %5636 = vmax.xlane.f32.xlu0 %v5635_v6 }
0x15f0   : > { %v5407_v43 = vsel %vm1067_vm6, %v11880_v46, -inf }
0x15f3   : > { %v5614_v8 = vpop.f32.mrf.mxu3 }
0x15f4   : > { %v11891_v56 = vadd.f32 %v7921_v41, %v5614_v8 }
0x15f5   : > { %v5828_v38 = vpop.f32.mrf.mxu1 }
0x15f6   : > { %v11882_v19 = vadd.f32 %v7924_v29, %v5828_v38  ;;  %v5638_v58 = vsel %vm1067_vm6, %v11891_v56, -inf  ;;  %v7995_v29 = vld [vmem:[%s12629_s2 + $0x150] sm:$0xff]  }
0x15f7   : > { %5408 = vmax.xlane.f32.xlu0 %v5407_v43  ;;  %v7999_v38 = vld [vmem:[%s12629_s2 + $0x170] sm:$0xff]   ;;  %v7932_v41 = vunpack.c.l.bf16 %v7995_v29 }
0x15f8   : > { %v5848_v12 = vsel %vm1067_vm6, %v11882_v19, -inf }
0x15f9   : > { %5849 = vmax.xlane.f32.xlu1 %v5848_v12  ;;  %v7948_v12 = vunpack.c.l.bf16 %v7999_v38 }
0x15fc   : > { %v6059_v9 = vpop.f32.mrf.mxu3 }
0x15fd   : > { %v11893_v32 = vadd.f32 %v7940_v7, %v6059_v9  ;;  %v5830_v31 = vpop.f32.mrf.mxu1 }
0x15fe   : > { %v11899_v59 = vadd.f32 %v7925_v37, %v5830_v31 }
0x15ff   : > { %5639 = vmax.xlane.f32.xlu0 %v5638_v58  ;;  %v6079_v50 = vsel %vm1067_vm6, %v11893_v32, -inf  ;;  %v7933_v58 = vunpack.c.h.bf16 %v7995_v29 }
0x1600   : > { %v5851_v23 = vsel %vm1067_vm6, %v11899_v59, -inf }
0x1601   : > { %6080 = vmax.xlane.f32.xlu1 %v6079_v50 }
0x1604   : > { %v6061_v13 = vpop.f32.mrf.mxu3 }
0x1605   : > { %v11901_v40 = vadd.f32 %v7941_v3, %v6061_v13  ;;  %v5833_v63 = vpop.f32.mrf.mxu1  ;;  %v7949_v13 = vunpack.c.h.bf16 %v7999_v38 }
0x1606   : > { %v11910_v27 = vadd.f32 %v7928_v25, %v5833_v63 }
0x1607   : > { %5852 = vmax.xlane.f32.xlu0 %v5851_v23  ;;  %v6082_v55 = vsel %vm1067_vm6, %v11901_v40, -inf  ;;  %v7996_v23 = vld [vmem:[%s12629_s2 + $0x158] sm:$0xff]  }
0x1608   : > { %v5854_v5 = vsel %vm1067_vm6, %v11910_v27, -inf  ;;  %v7937_v38 = vunpack.c.h.bf16 %v7996_v23 }
0x1609   : > { %6083 = vmax.xlane.f32.xlu1 %v6082_v55 }
0x160c   : > { %v6064_v26 = vpop.f32.mrf.mxu3 }
0x160d   : > { %v5835_v35 = vpop.f32.mrf.mxu1  ;;  %v11921_v0 = vadd.f32 %v7944_v34, %v6064_v26  ;;  %v7936_v26 = vunpack.c.l.bf16 %v7996_v23 }
0x160e   : > { %v11915_v28 = vadd.f32 %v7929_v54, %v5835_v35  ;;  %v8000_v54 = vld [vmem:[%s12629_s2 + $0x178] sm:$0xff]  }
0x160f   : > { %v6085_v49 = vsel %vm1067_vm6, %v11921_v0, -inf  ;;  %v7952_v34 = vunpack.c.l.bf16 %v8000_v54 }
0x1610   : > { %v5857_v36 = vsel %vm1067_vm6, %v11915_v28, -inf }
0x1611   : > { %5858 = vmax.xlane.f32.xlu0 %v5857_v36  ;;  %5855 = vmax.xlane.f32.xlu1 %v5854_v5 }
0x1614   : > { %v6066_v6 = vpop.f32.mrf.mxu3 }
0x1615   : > { %v11923_v21 = vadd.f32 %v7945_v47, %v6066_v6  ;;  %v5838_v8 = vpop.f32.mrf.mxu1 }
0x1616   : > { %v11935_v7 = vadd.f32 %v7932_v41, %v5838_v8 }
0x1617   : > { %v6088_v43 = vsel %vm1067_vm6, %v11923_v21, -inf }
0x1618   : > { %v5860_v3 = vsel %vm1067_vm6, %v11935_v7, -inf }
0x1619   : > { %6089 = vmax.xlane.f32.xlu0 %v6088_v43  ;;  %6086 = vmax.xlane.f32.xlu1 %v6085_v49 }
0x161c   : > { %v6069_v9 = vpop.f32.mrf.mxu3 }
0x161d   : > { %v11937_v31 = vadd.f32 %v7948_v12, %v6069_v9  ;;  %v5840_v37 = vpop.f32.mrf.mxu1  ;;  %v7953_v12 = vunpack.c.h.bf16 %v8000_v54 }
0x161e   : > { %v11943_v20 = vadd.f32 %v7933_v58, %v5840_v37 }
0x161f   : > { %v6091_v50 = vsel %vm1067_vm6, %v11937_v31, -inf }
0x1620   : > { %v5863_v35 = vsel %vm1067_vm6, %v11943_v20, -inf }
0x1621   : > { %6092 = vmax.xlane.f32.xlu0 %v6091_v50  ;;  %5861 = vmax.xlane.f32.xlu1 %v5860_v3 }
0x1624   : > { %v6071_v63 = vpop.f32.mrf.mxu3 }
0x1625   : > { %v11948_v25 = vadd.f32 %v7949_v13, %v6071_v63  ;;  %v5843_v55 = vpop.f32.mrf.mxu1 }
0x1626   : > { %v11957_v36 = vadd.f32 %v7936_v26, %v5843_v55 }
0x1627   : > { %v6094_v22 = vsel %vm1067_vm6, %v11948_v25, -inf }
0x1628   : > { %6095 = vmax.xlane.f32.xlu2 %v6094_v22  ;;  %v5866_v41 = vsel %vm1067_vm6, %v11957_v36, -inf }
0x1629   : > { %5864 = vmax.xlane.f32.xlu0 %v5863_v35 }
0x162c   : > { %v6074_v5 = vpop.f32.mrf.mxu3  ;;  %v5388_v47 = vpop.xlane.xlu2 %5387 }
0x162d   : > { %v11959_v6 = vadd.f32 %v7952_v34, %v6074_v5  ;;  %v5410_v29 = vsub.f32 %v11803_v51, %v5388_v47  ;;  %v5845_v49 = vpop.f32.mrf.mxu1 }
0x162e   : > { %v11966_v37 = vadd.f32 %v7937_v38, %v5845_v49 }
0x162f   : > { %v5418_v8 = vmul.f32 1.442695, %v5410_v29  ;;  %v6097_v43 = vsel %vm1067_vm6, %v11959_v6, -inf }
0x1630   : > { %5867 = vmax.xlane.f32.xlu2 %v5866_v41  ;;  %6098 = vmax.xlane.f32.xlu1 %v6097_v43  ;;  %v5869_v54 = vsel %vm1067_vm6, %v11966_v37, -inf }
0x1631   : > { %8652 = vpow2.f32 %v5418_v8 }
0x1632   : > { %v5619_v9 = vpop.xlane.xlu1 %5618 }
0x1633   : > { %v5641_v58 = vsub.f32 %v11807_v42, %v5619_v9 }
0x1634   : > { %v6076_v50 = vpop.f32.mrf.mxu3  ;;  %v5391_v51 = vpop.xlane.xlu0 %5390 }
0x1635   : > { %v5649_v3 = vmul.f32 1.442695, %v5641_v58  ;;  %v11969_v13 = vadd.f32 %v7953_v12, %v6076_v50  ;;  %v5411_v63 = vsub.f32 %v11809_v4, %v5391_v51 }
0x1637   : > { %v11972_v23 = vpop.eup %8652  ;;  %8654 = vpow2.f32 %v5649_v3  ;;  %v5420_v55 = vmul.f32 1.442695, %v5411_v63  ;;  %v6100_v26 = vsel %vm1067_vm6, %v11969_v13, -inf }
0x1638   : > { %6101 = vmax.xlane.f32.xlu0 %v6100_v26  ;;  %5870 = vmax.xlane.f32.xlu1 %v5869_v54  ;;  %v5434_v42 = vsel %vm1067_vm6, %v11972_v23, 0.0 }
0x1639   : > { %8656 = vpow2.f32 %v5420_v55  ;;  %5435 = vadd.xlane.f32.xlu2 %v5434_v42 }
0x163a   : > { %v5622_v22 = vpop.xlane.xlu2 %5621 }
0x163b   : > { %v5642_v4 = vsub.f32 %v11818_v10, %v5622_v22 }
0x163c   : > { %v5394_v35 = vpop.xlane.xlu0 %5393 }
0x163d   : > { %v11981_v34 = vpop.eup %8654  ;;  %v5651_v5 = vmul.f32 1.442695, %v5642_v4  ;;  %v5412_v47 = vsub.f32 %v11823_v11, %v5394_v35 }
0x163e   : > { %v5665_v29 = vsel %vm1067_vm6, %v11981_v34, 0.0 }
0x163f   : > { %v11986_v8 = vpop.eup %8656  ;;  %8658 = vpow2.f32 %v5651_v5  ;;  %v5422_v41 = vmul.f32 1.442695, %v5412_v47 }
0x1640   : > { %5666 = vadd.xlane.f32.xlu1 %v5665_v29  ;;  %v5437_v38 = vsel %vm1067_vm6, %v11986_v8, 0.0 }
0x1641   : > { %5438 = vadd.xlane.f32.xlu0 %v5437_v38  ;;  %8660 = vpow2.f32 %v5422_v41 }
0x1642   : > { %v5625_v43 = vpop.xlane.xlu2 %5624 }
0x1643   : > { %v5643_v10 = vsub.f32 %v11829_v60, %v5625_v43 }
0x1644   : > { %v5397_v49 = vpop.xlane.xlu1 %5396 }
0x1645   : > { %v11991_v12 = vpop.eup %8658  ;;  %v5653_v11 = vmul.f32 1.442695, %v5643_v10  ;;  %v5413_v9 = vsub.f32 %v11831_v2, %v5397_v49 }
0x1646   : > { %v5668_v58 = vsel %vm1067_vm6, %v11991_v12, 0.0 }
0x1647   : > { %8662 = vpow2.f32 %v5653_v11  ;;  %5669 = vadd.xlane.f32.xlu2 %v5668_v58  ;;  %v5424_v50 = vmul.f32 1.442695, %v5413_v9  ;;  %v11996_v3 = vpop.eup %8660 }
0x1648   : > { %v5440_v2 = vsel %vm1067_vm6, %v11996_v3, 0.0 }
0x1649   : > { %8664 = vpow2.f32 %v5424_v50 }
0x164a   : > { %v5628_v51 = vpop.xlane.xlu0 %5627 }
0x164b   : > { %v5644_v63 = vsub.f32 %v11840_v62, %v5628_v51 }
0x164c   : > { %v5400_v55 = vpop.xlane.xlu1 %5399 }
0x164d   : > { %v11999_v60 = vpop.eup %8662  ;;  %v5655_v26 = vmul.f32 1.442695, %v5644_v63  ;;  %v5414_v54 = vsub.f32 %v11845_v53, %v5400_v55 }
0x164e   : > { %v5671_v42 = vsel %vm1067_vm6, %v11999_v60, 0.0 }
0x164f   : > { %8666 = vpow2.f32 %v5655_v26  ;;  %5441 = vadd.xlane.f32.xlu2 %v5440_v2  ;;  %5672 = vadd.xlane.f32.xlu1 %v5671_v42  ;;  %v5426_v22 = vmul.f32 1.442695, %v5414_v54  ;;  %v12006_v35 = vpop.eup %8664 }
0x1650   : > { %v5443_v38 = vsel %vm1067_vm6, %v12006_v35, 0.0 }
0x1651   : > { %8668 = vpow2.f32 %v5426_v22 }
0x1652   : > { %v5631_v4 = vpop.xlane.xlu0 %5630 }
0x1653   : > { %v5645_v47 = vsub.f32 %v11851_v48, %v5631_v4 }
0x1654   : > { %v5403_v62 = vpop.xlane.xlu2 %5402 }
0x1655   : > { %v12008_v5 = vpop.eup %8666  ;;  %v5415_v53 = vsub.f32 %v11853_v18, %v5403_v62  ;;  %v5657_v43 = vmul.f32 1.442695, %v5645_v47 }
0x1656   : > { %v5674_v29 = vsel %vm1067_vm6, %v12008_v5, 0.0 }
0x1657   : > { %v5428_v41 = vmul.f32 1.442695, %v5415_v53  ;;  %5675 = vadd.xlane.f32.xlu2 %v5674_v29  ;;  %5444 = vadd.xlane.f32.xlu1 %v5443_v38  ;;  %v12016_v49 = vpop.eup %8668 }
0x1658   : > { %v5446_v58 = vsel %vm1067_vm6, %v12016_v49, 0.0 }
0x1659   : > { %8670 = vpow2.f32 %v5428_v41 }
0x165a   : > { %v5634_v10 = vpop.xlane.xlu1 %5633  ;;  %8672 = vpow2.f32 %v5657_v43 }
0x165b   : > { %v5646_v11 = vsub.f32 %v11862_v30, %v5634_v10 }
0x165c   : > { %v5406_v9 = vpop.xlane.xlu2 %5405 }
0x165d   : > { %v5659_v48 = vmul.f32 1.442695, %v5646_v11  ;;  %v5416_v18 = vsub.f32 %v11867_v52, %v5406_v9 }
0x165f   : > { %v12022_v50 = vpop.eup %8670  ;;  %8674 = vpow2.f32 %v5659_v48  ;;  %v5430_v51 = vmul.f32 1.442695, %v5416_v18  ;;  %5447 = vadd.xlane.f32.xlu1 %v5446_v58 }
0x1660   : > { %v5449_v63 = vsel %vm1067_vm6, %v12022_v50, 0.0  ;;  %v12026_v30 = vpop.eup %8672 }
0x1661   : > { %8676 = vpow2.f32 %v5430_v51  ;;  %5450 = vadd.xlane.f32.xlu0 %v5449_v63  ;;  %v5677_v2 = vsel %vm1067_vm6, %v12026_v30, 0.0 }
0x1662   : > { %v5637_v55 = vpop.xlane.xlu0 %5636 }
0x1663   : > { %v5647_v26 = vsub.f32 %v11873_v1, %v5637_v55 }
0x1665   : > { %v12029_v54 = vpop.eup %8674  ;;  %v5661_v52 = vmul.f32 1.442695, %v5647_v26 }
0x1666   : > { %v5680_v4 = vsel %vm1067_vm6, %v12029_v54, 0.0 }
0x1667   : > { %v12033_v42 = vpop.eup %8676  ;;  %8678 = vpow2.f32 %v5661_v52  ;;  %5678 = vadd.xlane.f32.xlu1 %v5677_v2 }
0x1668   : > { %v5452_v22 = vsel %vm1067_vm6, %v12033_v42, 0.0 }
0x1669   : > { %5453 = vadd.xlane.f32.xlu2 %v5452_v22  ;;  %5681 = vadd.xlane.f32.xlu0 %v5680_v4 }
0x166a   : > { %v5409_v62 = vpop.xlane.xlu0 %5408 }
0x166b   : > { %v5417_v1 = vsub.f32 %v11880_v46, %v5409_v62 }
0x166c   : > { %v5850_v47 = vpop.xlane.xlu1 %5849 }
0x166d   : > { %v12040_v53 = vpop.eup %8678  ;;  %v5432_v29 = vmul.f32 1.442695, %v5417_v1  ;;  %v5872_v38 = vsub.f32 %v11882_v19, %v5850_v47 }
0x166e   : > { %v5683_v41 = vsel %vm1067_vm6, %v12040_v53, 0.0 }
0x166f   : > { %8680 = vpow2.f32 %v5432_v29  ;;  %v5880_v43 = vmul.f32 1.442695, %v5872_v38  ;;  %5684 = vadd.xlane.f32.xlu1 %v5683_v41 }
0x1671   : > { %8682 = vpow2.f32 %v5880_v43 }
0x1672   : > { %v5640_v10 = vpop.xlane.xlu0 %5639 }
0x1673   : > { %v5648_v11 = vsub.f32 %v11891_v56, %v5640_v10 }
0x1674   : > { %v6081_v9 = vpop.xlane.xlu1 %6080 }
0x1675   : > { %v12046_v48 = vpop.eup %8680  ;;  %v5663_v46 = vmul.f32 1.442695, %v5648_v11  ;;  %v6103_v18 = vsub.f32 %v11893_v32, %v6081_v9 }
0x1676   : > { %v5455_v58 = vsel %vm1067_vm6, %v12046_v48, 0.0 }
0x1677   : > { %v12051_v19 = vpop.eup %8682  ;;  %8684 = vpow2.f32 %v5663_v46  ;;  %v6111_v51 = vmul.f32 1.442695, %v6103_v18  ;;  %5456 = vadd.xlane.f32.xlu1 %v5455_v58 }
0x1678   : > { %v5896_v63 = vsel %vm1067_vm6, %v12051_v19, 0.0 }
0x1679   : > { %8686 = vpow2.f32 %v6111_v51  ;;  %5897 = vadd.xlane.f32.xlu2 %v5896_v63 }
0x167a   : > { %v5853_v26 = vpop.xlane.xlu0 %5852 }
0x167b   : > { %v5873_v10 = vsub.f32 %v11899_v59, %v5853_v26 }
0x167c   : > { %v6084_v55 = vpop.xlane.xlu1 %6083 }
0x167d   : > { %v12055_v56 = vpop.eup %8684  ;;  %v5882_v46 = vmul.f32 1.442695, %v5873_v10 }
0x167e   : > { %v5686_v32 = vsel %vm1067_vm6, %v12055_v56, 0.0 }
0x167f   : > { %v12059_v52 = vpop.eup %8686  ;;  %5687 = vadd.xlane.f32.xlu0 %v5686_v32  ;;  %8688 = vpow2.f32 %v5882_v46 }
0x1680   : > { %v6127_v2 = vsel %vm1067_vm6, %v12059_v52, 0.0 }
0x1681   : > { %6128 = vadd.xlane.f32.xlu2 %v6127_v2 }
0x1684   : > { %v5859_v22 = vpop.xlane.xlu0 %5858  ;;  %v5856_v4 = vpop.xlane.xlu1 %5855 }
0x1685   : > { %v5875_v9 = vsub.f32 %v11915_v28, %v5859_v22  ;;  %v12086_v28 = vpop.eup %8688 }
0x1687   : > { %v5886_v58 = vmul.f32 1.442695, %v5875_v9  ;;  %v5874_v9 = vsub.f32 %v11910_v27, %v5856_v4 }
0x1689   : > { %8690 = vpow2.f32 %v5886_v58  ;;  %v5884_v46 = vmul.f32 1.442695, %v5874_v9 }
0x168c   : > { %v12063_v62 = vpop.xlane.xlu0 %6089  ;;  %v6087_v1 = vpop.xlane.xlu1 %6086 }
0x168d   : > { %v6105_v51 = vsub.f32 %v11921_v0, %v6087_v1 }
0x168f   : > { %v6115_v26 = vmul.f32 1.442695, %v6105_v51 }
0x1690   : > { %6171 = vrot.lane.b32.xlu1 %v11663_v57, %s8856_s14 }
0x1693   : > { %5940 = vrot.lane.b32.xlu0 %v11663_v57, %s8857_s15 }
0x1694   : > { %v6093_v47 = vpop.xlane.xlu0 %6092  ;;  %v5862_v29 = vpop.xlane.xlu1 %5861 }
0x1695   : > { %v5876_v32 = vsub.f32 %v11935_v7, %v5862_v29  ;;  %v6107_v0 = vsub.f32 %v11937_v31, %v6093_v47  ;;  %v5899_v7 = vsel %vm1067_vm6, %v12086_v28, 0.0 }
0x1697   : > { %v5888_v22 = vmul.f32 1.442695, %v5876_v32 }
0x1699   : > { %6173 = vrot.lane.b32.xlu2 %v11667_v16, %s8856_s14  ;;  %v6104_v16 = vsub.f32 %v11901_v40, %v6084_v55  ;;  %v12089_v40 = vpop.eup %8690 }
0x169a   : > { %v5905_v31 = vsel %vm1067_vm6, %v12089_v40, 0.0 }
0x169b   : > { %v12071_v38 = vpop.xlane.xlu2 %6095  ;;  %v6113_v59 = vmul.f32 1.442695, %v6104_v16  ;;  %v6119_v16 = vmul.f32 1.442695, %v6107_v0 }
0x169c   : > { %v5865_v43 = vpop.xlane.xlu0 %5864 }
0x169d   : > { %v5877_v58 = vsub.f32 %v11943_v20, %v5865_v43  ;;  %v6108_v20 = vsub.f32 %v11948_v25, %v12071_v38 }
0x169f   : > { %v6121_v9 = vmul.f32 1.442695, %v6108_v20 }
0x16a3   : > { %v12073_v41 = vpop.xlane.xlu1 %6098  ;;  %v12076_v11 = vpop.xlane.xlu2 %5867 }
0x16ab   : > { %v12079_v18 = vpop.xlane.xlu0 %6101  ;;  %v12081_v57 = vpop.xlane.xlu1 %5870 }
0x16ac   : > { %v5436_v63 = vpop.xlane.xlu2 %5435 }
0x16ad   : > { %8692 = vrcp.f32 %v5436_v63  ;;  %v6106_v63 = vsub.f32 %v11923_v21, %v12063_v62 }
0x16af   : > { %v6117_v62 = vmul.f32 1.442695, %v6106_v63 }
0x16b3   : > { %v5667_v10 = vpop.xlane.xlu1 %5666  ;;  %v8693_v55 = vpop.eup %8692 }
0x16b4   : > { %v5439_v2 = vpop.xlane.xlu0 %5438  ;;  %v5466_v27 = vmul.f32 %v8693_v55, %v11972_v23  ;;  %v5890_v23 = vmul.f32 1.442695, %v5877_v58 }
0x16b5   : > { %8694 = vrcp.f32 %v5439_v2 }
0x16b6   : > { %8696 = vpow2.f32 %v6113_v59 }
0x16b7   : > { %8698 = vpow2.f32 %v6115_v26 }
0x16b8   : > { %8700 = vrcp.f32 %v5667_v10 }
0x16b9   : > { %8702 = vpow2.f32 %v5888_v22 }
0x16ba   : > { %v5670_v1 = vpop.xlane.xlu2 %5669  ;;  %5900 = vadd.xlane.f32.xlu1 %v5899_v7 }
0x16bb   : > { %v8695_v29 = vpop.eup %8694  ;;  %8704 = vrcp.f32 %v5670_v1 }
0x16bc   : > { %v5467_v4 = vmul.f32 %v8695_v29, %v11986_v8  ;;  %v12099_v47 = vpop.eup %8696  ;;  %8706 = vpow2.f32 %v5884_v46  ;;  %v5878_v8 = vsub.f32 %v11957_v36, %v12076_v11 }
0x16bd   : > { %5906 = vadd.xlane.f32.xlu0 %v5905_v31  ;;  %v12101_v51 = vpop.eup %8698  ;;  %8708 = vpow2.f32 %v6119_v16  ;;  %v6130_v2 = vsel %vm1067_vm6, %v12099_v47, 0.0 }
0x16be   : > { %v5474_v32 = vpack.c.bf16 %v5467_v4, %v5466_v27  ;;  %v8701_v59 = vpop.eup %8700  ;;  %v6133_v21 = vsel %vm1067_vm6, %v12101_v51, 0.0  ;;  %8710 = vpow2.f32 %v5890_v23  ;;  %v5892_v36 = vmul.f32 1.442695, %v5878_v8 }
0x16bf   : > { %v12107_v43 = vpop.eup %8702  ;;  %v5697_v22 = vmul.f32 %v8701_v59, %v11981_v34  ;;  %8712 = vpow2.f32 %v6117_v62  ;;  %v6109_v34 = vsub.f32 %v11959_v6, %v12073_v41  ;;  %v5879_v6 = vsub.f32 %v11966_v37, %v12081_v57 }
0x16c0   : > { %7570 = vmatmul.msk.bf16.vlgmr.msrb.gmra.mxu2 %vm1067_vm6, %v5474_v32  ;;  %v5908_v0 = vsel %vm1067_vm6, %v12107_v43, 0.0  ;;  %8714 = vpow2.f32 %v6121_v9 }
0x16c1   : > { %v8705_v26 = vpop.eup %8704  ;;  %8716 = vpow2.f32 %v5892_v36  ;;  %v6123_v27 = vmul.f32 1.442695, %v6109_v34  ;;  %v5894_v32 = vmul.f32 1.442695, %v5879_v6 }
0x16c2   : > { %v5698_v25 = vmul.f32 %v8705_v26, %v11991_v12  ;;  %v5442_v38 = vpop.xlane.xlu2 %5441  ;;  %6131 = vadd.xlane.f32.xlu1 %v6130_v2  ;;  %6134 = vadd.xlane.f32.xlu2 %v6133_v21  ;;  %v5673_v10 = vpop.xlane.xlu1 %5672  ;;  %v6110_v12 = vsub.f32 %v11969_v13, %v12079_v18 }
0x16c3   : > { %v12120_v55 = vpop.eup %8706  ;;  %8718 = vrcp.f32 %v5673_v10 }
0x16c4   : > { %v5705_v11 = vpack.c.bf16 %v5698_v25, %v5697_v22  ;;  %v12122_v7 = vpop.eup %8708  ;;  %v5902_v29 = vsel %vm1067_vm6, %v12120_v55, 0.0  ;;  %8720 = vrcp.f32 %v5442_v38  ;;  %v6125_v41 = vmul.f32 1.442695, %v6110_v12 }
0x16c5   : > { %5909 = vadd.xlane.f32.xlu0 %v5908_v0  ;;  %v12129_v1 = vpop.eup %8710  ;;  %v6139_v46 = vsel %vm1067_vm6, %v12122_v7, 0.0 }
0x16c6   : > { %7586 = vmatmul.msk.bf16.vlgmr.msrb.gmra.mxu0 %vm1067_vm6, %v5705_v11  ;;  %v12137_v13 = vpop.eup %8712  ;;  %v5911_v18 = vsel %vm1067_vm6, %v12129_v1, 0.0 }
0x16c7   : > { %v12141_v4 = vpop.eup %8714  ;;  %v6136_v37 = vsel %vm1067_vm6, %v12137_v13, 0.0 }
0x16c8   : > { %v12143_v31 = vpop.eup %8716  ;;  %v6142_v25 = vsel %vm1067_vm6, %v12141_v4, 0.0 }
0x16c9   : > { %v8719_v63 = vpop.eup %8718  ;;  %v5914_v57 = vsel %vm1067_vm6, %v12143_v31, 0.0 }
0x16ca   : > { %v5676_v58 = vpop.xlane.xlu2 %5675  ;;  %5903 = vadd.xlane.f32.xlu1 %v5902_v29  ;;  %6140 = vadd.xlane.f32.xlu2 %v6139_v46  ;;  %v5445_v16 = vpop.xlane.xlu1 %5444  ;;  %v5699_v8 = vmul.f32 %v8719_v63, %v11999_v60 }
0x16cb   : > { %8722 = vrcp.f32 %v5676_v58  ;;  %v8721_v59 = vpop.eup %8720 }
0x16cc   : > { %8724 = vrcp.f32 %v5445_v16  ;;  %v5468_v21 = vmul.f32 %v8721_v59, %v11996_v3 }
0x16cd   : > { %5912 = vadd.xlane.f32.xlu0 %v5911_v18  ;;  %8726 = vpow2.f32 %v6123_v27 }
0x16ce   : > { %8728 = vpow2.f32 %v6125_v41 }
0x16cf   : > { %8730 = vpow2.f32 %v5894_v32 }
0x16d1   : > { %v8723_v20 = vpop.eup %8722 }
0x16d2   : > { %v8725_v23 = vpop.eup %8724  ;;  %v5700_v26 = vmul.f32 %v8723_v20, %v12008_v5  ;;  %6137 = vadd.xlane.f32.xlu1 %v6136_v37  ;;  %5915 = vadd.xlane.f32.xlu2 %v5914_v57  ;;  %v5448_v2 = vpop.xlane.xlu1 %5447 }
0x16d3   : > { %v5469_v62 = vmul.f32 %v8725_v23, %v12006_v35  ;;  %v12155_v10 = vpop.eup %8726 }
0x16d4   : > { %v5451_v22 = vpop.xlane.xlu0 %5450  ;;  %v5706_v38 = vpack.c.bf16 %v5700_v26, %v5699_v8  ;;  %v12157_v60 = vpop.eup %8728  ;;  %v6145_v35 = vsel %vm1067_vm6, %v12155_v10, 0.0 }
0x16d5   : > { %6143 = vadd.xlane.f32.xlu0 %v6142_v25  ;;  %v5475_v9 = vpack.c.bf16 %v5469_v62, %v5468_v21  ;;  %8732 = vrcp.f32 %v5451_v22  ;;  %v12161_v5 = vpop.eup %8730  ;;  %v6148_v3 = vsel %vm1067_vm6, %v12157_v60, 0.0 }
0x16d6   : > { %7587 = vmatmul.msk.bf16.gmra.mxu0 %vm1067_vm6, %v5706_v38  ;;  %8734 = vrcp.f32 %v5448_v2  ;;  %v5917_v0 = vsel %vm1067_vm6, %v12161_v5, 0.0 }
0x16d7   : > { %7571 = vmatmul.msk.bf16.gmra.mxu2 %vm1067_vm6, %v5475_v9 }
0x16da   : > { %6149 = vadd.xlane.f32.xlu2 %v6148_v3  ;;  %6146 = vadd.xlane.f32.xlu1 %v6145_v35  ;;  %v5679_v36 = vpop.xlane.xlu1 %5678 }
0x16db   : > { %8736 = vrcp.f32 %v5679_v36  ;;  %v8733_v34 = vpop.eup %8732 }
0x16dc   : > { %v5682_v11 = vpop.xlane.xlu0 %5681  ;;  %v8735_v12 = vpop.eup %8734  ;;  %v5471_v29 = vmul.f32 %v8733_v34, %v12022_v50 }
0x16dd   : > { %5918 = vadd.xlane.f32.xlu0 %v5917_v0  ;;  %8738 = vrcp.f32 %v5682_v11  ;;  %v5470_v16 = vmul.f32 %v8735_v12, %v12016_v49  ;;  %v5454_v6 = vpop.xlane.xlu2 %5453 }
0x16de   : > { %8740 = vrcp.f32 %v5454_v6 }
0x16df   : > { %v5476_v63 = vpack.c.bf16 %v5471_v29, %v5470_v16 }
0x16e1   : > { %v8737_v46 = vpop.eup %8736 }
0x16e2   : > { %v5685_v58 = vpop.xlane.xlu1 %5684  ;;  %v5701_v41 = vmul.f32 %v8737_v46, %v12026_v30 }
0x16e3   : > { %v8739_v27 = vpop.eup %8738 }
0x16e4   : > { %v5702_v18 = vmul.f32 %v8739_v27, %v12029_v54  ;;  %v8741_v20 = vpop.eup %8740 }
0x16e5   : > { %v5472_v49 = vmul.f32 %v8741_v20, %v12033_v42 }
0x16e6   : > { %v5707_v32 = vpack.c.bf16 %v5702_v18, %v5701_v41 }
0x16e7   : > { %7572 = vmatmul.msk.bf16.gmra.mxu2 %vm1067_vm6, %v5476_v63 }
0x16e8   : > { %7588 = vmatmul.msk.bf16.gmra.mxu0 %vm1067_vm6, %v5707_v32 }
0x16ea   : > { %v5457_v59 = vpop.xlane.xlu1 %5456 }
0x16eb   : > { %8742 = vrcp.f32 %v5457_v59 }
0x16ec   : > { %v5898_v50 = vpop.xlane.xlu2 %5897  ;;  %8744 = vrcp.f32 %v5685_v58 }
0x16f1   : > { %v8743_v37 = vpop.eup %8742 }
0x16f2   : > { %v5473_v57 = vmul.f32 %v8743_v37, %v12046_v48  ;;  %v5688_v30 = vpop.xlane.xlu0 %5687  ;;  %v8745_v8 = vpop.eup %8744 }
0x16f3   : > { %8746 = vrcp.f32 %v5688_v30  ;;  %v5703_v2 = vmul.f32 %v8745_v8, %v12040_v53 }
0x16f4   : > { %v6129_v54 = vpop.xlane.xlu2 %6128  ;;  %v5477_v23 = vpack.c.bf16 %v5473_v57, %v5472_v49  ;;  %8748 = vrcp.f32 %v5898_v50 }
0x16f7   : > { %7573 = vmatmul.msk.bf16.gmra.mxu2 %vm1067_vm6, %v5477_v23 }
0x16f9   : > { %v8747_v26 = vpop.eup %8746 }
0x16fa   : > { %v5704_v21 = vmul.f32 %v8747_v26, %v12055_v56  ;;  %v8749_v9 = vpop.eup %8748 }
0x16fb   : > { %v5928_v35 = vmul.f32 %v8749_v9, %v12051_v19 }
0x16fc   : > { %v6174_v62 = vpop.permute.xlu2 %6173  ;;  %v5708_v22 = vpack.c.bf16 %v5704_v21, %v5703_v2 }
0x16fd   : > { %6201 = vmatpush.bf16.msra.mxu0 %v6174_v62 }
0x16fe   : > { %7589 = vmatmul.msk.bf16.gmra.mxu0 %vm1067_vm6, %v5708_v22 }
0x1702   : > { %v6172_v42 = vpop.permute.xlu1 %6171 }
0x1703   : > { %6202 = vmatpush.bf16.msra.mxu0 %v6172_v42 }
0x1705   : > { %v5941_v48 = vpop.permute.xlu0 %5940 }
0x1706   : > { %5971 = vmatpush.bf16.msra.mxu2 %v5941_v48 }
0x172d   : > { %v5901_v25 = vpop.xlane.xlu1 %5900 }
0x172e   : > { %8750 = vrcp.f32 %v5901_v25 }
0x172f   : > { %8752 = vrcp.f32 %v6129_v54 }
0x1730   : > { %v5907_v38 = vpop.xlane.xlu0 %5906 }
0x1734   : > { %v8751_v3 = vpop.eup %8750 }
0x1735   : > { %v5929_v53 = vmul.f32 %v8751_v3, %v12086_v28  ;;  %v6132_v56 = vpop.xlane.xlu1 %6131  ;;  %v8753_v0 = vpop.eup %8752 }
0x1736   : > { %8754 = vrcp.f32 %v6132_v56  ;;  %v6159_v29 = vmul.f32 %v8753_v0, %v12059_v52  ;;  %v6135_v19 = vpop.xlane.xlu2 %6134 }
0x1737   : > { %v5936_v36 = vpack.c.bf16 %v5929_v53, %v5928_v35  ;;  %8756 = vrcp.f32 %v5907_v38 }
0x1738   : > { %v5910_v11 = vpop.xlane.xlu0 %5909 }
0x1739   : > { %7602 = vmatmul.msk.bf16.vlgmr.msra.gmra.mxu2 %vm1067_vm6, %v5936_v36 }
0x173c   : > { %v8755_v34 = vpop.eup %8754 }
0x173d   : > { %v5904_v12 = vpop.xlane.xlu1 %5903  ;;  %v6160_v46 = vmul.f32 %v8755_v34, %v12099_v47  ;;  %v8757_v28 = vpop.eup %8756 }
0x173e   : > { %8758 = vrcp.f32 %v5904_v12  ;;  %v5931_v18 = vmul.f32 %v8757_v28, %v12089_v40  ;;  %v6141_v47 = vpop.xlane.xlu2 %6140 }
0x173f   : > { %v6167_v58 = vpack.c.bf16 %v6160_v46, %v6159_v29  ;;  %8760 = vrcp.f32 %v6135_v19 }
0x1740   : > { %v5913_v27 = vpop.xlane.xlu0 %5912 }
0x1741   : > { %7618 = vmatmul.msk.bf16.vlgmr.msra.gmra.mxu0 %vm1067_vm6, %v6167_v58 }
0x1743   : > { %v5742_v16 = vpop.f32.mrf.mxu0 }
0x1744   : > { %v8759_v6 = vpop.eup %8758 }
0x1745   : > { %v6138_v41 = vpop.xlane.xlu1 %6137  ;;  %v5930_v63 = vmul.f32 %v8759_v6, %v12120_v55  ;;  %v8761_v52 = vpop.eup %8760 }
0x1746   : > { %8762 = vrcp.f32 %v6138_v41  ;;  %v6161_v37 = vmul.f32 %v8761_v52, %v12101_v51  ;;  %v5916_v8 = vpop.xlane.xlu2 %5915 }
0x1747   : > { %v5937_v32 = vpack.c.bf16 %v5931_v18, %v5930_v63  ;;  %8764 = vrcp.f32 %v5913_v27 }
0x1748   : > { %8766 = vrcp.f32 %v5910_v11  ;;  %v6144_v57 = vpop.xlane.xlu0 %6143  ;;  %v12206_v11 = vpop.f32.mrf.mxu2 }
0x1749   : > { %7603 = vmatmul.msk.bf16.gmra.mxu2 %vm1067_vm6, %v5937_v32  ;;  %8768 = vrcp.f32 %v6144_v57  ;;  %v7751_v57 = vld [vmem:[%s12633_s6 + $0x28] sm:$0xff] }
0x174a   : > { %8770 = vrcp.f32 %v6141_v47  ;;  %6385 = vmatpush.bf16.msrb.mxu1 %v7751_v57 }
0x174b   : > { %v5744_v59 = vpop.f32.mrf.mxu0 }
0x174c   : > { %v8148_v50 = vpack.i.bf16 %v5744_v59, %v5742_v16  ;;  %v8763_v20 = vpop.eup %8762 }
0x174d   : > { %v6162_v49 = vmul.f32 %v8763_v20, %v12137_v13  ;;  %v8765_v55 = vpop.eup %8764  ;;  %v6147_v25 = vpop.xlane.xlu1 %6146 }
0x174e   : > { %8149 = vrot.lane.b32.xlu0 %v8148_v50, %s8858_s16  ;;  %v8767_v30 = vpop.eup %8766  ;;  %v5933_v23 = vmul.f32 %v8765_v55, %v12129_v1  ;;  %v6150_v1 = vpop.xlane.xlu2 %6149 }
0x174f   : > { %v6168_v40 = vpack.c.bf16 %v6162_v49, %v6161_v37  ;;  %v5932_v26 = vmul.f32 %v8767_v30, %v12107_v43  ;;  %v8769_v21 = vpop.eup %8768 }
0x1750   : > { %v5919_v2 = vpop.xlane.xlu0 %5918  ;;  %v8771_v13 = vpop.eup %8770  ;;  %v6164_v22 = vmul.f32 %v8769_v21, %v12141_v4 }
0x1751   : > { %7619 = vmatmul.msk.bf16.gmra.mxu0 %vm1067_vm6, %v6168_v40  ;;  %v5938_v51 = vpack.c.bf16 %v5933_v23, %v5932_v26  ;;  %8772 = vrcp.f32 %v5919_v2  ;;  %v6163_v48 = vmul.f32 %v8771_v13, %v12122_v7  ;;  %v5513_v34 = vpop.f32.mrf.mxu2 }
0x1752   : > { %8774 = vrcp.f32 %v5916_v8 }
0x1753   : > { %v5747_v54 = vpop.f32.mrf.mxu0  ;;  %v6169_v38 = vpack.c.bf16 %v6164_v22, %v6163_v48  ;;  %8776 = vrcp.f32 %v6150_v1  ;;  %v7750_v22 = vld [vmem:[%s12633_s6 + $0x20] sm:$0xff] }
0x1754   : > { %8778 = vrcp.f32 %v6147_v25  ;;  %6386 = vmatpush.bf16.msrb.mxu1 %v7750_v22 }
0x1757   : > { %v8773_v43 = vpop.eup %8772 }
0x1758   : > { %v8775_v9 = vpop.eup %8774  ;;  %v5935_v3 = vmul.f32 %v8773_v43, %v12161_v5 }
0x1759   : > { %7604 = vmatmul.msk.bf16.gmra.mxu2 %vm1067_vm6, %v5938_v51  ;;  %v5934_v35 = vmul.f32 %v8775_v9, %v12143_v31  ;;  %v8777_v4 = vpop.eup %8776 }
0x175a   : > { %v8779_v56 = vpop.eup %8778  ;;  %v6166_v7 = vmul.f32 %v8777_v4, %v12157_v60  ;;  %v12209_v12 = vpop.f32.mrf.mxu2 }
0x175b   : > { %v5749_v62 = vpop.f32.mrf.mxu0  ;;  %v5939_v53 = vpack.c.bf16 %v5935_v3, %v5934_v35  ;;  %v6165_v36 = vmul.f32 %v8779_v56, %v12155_v10 }
0x175c   : > { %v8163_v42 = vpack.i.bf16 %v5749_v62, %v5747_v54 }
0x175d   : > { %v6170_v0 = vpack.c.bf16 %v6166_v7, %v6165_v36 }
0x175e   : > { %8164 = vrot.lane.b32.xlu0 %v8163_v42, %s8858_s16 }
0x1761   : > { %7620 = vmatmul.msk.bf16.gmra.mxu0 %vm1067_vm6, %v6169_v38 }
0x1762   : > { %v12211_v5 = vpop.f32.mrf.mxu2 }
0x1765   : > { %v5752_v29 = vpop.f32.mrf.mxu0 }
0x1769   : > { %7605 = vmatmul.msk.bf16.gmra.mxu2 %vm1067_vm6, %v5939_v53 }
0x176a   : > { %v12213_v31 = vpop.f32.mrf.mxu2 }
0x176d   : > { %v5754_v58 = vpop.f32.mrf.mxu0 }
0x176e   : > { %v8178_v32 = vpack.i.bf16 %v5754_v58, %v5752_v29 }
0x1771   : > { %7621 = vmatmul.msk.bf16.gmra.mxu0 %vm1067_vm6, %v6170_v0 }
0x1772   : > { %v12215_v46 = vpop.f32.mrf.mxu2 }
0x177a   : > { %v12217_v19 = vpop.f32.mrf.mxu2 }
0x177b   : > { %v5757_v60 = vpop.f32.mrf.mxu0 }
0x1782   : > { %v12219_v10 = vpop.f32.mrf.mxu2 }
0x1783   : > { %v5759_v28 = vpop.f32.mrf.mxu0 }
0x1784   : > { %v8193_v59 = vpack.i.bf16 %v5759_v28, %v5757_v60 }
0x17bc   : > { %v5973_v16 = vpop.f32.mrf.mxu2 }
0x17be   : > { %v6204_v27 = vpop.f32.mrf.mxu0 }
0x17c0   : > { %v8150_v42 = vpop.permute.xlu0 %8149 }
0x17c1   : > { %v8152_v48 = vunpack.i.h.bf16 %v8150_v42  ;;  %v8151_v1 = vunpack.i.l.bf16 %v8150_v42 }
0x17c3   : > { %v6321_v3 = vsel %vm1013_vm5, %v5513_v34, %v8152_v48  ;;  %v6320_v35 = vsel %vm1013_vm5, %v12206_v11, %v8151_v1 }
0x17c4   : > { %v5975_v6 = vpop.f32.mrf.mxu2 }
0x17c5   : > { %v8153_v41 = vpack.i.bf16 %v5975_v6, %v5973_v16 }
0x17c6   : > { %v6206_v18 = vpop.f32.mrf.mxu0 }
0x17c7   : > { %8154 = vrot.lane.b32.xlu1 %v8153_v41, %s8859_s18  ;;  %v8158_v63 = vpack.i.bf16 %v6206_v18, %v6204_v27 }
0x17c9   : > { %8159 = vrot.lane.b32.xlu2 %v8158_v63, %s8860_s19 }
0x17cc   : > { %v5978_v52 = vpop.f32.mrf.mxu2 }
0x17ce   : > { %v6209_v47 = vpop.f32.mrf.mxu0 }
0x17cf   : > { %8179 = vrot.lane.b32.xlu1 %v8178_v32, %s8858_s16 }
0x17d0   : > { %v8165_v58 = vpop.permute.xlu0 %8164 }
0x17d1   : > { %v8167_v60 = vunpack.i.h.bf16 %v8165_v58  ;;  %v8166_v28 = vunpack.i.l.bf16 %v8165_v58 }
0x17d3   : > { %v6322_v6 = vsel %vm1013_vm5, %v12209_v12, %v8166_v28  ;;  %v6323_v41 = vsel %vm1013_vm5, %v12211_v5, %v8167_v60 }
0x17d4   : > { %v5980_v50 = vpop.f32.mrf.mxu2 }
0x17d5   : > { %v8168_v20 = vpack.i.bf16 %v5980_v50, %v5978_v52 }
0x17d6   : > { %v6211_v37 = vpop.f32.mrf.mxu0 }
0x17d7   : > { %8194 = vrot.lane.b32.xlu1 %v8193_v59, %s8858_s16  ;;  %v8173_v49 = vpack.i.bf16 %v6211_v37, %v6209_v47  ;;  %8169 = vrot.lane.b32.xlu0 %v8168_v20, %s8859_s18 }
0x17d9   : > { %8174 = vrot.lane.b32.xlu2 %v8173_v49, %s8860_s19 }
0x17dc   : > { %v5983_v40 = vpop.f32.mrf.mxu2 }
0x17de   : > { %v6214_v55 = vpop.f32.mrf.mxu0 }
0x17e4   : > { %v5985_v30 = vpop.f32.mrf.mxu2 }
0x17e5   : > { %v8183_v54 = vpack.i.bf16 %v5985_v30, %v5983_v40 }
0x17e6   : > { %v6216_v23 = vpop.f32.mrf.mxu0 }
0x17e7   : > { %v8188_v8 = vpack.i.bf16 %v6216_v23, %v6214_v55  ;;  %8184 = vrot.lane.b32.xlu0 %v8183_v54, %s8859_s18 }
0x17e9   : > { %8189 = vrot.lane.b32.xlu2 %v8188_v8, %s8860_s19 }
0x17ec   : > { %v5988_v26 = vpop.f32.mrf.mxu2 }
0x17ee   : > { %v6219_v2 = vpop.f32.mrf.mxu0 }
0x17f4   : > { %v5990_v51 = vpop.f32.mrf.mxu2 }
0x17f5   : > { %v8198_v21 = vpack.i.bf16 %v5990_v51, %v5988_v26 }
0x17f6   : > { %v6221_v13 = vpop.f32.mrf.mxu0 }
0x17f7   : > { %v8203_v62 = vpack.i.bf16 %v6221_v13, %v6219_v2  ;;  %8199 = vrot.lane.b32.xlu0 %v8198_v21, %s8859_s18 }
0x17f9   : > { %8204 = vrot.lane.b32.xlu2 %v8203_v62, %s8860_s19 }
0x1823   : > { %v8160_v25 = vpop.permute.xlu2 %8159 }
0x1824   : > { %v8162_v4 = vunpack.i.h.bf16 %v8160_v25  ;;  %v8161_v53 = vunpack.i.l.bf16 %v8160_v25 }
0x1833   : > { %v8175_v34 = vpop.permute.xlu2 %8174 }
0x1834   : > { %v8177_v18 = vunpack.i.h.bf16 %v8175_v34  ;;  %v8176_v63 = vunpack.i.l.bf16 %v8175_v34 }
0x1839   : > { %v8155_v38 = vpop.permute.xlu1 %8154 }
0x183a   : > { %v8157_v43 = vunpack.i.h.bf16 %v8155_v38  ;;  %v8156_v9 = vunpack.i.l.bf16 %v8155_v38 }
0x183c   : > { %v6329_v56 = vsel %vm2010_vm7, %v6321_v3, %v8157_v43  ;;  %v6328_v7 = vsel %vm2010_vm7, %v6320_v35, %v8156_v9 }
0x183d   : > { %v6337_v36 = vsel %vm2019_vm8, %v6329_v56, %v8162_v4  ;;  %v6336_v0 = vsel %vm2019_vm8, %v6328_v7, %v8161_v53 }
0x183e   : > { %v6344_v29 = vpack.c.bf16 %v6337_v36, %v6336_v0 }
0x1840   : > { %7635 = vmatmul.msk.bf16.vlgmr.msrb.gmra.mxu1 %vm372_vm0, %v6344_v29 }
0x1841   : > { %v8180_v20 = vpop.permute.xlu1 %8179 }
0x1842   : > { %v8182_v37 = vunpack.i.h.bf16 %v8180_v20  ;;  %v8181_v49 = vunpack.i.l.bf16 %v8180_v20 }
0x1843   : > { %v8190_v12 = vpop.permute.xlu2 %8189 }
0x1844   : > { %v6325_v55 = vsel %vm1013_vm5, %v12215_v46, %v8182_v37  ;;  %v6324_v30 = vsel %vm1013_vm5, %v12213_v31, %v8181_v49  ;;  %v8192_v54 = vunpack.i.h.bf16 %v8190_v12  ;;  %v8191_v23 = vunpack.i.l.bf16 %v8190_v12 }
0x1849   : > { %v8170_v16 = vpop.permute.xlu0 %8169  ;;  %v8195_v13 = vpop.permute.xlu1 %8194 }
0x184a   : > { %v8172_v27 = vunpack.i.h.bf16 %v8170_v16  ;;  %v8171_v11 = vunpack.i.l.bf16 %v8170_v16  ;;  %v8197_v62 = vunpack.i.h.bf16 %v8195_v13  ;;  %v8196_v22 = vunpack.i.l.bf16 %v8195_v13 }
0x184c   : > { %v6331_v32 = vsel %vm2010_vm7, %v6323_v41, %v8172_v27  ;;  %v6330_v52 = vsel %vm2010_vm7, %v6322_v6, %v8171_v11  ;;  %v6327_v1 = vsel %vm1013_vm5, %v12219_v10, %v8197_v62  ;;  %v6326_v25 = vsel %vm1013_vm5, %v12217_v19, %v8196_v22  ;;  %v8229_v10 = vld [vmem:[%s12630_s3 + $0x25] ss:$0 sm:$0xff] }
0x184d   : > { %v6338_v47 = vsel %vm2019_vm8, %v6330_v52, %v8176_v63  ;;  %v6339_v59 = vsel %vm2019_vm8, %v6331_v32, %v8177_v18 }
0x184e   : > { %v6345_v50 = vpack.c.bf16 %v6339_v59, %v6338_v47 }
0x1850   : > { %7636 = vmatmul.msk.bf16.gmra.mxu1 %vm372_vm0, %v6345_v50 }
0x1853   : > { %v8205_v46 = vpop.permute.xlu2 %8204 }
0x1854   : > { %v8207_v38 = vunpack.i.h.bf16 %v8205_v46  ;;  %v8206_v43 = vunpack.i.l.bf16 %v8205_v46 }
0x1859   : > { %v8185_v57 = vpop.permute.xlu0 %8184 }
0x185a   : > { %v8187_v40 = vunpack.i.h.bf16 %v8185_v57  ;;  %v8186_v5 = vunpack.i.l.bf16 %v8185_v57 }
0x185c   : > { %v6332_v8 = vsel %vm2010_vm7, %v6324_v30, %v8186_v5  ;;  %v6333_v26 = vsel %vm2010_vm7, %v6325_v55, %v8187_v40 }
0x185d   : > { %v6340_v2 = vsel %vm2019_vm8, %v6332_v8, %v8191_v23  ;;  %v6341_v51 = vsel %vm2019_vm8, %v6333_v26, %v8192_v54 }
0x185e   : > { %v6346_v21 = vpack.c.bf16 %v6341_v51, %v6340_v2 }
0x1860   : > { %7637 = vmatmul.msk.bf16.gmra.mxu1 %vm372_vm0, %v6346_v21 }
0x1869   : > { %v8200_v42 = vpop.permute.xlu0 %8199 }
0x186a   : > { %v8202_v48 = vunpack.i.h.bf16 %v8200_v42  ;;  %v8201_v31 = vunpack.i.l.bf16 %v8200_v42 }
0x186c   : > { %v6334_v9 = vsel %vm2010_vm7, %v6326_v25, %v8201_v31  ;;  %v6335_v3 = vsel %vm2010_vm7, %v6327_v1, %v8202_v48 }
0x186d   : > { %v6342_v35 = vsel %vm2019_vm8, %v6334_v9, %v8206_v43  ;;  %v6343_v4 = vsel %vm2019_vm8, %v6335_v3, %v8207_v38 }
0x186e   : > { %v6347_v53 = vpack.c.bf16 %v6343_v4, %v6342_v35 }
0x1870   : > { %7638 = vmatmul.msk.bf16.gmra.mxu1 %vm372_vm0, %v6347_v53 }
0x18bd   : > { %v6388_v56 = vpop.f32.mrf.mxu1 }
0x18be   : > { %v6389_v7 = vadd.f32 %v8229_v10, %v6388_v56 }
0x18c0   : > { %v12276_v19 = vadd.f32 %v6389_v7, %v11496_v14 }
0x18c2   : > { %v6418_v36 = vsel %vm372_vm0, %v12276_v19, 0.0 }
0x18c3   : > { %6419 = vadd.xlane.f32.xlu1 %v6418_v36 }
0x18c5   : > { %v6390_v0 = vpop.f32.mrf.mxu1 }
0x18c6   : > { %v6391_v29 = vadd.f32 %v8229_v10, %v6390_v0 }
0x18c8   : > { %v12281_v58 = vadd.f32 %v6391_v29, %v11501_v44 }
0x18ca   : > { %v6421_v60 = vsel %vm372_vm0, %v12281_v58, 0.0 }
0x18cb   : > { %6422 = vadd.xlane.f32.xlu0 %v6421_v60 }
0x18cd   : > { %v6393_v28 = vpop.f32.mrf.mxu1 }
0x18ce   : > { %v6394_v34 = vadd.f32 %v8229_v10, %v6393_v28 }
0x18d0   : > { %v12286_v16 = vadd.f32 %v6394_v34, %v11506_v15 }
0x18d2   : > { %v6424_v14 = vsel %vm372_vm0, %v12286_v16, 0.0 }
0x18d3   : > { %6425 = vadd.xlane.f32.xlu2 %v6424_v14 }
0x18d5   : > { %v6395_v27 = vpop.f32.mrf.mxu1 }
0x18d6   : > { %v6396_v11 = vadd.f32 %v8229_v10, %v6395_v27 }
0x18d8   : > { %v12291_v6 = vadd.f32 %v6396_v11, %v11511_v39 }
0x18da   : > { %v6427_v44 = vsel %vm372_vm0, %v12291_v6, 0.0 }
0x18db   : > { %6428 = vadd.xlane.f32.xlu1 %v6427_v44 }
0x18dd   : > { %v6398_v41 = vpop.f32.mrf.mxu1 }
0x18de   : > { %v6399_v18 = vadd.f32 %v8229_v10, %v6398_v41 }
0x18e0   : > { %v12296_v63 = vadd.f32 %v6399_v18, %v11516_v33 }
0x18e2   : > { %v6430_v15 = vsel %vm372_vm0, %v12296_v63, 0.0 }
0x18e3   : > { %6431 = vadd.xlane.f32.xlu0 %v6430_v15 }
0x18e5   : > { %v6400_v32 = vpop.f32.mrf.mxu1 }
0x18e6   : > { %v6401_v52 = vadd.f32 %v8229_v10, %v6400_v32 }
0x18e8   : > { %v12301_v47 = vadd.f32 %v6401_v52, %v11521_v24 }
0x18ea   : > { %v6433_v39 = vsel %vm372_vm0, %v12301_v47, 0.0 }
0x18eb   : > { %6434 = vadd.xlane.f32.xlu2 %v6433_v39  ;;  %v7753_v39 = vld [vmem:[%s12634_s7 + $0x28] sm:$0xff] }
0x18ec   : > { %6653 = vmatpush.bf16.msrb.mxu2 %v7753_v39 }
0x18ed   : > { %v6403_v59 = vpop.f32.mrf.mxu1 }
0x18ee   : > { %v6404_v50 = vadd.f32 %v8229_v10, %v6403_v59 }
0x18f0   : > { %v12306_v20 = vadd.f32 %v6404_v50, %v11532_v61 }
0x18f2   : > { %v6436_v33 = vsel %vm372_vm0, %v12306_v20, 0.0 }
0x18f3   : > { %6437 = vadd.xlane.f32.xlu2 %v6436_v33 }
0x18f5   : > { %v6405_v24 = vpop.f32.mrf.mxu1 }
0x18f6   : > { %v6406_v40 = vadd.f32 %v8229_v10, %v6405_v24  ;;  %v7752_v24 = vld [vmem:[%s12634_s7 + $0x20] sm:$0xff] }
0x18f7   : > { %6654 = vmatpush.bf16.msrb.mxu2 %v7752_v24 }
0x18f8   : > { %v12319_v30 = vadd.f32 %v6406_v40, %v11544_v45 }
0x18fa   : > { %v6439_v26 = vsel %vm372_vm0, %v12319_v30, 0.0 }
0x1936   : > { %v6420_v37 = vpop.xlane.xlu1 %6419 }
0x1937   : > { %v6442_v49 = vmul.f32 %v6420_v37, %v12683_v17 }
0x1939   : > { %v12312_v12 = vsub.f32 %v12276_v19, %v6442_v49 }
0x193b   : > { %v6458_v57 = vmul.f32 %v12312_v12, %v12312_v12 }
0x193d   : > { %v6466_v5 = vsel %vm372_vm0, %v6458_v57, 0.0 }
0x193e   : > { %v6423_v55 = vpop.xlane.xlu0 %6422  ;;  %6467 = vadd.xlane.f32.xlu1 %v6466_v5 }
0x193f   : > { %v6443_v61 = vmul.f32 %v6423_v55, %v12683_v17 }
0x1941   : > { %v12322_v54 = vsub.f32 %v12281_v58, %v6443_v61 }
0x1943   : > { %v6459_v23 = vmul.f32 %v12322_v54, %v12322_v54 }
0x1945   : > { %v6469_v8 = vsel %vm372_vm0, %v6459_v23, 0.0 }
0x1946   : > { %6470 = vadd.xlane.f32.xlu0 %v6469_v8  ;;  %6440 = vadd.xlane.f32.xlu1 %v6439_v26  ;;  %v6426_v2 = vpop.xlane.xlu2 %6425 }
0x1947   : > { %v6444_v51 = vmul.f32 %v6426_v2, %v12683_v17 }
0x1949   : > { %v12331_v21 = vsub.f32 %v12286_v16, %v6444_v51 }
0x194b   : > { %v6460_v45 = vmul.f32 %v12331_v21, %v12331_v21 }
0x194d   : > { %v6472_v13 = vsel %vm372_vm0, %v6460_v45, 0.0  ;;  %v12384_v45 = vld [vmem:[%s12630_s3 + $0x22] ss:$0 sm:$0xff] }
0x194e   : > { %6473 = vadd.xlane.f32.xlu0 %v6472_v13  ;;  %v6429_v62 = vpop.xlane.xlu1 %6428 }
0x194f   : > { %v6445_v22 = vmul.f32 %v6429_v62, %v12683_v17 }
0x1951   : > { %v12338_v46 = vsub.f32 %v12291_v6, %v6445_v22 }
0x1953   : > { %v6461_v42 = vmul.f32 %v12338_v46, %v12338_v46 }
0x1955   : > { %v6475_v48 = vsel %vm372_vm0, %v6461_v42, 0.0 }
0x1956   : > { %v6432_v31 = vpop.xlane.xlu0 %6431  ;;  %6476 = vadd.xlane.f32.xlu2 %v6475_v48 }
0x1957   : > { %v6446_v1 = vmul.f32 %v6432_v31, %v12683_v17 }
0x1959   : > { %v12345_v25 = vsub.f32 %v12296_v63, %v6446_v1  ;;  %v12390_v1 = vld [vmem:[%s12630_s3 + $0x23] ss:$0 sm:$0xff] }
0x195b   : > { %v6462_v38 = vmul.f32 %v12345_v25, %v12345_v25 }
0x195d   : > { %v6478_v43 = vsel %vm372_vm0, %v6462_v38, 0.0 }
0x195e   : > { %v6435_v9 = vpop.xlane.xlu2 %6434  ;;  %6479 = vadd.xlane.f32.xlu1 %v6478_v43 }
0x195f   : > { %v6447_v3 = vmul.f32 %v6435_v9, %v12683_v17 }
0x1961   : > { %v12352_v35 = vsub.f32 %v12301_v47, %v6447_v3 }
0x1963   : > { %v6463_v4 = vmul.f32 %v12352_v35, %v12352_v35 }
0x1965   : > { %v6481_v53 = vsel %vm372_vm0, %v6463_v4, 0.0 }
0x1966   : > { %v6438_v10 = vpop.xlane.xlu2 %6437  ;;  %6482 = vadd.xlane.f32.xlu0 %v6481_v53 }
0x1967   : > { %v6448_v56 = vmul.f32 %v6438_v10, %v12683_v17 }
0x1969   : > { %v12359_v7 = vsub.f32 %v12306_v20, %v6448_v56 }
0x196b   : > { %v6464_v36 = vmul.f32 %v12359_v7, %v12359_v7 }
0x196d   : > { %v6484_v0 = vsel %vm372_vm0, %v6464_v36, 0.0 }
0x196e   : > { %6485 = vadd.xlane.f32.xlu2 %v6484_v0 }
0x19b1   : > { %v6468_v29 = vpop.xlane.xlu1 %6467 }
0x19b2   : > { %v6490_v60 = vmul.f32 %v6468_v29, %v12683_v17 }
0x19b4   : > { %v6498_v28 = vadd.f32 1e-05, %v6490_v60 }
0x19b6   : > { %8780 = vrsqrt.f32 %v6498_v28  ;;  %vm6512_vm6 = vweird.f32 %v6498_v28 }
0x19b9   : > { %v6471_v34 = vpop.xlane.xlu0 %6470  ;;  %v6441_v14 = vpop.xlane.xlu1 %6440 }
0x19ba   : > { %v6491_v27 = vmul.f32 %v6471_v34, %v12683_v17  ;;  %v6449_v11 = vmul.f32 %v6441_v14, %v12683_v17 }
0x19bc   : > { %v8781_v44 = vpop.eup %8780  ;;  %v6499_v41 = vadd.f32 1e-05, %v6491_v27  ;;  %v12368_v18 = vsub.f32 %v12319_v30, %v6449_v11 }
0x19bd   : > { %v6507_v15 = vmul.f32 %v8781_v44, %v6498_v28  ;;  %vm6513_vm5 = vweird.f32 %v8781_v44 }
0x19be   : > { %8782 = vrsqrt.f32 %v6499_v41  ;;  %v6465_v32 = vmul.f32 %v12368_v18, %v12368_v18  ;;  %vm6514_vm7 = vmor %vm6512_vm6, %vm6513_vm5  ;;  %vm6522_vm9 = vweird.f32 %v6499_v41 }
0x19bf   : > { %v6508_v52 = vmul.f32 %v8781_v44, %v6507_v15 }
0x19c0   : > { %v6487_v59 = vsel %vm372_vm0, %v6465_v32, 0.0 }
0x19c1   : > { %v6509_v50 = vmul.f32 0.5, %v6508_v52  ;;  %6488 = vadd.xlane.f32.xlu1 %v6487_v59  ;;  %v6474_v33 = vpop.xlane.xlu0 %6473 }
0x19c2   : > { %v6492_v49 = vmul.f32 %v6474_v33, %v12683_v17 }
0x19c3   : > { %v6510_v37 = vsub.f32 1.5, %v6509_v50 }
0x19c4   : > { %v8783_v57 = vpop.eup %8782  ;;  %v6500_v55 = vadd.f32 1e-05, %v6492_v49 }
0x19c5   : > { %v6511_v40 = vmul.f32 %v8781_v44, %v6510_v37  ;;  %v6517_v5 = vmul.f32 %v8783_v57, %v6499_v41  ;;  %vm6523_vm8 = vweird.f32 %v8783_v57 }
0x19c6   : > { %8784 = vrsqrt.f32 %v6500_v55  ;;  %vm6524_vm10 = vmor %vm6522_vm9, %vm6523_vm8  ;;  %vm6532_vm12 = vweird.f32 %v6500_v55 }
0x19c7   : > { %v6518_v61 = vmul.f32 %v8783_v57, %v6517_v5  ;;  %v6515_v23 = vsel %vm6514_vm7, %v8781_v44, %v6511_v40 }
0x19c8   : > { %v6586_v13 = vmul.f32 %v6515_v23, %v12312_v12 }
0x19c9   : > { %v6519_v8 = vmul.f32 0.5, %v6518_v61  ;;  %v6477_v26 = vpop.xlane.xlu2 %6476 }
0x19ca   : > { %v6493_v51 = vmul.f32 %v6477_v26, %v12683_v17  ;;  %v6595_v38 = vmul.f32 %v12384_v45, %v6586_v13 }
0x19cb   : > { %v6520_v2 = vsub.f32 1.5, %v6519_v8 }
0x19cc   : > { %v8785_v62 = vpop.eup %8784  ;;  %v6501_v42 = vadd.f32 1e-05, %v6493_v51  ;;  %v6604_v10 = vadd.f32 %v12390_v1, %v6595_v38 }
0x19cd   : > { %v6521_v22 = vmul.f32 %v8783_v57, %v6520_v2  ;;  %v6527_v48 = vmul.f32 %v8785_v62, %v6500_v55  ;;  %vm6533_vm11 = vweird.f32 %v8785_v62 }
0x19ce   : > { %8786 = vrsqrt.f32 %v6501_v42  ;;  %vm6534_vm13 = vmor %vm6532_vm12, %vm6533_vm11  ;;  %vm6542_vm15 = vweird.f32 %v6501_v42 }
0x19cf   : > { %v6525_v31 = vsel %vm6524_vm10, %v8783_v57, %v6521_v22  ;;  %v6528_v9 = vmul.f32 %v8785_v62, %v6527_v48 }
0x19d0   : > { %v6587_v43 = vmul.f32 %v6525_v31, %v12322_v54 }
0x19d1   : > { %v6529_v3 = vmul.f32 0.5, %v6528_v9  ;;  %v6480_v4 = vpop.xlane.xlu1 %6479 }
0x19d2   : > { %v6596_v12 = vmul.f32 %v12384_v45, %v6587_v43  ;;  %v6494_v53 = vmul.f32 %v6480_v4, %v12683_v17 }
0x19d3   : > { %v6530_v36 = vsub.f32 1.5, %v6529_v3 }
0x19d4   : > { %v6605_v56 = vadd.f32 %v12390_v1, %v6596_v12  ;;  %v8787_v0 = vpop.eup %8786  ;;  %v6502_v29 = vadd.f32 1e-05, %v6494_v53 }
0x19d5   : > { %v6531_v28 = vmul.f32 %v8785_v62, %v6530_v36  ;;  %v6537_v34 = vmul.f32 %v8787_v0, %v6501_v42  ;;  %vm6543_vm14 = vweird.f32 %v8787_v0 }
0x19d6   : > { %v6612_v60 = vpack.c.bf16 %v6605_v56, %v6604_v10  ;;  %8788 = vrsqrt.f32 %v6502_v29  ;;  %vm6544_vm1 = vmor %vm6542_vm15, %vm6543_vm14  ;;  %vm6552_vm3 = vweird.f32 %v6502_v29 }
0x19d7   : > { %v6538_v54 = vmul.f32 %v8787_v0, %v6537_v34  ;;  %v6535_v14 = vsel %vm6534_vm13, %v8785_v62, %v6531_v28 }
0x19d8   : > { %7654 = vmatmul.msk.bf16.vlgmr.msrb.gmra.mxu2 %vm372_vm0, %v6612_v60  ;;  %v6588_v32 = vmul.f32 %v6535_v14, %v12331_v21 }
0x19d9   : > { %v6539_v27 = vmul.f32 0.5, %v6538_v54  ;;  %v6483_v11 = vpop.xlane.xlu0 %6482 }
0x19da   : > { %v6495_v44 = vmul.f32 %v6483_v11, %v12683_v17  ;;  %v6597_v49 = vmul.f32 %v12384_v45, %v6588_v32 }
0x19db   : > { %v6540_v41 = vsub.f32 1.5, %v6539_v27 }
0x19dc   : > { %v8789_v15 = vpop.eup %8788  ;;  %v6503_v52 = vadd.f32 1e-05, %v6495_v44  ;;  %v6606_v55 = vadd.f32 %v12390_v1, %v6597_v49 }
0x19dd   : > { %v6541_v39 = vmul.f32 %v8787_v0, %v6540_v41  ;;  %v6547_v59 = vmul.f32 %v8789_v15, %v6502_v29  ;;  %vm6553_vm2 = vweird.f32 %v8789_v15 }
0x19de   : > { %8790 = vrsqrt.f32 %v6503_v52  ;;  %vm6554_vm4 = vmor %vm6552_vm3, %vm6553_vm2  ;;  %vm6562_vm6 = vweird.f32 %v6503_v52 }
0x19df   : > { %v6545_v50 = vsel %vm6544_vm1, %v8787_v0, %v6541_v39  ;;  %v6548_v33 = vmul.f32 %v8789_v15, %v6547_v59 }
0x19e0   : > { %v6589_v37 = vmul.f32 %v6545_v50, %v12338_v46 }
0x19e1   : > { %v6549_v24 = vmul.f32 0.5, %v6548_v33  ;;  %v6486_v12 = vpop.xlane.xlu2 %6485 }
0x19e2   : > { %v6598_v57 = vmul.f32 %v12384_v45, %v6589_v37 }
0x19e3   : > { %v6550_v40 = vsub.f32 1.5, %v6549_v24 }
0x19e4   : > { %v8791_v5 = vpop.eup %8790  ;;  %v6607_v21 = vadd.f32 %v12390_v1, %v6598_v57 }
0x19e5   : > { %v6551_v61 = vmul.f32 %v8789_v15, %v6550_v40  ;;  %v6557_v23 = vmul.f32 %v8791_v5, %v6503_v52  ;;  %vm6563_vm5 = vweird.f32 %v8791_v5 }
0x19e6   : > { %v6613_v8 = vpack.c.bf16 %v6607_v21, %v6606_v55  ;;  %vm6564_vm7 = vmor %vm6562_vm6, %vm6563_vm5 }
0x19e7   : > { %v6558_v26 = vmul.f32 %v8791_v5, %v6557_v23  ;;  %v6555_v46 = vsel %vm6554_vm4, %v8789_v15, %v6551_v61 }
0x19e8   : > { %7655 = vmatmul.msk.bf16.gmra.mxu2 %vm372_vm0, %v6613_v8  ;;  %v6590_v13 = vmul.f32 %v6555_v46, %v12345_v25  ;;  %v6496_v25 = vmul.f32 %v6486_v12, %v12683_v17 }
0x19e9   : > { %v6559_v2 = vmul.f32 0.5, %v6558_v26  ;;  %v7761_v26 = vld [vmem:[%s12635_s8 + $0xb8] sm:$0xff] }
0x19ea   : > { %v6599_v48 = vmul.f32 %v12384_v45, %v6590_v13  ;;  %v6504_v3 = vadd.f32 1e-05, %v6496_v25  ;;  %7067 = vmatpush.bf16.msrb.mxu3 %v7761_v26 }
0x19eb   : > { %v6560_v51 = vsub.f32 1.5, %v6559_v2 }
0x19ec   : > { %v6608_v38 = vadd.f32 %v12390_v1, %v6599_v48  ;;  %8792 = vrsqrt.f32 %v6504_v3  ;;  %vm6572_vm9 = vweird.f32 %v6504_v3 }
0x19ed   : > { %v6561_v62 = vmul.f32 %v8791_v5, %v6560_v51 }
0x19ef   : > { %v6565_v22 = vsel %vm6564_vm7, %v8791_v5, %v6561_v62 }
0x19f0   : > { %v6591_v42 = vmul.f32 %v6565_v22, %v12352_v35 }
0x19f2   : > { %v6600_v31 = vmul.f32 %v12384_v45, %v6591_v42  ;;  %v8793_v4 = vpop.eup %8792  ;;  %v7760_v42 = vld [vmem:[%s12635_s8 + $0xb0] sm:$0xff] }
0x19f3   : > { %v6567_v53 = vmul.f32 %v8793_v4, %v6504_v3  ;;  %vm6573_vm8 = vweird.f32 %v8793_v4  ;;  %7068 = vmatpush.bf16.msrb.mxu3 %v7760_v42 }
0x19f4   : > { %v6609_v43 = vadd.f32 %v12390_v1, %v6600_v31  ;;  %vm6574_vm10 = vmor %vm6572_vm9, %vm6573_vm8 }
0x19f5   : > { %v6568_v10 = vmul.f32 %v8793_v4, %v6567_v53  ;;  %v7759_v53 = vld [vmem:[%s12635_s8 + $0xa8] sm:$0xff] }
0x19f6   : > { %v6614_v9 = vpack.c.bf16 %v6609_v43, %v6608_v38 }
0x19f7   : > { %v6569_v0 = vmul.f32 0.5, %v6568_v10  ;;  %7069 = vmatpush.bf16.msrb.mxu3 %v7759_v53 }
0x19f8   : > { %7656 = vmatmul.msk.bf16.gmra.mxu2 %vm372_vm0, %v6614_v9 }
0x19f9   : > { %v6570_v29 = vsub.f32 1.5, %v6569_v0 }
0x19fb   : > { %v6571_v28 = vmul.f32 %v8793_v4, %v6570_v29 }
0x19fd   : > { %v6575_v14 = vsel %vm6574_vm10, %v8793_v4, %v6571_v28 }
0x19fe   : > { %v6592_v44 = vmul.f32 %v6575_v14, %v12359_v7  ;;  %v12426_v7 = vld [vmem:[%s12630_s3 + $0x28] ss:$0 sm:$0xff] }
0x1a00   : > { %v6601_v32 = vmul.f32 %v12384_v45, %v6592_v44  ;;  %v7758_v44 = vld [vmem:[%s12635_s8 + $0xa0] sm:$0xff] }
0x1a01   : > { %7070 = vmatpush.bf16.msrb.mxu3 %v7758_v44 }
0x1a02   : > { %v6610_v39 = vadd.f32 %v12390_v1, %v6601_v32 }
0x1a34   : > { %v6489_v35 = vpop.xlane.xlu1 %6488 }
0x1a35   : > { %v6497_v56 = vmul.f32 %v6489_v35, %v12683_v17 }
0x1a37   : > { %v6505_v36 = vadd.f32 1e-05, %v6497_v56 }
0x1a39   : > { %8794 = vrsqrt.f32 %v6505_v36  ;;  %vm6582_vm12 = vweird.f32 %v6505_v36 }
0x1a3f   : > { %v8795_v60 = vpop.eup %8794 }
0x1a40   : > { %v6577_v34 = vmul.f32 %v8795_v60, %v6505_v36  ;;  %vm6583_vm11 = vweird.f32 %v8795_v60 }
0x1a41   : > { %vm6584_vm13 = vmor %vm6582_vm12, %vm6583_vm11 }
0x1a42   : > { %v6578_v54 = vmul.f32 %v8795_v60, %v6577_v34 }
0x1a44   : > { %v6579_v27 = vmul.f32 0.5, %v6578_v54 }
0x1a46   : > { %v6580_v11 = vsub.f32 1.5, %v6579_v27 }
0x1a48   : > { %v6581_v41 = vmul.f32 %v8795_v60, %v6580_v11 }
0x1a4a   : > { %v6585_v17 = vsel %vm6584_vm13, %v8795_v60, %v6581_v41 }
0x1a4b   : > { %v6593_v15 = vmul.f32 %v6585_v17, %v12368_v18 }
0x1a4d   : > { %v6602_v52 = vmul.f32 %v12384_v45, %v6593_v15 }
0x1a4f   : > { %v6611_v59 = vadd.f32 %v12390_v1, %v6602_v52 }
0x1a51   : > { %v6615_v50 = vpack.c.bf16 %v6611_v59, %v6610_v39 }
0x1a53   : > { %7657 = vmatmul.msk.bf16.gmra.mxu2 %vm372_vm0, %v6615_v50 }
0x1a5b   : > { %v6656_v33 = vpop.f32.mrf.mxu2 }
0x1a5c   : > { %v12429_v37 = vadd.f32 %v12426_v7, %v6656_v33  ;;  %v7757_v33 = vld [vmem:[%s12635_s8 + $0x98] sm:$0xff] }
0x1a5d   : > { %7071 = vmatpush.bf16.msrb.mxu3 %v7757_v33 }
0x1a5e   : > { %v12432_v18 = vmul.f32 0.70710677, %v12429_v37 }
0x1a60   : > { %v6692_v45 = vand.u32 2147483647, %v12432_v18 }
0x1a62   : > { %v6700_v49 = vmul.f32 0.3275911, %v6692_v45  ;;  %v6908_v3 = vsub.f32 0.0, %v6692_v45 }
0x1a63   : > { %v6658_v24 = vpop.f32.mrf.mxu2 }
0x1a64   : > { %v6708_v1 = vadd.f32 1.0, %v6700_v49  ;;  %v12436_v57 = vadd.f32 %v12426_v7, %v6658_v24  ;;  %v6916_v28 = vmul.f32 %v6908_v3, %v6692_v45 }
0x1a66   : > { %8796 = vrcp.f32 %v6708_v1  ;;  %v12439_v40 = vmul.f32 0.70710677, %v12436_v57  ;;  %v6727_v51 = vand.u32 2147483648, %v6708_v1  ;;  %v6725_v22 = vand.u32 2147483647, %v6708_v1 }
0x1a67   : > { %vm6721_vm15 = vweird.f32 %v6708_v1  ;;  %v6924_v39 = vmul.f32 1.442695, %v6916_v28 }
0x1a68   : > { %v6693_v5 = vand.u32 2147483647, %v12439_v40  ;;  %v6728_v38 = vor.u32 1.1754944e-38, %v6727_v51  ;;  %vm6726_vm2 = vcmp.eq.f32.partialorder %v6725_v22, 8.507059e+37 }
0x1a6a   : > { %v6701_v55 = vmul.f32 0.3275911, %v6693_v5  ;;  %v6909_v54 = vsub.f32 0.0, %v6693_v5 }
0x1a6b   : > { %v6661_v61 = vpop.f32.mrf.mxu2 }
0x1a6c   : > { %v8797_v21 = vpop.eup %8796  ;;  %v6709_v8 = vadd.f32 1.0, %v6701_v55  ;;  %v12446_v46 = vadd.f32 %v12426_v7, %v6661_v61  ;;  %v6917_v50 = vmul.f32 %v6909_v54, %v6693_v5 }
0x1a6d   : > { %v6717_v23 = vmul.f32 %v8797_v21, %v6708_v1  ;;  %vm6722_vm14 = vweird.f32 %v8797_v21 }
0x1a6e   : > { %8798 = vrcp.f32 %v6709_v8  ;;  %v12449_v13 = vmul.f32 0.70710677, %v12446_v46  ;;  %vm6723_vm1 = vmor %vm6721_vm15, %vm6722_vm14  ;;  %v6742_v34 = vand.u32 2147483648, %v6709_v8  ;;  %v6740_v27 = vand.u32 2147483647, %v6709_v8 }
0x1a6f   : > { %v6718_v2 = vsub.f32 1.0, %v6717_v23  ;;  %vm6736_vm4 = vweird.f32 %v6709_v8  ;;  %vm6956_vm15 = vcmp.lt.f32.partialorder %v12432_v18, 0.0 }
0x1a70   : > { %v12455_v48 = vand.u32 2147483647, %v12449_v13  ;;  %v6743_v59 = vor.u32 1.1754944e-38, %v6742_v34  ;;  %vm6741_vm6 = vcmp.eq.f32.partialorder %v6740_v27, 8.507059e+37 }
0x1a71   : > { %v6719_v62 = vmul.f32 %v8797_v21, %v6718_v2 }
0x1a72   : > { %v6702_v43 = vmul.f32 0.3275911, %v12455_v48  ;;  %v6910_v3 = vsub.f32 0.0, %v12455_v48 }
0x1a73   : > { %v6720_v31 = vadd.f32 %v8797_v21, %v6719_v62  ;;  %v6663_v9 = vpop.f32.mrf.mxu2 }
0x1a74   : > { %v8799_v12 = vpop.eup %8798  ;;  %v12459_v4 = vadd.f32 %v12426_v7, %v6663_v9  ;;  %v12466_v56 = vadd.f32 1.0, %v6702_v43 }
0x1a75   : > { %v6724_v25 = vsel %vm6723_vm1, %v8797_v21, %v6720_v31  ;;  %v6732_v35 = vmul.f32 %v8799_v12, %v6709_v8  ;;  %vm6737_vm3 = vweird.f32 %v8799_v12  ;;  %v6926_v8 = vmul.f32 1.442695, %v6917_v50 }
0x1a76   : > { %v12464_v10 = vsel %vm6726_vm2, %v6728_v38, %v6724_v25  ;;  %v12470_v0 = vmul.f32 0.70710677, %v12459_v4  ;;  %8800 = vrcp.f32 %v12466_v56  ;;  %vm6738_vm5 = vmor %vm6736_vm4, %vm6737_vm3  ;;  %v6757_v51 = vand.u32 2147483648, %v12466_v56  ;;  %v7756_v38 = vld [vmem:[%s12635_s8 + $0x90] sm:$0xff] }
0x1a77   : > { %v6836_v36 = vmul.f32 1.0614054, %v12464_v10  ;;  %v6733_v29 = vsub.f32 1.0, %v6732_v35  ;;  %v6755_v31 = vand.u32 2147483647, %v12466_v56  ;;  %vm6751_vm8 = vweird.f32 %v12466_v56  ;;  %7072 = vmatpush.bf16.msrb.mxu3 %v7756_v38  ;;  %v7755_v35 = vld [vmem:[%s12635_s8 + $0x88] sm:$0xff] }
0x1a78   : > { %v12474_v11 = vand.u32 2147483647, %v12470_v0  ;;  %vm6957_vm2 = vcmp.lt.f32.partialorder %v12439_v40, 0.0 }
0x1a79   : > { %v6844_v60 = vadd.f32 -1.4531521, %v6836_v36  ;;  %v6734_v14 = vmul.f32 %v8799_v12, %v6733_v29  ;;  %vm6756_vm10 = vcmp.eq.f32.partialorder %v6755_v31, 8.507059e+37 }
0x1a7a   : > { %v6703_v15 = vmul.f32 0.3275911, %v12474_v11 }
0x1a7b   : > { %v6852_v41 = vmul.f32 %v6844_v60, %v12464_v10  ;;  %v6735_v17 = vadd.f32 %v8799_v12, %v6734_v14  ;;  %v6666_v32 = vpop.f32.mrf.mxu2  ;;  %v6758_v60 = vor.u32 1.1754944e-38, %v6757_v51  ;;  %7073 = vmatpush.bf16.msrb.mxu3 %v7755_v35 }
0x1a7c   : > { %v8801_v45 = vpop.eup %8800  ;;  %v12484_v24 = vadd.f32 1.0, %v6703_v15  ;;  %v12487_v1 = vadd.f32 %v12426_v7, %v6666_v32 }
0x1a7d   : > { %v6860_v52 = vadd.f32 1.4214138, %v6852_v41  ;;  %v6739_v49 = vsel %vm6738_vm5, %v8799_v12, %v6735_v17  ;;  %v6747_v61 = vmul.f32 %v8801_v45, %v12466_v56  ;;  %vm6752_vm7 = vweird.f32 %v8801_v45 }
0x1a7e   : > { %v12490_v21 = vsel %vm6741_vm6, %v6743_v59, %v6739_v49  ;;  %8802 = vrcp.f32 %v12484_v24  ;;  %v12497_v62 = vmul.f32 0.70710677, %v12487_v1  ;;  %vm6753_vm9 = vmor %vm6751_vm8, %vm6752_vm7  ;;  %v6770_v50 = vand.u32 2147483647, %v12484_v24 }
0x1a7f   : > { %v6868_v55 = vmul.f32 %v6860_v52, %v12464_v10  ;;  %v6837_v5 = vmul.f32 1.0614054, %v12490_v21  ;;  %v6748_v26 = vsub.f32 1.0, %v6747_v61  ;;  %8804 = vpow2.f32 %v6924_v39  ;;  %v7754_v39 = vld [vmem:[%s12635_s8 + $0x80] sm:$0xff] }
0x1a80   : > { %v12506_v9 = vand.u32 2147483647, %v12497_v62  ;;  %8806 = vpow2.f32 %v6926_v8  ;;  %v6918_v52 = vmul.f32 %v6910_v3, %v12455_v48  ;;  %v6772_v33 = vand.u32 2147483648, %v12484_v24  ;;  %7074 = vmatpush.bf16.msrb.mxu3 %v7754_v39 }
0x1a81   : > { %v6876_v23 = vadd.f32 -0.28449672, %v6868_v55  ;;  %v6845_v2 = vadd.f32 -1.4531521, %v6837_v5  ;;  %v6749_v42 = vmul.f32 %v8801_v45, %v6748_v26  ;;  %vm6766_vm12 = vweird.f32 %v12484_v24 }
0x1a82   : > { %v6704_v28 = vmul.f32 0.3275911, %v12506_v9  ;;  %v6928_v8 = vmul.f32 1.442695, %v6918_v52  ;;  %v6773_v51 = vor.u32 1.1754944e-38, %v6772_v33  ;;  %vm6771_vm14 = vcmp.eq.f32.partialorder %v6770_v50, 8.507059e+37 }
0x1a83   : > { %v6884_v22 = vmul.f32 %v6876_v23, %v12464_v10  ;;  %v6853_v43 = vmul.f32 %v6845_v2, %v12490_v21  ;;  %v6750_v25 = vadd.f32 %v8801_v45, %v6749_v42  ;;  %v6668_v53 = vpop.f32.mrf.mxu2 }
0x1a84   : > { %v8803_v36 = vpop.eup %8802  ;;  %v12520_v41 = vadd.f32 1.0, %v6704_v28  ;;  %v12523_v17 = vadd.f32 %v12426_v7, %v6668_v53 }
0x1a85   : > { %v6892_v12 = vadd.f32 0.2548296, %v6884_v22  ;;  %v6861_v29 = vadd.f32 1.4214138, %v6853_v43  ;;  %v6754_v54 = vsel %vm6753_vm9, %v8801_v45, %v6750_v25  ;;  %v6762_v56 = vmul.f32 %v8803_v36, %v12484_v24  ;;  %v8805_v14 = vpop.eup %8804 }
0x1a86   : > { %v12518_v44 = vsel %vm6756_vm10, %v6758_v60, %v6754_v54  ;;  %8808 = vrcp.f32 %v12520_v41  ;;  %vm6767_vm11 = vweird.f32 %v8803_v36  ;;  %v8807_v61 = vpop.eup %8806  ;;  %v12535_v5 = vmul.f32 0.70710677, %v12523_v17 }
0x1a87   : > { %v6900_v34 = vmul.f32 %v6892_v12, %v12464_v10  ;;  %v6869_v27 = vmul.f32 %v6861_v29, %v12490_v21  ;;  %v6838_v32 = vmul.f32 1.0614054, %v12518_v44  ;;  %v6763_v10 = vsub.f32 1.0, %v6762_v56  ;;  %vm6768_vm13 = vmor %vm6766_vm12, %vm6767_vm11 }
0x1a88   : > { %v6911_v22 = vsub.f32 0.0, %v12474_v11  ;;  %v12541_v42 = vand.u32 2147483647, %v12535_v5  ;;  %v6676_v25 = vmul.f32 0.5, %v12429_v37  ;;  %8810 = vpow2.f32 %v6928_v8 }
0x1a89   : > { %v6940_v15 = vmul.f32 %v8805_v14, %v6900_v34  ;;  %v6877_v59 = vadd.f32 -0.28449672, %v6869_v27  ;;  %v6846_v49 = vadd.f32 -1.4531521, %v6838_v32  ;;  %v6764_v55 = vmul.f32 %v8803_v36, %v6763_v10 }
0x1a8a   : > { %v6705_v24 = vmul.f32 0.3275911, %v12541_v42  ;;  %v6785_v27 = vand.u32 2147483647, %v12520_v41  ;;  %v6787_v18 = vand.u32 2147483648, %v12520_v41  ;;  %v6677_v10 = vmul.f32 0.5, %v12436_v57 }
0x1a8b   : > { %v6948_v45 = vsub.f32 1.0, %v6940_v15  ;;  %v6885_v48 = vmul.f32 %v6877_v59, %v12490_v21  ;;  %v6854_v23 = vmul.f32 %v6846_v49, %v12518_v44  ;;  %v6765_v26 = vadd.f32 %v8803_v36, %v6764_v55 }
0x1a8c   : > { %v8809_v12 = vpop.eup %8808  ;;  %v12553_v34 = vadd.f32 1.0, %v6705_v24  ;;  %vm6781_vm3 = vweird.f32 %v12520_v41  ;;  %vm6786_vm5 = vcmp.eq.f32.partialorder %v6785_v27, 8.507059e+37  ;;  %vm6958_vm9 = vcmp.lt.f32.partialorder %v12449_v13, 0.0 }
0x1a8d   : > { %v6893_v2 = vadd.f32 0.2548296, %v6885_v48  ;;  %v6964_v31 = vsub.f32 0.0, %v6948_v45  ;;  %v6862_v38 = vadd.f32 1.4214138, %v6854_v23  ;;  %v6769_v43 = vsel %vm6768_vm13, %v8803_v36, %v6765_v26 }
0x1a8e   : > { %v12545_v53 = vsel %vm6771_vm14, %v6773_v51, %v6769_v43  ;;  %v6777_v60 = vmul.f32 %v8809_v12, %v12520_v41  ;;  %v6919_v36 = vmul.f32 %v6911_v22, %v12474_v11  ;;  %8812 = vrcp.f32 %v12553_v34 }
0x1a8f   : > { %v6901_v3 = vmul.f32 %v6893_v2, %v12490_v21  ;;  %v6870_v35 = vmul.f32 %v6862_v38, %v12518_v44  ;;  %v6839_v29 = vmul.f32 1.0614054, %v12545_v53  ;;  %v6972_v37 = vsel %vm6956_vm15, %v6964_v31, %v6948_v45  ;;  %v8811_v45 = vpop.eup %8810 }
0x1a90   : > { %v6778_v56 = vsub.f32 1.0, %v6777_v60  ;;  %vm6782_vm1 = vweird.f32 %v8809_v12  ;;  %v6980_v11 = vadd.f32 1.0, %v6972_v37  ;;  %v6930_v55 = vmul.f32 1.442695, %v6919_v36 }
0x1a91   : > { %v6941_v28 = vmul.f32 %v8807_v61, %v6901_v3  ;;  %v6878_v21 = vadd.f32 -0.28449672, %v6870_v35  ;;  %v6847_v54 = vadd.f32 -1.4531521, %v6839_v29  ;;  %vm6783_vm4 = vmor %vm6781_vm3, %vm6782_vm1  ;;  %v6788_v61 = vor.u32 1.1754944e-38, %v6787_v18 }
0x1a92   : > { %v6779_v52 = vmul.f32 %v8809_v12, %v6778_v56  ;;  %v6988_v40 = vmul.f32 %v6980_v11, %v6676_v25  ;;  %v6912_v51 = vsub.f32 0.0, %v12506_v9  ;;  %8814 = vpow2.f32 %v6930_v55 }
0x1a93   : > { %v6949_v14 = vsub.f32 1.0, %v6941_v28  ;;  %v6886_v15 = vmul.f32 %v6878_v21, %v12518_v44  ;;  %v6855_v32 = vmul.f32 %v6847_v54, %v12545_v53  ;;  %v6802_v28 = vand.u32 2147483648, %v12553_v34 }
0x1a94   : > { %v6780_v33 = vadd.f32 %v8809_v12, %v6779_v52  ;;  %v8813_v26 = vpop.eup %8812  ;;  %v6920_v25 = vmul.f32 %v6912_v51, %v12506_v9  ;;  %v6800_v37 = vand.u32 2147483647, %v12553_v34  ;;  %vm6796_vm7 = vweird.f32 %v12553_v34 }
0x1a95   : > { %v6965_v39 = vsub.f32 0.0, %v6949_v14  ;;  %v6894_v59 = vadd.f32 0.2548296, %v6886_v15  ;;  %v6863_v50 = vadd.f32 1.4214138, %v6855_v32  ;;  %v6792_v43 = vmul.f32 %v8813_v26, %v12553_v34 }
0x1a96   : > { %v6784_v57 = vsel %vm6783_vm4, %v8809_v12, %v6780_v33  ;;  %vm6797_vm6 = vweird.f32 %v8813_v26  ;;  %v6932_v32 = vmul.f32 1.442695, %v6920_v25  ;;  %v6803_v9 = vor.u32 1.1754944e-38, %v6802_v28 }
0x1a97   : > { %v6973_v49 = vsel %vm6957_vm2, %v6965_v39, %v6949_v14  ;;  %v6902_v23 = vmul.f32 %v6894_v59, %v12518_v44  ;;  %v6871_v8 = vmul.f32 %v6863_v50, %v12545_v53  ;;  %v6789_v2 = vsel %vm6786_vm5, %v6788_v61, %v6784_v57  ;;  %vm6798_vm8 = vmor %vm6796_vm7, %vm6797_vm6 }
0x1a98   : > { %v6981_v48 = vadd.f32 1.0, %v6973_v49  ;;  %v6840_v38 = vmul.f32 1.0614054, %v6789_v2  ;;  %v6793_v29 = vsub.f32 1.0, %v6792_v43  ;;  %v8815_v14 = vpop.eup %8814  ;;  %vm6801_vm10 = vcmp.eq.f32.partialorder %v6800_v37, 8.507059e+37 }
0x1a99   : > { %v6942_v31 = vmul.f32 %v8811_v45, %v6902_v23  ;;  %v6879_v41 = vadd.f32 -0.28449672, %v6871_v8  ;;  %v6913_v11 = vsub.f32 0.0, %v12541_v42  ;;  %8816 = vpow2.f32 %v6932_v32 }
0x1a9a   : > { %v6989_v22 = vmul.f32 %v6981_v48, %v6677_v10  ;;  %v6848_v44 = vadd.f32 -1.4531521, %v6840_v38  ;;  %v6794_v36 = vmul.f32 %v8813_v26, %v6793_v29  ;;  %vm6959_vm11 = vcmp.lt.f32.partialorder %v12470_v0, 0.0 }
0x1a9b   : > { %v6950_v24 = vsub.f32 1.0, %v6942_v31  ;;  %v6887_v35 = vmul.f32 %v6879_v41, %v12545_v53  ;;  %v6921_v13 = vmul.f32 %v6913_v11, %v12541_v42  ;;  %v6678_v48 = vmul.f32 0.5, %v12446_v46 }
0x1a9c   : > { %v6996_v3 = vpack.c.bf16 %v6989_v22, %v6988_v40  ;;  %v6856_v12 = vmul.f32 %v6848_v44, %v6789_v2  ;;  %v6795_v27 = vadd.f32 %v8813_v26, %v6794_v36  ;;  %v6679_v23 = vmul.f32 0.5, %v12459_v4 }
0x1a9d   : > { %v6895_v60 = vadd.f32 0.2548296, %v6887_v35  ;;  %v6966_v21 = vsub.f32 0.0, %v6950_v24  ;;  %v6934_v41 = vmul.f32 1.442695, %v6921_v13  ;;  %vm6960_vm12 = vcmp.lt.f32.partialorder %v12497_v62, 0.0 }
0x1a9e   : > { %7075 = vmatmul.bf16.vlgmr.msrb.gmra.mxu3 %v6996_v3  ;;  %v6864_v56 = vadd.f32 1.4214138, %v6856_v12  ;;  %v6799_v52 = vsel %vm6798_vm8, %v8813_v26, %v6795_v27  ;;  %vm6961_vm13 = vcmp.lt.f32.partialorder %v12535_v5, 0.0  ;;  %v6680_v36 = vmul.f32 0.5, %v12487_v1 }
0x1a9f   : > { %v6903_v54 = vmul.f32 %v6895_v60, %v12545_v53  ;;  %v6974_v10 = vsel %vm6958_vm9, %v6966_v21, %v6950_v24  ;;  %v6804_v53 = vsel %vm6801_vm10, %v6803_v9, %v6799_v52  ;;  %v8817_v31 = vpop.eup %8816  ;;  %8818 = vpow2.f32 %v6934_v41 }
0x1aa0   : > { %v6872_v15 = vmul.f32 %v6864_v56, %v6789_v2  ;;  %v6841_v50 = vmul.f32 1.0614054, %v6804_v53  ;;  %v6982_v34 = vadd.f32 1.0, %v6974_v10  ;;  %v6681_v37 = vmul.f32 0.5, %v12523_v17 }
0x1aa1   : > { %v6943_v18 = vmul.f32 %v8815_v14, %v6903_v54 }
0x1aa2   : > { %v6880_v59 = vadd.f32 -0.28449672, %v6872_v15  ;;  %v6849_v49 = vadd.f32 -1.4531521, %v6841_v50  ;;  %v6990_v40 = vmul.f32 %v6982_v34, %v6678_v48 }
0x1aa3   : > { %v6951_v39 = vsub.f32 1.0, %v6943_v18 }
0x1aa4   : > { %v6888_v45 = vmul.f32 %v6880_v59, %v6789_v2  ;;  %v6857_v57 = vmul.f32 %v6849_v49, %v6804_v53 }
0x1aa5   : > { %v6967_v33 = vsub.f32 0.0, %v6951_v39  ;;  %v8819_v4 = vpop.eup %8818 }
0x1aa6   : > { %v6896_v61 = vadd.f32 0.2548296, %v6888_v45  ;;  %v6865_v22 = vadd.f32 1.4214138, %v6857_v57 }
0x1aa7   : > { %v6975_v55 = vsel %vm6959_vm11, %v6967_v33, %v6951_v39 }
0x1aa8   : > { %v6983_v8 = vadd.f32 1.0, %v6975_v55  ;;  %v6904_v26 = vmul.f32 %v6896_v61, %v6789_v2  ;;  %v6873_v43 = vmul.f32 %v6865_v22, %v6804_v53 }
0x1aaa   : > { %v6991_v51 = vmul.f32 %v6983_v8, %v6679_v23  ;;  %v6944_v38 = vmul.f32 %v8817_v31, %v6904_v26  ;;  %v6881_v3 = vadd.f32 -0.28449672, %v6873_v43 }
0x1aac   : > { %v6997_v0 = vpack.c.bf16 %v6991_v51, %v6990_v40  ;;  %v6952_v24 = vsub.f32 1.0, %v6944_v38  ;;  %v6889_v42 = vmul.f32 %v6881_v3, %v6804_v53 }
0x1aae   : > { %7080 = vmatmul.bf16.gmra.mxu3 %v6997_v0  ;;  %v6897_v35 = vadd.f32 0.2548296, %v6889_v42  ;;  %v6968_v46 = vsub.f32 0.0, %v6952_v24 }
0x1ab0   : > { %v6905_v44 = vmul.f32 %v6897_v35, %v6804_v53  ;;  %v6976_v2 = vsel %vm6960_vm12, %v6968_v46, %v6952_v24 }
0x1ab1   : > { %v6984_v25 = vadd.f32 1.0, %v6976_v2 }
0x1ab2   : > { %v6945_v29 = vmul.f32 %v8819_v4, %v6905_v44 }
0x1ab3   : > { %v6992_v54 = vmul.f32 %v6984_v25, %v6680_v36 }
0x1ab4   : > { %v6953_v60 = vsub.f32 1.0, %v6945_v29 }
0x1ab6   : > { %v6969_v12 = vsub.f32 0.0, %v6953_v60 }
0x1ab8   : > { %v6977_v28 = vsel %vm6961_vm13, %v6969_v12, %v6953_v60 }
0x1ab9   : > { %v6985_v21 = vadd.f32 1.0, %v6977_v28 }
0x1abb   : > { %v6993_v56 = vmul.f32 %v6985_v21, %v6681_v37 }
0x1abd   : > { %v6998_v14 = vpack.c.bf16 %v6993_v56, %v6992_v54 }
0x1abf   : > { %7085 = vmatmul.bf16.gmra.mxu3 %v6998_v14 }
0x1ad6   : > { %v6671_v27 = vpop.f32.mrf.mxu2 }
0x1ad7   : > { %v12584_v18 = vadd.f32 %v12426_v7, %v6671_v27 }
0x1ad9   : > { %v12587_v62 = vmul.f32 0.70710677, %v12584_v18 }
0x1adb   : > { %v6698_v15 = vand.u32 2147483647, %v12587_v62  ;;  %vm6962_vm7 = vcmp.lt.f32.partialorder %v12587_v62, 0.0  ;;  %v8233_v62 = vld [vmem:[%s12630_s3 + $0x26] ss:$0 sm:$0xff] }
0x1add   : > { %v6706_v5 = vmul.f32 0.3275911, %v6698_v15  ;;  %v6914_v13 = vsub.f32 0.0, %v6698_v15 }
0x1ade   : > { %v6673_v32 = vpop.f32.mrf.mxu2 }
0x1adf   : > { %v6714_v9 = vadd.f32 1.0, %v6706_v5  ;;  %v12591_v1 = vadd.f32 %v12426_v7, %v6673_v32  ;;  %v6922_v40 = vmul.f32 %v6914_v13, %v6698_v15 }
0x1ae1   : > { %8820 = vrcp.f32 %v6714_v9  ;;  %v12594_v17 = vmul.f32 0.70710677, %v12591_v1  ;;  %v6817_v50 = vand.u32 2147483648, %v6714_v9  ;;  %v6815_v45 = vand.u32 2147483647, %v6714_v9 }
0x1ae2   : > { %vm6811_vm15 = vweird.f32 %v6714_v9  ;;  %v6936_v0 = vmul.f32 1.442695, %v6922_v40 }
0x1ae3   : > { %v6699_v52 = vand.u32 2147483647, %v12594_v17  ;;  %v6818_v7 = vor.u32 1.1754944e-38, %v6817_v50  ;;  %vm6816_vm2 = vcmp.eq.f32.partialorder %v6815_v45, 8.507059e+37  ;;  %vm6963_vm8 = vcmp.lt.f32.partialorder %v12594_v17, 0.0 }
0x1ae4   : > { %v6682_v50 = vmul.f32 0.5, %v12584_v18 }
0x1ae5   : > { %v6707_v11 = vmul.f32 0.3275911, %v6699_v52  ;;  %v6915_v35 = vsub.f32 0.0, %v6699_v52 }
0x1ae7   : > { %v8821_v10 = vpop.eup %8820  ;;  %v6715_v59 = vadd.f32 1.0, %v6707_v11  ;;  %v6923_v2 = vmul.f32 %v6915_v35, %v6699_v52 }
0x1ae8   : > { %v6807_v39 = vmul.f32 %v8821_v10, %v6714_v9  ;;  %vm6812_vm14 = vweird.f32 %v8821_v10 }
0x1ae9   : > { %8822 = vrcp.f32 %v6715_v59  ;;  %vm6813_vm1 = vmor %vm6811_vm15, %vm6812_vm14  ;;  %v6832_v26 = vand.u32 2147483648, %v6715_v59  ;;  %v6830_v22 = vand.u32 2147483647, %v6715_v59  ;;  %vm6826_vm4 = vweird.f32 %v6715_v59 }
0x1aea   : > { %v6808_v53 = vsub.f32 1.0, %v6807_v39  ;;  %8824 = vpow2.f32 %v6936_v0  ;;  %v6938_v36 = vmul.f32 1.442695, %v6923_v2 }
0x1aeb   : > { %v6833_v43 = vor.u32 1.1754944e-38, %v6832_v26  ;;  %vm6831_vm6 = vcmp.eq.f32.partialorder %v6830_v22, 8.507059e+37 }
0x1aec   : > { %v6809_v33 = vmul.f32 %v8821_v10, %v6808_v53  ;;  %8826 = vpow2.f32 %v6938_v36 }
0x1aee   : > { %v6810_v34 = vadd.f32 %v8821_v10, %v6809_v33  ;;  %v6683_v33 = vmul.f32 0.5, %v12591_v1 }
0x1aef   : > { %v8823_v49 = vpop.eup %8822 }
0x1af0   : > { %v6814_v55 = vsel %vm6813_vm1, %v8821_v10, %v6810_v34  ;;  %v6822_v48 = vmul.f32 %v8823_v49, %v6715_v59  ;;  %vm6827_vm3 = vweird.f32 %v8823_v49  ;;  %v8825_v37 = vpop.eup %8824 }
0x1af1   : > { %v6819_v61 = vsel %vm6816_vm2, %v6818_v7, %v6814_v55  ;;  %vm6828_vm5 = vmor %vm6826_vm4, %vm6827_vm3 }
0x1af2   : > { %v6842_v23 = vmul.f32 1.0614054, %v6819_v61  ;;  %v6823_v8 = vsub.f32 1.0, %v6822_v48  ;;  %v8827_v9 = vpop.eup %8826 }
0x1af4   : > { %v6850_v57 = vadd.f32 -1.4531521, %v6842_v23  ;;  %v6824_v51 = vmul.f32 %v8823_v49, %v6823_v8 }
0x1af6   : > { %v6858_v31 = vmul.f32 %v6850_v57, %v6819_v61  ;;  %v6825_v41 = vadd.f32 %v8823_v49, %v6824_v51 }
0x1af8   : > { %v6866_v38 = vadd.f32 1.4214138, %v6858_v31  ;;  %v6829_v3 = vsel %vm6828_vm5, %v8823_v49, %v6825_v41 }
0x1af9   : > { %v6834_v42 = vsel %vm6831_vm6, %v6833_v43, %v6829_v3 }
0x1afa   : > { %v6874_v24 = vmul.f32 %v6866_v38, %v6819_v61  ;;  %v6843_v46 = vmul.f32 1.0614054, %v6834_v42 }
0x1afc   : > { %v6882_v44 = vadd.f32 -0.28449672, %v6874_v24  ;;  %v6851_v4 = vadd.f32 -1.4531521, %v6843_v46 }
0x1afe   : > { %v6890_v29 = vmul.f32 %v6882_v44, %v6819_v61  ;;  %v6859_v60 = vmul.f32 %v6851_v4, %v6834_v42 }
0x1b00   : > { %v6898_v12 = vadd.f32 0.2548296, %v6890_v29  ;;  %v6867_v25 = vadd.f32 1.4214138, %v6859_v60 }
0x1b02   : > { %v6906_v28 = vmul.f32 %v6898_v12, %v6819_v61  ;;  %v6875_v21 = vmul.f32 %v6867_v25, %v6834_v42 }
0x1b04   : > { %v6946_v54 = vmul.f32 %v8825_v37, %v6906_v28  ;;  %v6883_v56 = vadd.f32 -0.28449672, %v6875_v21 }
0x1b06   : > { %v6954_v14 = vsub.f32 1.0, %v6946_v54  ;;  %v6891_v27 = vmul.f32 %v6883_v56, %v6834_v42 }
0x1b08   : > { %v6899_v15 = vadd.f32 0.2548296, %v6891_v27  ;;  %v6970_v5 = vsub.f32 0.0, %v6954_v14 }
0x1b0a   : > { %v6907_v32 = vmul.f32 %v6899_v15, %v6834_v42  ;;  %v6978_v52 = vsel %vm6962_vm7, %v6970_v5, %v6954_v14 }
0x1b0b   : > { %v6986_v59 = vadd.f32 1.0, %v6978_v52 }
0x1b0c   : > { %v6947_v11 = vmul.f32 %v8827_v9, %v6907_v32 }
0x1b0d   : > { %v6994_v34 = vmul.f32 %v6986_v59, %v6682_v50 }
0x1b0e   : > { %v6955_v10 = vsub.f32 1.0, %v6947_v11 }
0x1b10   : > { %v6971_v39 = vsub.f32 0.0, %v6955_v10 }
0x1b12   : > { %v6979_v53 = vsel %vm6963_vm8, %v6971_v39, %v6955_v10 }
0x1b13   : > { %v6987_v45 = vadd.f32 1.0, %v6979_v53 }
0x1b15   : > { %v6995_v7 = vmul.f32 %v6987_v45, %v6683_v33 }
0x1b17   : > { %v6999_v49 = vpack.c.bf16 %v6995_v7, %v6994_v34 }
0x1b19   : > { %7090 = vmatmul.bf16.gmra.mxu3 %v6999_v49 }
0x1b21   : > { %v7076_v55 = vpop.f32.mrf.mxu3 }
0x1b22   : > { %v7077_v61 = vadd.f32 %v8233_v62, %v7076_v55 }
0x1b24   : > { %v7096_v17 = vadd.f32 %v7077_v61, %v12276_v19 }
0x1b26   : > { %7104 = vst.msk [vmem:[%s352_s26] sm:$0xff] %vm372_vm0, %v7096_v17 }
0x1b29   : > { %v7078_v18 = vpop.f32.mrf.mxu3 }
0x1b2a   : > { %v7079_v1 = vadd.f32 %v8233_v62, %v7078_v18 }
0x1b2c   : > { %v7097_v13 = vadd.f32 %v7079_v1, %v12281_v58 }
0x1b2e   : > { %7105 = vst.msk [vmem:[%s352_s26 + $0x8] sm:$0xff] %vm372_vm0, %v7097_v13 }
0x1b31   : > { %v7081_v48 = vpop.f32.mrf.mxu3 }
0x1b32   : > { %v7082_v23 = vadd.f32 %v8233_v62, %v7081_v48 }
0x1b34   : > { %v7098_v8 = vadd.f32 %v7082_v23, %v12286_v16 }
0x1b36   : > { %7106 = vst.msk [vmem:[%s352_s26 + $0x10] sm:$0xff] %vm372_vm0, %v7098_v8 }
0x1b39   : > { %v7083_v57 = vpop.f32.mrf.mxu3 }
0x1b3a   : > { %v7084_v26 = vadd.f32 %v8233_v62, %v7083_v57 }
0x1b3c   : > { %v7099_v40 = vadd.f32 %v7084_v26, %v12291_v6 }
0x1b3e   : > { %7107 = vst.msk [vmem:[%s352_s26 + $0x18] sm:$0xff] %vm372_vm0, %v7099_v40 }
0x1b42   : > { %v7086_v19 = vpop.f32.mrf.mxu3 }
0x1b43   : > { %v7087_v51 = vadd.f32 %v8233_v62, %v7086_v19 }
0x1b45   : > { %v7100_v22 = vadd.f32 %v7087_v51, %v12296_v63 }
0x1b47   : > { %7108 = vst.msk [vmem:[%s352_s26 + $0x20] sm:$0xff] %vm372_vm0, %v7100_v22 }
0x1b4a   : > { %v7088_v58 = vpop.f32.mrf.mxu3 }
0x1b4b   : > { %v7089_v31 = vadd.f32 %v8233_v62, %v7088_v58 }
0x1b4d   : > { %v7101_v41 = vadd.f32 %v7089_v31, %v12301_v47 }
0x1b4f   : > { %7109 = vst.msk [vmem:[%s352_s26 + $0x28] sm:$0xff] %vm372_vm0, %v7101_v41 }
0x1b9c   : > { %v7091_v16 = vpop.f32.mrf.mxu3 }
0x1b9d   : > { %v7092_v38 = vadd.f32 %v8233_v62, %v7091_v16 }
0x1b9f   : > { %v7102_v43 = vadd.f32 %v7092_v38, %v12306_v20 }
0x1ba1   : > { %7110 = vst.msk [vmem:[%s352_s26 + $0x30] sm:$0xff] %vm372_vm0, %v7102_v43 }
0x1ba4   : > { %v7093_v6 = vpop.f32.mrf.mxu3 }
0x1ba5   : > { %v7094_v0 = vadd.f32 %v8233_v62, %v7093_v6 }
0x1ba7   : > { %v7103_v3 = vadd.f32 %v7094_v0, %v12319_v30 }
0x1ba9   : > { %7111 = vst.msk [vmem:[%s352_s26 + $0x38] sm:$0xff] %vm372_vm0, %v7103_v3 }
0x1baa PF: > { %s19_s30 = sadd.s32 1, %s8844_s30  }
0x1bab   : > { %p16_p4 = scmp.ge.s32.totalorder %s19_s30, 4  }
0x1bad   :  { %18 = sbr.rel (!%p16_p4) target bundleno = 1 (0x1), region = 111 }

</bundles_post_ra>
